<compile_context>
chip_gen: v5e
topology: v5e:2x2
jax: 0.10.0
libtpu: 0.0.40
codegen_flags: <defaults>
</compile_context>

<pallas_src>
import numpy as np

import jax
import jax.numpy as jnp
from jax import lax
from jax.experimental import pallas as pl
from jax.experimental.pallas import tpu as pltpu

NC = 3            # parameters.nc  (image channels)
NDF = 8           # parameters.ndf (kept small for this synthetic demo)
IMG = 64          # spatial size fixed by the module (y.view(-1, 1, 64, 64))
NCOND = 24        # conditioning vector length
LRELU_SLOPE = 0.2
BN_EPS = 1e-5
K = 4             # every conv is 4x4

# conv layer configs: (input spatial size, stride, pad)
_CONV_CFG = [(64, 2, 1), (32, 2, 1), (16, 2, 1), (8, 2, 1), (4, 1, 0)]
# (channels, output spatial size) of each BatchNorm'd activation
_BN_CFG = [(NDF * 2, 16), (NDF * 4, 8), (NDF * 8, 4)]


# ----------------------------------------------------------------------------
# The single fused kernel
# ----------------------------------------------------------------------------
def _disc_kernel(condi_ref, x_ref, w3_ref,
                 r0_ref, r1_ref, r2_ref, r3_ref, r4_ref,
                 g_ref, g4_ref, p_ref, ptg_ref, bpt_ref,
                 out_ref):
    B = x_ref.shape[0]

    def leaky(z):
        return jnp.where(z > 0, z, LRELU_SLOPE * z)

    # ---- ylabel: Linear(24 -> 64*64) + ReLU, computed directly as per-image
    # (64, 64) planes with 24 scalar-coefficient FMAs on the VPU (f32).
    # w3_ref holds the 24 reshaped weight planes plus the bias plane at [24].
    ys = [w3_ref[NCOND] for _ in range(B)]          # start from the bias plane
    for k in range(NCOND):
        plane = w3_ref[k]
        for b in range(B):
            ys[b] = ys[b] + condi_ref[b:b + 1, k:k + 1] * plane

    # ---- torch.cat([input, y], 1) + NCHW -> (B*H, C*W) activation slab.
    # Lanes are channel-major (c*64 + w); conv0's folded weights expect this.
    img_slabs = []
    for b in range(B):
        planes = [x_ref[b, 0], x_ref[b, 1], x_ref[b, 2],
                  jnp.maximum(ys[b], 0.0)]
        img_slabs.append(jnp.concatenate(planes, axis=1))         # (64, 256)
    a0 = jnp.concatenate(img_slabs, axis=0).astype(jnp.bfloat16)  # (B*64, 256)

    # ---- 4x4 conv as MXU matmuls: one stacked row-gather push (Rstack @ A),
    # then four per-dy weight matmuls on sublane-aligned static slices.
    def conv(a_bf, r_ref, g_for_dy):
        rows = jnp.dot(r_ref[...], a_bf,
                       preferred_element_type=jnp.float32)
        rows = rows.astype(jnp.bfloat16)            # exact: R entries are 0/1
        m = rows.shape[0] // K
        acc = None
        for dy in range(K):
            part = jnp.dot(rows[dy * m:(dy + 1) * m], g_for_dy(dy),
                           preferred_element_type=jnp.float32)
            acc = part if acc is None else acc + part
        return acc

    # ---- training-mode BatchNorm (batch statistics) + LeakyReLU, all f32.
    # gamma folded into ptg, beta into bpt, 1/(B*OH*OW) into p (offline).
    def bn_leaky(y, i):
        colsum = jnp.sum(y, axis=0, keepdims=True)                 # (1, 256)
        sqsum = jnp.sum(y * y, axis=0, keepdims=True)
        stats = jnp.concatenate([colsum, sqsum], axis=0)           # (2, 256)
        ms = jnp.dot(stats, p_ref[i],
                     preferred_element_type=jnp.float32)           # (2, 64)
        mean = ms[0:1]
        var = ms[1:2] - mean * mean
        r = lax.rsqrt(var + BN_EPS)                                # (1, 64)
        lhs = jnp.concatenate([r, mean * r], axis=0)               # (2, 64)
        sf = jnp.dot(lhs, ptg_ref[i],
                     preferred_element_type=jnp.float32)           # (2, 256)
        z = y * sf[0:1] + (bpt_ref[i] - sf[1:2])
        return leaky(z)

    h = leaky(conv(a0, r0_ref, lambda dy: g_ref[0, dy]))                            # (B*32, 256)
    h = bn_leaky(conv(h.astype(jnp.bfloat16), r1_ref, lambda dy: g_ref[1, dy]), 0)  # (B*16, 256)
    h = bn_leaky(conv(h.astype(jnp.bfloat16), r2_ref, lambda dy: g_ref[2, dy]), 1)  # (B*8,  256)
    h = bn_leaky(conv(h.astype(jnp.bfloat16), r3_ref, lambda dy: g_ref[3, dy]), 2)  # (B*4,  256)
    logit = conv(h.astype(jnp.bfloat16), r4_ref, lambda dy: g4_ref[dy])             # (B, 1)
    out_ref[...] = jax.nn.sigmoid(logit)


# ----------------------------------------------------------------------------
# Parameter init (deterministic, DCGAN-style)
# ----------------------------------------------------------------------------
def init_params(key):
    ks = jax.random.split(key, 8)
    p = {}
    p["lin_w"] = jax.random.normal(ks[0], (IMG * IMG, NCOND), jnp.float32) * 0.02
    p["lin_b"] = jnp.zeros((IMG * IMG,), jnp.float32)
    chans = [NC + 1, NDF, NDF * 2, NDF * 4, NDF * 8, 1]
    for i in range(5):
        p[f"conv{i}_w"] = (
            jax.random.normal(ks[i + 1], (chans[i + 1], chans[i], K, K), jnp.float32)
            * 0.02)
    for i, (c, _) in enumerate(_BN_CFG):
        p[f"bn{i}_gamma"] = jnp.ones((c,), jnp.float32)   # PyTorch BN init
        p[f"bn{i}_beta"] = jnp.zeros((c,), jnp.float32)
    return p


# ----------------------------------------------------------------------------
# One-time weight folding (outside the jitted forward)
# ----------------------------------------------------------------------------
def _build_R(batch, H, OH, s, pad):
    """Stacked 0/1 row-gather: row dy*(B*OH)+b*OH+oh selects input row b*H+h,
    h = s*oh + dy - pad (row stays zero for out-of-range h = zero padding)."""
    R = np.zeros((K, batch * OH, batch * H), np.float32)
    for dy in range(K):
        for b in range(batch):
            for oh in range(OH):
                h = s * oh + dy - pad
                if 0 <= h < H:
                    R[dy, b * OH + oh, b * H + h] = 1.0
    return R.reshape(K * batch * OH, batch * H)


def _build_G(w_oihw, W, s, pad, channel_major_in):
    """Fold conv weights + W-tap selection/zero-padding into (K, W*Cin, OW*Cout)."""
    w = np.asarray(w_oihw, np.float32)
    Cout, Cin, KH, KW = w.shape
    OW = (W + 2 * pad - KW) // s + 1
    G = np.zeros((KH, W * Cin, OW * Cout), np.float32)
    for dy in range(KH):
        for dx in range(KW):
            for ow in range(OW):
                wi = s * ow + dx - pad
                if 0 <= wi < W:
                    for ci in range(Cin):
                        row = ci * W + wi if channel_major_in else wi * Cin + ci
                        G[dy, row, ow * Cout:(ow + 1) * Cout] += w[:, ci, dy, dx]
    return G


def prepare_params(params, batch):
    """One-time (batch-size dependent) folding of all constants the kernel needs."""
    # Linear weight as 24 (64,64) planes + the bias plane at index 24 (f32).
    w3 = (np.asarray(params["lin_w"], np.float32)
          .reshape(IMG, IMG, NCOND).transpose(2, 0, 1))
    bias_plane = np.asarray(params["lin_b"], np.float32).reshape(1, IMG, IMG)
    prep = {"w3": jnp.asarray(np.concatenate([w3, bias_plane], axis=0))}

    Rs, Gs = [], []
    for i, (H, s, pad) in enumerate(_CONV_CFG):
        OH = (H + 2 * pad - K) // s + 1
        Rs.append(jnp.asarray(_build_R(batch, H, OH, s, pad), jnp.bfloat16))
        Gs.append(_build_G(params[f"conv{i}_w"], H, s, pad,
                           channel_major_in=(i == 0)))
    prep["R"] = Rs
    prep["G"] = jnp.asarray(np.stack(Gs[:4]), jnp.bfloat16)      # (4, 4, 256, 256)
    prep["G4"] = jnp.asarray(Gs[4], jnp.bfloat16)                # (4, 256, 1)

    # BatchNorm constants.  All lane widths are 256; channel axes are
    # zero-padded to 64 so the three BN layers stack into one operand each.
    Ps, PTGs, BPTs = [], [], []
    for i, (C, OW) in enumerate(_BN_CFG):
        count = batch * OW * OW
        gamma = np.asarray(params[f"bn{i}_gamma"], np.float32)
        beta = np.asarray(params[f"bn{i}_beta"], np.float32)
        P = np.zeros((OW * C, 64), np.float32)       # column pool (+ 1/count)
        PTG = np.zeros((64, OW * C), np.float32)     # channel broadcast * gamma
        BPT = np.zeros((1, OW * C), np.float32)      # beta broadcast
        for ow in range(OW):
            for c in range(C):
                P[ow * C + c, c] = 1.0 / count
                PTG[c, ow * C + c] = gamma[c]
                BPT[0, ow * C + c] = beta[c]
        Ps.append(P)
        PTGs.append(PTG)
        BPTs.append(BPT)
    prep["P"] = jnp.asarray(np.stack(Ps))        # (3, 256, 64)
    prep["PTG"] = jnp.asarray(np.stack(PTGs))    # (3, 64, 256)
    prep["BPT"] = jnp.asarray(np.stack(BPTs))    # (3, 1, 256)
    return prep


# ----------------------------------------------------------------------------
# Forward pass: ONE pallas_call, nothing else.
# ----------------------------------------------------------------------------
def discriminator_forward(prep, x_nchw, condi):
    B = x_nchw.shape[0]
    args = [condi.astype(jnp.float32), x_nchw.astype(jnp.float32), prep["w3"],
            prep["R"][0], prep["R"][1], prep["R"][2], prep["R"][3], prep["R"][4],
            prep["G"], prep["G4"], prep["P"], prep["PTG"], prep["BPT"]]

    def full_spec(a):
        nd = a.ndim
        return pl.BlockSpec(a.shape, lambda i, nd=nd: (0,) * nd)

    out = pl.pallas_call(
        _disc_kernel,
        out_shape=jax.ShapeDtypeStruct((B, 1), jnp.float32),
        grid=(1,),
        in_specs=[full_spec(a) for a in args],
        out_specs=pl.BlockSpec((B, 1), lambda i: (0, 0)),
        compiler_params=pltpu.CompilerParams(
            dimension_semantics=("arbitrary",),
            vmem_limit_bytes=12 * 1024 * 1024),   # ~3 MiB of constants resident
    )(*args)
    return out.reshape(B, 1, 1, 1)


if __name__ == "__main__":
    key = jax.random.PRNGKey(0)
    kp, kx, kc = jax.random.split(key, 3)
    params = init_params(kp)

    B = 2
    # Spatial size is fixed at 64x64 by the module (y.view(-1, 1, 64, 64)).
    x = jax.random.normal(kx, (B, NC, IMG, IMG), jnp.float32)
    condi = jax.random.normal(kc, (B, NCOND), jnp.float32)

    prep = prepare_params(params, batch=B)       # one-time weight folding
    fwd = jax.jit(discriminator_forward)
    out = jax.block_until_ready(fwd(prep, x, condi))

    assert out.shape == (B, 1, 1, 1)
    assert bool(jnp.all((out >= 0.0) & (out <= 1.0)))
    print("KERNEL_OK")
</pallas_src>

<mosaic_0001>
module attributes {stable_mosaic.version = 11 : i64} {
  func.func @_disc_kernel(%arg0: i32, %arg1: memref<2x24xf32, #tpu.memory_space<vmem>>, %arg2: memref<2x3x64x64xf32, #tpu.memory_space<vmem>>, %arg3: memref<25x64x64xf32, #tpu.memory_space<vmem>>, %arg4: memref<256x128xbf16, #tpu.memory_space<vmem>>, %arg5: memref<128x64xbf16, #tpu.memory_space<vmem>>, %arg6: memref<64x32xbf16, #tpu.memory_space<vmem>>, %arg7: memref<32x16xbf16, #tpu.memory_space<vmem>>, %arg8: memref<8x8xbf16, #tpu.memory_space<vmem>>, %arg9: memref<4x4x256x256xbf16, #tpu.memory_space<vmem>>, %arg10: memref<4x256x1xbf16, #tpu.memory_space<vmem>>, %arg11: memref<3x256x64xf32, #tpu.memory_space<vmem>>, %arg12: memref<3x64x256xf32, #tpu.memory_space<vmem>>, %arg13: memref<3x1x256xf32, #tpu.memory_space<vmem>>, %arg14: memref<2x1xf32, #tpu.memory_space<vmem>>) attributes {dimension_semantics = [#tpu.dimension_semantics<arbitrary>], iteration_bounds = array<i64: 1>, scalar_prefetch = 0 : i64, scratch_operands = 0 : i64, tpu.core_type = #tpu.core_type<tc>, window_params = [{pipeline_mode = #tpu.pipeline_mode<synchronous>, transform_indices = @transform_0, window_bounds = array<i64: 2, 24>}, {pipeline_mode = #tpu.pipeline_mode<synchronous>, transform_indices = @transform_1, window_bounds = array<i64: 2, 3, 64, 64>}, {pipeline_mode = #tpu.pipeline_mode<synchronous>, transform_indices = @transform_2, window_bounds = array<i64: 25, 64, 64>}, {pipeline_mode = #tpu.pipeline_mode<synchronous>, transform_indices = @transform_3, window_bounds = array<i64: 256, 128>}, {pipeline_mode = #tpu.pipeline_mode<synchronous>, transform_indices = @transform_4, window_bounds = array<i64: 128, 64>}, {pipeline_mode = #tpu.pipeline_mode<synchronous>, transform_indices = @transform_5, window_bounds = array<i64: 64, 32>}, {pipeline_mode = #tpu.pipeline_mode<synchronous>, transform_indices = @transform_6, window_bounds = array<i64: 32, 16>}, {pipeline_mode = #tpu.pipeline_mode<synchronous>, transform_indices = @transform_7, window_bounds = array<i64: 8, 8>}, {pipeline_mode = #tpu.pipeline_mode<synchronous>, transform_indices = @transform_8, window_bounds = array<i64: 4, 4, 256, 256>}, {pipeline_mode = #tpu.pipeline_mode<synchronous>, transform_indices = @transform_9, window_bounds = array<i64: 4, 256, 1>}, {pipeline_mode = #tpu.pipeline_mode<synchronous>, transform_indices = @transform_10, window_bounds = array<i64: 3, 256, 64>}, {pipeline_mode = #tpu.pipeline_mode<synchronous>, transform_indices = @transform_11, window_bounds = array<i64: 3, 64, 256>}, {pipeline_mode = #tpu.pipeline_mode<synchronous>, transform_indices = @transform_12, window_bounds = array<i64: 3, 1, 256>}, {pipeline_mode = #tpu.pipeline_mode<synchronous>, transform_indices = @transform_13, window_bounds = array<i64: 2, 1>}]} {
    %c24 = arith.constant 24 : index
    %c0 = arith.constant 0 : index
    %c0_0 = arith.constant 0 : index
    %0 = vector.load %arg3[%c24, %c0, %c0_0] : memref<25x64x64xf32, #tpu.memory_space<vmem>>, vector<1x64x64xf32>
    %1 = vector.shape_cast %0 : vector<1x64x64xf32> to vector<64x64xf32>
    %c24_1 = arith.constant 24 : index
    %c0_2 = arith.constant 0 : index
    %c0_3 = arith.constant 0 : index
    %2 = vector.load %arg3[%c24_1, %c0_2, %c0_3] : memref<25x64x64xf32, #tpu.memory_space<vmem>>, vector<1x64x64xf32>
    %3 = vector.shape_cast %2 : vector<1x64x64xf32> to vector<64x64xf32>
    %c0_4 = arith.constant 0 : index
    %c0_5 = arith.constant 0 : index
    %c0_6 = arith.constant 0 : index
    %4 = vector.load %arg3[%c0_4, %c0_5, %c0_6] : memref<25x64x64xf32, #tpu.memory_space<vmem>>, vector<1x64x64xf32>
    %5 = vector.shape_cast %4 : vector<1x64x64xf32> to vector<64x64xf32>
    %c0_7 = arith.constant 0 : index
    %c0_8 = arith.constant 0 : index
    %6 = vector.load %arg1[%c0_7, %c0_8] : memref<2x24xf32, #tpu.memory_space<vmem>>, vector<1x1xf32>
    %7 = vector.broadcast %6 : vector<1x1xf32> to vector<64x64xf32>
    %8 = arith.mulf %7, %5 : vector<64x64xf32>
    %9 = arith.addf %1, %8 : vector<64x64xf32>
    %c1 = arith.constant 1 : index
    %c0_9 = arith.constant 0 : index
    %10 = vector.load %arg1[%c1, %c0_9] : memref<2x24xf32, #tpu.memory_space<vmem>>, vector<1x1xf32>
    %11 = vector.broadcast %10 : vector<1x1xf32> to vector<64x64xf32>
    %12 = arith.mulf %11, %5 : vector<64x64xf32>
    %13 = arith.addf %3, %12 : vector<64x64xf32>
    %c1_10 = arith.constant 1 : index
    %c0_11 = arith.constant 0 : index
    %c0_12 = arith.constant 0 : index
    %14 = vector.load %arg3[%c1_10, %c0_11, %c0_12] : memref<25x64x64xf32, #tpu.memory_space<vmem>>, vector<1x64x64xf32>
    %15 = vector.shape_cast %14 : vector<1x64x64xf32> to vector<64x64xf32>
    %c0_13 = arith.constant 0 : index
    %c1_14 = arith.constant 1 : index
    %16 = vector.load %arg1[%c0_13, %c1_14] : memref<2x24xf32, #tpu.memory_space<vmem>>, vector<1x1xf32>
    %17 = vector.broadcast %16 : vector<1x1xf32> to vector<64x64xf32>
    %18 = arith.mulf %17, %15 : vector<64x64xf32>
    %19 = arith.addf %9, %18 : vector<64x64xf32>
    %c1_15 = arith.constant 1 : index
    %c1_16 = arith.constant 1 : index
    %20 = vector.load %arg1[%c1_15, %c1_16] : memref<2x24xf32, #tpu.memory_space<vmem>>, vector<1x1xf32>
    %21 = vector.broadcast %20 : vector<1x1xf32> to vector<64x64xf32>
    %22 = arith.mulf %21, %15 : vector<64x64xf32>
    %23 = arith.addf %13, %22 : vector<64x64xf32>
    %c2 = arith.constant 2 : index
    %c0_17 = arith.constant 0 : index
    %c0_18 = arith.constant 0 : index
    %24 = vector.load %arg3[%c2, %c0_17, %c0_18] : memref<25x64x64xf32, #tpu.memory_space<vmem>>, vector<1x64x64xf32>
    %25 = vector.shape_cast %24 : vector<1x64x64xf32> to vector<64x64xf32>
    %c0_19 = arith.constant 0 : index
    %c2_20 = arith.constant 2 : index
    %26 = vector.load %arg1[%c0_19, %c2_20] : memref<2x24xf32, #tpu.memory_space<vmem>>, vector<1x1xf32>
    %27 = vector.broadcast %26 : vector<1x1xf32> to vector<64x64xf32>
    %28 = arith.mulf %27, %25 : vector<64x64xf32>
    %29 = arith.addf %19, %28 : vector<64x64xf32>
    %c1_21 = arith.constant 1 : index
    %c2_22 = arith.constant 2 : index
    %30 = vector.load %arg1[%c1_21, %c2_22] : memref<2x24xf32, #tpu.memory_space<vmem>>, vector<1x1xf32>
    %31 = vector.broadcast %30 : vector<1x1xf32> to vector<64x64xf32>
    %32 = arith.mulf %31, %25 : vector<64x64xf32>
    %33 = arith.addf %23, %32 : vector<64x64xf32>
    %c3 = arith.constant 3 : index
    %c0_23 = arith.constant 0 : index
    %c0_24 = arith.constant 0 : index
    %34 = vector.load %arg3[%c3, %c0_23, %c0_24] : memref<25x64x64xf32, #tpu.memory_space<vmem>>, vector<1x64x64xf32>
    %35 = vector.shape_cast %34 : vector<1x64x64xf32> to vector<64x64xf32>
    %c0_25 = arith.constant 0 : index
    %c3_26 = arith.constant 3 : index
    %36 = vector.load %arg1[%c0_25, %c3_26] : memref<2x24xf32, #tpu.memory_space<vmem>>, vector<1x1xf32>
    %37 = vector.broadcast %36 : vector<1x1xf32> to vector<64x64xf32>
    %38 = arith.mulf %37, %35 : vector<64x64xf32>
    %39 = arith.addf %29, %38 : vector<64x64xf32>
    %c1_27 = arith.constant 1 : index
    %c3_28 = arith.constant 3 : index
    %40 = vector.load %arg1[%c1_27, %c3_28] : memref<2x24xf32, #tpu.memory_space<vmem>>, vector<1x1xf32>
    %41 = vector.broadcast %40 : vector<1x1xf32> to vector<64x64xf32>
    %42 = arith.mulf %41, %35 : vector<64x64xf32>
    %43 = arith.addf %33, %42 : vector<64x64xf32>
    %c4 = arith.constant 4 : index
    %c0_29 = arith.constant 0 : index
    %c0_30 = arith.constant 0 : index
    %44 = vector.load %arg3[%c4, %c0_29, %c0_30] : memref<25x64x64xf32, #tpu.memory_space<vmem>>, vector<1x64x64xf32>
    %45 = vector.shape_cast %44 : vector<1x64x64xf32> to vector<64x64xf32>
    %c0_31 = arith.constant 0 : index
    %c4_32 = arith.constant 4 : index
    %46 = vector.load %arg1[%c0_31, %c4_32] : memref<2x24xf32, #tpu.memory_space<vmem>>, vector<1x1xf32>
    %47 = vector.broadcast %46 : vector<1x1xf32> to vector<64x64xf32>
    %48 = arith.mulf %47, %45 : vector<64x64xf32>
    %49 = arith.addf %39, %48 : vector<64x64xf32>
    %c1_33 = arith.constant 1 : index
    %c4_34 = arith.constant 4 : index
    %50 = vector.load %arg1[%c1_33, %c4_34] : memref<2x24xf32, #tpu.memory_space<vmem>>, vector<1x1xf32>
    %51 = vector.broadcast %50 : vector<1x1xf32> to vector<64x64xf32>
    %52 = arith.mulf %51, %45 : vector<64x64xf32>
    %53 = arith.addf %43, %52 : vector<64x64xf32>
    %c5 = arith.constant 5 : index
    %c0_35 = arith.constant 0 : index
    %c0_36 = arith.constant 0 : index
    %54 = vector.load %arg3[%c5, %c0_35, %c0_36] : memref<25x64x64xf32, #tpu.memory_space<vmem>>, vector<1x64x64xf32>
    %55 = vector.shape_cast %54 : vector<1x64x64xf32> to vector<64x64xf32>
    %c0_37 = arith.constant 0 : index
    %c5_38 = arith.constant 5 : index
    %56 = vector.load %arg1[%c0_37, %c5_38] : memref<2x24xf32, #tpu.memory_space<vmem>>, vector<1x1xf32>
    %57 = vector.broadcast %56 : vector<1x1xf32> to vector<64x64xf32>
    %58 = arith.mulf %57, %55 : vector<64x64xf32>
    %59 = arith.addf %49, %58 : vector<64x64xf32>
    %c1_39 = arith.constant 1 : index
    %c5_40 = arith.constant 5 : index
    %60 = vector.load %arg1[%c1_39, %c5_40] : memref<2x24xf32, #tpu.memory_space<vmem>>, vector<1x1xf32>
    %61 = vector.broadcast %60 : vector<1x1xf32> to vector<64x64xf32>
    %62 = arith.mulf %61, %55 : vector<64x64xf32>
    %63 = arith.addf %53, %62 : vector<64x64xf32>
    %c6 = arith.constant 6 : index
    %c0_41 = arith.constant 0 : index
    %c0_42 = arith.constant 0 : index
    %64 = vector.load %arg3[%c6, %c0_41, %c0_42] : memref<25x64x64xf32, #tpu.memory_space<vmem>>, vector<1x64x64xf32>
    %65 = vector.shape_cast %64 : vector<1x64x64xf32> to vector<64x64xf32>
    %c0_43 = arith.constant 0 : index
    %c6_44 = arith.constant 6 : index
    %66 = vector.load %arg1[%c0_43, %c6_44] : memref<2x24xf32, #tpu.memory_space<vmem>>, vector<1x1xf32>
    %67 = vector.broadcast %66 : vector<1x1xf32> to vector<64x64xf32>
    %68 = arith.mulf %67, %65 : vector<64x64xf32>
    %69 = arith.addf %59, %68 : vector<64x64xf32>
    %c1_45 = arith.constant 1 : index
    %c6_46 = arith.constant 6 : index
    %70 = vector.load %arg1[%c1_45, %c6_46] : memref<2x24xf32, #tpu.memory_space<vmem>>, vector<1x1xf32>
    %71 = vector.broadcast %70 : vector<1x1xf32> to vector<64x64xf32>
    %72 = arith.mulf %71, %65 : vector<64x64xf32>
    %73 = arith.addf %63, %72 : vector<64x64xf32>
    %c7 = arith.constant 7 : index
    %c0_47 = arith.constant 0 : index
    %c0_48 = arith.constant 0 : index
    %74 = vector.load %arg3[%c7, %c0_47, %c0_48] : memref<25x64x64xf32, #tpu.memory_space<vmem>>, vector<1x64x64xf32>
    %75 = vector.shape_cast %74 : vector<1x64x64xf32> to vector<64x64xf32>
    %c0_49 = arith.constant 0 : index
    %c7_50 = arith.constant 7 : index
    %76 = vector.load %arg1[%c0_49, %c7_50] : memref<2x24xf32, #tpu.memory_space<vmem>>, vector<1x1xf32>
    %77 = vector.broadcast %76 : vector<1x1xf32> to vector<64x64xf32>
    %78 = arith.mulf %77, %75 : vector<64x64xf32>
    %79 = arith.addf %69, %78 : vector<64x64xf32>
    %c1_51 = arith.constant 1 : index
    %c7_52 = arith.constant 7 : index
    %80 = vector.load %arg1[%c1_51, %c7_52] : memref<2x24xf32, #tpu.memory_space<vmem>>, vector<1x1xf32>
    %81 = vector.broadcast %80 : vector<1x1xf32> to vector<64x64xf32>
    %82 = arith.mulf %81, %75 : vector<64x64xf32>
    %83 = arith.addf %73, %82 : vector<64x64xf32>
    %c8 = arith.constant 8 : index
    %c0_53 = arith.constant 0 : index
    %c0_54 = arith.constant 0 : index
    %84 = vector.load %arg3[%c8, %c0_53, %c0_54] : memref<25x64x64xf32, #tpu.memory_space<vmem>>, vector<1x64x64xf32>
    %85 = vector.shape_cast %84 : vector<1x64x64xf32> to vector<64x64xf32>
    %c0_55 = arith.constant 0 : index
    %c8_56 = arith.constant 8 : index
    %86 = vector.load %arg1[%c0_55, %c8_56] : memref<2x24xf32, #tpu.memory_space<vmem>>, vector<1x1xf32>
    %87 = vector.broadcast %86 : vector<1x1xf32> to vector<64x64xf32>
    %88 = arith.mulf %87, %85 : vector<64x64xf32>
    %89 = arith.addf %79, %88 : vector<64x64xf32>
    %c1_57 = arith.constant 1 : index
    %c8_58 = arith.constant 8 : index
    %90 = vector.load %arg1[%c1_57, %c8_58] : memref<2x24xf32, #tpu.memory_space<vmem>>, vector<1x1xf32>
    %91 = vector.broadcast %90 : vector<1x1xf32> to vector<64x64xf32>
    %92 = arith.mulf %91, %85 : vector<64x64xf32>
    %93 = arith.addf %83, %92 : vector<64x64xf32>
    %c9 = arith.constant 9 : index
    %c0_59 = arith.constant 0 : index
    %c0_60 = arith.constant 0 : index
    %94 = vector.load %arg3[%c9, %c0_59, %c0_60] : memref<25x64x64xf32, #tpu.memory_space<vmem>>, vector<1x64x64xf32>
    %95 = vector.shape_cast %94 : vector<1x64x64xf32> to vector<64x64xf32>
    %c0_61 = arith.constant 0 : index
    %c9_62 = arith.constant 9 : index
    %96 = vector.load %arg1[%c0_61, %c9_62] : memref<2x24xf32, #tpu.memory_space<vmem>>, vector<1x1xf32>
    %97 = vector.broadcast %96 : vector<1x1xf32> to vector<64x64xf32>
    %98 = arith.mulf %97, %95 : vector<64x64xf32>
    %99 = arith.addf %89, %98 : vector<64x64xf32>
    %c1_63 = arith.constant 1 : index
    %c9_64 = arith.constant 9 : index
    %100 = vector.load %arg1[%c1_63, %c9_64] : memref<2x24xf32, #tpu.memory_space<vmem>>, vector<1x1xf32>
    %101 = vector.broadcast %100 : vector<1x1xf32> to vector<64x64xf32>
    %102 = arith.mulf %101, %95 : vector<64x64xf32>
    %103 = arith.addf %93, %102 : vector<64x64xf32>
    %c10 = arith.constant 10 : index
    %c0_65 = arith.constant 0 : index
    %c0_66 = arith.constant 0 : index
    %104 = vector.load %arg3[%c10, %c0_65, %c0_66] : memref<25x64x64xf32, #tpu.memory_space<vmem>>, vector<1x64x64xf32>
    %105 = vector.shape_cast %104 : vector<1x64x64xf32> to vector<64x64xf32>
    %c0_67 = arith.constant 0 : index
    %c10_68 = arith.constant 10 : index
    %106 = vector.load %arg1[%c0_67, %c10_68] : memref<2x24xf32, #tpu.memory_space<vmem>>, vector<1x1xf32>
    %107 = vector.broadcast %106 : vector<1x1xf32> to vector<64x64xf32>
    %108 = arith.mulf %107, %105 : vector<64x64xf32>
    %109 = arith.addf %99, %108 : vector<64x64xf32>
    %c1_69 = arith.constant 1 : index
    %c10_70 = arith.constant 10 : index
    %110 = vector.load %arg1[%c1_69, %c10_70] : memref<2x24xf32, #tpu.memory_space<vmem>>, vector<1x1xf32>
    %111 = vector.broadcast %110 : vector<1x1xf32> to vector<64x64xf32>
    %112 = arith.mulf %111, %105 : vector<64x64xf32>
    %113 = arith.addf %103, %112 : vector<64x64xf32>
    %c11 = arith.constant 11 : index
    %c0_71 = arith.constant 0 : index
    %c0_72 = arith.constant 0 : index
    %114 = vector.load %arg3[%c11, %c0_71, %c0_72] : memref<25x64x64xf32, #tpu.memory_space<vmem>>, vector<1x64x64xf32>
    %115 = vector.shape_cast %114 : vector<1x64x64xf32> to vector<64x64xf32>
    %c0_73 = arith.constant 0 : index
    %c11_74 = arith.constant 11 : index
    %116 = vector.load %arg1[%c0_73, %c11_74] : memref<2x24xf32, #tpu.memory_space<vmem>>, vector<1x1xf32>
    %117 = vector.broadcast %116 : vector<1x1xf32> to vector<64x64xf32>
    %118 = arith.mulf %117, %115 : vector<64x64xf32>
    %119 = arith.addf %109, %118 : vector<64x64xf32>
    %c1_75 = arith.constant 1 : index
    %c11_76 = arith.constant 11 : index
    %120 = vector.load %arg1[%c1_75, %c11_76] : memref<2x24xf32, #tpu.memory_space<vmem>>, vector<1x1xf32>
    %121 = vector.broadcast %120 : vector<1x1xf32> to vector<64x64xf32>
    %122 = arith.mulf %121, %115 : vector<64x64xf32>
    %123 = arith.addf %113, %122 : vector<64x64xf32>
    %c12 = arith.constant 12 : index
    %c0_77 = arith.constant 0 : index
    %c0_78 = arith.constant 0 : index
    %124 = vector.load %arg3[%c12, %c0_77, %c0_78] : memref<25x64x64xf32, #tpu.memory_space<vmem>>, vector<1x64x64xf32>
    %125 = vector.shape_cast %124 : vector<1x64x64xf32> to vector<64x64xf32>
    %c0_79 = arith.constant 0 : index
    %c12_80 = arith.constant 12 : index
    %126 = vector.load %arg1[%c0_79, %c12_80] : memref<2x24xf32, #tpu.memory_space<vmem>>, vector<1x1xf32>
    %127 = vector.broadcast %126 : vector<1x1xf32> to vector<64x64xf32>
    %128 = arith.mulf %127, %125 : vector<64x64xf32>
    %129 = arith.addf %119, %128 : vector<64x64xf32>
    %c1_81 = arith.constant 1 : index
    %c12_82 = arith.constant 12 : index
    %130 = vector.load %arg1[%c1_81, %c12_82] : memref<2x24xf32, #tpu.memory_space<vmem>>, vector<1x1xf32>
    %131 = vector.broadcast %130 : vector<1x1xf32> to vector<64x64xf32>
    %132 = arith.mulf %131, %125 : vector<64x64xf32>
    %133 = arith.addf %123, %132 : vector<64x64xf32>
    %c13 = arith.constant 13 : index
    %c0_83 = arith.constant 0 : index
    %c0_84 = arith.constant 0 : index
    %134 = vector.load %arg3[%c13, %c0_83, %c0_84] : memref<25x64x64xf32, #tpu.memory_space<vmem>>, vector<1x64x64xf32>
    %135 = vector.shape_cast %134 : vector<1x64x64xf32> to vector<64x64xf32>
    %c0_85 = arith.constant 0 : index
    %c13_86 = arith.constant 13 : index
    %136 = vector.load %arg1[%c0_85, %c13_86] : memref<2x24xf32, #tpu.memory_space<vmem>>, vector<1x1xf32>
    %137 = vector.broadcast %136 : vector<1x1xf32> to vector<64x64xf32>
    %138 = arith.mulf %137, %135 : vector<64x64xf32>
    %139 = arith.addf %129, %138 : vector<64x64xf32>
    %c1_87 = arith.constant 1 : index
    %c13_88 = arith.constant 13 : index
    %140 = vector.load %arg1[%c1_87, %c13_88] : memref<2x24xf32, #tpu.memory_space<vmem>>, vector<1x1xf32>
    %141 = vector.broadcast %140 : vector<1x1xf32> to vector<64x64xf32>
    %142 = arith.mulf %141, %135 : vector<64x64xf32>
    %143 = arith.addf %133, %142 : vector<64x64xf32>
    %c14 = arith.constant 14 : index
    %c0_89 = arith.constant 0 : index
    %c0_90 = arith.constant 0 : index
    %144 = vector.load %arg3[%c14, %c0_89, %c0_90] : memref<25x64x64xf32, #tpu.memory_space<vmem>>, vector<1x64x64xf32>
    %145 = vector.shape_cast %144 : vector<1x64x64xf32> to vector<64x64xf32>
    %c0_91 = arith.constant 0 : index
    %c14_92 = arith.constant 14 : index
    %146 = vector.load %arg1[%c0_91, %c14_92] : memref<2x24xf32, #tpu.memory_space<vmem>>, vector<1x1xf32>
    %147 = vector.broadcast %146 : vector<1x1xf32> to vector<64x64xf32>
    %148 = arith.mulf %147, %145 : vector<64x64xf32>
    %149 = arith.addf %139, %148 : vector<64x64xf32>
    %c1_93 = arith.constant 1 : index
    %c14_94 = arith.constant 14 : index
    %150 = vector.load %arg1[%c1_93, %c14_94] : memref<2x24xf32, #tpu.memory_space<vmem>>, vector<1x1xf32>
    %151 = vector.broadcast %150 : vector<1x1xf32> to vector<64x64xf32>
    %152 = arith.mulf %151, %145 : vector<64x64xf32>
    %153 = arith.addf %143, %152 : vector<64x64xf32>
    %c15 = arith.constant 15 : index
    %c0_95 = arith.constant 0 : index
    %c0_96 = arith.constant 0 : index
    %154 = vector.load %arg3[%c15, %c0_95, %c0_96] : memref<25x64x64xf32, #tpu.memory_space<vmem>>, vector<1x64x64xf32>
    %155 = vector.shape_cast %154 : vector<1x64x64xf32> to vector<64x64xf32>
    %c0_97 = arith.constant 0 : index
    %c15_98 = arith.constant 15 : index
    %156 = vector.load %arg1[%c0_97, %c15_98] : memref<2x24xf32, #tpu.memory_space<vmem>>, vector<1x1xf32>
    %157 = vector.broadcast %156 : vector<1x1xf32> to vector<64x64xf32>
    %158 = arith.mulf %157, %155 : vector<64x64xf32>
    %159 = arith.addf %149, %158 : vector<64x64xf32>
    %c1_99 = arith.constant 1 : index
    %c15_100 = arith.constant 15 : index
    %160 = vector.load %arg1[%c1_99, %c15_100] : memref<2x24xf32, #tpu.memory_space<vmem>>, vector<1x1xf32>
    %161 = vector.broadcast %160 : vector<1x1xf32> to vector<64x64xf32>
    %162 = arith.mulf %161, %155 : vector<64x64xf32>
    %163 = arith.addf %153, %162 : vector<64x64xf32>
    %c16 = arith.constant 16 : index
    %c0_101 = arith.constant 0 : index
    %c0_102 = arith.constant 0 : index
    %164 = vector.load %arg3[%c16, %c0_101, %c0_102] : memref<25x64x64xf32, #tpu.memory_space<vmem>>, vector<1x64x64xf32>
    %165 = vector.shape_cast %164 : vector<1x64x64xf32> to vector<64x64xf32>
    %c0_103 = arith.constant 0 : index
    %c16_104 = arith.constant 16 : index
    %166 = vector.load %arg1[%c0_103, %c16_104] : memref<2x24xf32, #tpu.memory_space<vmem>>, vector<1x1xf32>
    %167 = vector.broadcast %166 : vector<1x1xf32> to vector<64x64xf32>
    %168 = arith.mulf %167, %165 : vector<64x64xf32>
    %169 = arith.addf %159, %168 : vector<64x64xf32>
    %c1_105 = arith.constant 1 : index
    %c16_106 = arith.constant 16 : index
    %170 = vector.load %arg1[%c1_105, %c16_106] : memref<2x24xf32, #tpu.memory_space<vmem>>, vector<1x1xf32>
    %171 = vector.broadcast %170 : vector<1x1xf32> to vector<64x64xf32>
    %172 = arith.mulf %171, %165 : vector<64x64xf32>
    %173 = arith.addf %163, %172 : vector<64x64xf32>
    %c17 = arith.constant 17 : index
    %c0_107 = arith.constant 0 : index
    %c0_108 = arith.constant 0 : index
    %174 = vector.load %arg3[%c17, %c0_107, %c0_108] : memref<25x64x64xf32, #tpu.memory_space<vmem>>, vector<1x64x64xf32>
    %175 = vector.shape_cast %174 : vector<1x64x64xf32> to vector<64x64xf32>
    %c0_109 = arith.constant 0 : index
    %c17_110 = arith.constant 17 : index
    %176 = vector.load %arg1[%c0_109, %c17_110] : memref<2x24xf32, #tpu.memory_space<vmem>>, vector<1x1xf32>
    %177 = vector.broadcast %176 : vector<1x1xf32> to vector<64x64xf32>
    %178 = arith.mulf %177, %175 : vector<64x64xf32>
    %179 = arith.addf %169, %178 : vector<64x64xf32>
    %c1_111 = arith.constant 1 : index
    %c17_112 = arith.constant 17 : index
    %180 = vector.load %arg1[%c1_111, %c17_112] : memref<2x24xf32, #tpu.memory_space<vmem>>, vector<1x1xf32>
    %181 = vector.broadcast %180 : vector<1x1xf32> to vector<64x64xf32>
    %182 = arith.mulf %181, %175 : vector<64x64xf32>
    %183 = arith.addf %173, %182 : vector<64x64xf32>
    %c18 = arith.constant 18 : index
    %c0_113 = arith.constant 0 : index
    %c0_114 = arith.constant 0 : index
    %184 = vector.load %arg3[%c18, %c0_113, %c0_114] : memref<25x64x64xf32, #tpu.memory_space<vmem>>, vector<1x64x64xf32>
    %185 = vector.shape_cast %184 : vector<1x64x64xf32> to vector<64x64xf32>
    %c0_115 = arith.constant 0 : index
    %c18_116 = arith.constant 18 : index
    %186 = vector.load %arg1[%c0_115, %c18_116] : memref<2x24xf32, #tpu.memory_space<vmem>>, vector<1x1xf32>
    %187 = vector.broadcast %186 : vector<1x1xf32> to vector<64x64xf32>
    %188 = arith.mulf %187, %185 : vector<64x64xf32>
    %189 = arith.addf %179, %188 : vector<64x64xf32>
    %c1_117 = arith.constant 1 : index
    %c18_118 = arith.constant 18 : index
    %190 = vector.load %arg1[%c1_117, %c18_118] : memref<2x24xf32, #tpu.memory_space<vmem>>, vector<1x1xf32>
    %191 = vector.broadcast %190 : vector<1x1xf32> to vector<64x64xf32>
    %192 = arith.mulf %191, %185 : vector<64x64xf32>
    %193 = arith.addf %183, %192 : vector<64x64xf32>
    %c19 = arith.constant 19 : index
    %c0_119 = arith.constant 0 : index
    %c0_120 = arith.constant 0 : index
    %194 = vector.load %arg3[%c19, %c0_119, %c0_120] : memref<25x64x64xf32, #tpu.memory_space<vmem>>, vector<1x64x64xf32>
    %195 = vector.shape_cast %194 : vector<1x64x64xf32> to vector<64x64xf32>
    %c0_121 = arith.constant 0 : index
    %c19_122 = arith.constant 19 : index
    %196 = vector.load %arg1[%c0_121, %c19_122] : memref<2x24xf32, #tpu.memory_space<vmem>>, vector<1x1xf32>
    %197 = vector.broadcast %196 : vector<1x1xf32> to vector<64x64xf32>
    %198 = arith.mulf %197, %195 : vector<64x64xf32>
    %199 = arith.addf %189, %198 : vector<64x64xf32>
    %c1_123 = arith.constant 1 : index
    %c19_124 = arith.constant 19 : index
    %200 = vector.load %arg1[%c1_123, %c19_124] : memref<2x24xf32, #tpu.memory_space<vmem>>, vector<1x1xf32>
    %201 = vector.broadcast %200 : vector<1x1xf32> to vector<64x64xf32>
    %202 = arith.mulf %201, %195 : vector<64x64xf32>
    %203 = arith.addf %193, %202 : vector<64x64xf32>
    %c20 = arith.constant 20 : index
    %c0_125 = arith.constant 0 : index
    %c0_126 = arith.constant 0 : index
    %204 = vector.load %arg3[%c20, %c0_125, %c0_126] : memref<25x64x64xf32, #tpu.memory_space<vmem>>, vector<1x64x64xf32>
    %205 = vector.shape_cast %204 : vector<1x64x64xf32> to vector<64x64xf32>
    %c0_127 = arith.constant 0 : index
    %c20_128 = arith.constant 20 : index
    %206 = vector.load %arg1[%c0_127, %c20_128] : memref<2x24xf32, #tpu.memory_space<vmem>>, vector<1x1xf32>
    %207 = vector.broadcast %206 : vector<1x1xf32> to vector<64x64xf32>
    %208 = arith.mulf %207, %205 : vector<64x64xf32>
    %209 = arith.addf %199, %208 : vector<64x64xf32>
    %c1_129 = arith.constant 1 : index
    %c20_130 = arith.constant 20 : index
    %210 = vector.load %arg1[%c1_129, %c20_130] : memref<2x24xf32, #tpu.memory_space<vmem>>, vector<1x1xf32>
    %211 = vector.broadcast %210 : vector<1x1xf32> to vector<64x64xf32>
    %212 = arith.mulf %211, %205 : vector<64x64xf32>
    %213 = arith.addf %203, %212 : vector<64x64xf32>
    %c21 = arith.constant 21 : index
    %c0_131 = arith.constant 0 : index
    %c0_132 = arith.constant 0 : index
    %214 = vector.load %arg3[%c21, %c0_131, %c0_132] : memref<25x64x64xf32, #tpu.memory_space<vmem>>, vector<1x64x64xf32>
    %215 = vector.shape_cast %214 : vector<1x64x64xf32> to vector<64x64xf32>
    %c0_133 = arith.constant 0 : index
    %c21_134 = arith.constant 21 : index
    %216 = vector.load %arg1[%c0_133, %c21_134] : memref<2x24xf32, #tpu.memory_space<vmem>>, vector<1x1xf32>
    %217 = vector.broadcast %216 : vector<1x1xf32> to vector<64x64xf32>
    %218 = arith.mulf %217, %215 : vector<64x64xf32>
    %219 = arith.addf %209, %218 : vector<64x64xf32>
    %c1_135 = arith.constant 1 : index
    %c21_136 = arith.constant 21 : index
    %220 = vector.load %arg1[%c1_135, %c21_136] : memref<2x24xf32, #tpu.memory_space<vmem>>, vector<1x1xf32>
    %221 = vector.broadcast %220 : vector<1x1xf32> to vector<64x64xf32>
    %222 = arith.mulf %221, %215 : vector<64x64xf32>
    %223 = arith.addf %213, %222 : vector<64x64xf32>
    %c22 = arith.constant 22 : index
    %c0_137 = arith.constant 0 : index
    %c0_138 = arith.constant 0 : index
    %224 = vector.load %arg3[%c22, %c0_137, %c0_138] : memref<25x64x64xf32, #tpu.memory_space<vmem>>, vector<1x64x64xf32>
    %225 = vector.shape_cast %224 : vector<1x64x64xf32> to vector<64x64xf32>
    %c0_139 = arith.constant 0 : index
    %c22_140 = arith.constant 22 : index
    %226 = vector.load %arg1[%c0_139, %c22_140] : memref<2x24xf32, #tpu.memory_space<vmem>>, vector<1x1xf32>
    %227 = vector.broadcast %226 : vector<1x1xf32> to vector<64x64xf32>
    %228 = arith.mulf %227, %225 : vector<64x64xf32>
    %229 = arith.addf %219, %228 : vector<64x64xf32>
    %c1_141 = arith.constant 1 : index
    %c22_142 = arith.constant 22 : index
    %230 = vector.load %arg1[%c1_141, %c22_142] : memref<2x24xf32, #tpu.memory_space<vmem>>, vector<1x1xf32>
    %231 = vector.broadcast %230 : vector<1x1xf32> to vector<64x64xf32>
    %232 = arith.mulf %231, %225 : vector<64x64xf32>
    %233 = arith.addf %223, %232 : vector<64x64xf32>
    %c23 = arith.constant 23 : index
    %c0_143 = arith.constant 0 : index
    %c0_144 = arith.constant 0 : index
    %234 = vector.load %arg3[%c23, %c0_143, %c0_144] : memref<25x64x64xf32, #tpu.memory_space<vmem>>, vector<1x64x64xf32>
    %235 = vector.shape_cast %234 : vector<1x64x64xf32> to vector<64x64xf32>
    %c0_145 = arith.constant 0 : index
    %c23_146 = arith.constant 23 : index
    %236 = vector.load %arg1[%c0_145, %c23_146] : memref<2x24xf32, #tpu.memory_space<vmem>>, vector<1x1xf32>
    %237 = vector.broadcast %236 : vector<1x1xf32> to vector<64x64xf32>
    %238 = arith.mulf %237, %235 : vector<64x64xf32>
    %239 = arith.addf %229, %238 : vector<64x64xf32>
    %c1_147 = arith.constant 1 : index
    %c23_148 = arith.constant 23 : index
    %240 = vector.load %arg1[%c1_147, %c23_148] : memref<2x24xf32, #tpu.memory_space<vmem>>, vector<1x1xf32>
    %241 = vector.broadcast %240 : vector<1x1xf32> to vector<64x64xf32>
    %242 = arith.mulf %241, %235 : vector<64x64xf32>
    %243 = arith.addf %233, %242 : vector<64x64xf32>
    %c0_149 = arith.constant 0 : index
    %c0_150 = arith.constant 0 : index
    %c0_151 = arith.constant 0 : index
    %c0_152 = arith.constant 0 : index
    %244 = vector.load %arg2[%c0_149, %c0_150, %c0_151, %c0_152] : memref<2x3x64x64xf32, #tpu.memory_space<vmem>>, vector<1x1x64x64xf32>
    %245 = vector.shape_cast %244 : vector<1x1x64x64xf32> to vector<64x64xf32>
    %c0_153 = arith.constant 0 : index
    %c1_154 = arith.constant 1 : index
    %c0_155 = arith.constant 0 : index
    %c0_156 = arith.constant 0 : index
    %246 = vector.load %arg2[%c0_153, %c1_154, %c0_155, %c0_156] : memref<2x3x64x64xf32, #tpu.memory_space<vmem>>, vector<1x1x64x64xf32>
    %247 = vector.shape_cast %246 : vector<1x1x64x64xf32> to vector<64x64xf32>
    %c0_157 = arith.constant 0 : index
    %c2_158 = arith.constant 2 : index
    %c0_159 = arith.constant 0 : index
    %c0_160 = arith.constant 0 : index
    %248 = vector.load %arg2[%c0_157, %c2_158, %c0_159, %c0_160] : memref<2x3x64x64xf32, #tpu.memory_space<vmem>>, vector<1x1x64x64xf32>
    %249 = vector.shape_cast %248 : vector<1x1x64x64xf32> to vector<64x64xf32>
    %cst = arith.constant 0.000000e+00 : f32
    %250 = vector.broadcast %cst : f32 to vector<64x64xf32>
    %251 = arith.maximumf %239, %250 : vector<64x64xf32>
    %252 = tpu.concatenate %245, %247, %249, %251 in 1 : vector<64x64xf32>, vector<64x64xf32>, vector<64x64xf32>, vector<64x64xf32> -> vector<64x256xf32>
    %c1_161 = arith.constant 1 : index
    %c0_162 = arith.constant 0 : index
    %c0_163 = arith.constant 0 : index
    %c0_164 = arith.constant 0 : index
    %253 = vector.load %arg2[%c1_161, %c0_162, %c0_163, %c0_164] : memref<2x3x64x64xf32, #tpu.memory_space<vmem>>, vector<1x1x64x64xf32>
    %254 = vector.shape_cast %253 : vector<1x1x64x64xf32> to vector<64x64xf32>
    %c1_165 = arith.constant 1 : index
    %c1_166 = arith.constant 1 : index
    %c0_167 = arith.constant 0 : index
    %c0_168 = arith.constant 0 : index
    %255 = vector.load %arg2[%c1_165, %c1_166, %c0_167, %c0_168] : memref<2x3x64x64xf32, #tpu.memory_space<vmem>>, vector<1x1x64x64xf32>
    %256 = vector.shape_cast %255 : vector<1x1x64x64xf32> to vector<64x64xf32>
    %c1_169 = arith.constant 1 : index
    %c2_170 = arith.constant 2 : index
    %c0_171 = arith.constant 0 : index
    %c0_172 = arith.constant 0 : index
    %257 = vector.load %arg2[%c1_169, %c2_170, %c0_171, %c0_172] : memref<2x3x64x64xf32, #tpu.memory_space<vmem>>, vector<1x1x64x64xf32>
    %258 = vector.shape_cast %257 : vector<1x1x64x64xf32> to vector<64x64xf32>
    %cst_173 = arith.constant 0.000000e+00 : f32
    %259 = vector.broadcast %cst_173 : f32 to vector<64x64xf32>
    %260 = arith.maximumf %243, %259 : vector<64x64xf32>
    %261 = tpu.concatenate %254, %256, %258, %260 in 1 : vector<64x64xf32>, vector<64x64xf32>, vector<64x64xf32>, vector<64x64xf32> -> vector<64x256xf32>
    %262 = tpu.concatenate %252, %261 in 0 : vector<64x256xf32>, vector<64x256xf32> -> vector<128x256xf32>
    %263 = arith.truncf %262 : vector<128x256xf32> to vector<128x256xbf16>
    %c0_174 = arith.constant 0 : index
    %c0_175 = arith.constant 0 : index
    %264 = vector.load %arg4[%c0_174, %c0_175] : memref<256x128xbf16, #tpu.memory_space<vmem>>, vector<256x128xbf16>
    %cst_176 = arith.constant dense<0.000000e+00> : vector<256x256xf32>
    %265 = tpu.matmul %264, %263, %cst_176 {dimension_numbers = #tpu.dot_dimension_numbers<[1], [0], [0], [1], [0, 0, 1, 1], [], []>} : vector<256x128xbf16>, vector<128x256xbf16>, vector<256x256xf32> -> vector<256x256xf32>
    %266 = arith.truncf %265 : vector<256x256xf32> to vector<256x256xbf16>
    %267 = vector.extract_strided_slice %266 {offsets = [0, 0], sizes = [64, 256], strides = [1, 1]} : vector<256x256xbf16> to vector<64x256xbf16>
    %c0_177 = arith.constant 0 : index
    %c0_178 = arith.constant 0 : index
    %c0_179 = arith.constant 0 : index
    %c0_180 = arith.constant 0 : index
    %268 = vector.load %arg9[%c0_177, %c0_178, %c0_179, %c0_180] : memref<4x4x256x256xbf16, #tpu.memory_space<vmem>>, vector<1x1x256x256xbf16>
    %269 = vector.shape_cast %268 : vector<1x1x256x256xbf16> to vector<256x256xbf16>
    %cst_181 = arith.constant dense<0.000000e+00> : vector<64x256xf32>
    %270 = tpu.matmul %267, %269, %cst_181 {dimension_numbers = #tpu.dot_dimension_numbers<[1], [0], [0], [1], [0, 0, 1, 1], [], []>} : vector<64x256xbf16>, vector<256x256xbf16>, vector<64x256xf32> -> vector<64x256xf32>
    %271 = vector.extract_strided_slice %266 {offsets = [64, 0], sizes = [64, 256], strides = [1, 1]} : vector<256x256xbf16> to vector<64x256xbf16>
    %c0_182 = arith.constant 0 : index
    %c1_183 = arith.constant 1 : index
    %c0_184 = arith.constant 0 : index
    %c0_185 = arith.constant 0 : index
    %272 = vector.load %arg9[%c0_182, %c1_183, %c0_184, %c0_185] : memref<4x4x256x256xbf16, #tpu.memory_space<vmem>>, vector<1x1x256x256xbf16>
    %273 = vector.shape_cast %272 : vector<1x1x256x256xbf16> to vector<256x256xbf16>
    %cst_186 = arith.constant dense<0.000000e+00> : vector<64x256xf32>
    %274 = tpu.matmul %271, %273, %cst_186 {dimension_numbers = #tpu.dot_dimension_numbers<[1], [0], [0], [1], [0, 0, 1, 1], [], []>} : vector<64x256xbf16>, vector<256x256xbf16>, vector<64x256xf32> -> vector<64x256xf32>
    %275 = arith.addf %270, %274 : vector<64x256xf32>
    %276 = vector.extract_strided_slice %266 {offsets = [128, 0], sizes = [64, 256], strides = [1, 1]} : vector<256x256xbf16> to vector<64x256xbf16>
    %c0_187 = arith.constant 0 : index
    %c2_188 = arith.constant 2 : index
    %c0_189 = arith.constant 0 : index
    %c0_190 = arith.constant 0 : index
    %277 = vector.load %arg9[%c0_187, %c2_188, %c0_189, %c0_190] : memref<4x4x256x256xbf16, #tpu.memory_space<vmem>>, vector<1x1x256x256xbf16>
    %278 = vector.shape_cast %277 : vector<1x1x256x256xbf16> to vector<256x256xbf16>
    %cst_191 = arith.constant dense<0.000000e+00> : vector<64x256xf32>
    %279 = tpu.matmul %276, %278, %cst_191 {dimension_numbers = #tpu.dot_dimension_numbers<[1], [0], [0], [1], [0, 0, 1, 1], [], []>} : vector<64x256xbf16>, vector<256x256xbf16>, vector<64x256xf32> -> vector<64x256xf32>
    %280 = arith.addf %275, %279 : vector<64x256xf32>
    %281 = vector.extract_strided_slice %266 {offsets = [192, 0], sizes = [64, 256], strides = [1, 1]} : vector<256x256xbf16> to vector<64x256xbf16>
    %c0_192 = arith.constant 0 : index
    %c3_193 = arith.constant 3 : index
    %c0_194 = arith.constant 0 : index
    %c0_195 = arith.constant 0 : index
    %282 = vector.load %arg9[%c0_192, %c3_193, %c0_194, %c0_195] : memref<4x4x256x256xbf16, #tpu.memory_space<vmem>>, vector<1x1x256x256xbf16>
    %283 = vector.shape_cast %282 : vector<1x1x256x256xbf16> to vector<256x256xbf16>
    %cst_196 = arith.constant dense<0.000000e+00> : vector<64x256xf32>
    %284 = tpu.matmul %281, %283, %cst_196 {dimension_numbers = #tpu.dot_dimension_numbers<[1], [0], [0], [1], [0, 0, 1, 1], [], []>} : vector<64x256xbf16>, vector<256x256xbf16>, vector<64x256xf32> -> vector<64x256xf32>
    %285 = arith.addf %280, %284 : vector<64x256xf32>
    %cst_197 = arith.constant 0.000000e+00 : f32
    %286 = vector.broadcast %cst_197 : f32 to vector<64x256xf32>
    %287 = arith.cmpf ogt, %285, %286 : vector<64x256xf32>
    %cst_198 = arith.constant 2.000000e-01 : f32
    %288 = vector.broadcast %cst_198 : f32 to vector<64x256xf32>
    %289 = arith.mulf %288, %285 : vector<64x256xf32>
    %290 = arith.select %287, %285, %289 : vector<64x256xi1>, vector<64x256xf32>
    %291 = arith.truncf %290 : vector<64x256xf32> to vector<64x256xbf16>
    %c0_199 = arith.constant 0 : index
    %c0_200 = arith.constant 0 : index
    %292 = vector.load %arg5[%c0_199, %c0_200] : memref<128x64xbf16, #tpu.memory_space<vmem>>, vector<128x64xbf16>
    %cst_201 = arith.constant dense<0.000000e+00> : vector<128x256xf32>
    %293 = tpu.matmul %292, %291, %cst_201 {dimension_numbers = #tpu.dot_dimension_numbers<[1], [0], [0], [1], [0, 0, 1, 1], [], []>} : vector<128x64xbf16>, vector<64x256xbf16>, vector<128x256xf32> -> vector<128x256xf32>
    %294 = arith.truncf %293 : vector<128x256xf32> to vector<128x256xbf16>
    %295 = vector.extract_strided_slice %294 {offsets = [0, 0], sizes = [32, 256], strides = [1, 1]} : vector<128x256xbf16> to vector<32x256xbf16>
    %c1_202 = arith.constant 1 : index
    %c0_203 = arith.constant 0 : index
    %c0_204 = arith.constant 0 : index
    %c0_205 = arith.constant 0 : index
    %296 = vector.load %arg9[%c1_202, %c0_203, %c0_204, %c0_205] : memref<4x4x256x256xbf16, #tpu.memory_space<vmem>>, vector<1x1x256x256xbf16>
    %297 = vector.shape_cast %296 : vector<1x1x256x256xbf16> to vector<256x256xbf16>
    %cst_206 = arith.constant dense<0.000000e+00> : vector<32x256xf32>
    %298 = tpu.matmul %295, %297, %cst_206 {dimension_numbers = #tpu.dot_dimension_numbers<[1], [0], [0], [1], [0, 0, 1, 1], [], []>} : vector<32x256xbf16>, vector<256x256xbf16>, vector<32x256xf32> -> vector<32x256xf32>
    %299 = vector.extract_strided_slice %294 {offsets = [32, 0], sizes = [32, 256], strides = [1, 1]} : vector<128x256xbf16> to vector<32x256xbf16>
    %c1_207 = arith.constant 1 : index
    %c1_208 = arith.constant 1 : index
    %c0_209 = arith.constant 0 : index
    %c0_210 = arith.constant 0 : index
    %300 = vector.load %arg9[%c1_207, %c1_208, %c0_209, %c0_210] : memref<4x4x256x256xbf16, #tpu.memory_space<vmem>>, vector<1x1x256x256xbf16>
    %301 = vector.shape_cast %300 : vector<1x1x256x256xbf16> to vector<256x256xbf16>
    %cst_211 = arith.constant dense<0.000000e+00> : vector<32x256xf32>
    %302 = tpu.matmul %299, %301, %cst_211 {dimension_numbers = #tpu.dot_dimension_numbers<[1], [0], [0], [1], [0, 0, 1, 1], [], []>} : vector<32x256xbf16>, vector<256x256xbf16>, vector<32x256xf32> -> vector<32x256xf32>
    %303 = arith.addf %298, %302 : vector<32x256xf32>
    %304 = vector.extract_strided_slice %294 {offsets = [64, 0], sizes = [32, 256], strides = [1, 1]} : vector<128x256xbf16> to vector<32x256xbf16>
    %c1_212 = arith.constant 1 : index
    %c2_213 = arith.constant 2 : index
    %c0_214 = arith.constant 0 : index
    %c0_215 = arith.constant 0 : index
    %305 = vector.load %arg9[%c1_212, %c2_213, %c0_214, %c0_215] : memref<4x4x256x256xbf16, #tpu.memory_space<vmem>>, vector<1x1x256x256xbf16>
    %306 = vector.shape_cast %305 : vector<1x1x256x256xbf16> to vector<256x256xbf16>
    %cst_216 = arith.constant dense<0.000000e+00> : vector<32x256xf32>
    %307 = tpu.matmul %304, %306, %cst_216 {dimension_numbers = #tpu.dot_dimension_numbers<[1], [0], [0], [1], [0, 0, 1, 1], [], []>} : vector<32x256xbf16>, vector<256x256xbf16>, vector<32x256xf32> -> vector<32x256xf32>
    %308 = arith.addf %303, %307 : vector<32x256xf32>
    %309 = vector.extract_strided_slice %294 {offsets = [96, 0], sizes = [32, 256], strides = [1, 1]} : vector<128x256xbf16> to vector<32x256xbf16>
    %c1_217 = arith.constant 1 : index
    %c3_218 = arith.constant 3 : index
    %c0_219 = arith.constant 0 : index
    %c0_220 = arith.constant 0 : index
    %310 = vector.load %arg9[%c1_217, %c3_218, %c0_219, %c0_220] : memref<4x4x256x256xbf16, #tpu.memory_space<vmem>>, vector<1x1x256x256xbf16>
    %311 = vector.shape_cast %310 : vector<1x1x256x256xbf16> to vector<256x256xbf16>
    %cst_221 = arith.constant dense<0.000000e+00> : vector<32x256xf32>
    %312 = tpu.matmul %309, %311, %cst_221 {dimension_numbers = #tpu.dot_dimension_numbers<[1], [0], [0], [1], [0, 0, 1, 1], [], []>} : vector<32x256xbf16>, vector<256x256xbf16>, vector<32x256xf32> -> vector<32x256xf32>
    %313 = arith.addf %308, %312 : vector<32x256xf32>
    %cst_222 = arith.constant dense<0.000000e+00> : vector<256xf32>
    %314 = vector.multi_reduction <add>, %313, %cst_222 [0] : vector<32x256xf32> to vector<256xf32>
    %315 = vector.shape_cast %314 : vector<256xf32> to vector<1x256xf32>
    %316 = arith.mulf %313, %313 : vector<32x256xf32>
    %cst_223 = arith.constant dense<0.000000e+00> : vector<256xf32>
    %317 = vector.multi_reduction <add>, %316, %cst_223 [0] : vector<32x256xf32> to vector<256xf32>
    %318 = vector.shape_cast %317 : vector<256xf32> to vector<1x256xf32>
    %319 = tpu.concatenate %315, %318 in 0 : vector<1x256xf32>, vector<1x256xf32> -> vector<2x256xf32>
    %c0_224 = arith.constant 0 : index
    %c0_225 = arith.constant 0 : index
    %c0_226 = arith.constant 0 : index
    %320 = vector.load %arg11[%c0_224, %c0_225, %c0_226] : memref<3x256x64xf32, #tpu.memory_space<vmem>>, vector<1x256x64xf32>
    %321 = vector.shape_cast %320 : vector<1x256x64xf32> to vector<256x64xf32>
    %cst_227 = arith.constant dense<0.000000e+00> : vector<2x64xf32>
    %322 = tpu.matmul %319, %321, %cst_227 {dimension_numbers = #tpu.dot_dimension_numbers<[1], [0], [0], [1], [0, 0, 1, 1], [], []>} : vector<2x256xf32>, vector<256x64xf32>, vector<2x64xf32> -> vector<2x64xf32>
    %323 = vector.extract_strided_slice %322 {offsets = [0, 0], sizes = [1, 64], strides = [1, 1]} : vector<2x64xf32> to vector<1x64xf32>
    %324 = vector.extract_strided_slice %322 {offsets = [1, 0], sizes = [1, 64], strides = [1, 1]} : vector<2x64xf32> to vector<1x64xf32>
    %325 = arith.mulf %323, %323 : vector<1x64xf32>
    %326 = arith.subf %324, %325 : vector<1x64xf32>
    %cst_228 = arith.constant 9.99999974E-6 : f32
    %327 = vector.broadcast %cst_228 : f32 to vector<1x64xf32>
    %328 = arith.addf %326, %327 : vector<1x64xf32>
    %329 = math.rsqrt %328 : vector<1x64xf32>
    %330 = arith.mulf %323, %329 : vector<1x64xf32>
    %331 = tpu.concatenate %329, %330 in 0 : vector<1x64xf32>, vector<1x64xf32> -> vector<2x64xf32>
    %c0_229 = arith.constant 0 : index
    %c0_230 = arith.constant 0 : index
    %c0_231 = arith.constant 0 : index
    %332 = vector.load %arg12[%c0_229, %c0_230, %c0_231] : memref<3x64x256xf32, #tpu.memory_space<vmem>>, vector<1x64x256xf32>
    %333 = vector.shape_cast %332 : vector<1x64x256xf32> to vector<64x256xf32>
    %cst_232 = arith.constant dense<0.000000e+00> : vector<2x256xf32>
    %334 = tpu.matmul %331, %333, %cst_232 {dimension_numbers = #tpu.dot_dimension_numbers<[1], [0], [0], [1], [0, 0, 1, 1], [], []>} : vector<2x64xf32>, vector<64x256xf32>, vector<2x256xf32> -> vector<2x256xf32>
    %335 = vector.extract_strided_slice %334 {offsets = [0, 0], sizes = [1, 256], strides = [1, 1]} : vector<2x256xf32> to vector<1x256xf32>
    %336 = vector.broadcast %335 : vector<1x256xf32> to vector<32x256xf32>
    %337 = arith.mulf %313, %336 : vector<32x256xf32>
    %c0_233 = arith.constant 0 : index
    %c0_234 = arith.constant 0 : index
    %c0_235 = arith.constant 0 : index
    %338 = vector.load %arg13[%c0_233, %c0_234, %c0_235] : memref<3x1x256xf32, #tpu.memory_space<vmem>>, vector<1x1x256xf32>
    %339 = vector.shape_cast %338 : vector<1x1x256xf32> to vector<1x256xf32>
    %340 = vector.extract_strided_slice %334 {offsets = [1, 0], sizes = [1, 256], strides = [1, 1]} : vector<2x256xf32> to vector<1x256xf32>
    %341 = arith.subf %339, %340 : vector<1x256xf32>
    %342 = vector.broadcast %341 : vector<1x256xf32> to vector<32x256xf32>
    %343 = arith.addf %337, %342 : vector<32x256xf32>
    %cst_236 = arith.constant 0.000000e+00 : f32
    %344 = vector.broadcast %cst_236 : f32 to vector<32x256xf32>
    %345 = arith.cmpf ogt, %343, %344 : vector<32x256xf32>
    %cst_237 = arith.constant 2.000000e-01 : f32
    %346 = vector.broadcast %cst_237 : f32 to vector<32x256xf32>
    %347 = arith.mulf %346, %343 : vector<32x256xf32>
    %348 = arith.select %345, %343, %347 : vector<32x256xi1>, vector<32x256xf32>
    %349 = arith.truncf %348 : vector<32x256xf32> to vector<32x256xbf16>
    %c0_238 = arith.constant 0 : index
    %c0_239 = arith.constant 0 : index
    %350 = vector.load %arg6[%c0_238, %c0_239] : memref<64x32xbf16, #tpu.memory_space<vmem>>, vector<64x32xbf16>
    %cst_240 = arith.constant dense<0.000000e+00> : vector<64x256xf32>
    %351 = tpu.matmul %350, %349, %cst_240 {dimension_numbers = #tpu.dot_dimension_numbers<[1], [0], [0], [1], [0, 0, 1, 1], [], []>} : vector<64x32xbf16>, vector<32x256xbf16>, vector<64x256xf32> -> vector<64x256xf32>
    %352 = arith.truncf %351 : vector<64x256xf32> to vector<64x256xbf16>
    %353 = vector.extract_strided_slice %352 {offsets = [0, 0], sizes = [16, 256], strides = [1, 1]} : vector<64x256xbf16> to vector<16x256xbf16>
    %c2_241 = arith.constant 2 : index
    %c0_242 = arith.constant 0 : index
    %c0_243 = arith.constant 0 : index
    %c0_244 = arith.constant 0 : index
    %354 = vector.load %arg9[%c2_241, %c0_242, %c0_243, %c0_244] : memref<4x4x256x256xbf16, #tpu.memory_space<vmem>>, vector<1x1x256x256xbf16>
    %355 = vector.shape_cast %354 : vector<1x1x256x256xbf16> to vector<256x256xbf16>
    %cst_245 = arith.constant dense<0.000000e+00> : vector<16x256xf32>
    %356 = tpu.matmul %353, %355, %cst_245 {dimension_numbers = #tpu.dot_dimension_numbers<[1], [0], [0], [1], [0, 0, 1, 1], [], []>} : vector<16x256xbf16>, vector<256x256xbf16>, vector<16x256xf32> -> vector<16x256xf32>
    %357 = vector.extract_strided_slice %352 {offsets = [16, 0], sizes = [16, 256], strides = [1, 1]} : vector<64x256xbf16> to vector<16x256xbf16>
    %c2_246 = arith.constant 2 : index
    %c1_247 = arith.constant 1 : index
    %c0_248 = arith.constant 0 : index
    %c0_249 = arith.constant 0 : index
    %358 = vector.load %arg9[%c2_246, %c1_247, %c0_248, %c0_249] : memref<4x4x256x256xbf16, #tpu.memory_space<vmem>>, vector<1x1x256x256xbf16>
    %359 = vector.shape_cast %358 : vector<1x1x256x256xbf16> to vector<256x256xbf16>
    %cst_250 = arith.constant dense<0.000000e+00> : vector<16x256xf32>
    %360 = tpu.matmul %357, %359, %cst_250 {dimension_numbers = #tpu.dot_dimension_numbers<[1], [0], [0], [1], [0, 0, 1, 1], [], []>} : vector<16x256xbf16>, vector<256x256xbf16>, vector<16x256xf32> -> vector<16x256xf32>
    %361 = arith.addf %356, %360 : vector<16x256xf32>
    %362 = vector.extract_strided_slice %352 {offsets = [32, 0], sizes = [16, 256], strides = [1, 1]} : vector<64x256xbf16> to vector<16x256xbf16>
    %c2_251 = arith.constant 2 : index
    %c2_252 = arith.constant 2 : index
    %c0_253 = arith.constant 0 : index
    %c0_254 = arith.constant 0 : index
    %363 = vector.load %arg9[%c2_251, %c2_252, %c0_253, %c0_254] : memref<4x4x256x256xbf16, #tpu.memory_space<vmem>>, vector<1x1x256x256xbf16>
    %364 = vector.shape_cast %363 : vector<1x1x256x256xbf16> to vector<256x256xbf16>
    %cst_255 = arith.constant dense<0.000000e+00> : vector<16x256xf32>
    %365 = tpu.matmul %362, %364, %cst_255 {dimension_numbers = #tpu.dot_dimension_numbers<[1], [0], [0], [1], [0, 0, 1, 1], [], []>} : vector<16x256xbf16>, vector<256x256xbf16>, vector<16x256xf32> -> vector<16x256xf32>
    %366 = arith.addf %361, %365 : vector<16x256xf32>
    %367 = vector.extract_strided_slice %352 {offsets = [48, 0], sizes = [16, 256], strides = [1, 1]} : vector<64x256xbf16> to vector<16x256xbf16>
    %c2_256 = arith.constant 2 : index
    %c3_257 = arith.constant 3 : index
    %c0_258 = arith.constant 0 : index
    %c0_259 = arith.constant 0 : index
    %368 = vector.load %arg9[%c2_256, %c3_257, %c0_258, %c0_259] : memref<4x4x256x256xbf16, #tpu.memory_space<vmem>>, vector<1x1x256x256xbf16>
    %369 = vector.shape_cast %368 : vector<1x1x256x256xbf16> to vector<256x256xbf16>
    %cst_260 = arith.constant dense<0.000000e+00> : vector<16x256xf32>
    %370 = tpu.matmul %367, %369, %cst_260 {dimension_numbers = #tpu.dot_dimension_numbers<[1], [0], [0], [1], [0, 0, 1, 1], [], []>} : vector<16x256xbf16>, vector<256x256xbf16>, vector<16x256xf32> -> vector<16x256xf32>
    %371 = arith.addf %366, %370 : vector<16x256xf32>
    %cst_261 = arith.constant dense<0.000000e+00> : vector<256xf32>
    %372 = vector.multi_reduction <add>, %371, %cst_261 [0] : vector<16x256xf32> to vector<256xf32>
    %373 = vector.shape_cast %372 : vector<256xf32> to vector<1x256xf32>
    %374 = arith.mulf %371, %371 : vector<16x256xf32>
    %cst_262 = arith.constant dense<0.000000e+00> : vector<256xf32>
    %375 = vector.multi_reduction <add>, %374, %cst_262 [0] : vector<16x256xf32> to vector<256xf32>
    %376 = vector.shape_cast %375 : vector<256xf32> to vector<1x256xf32>
    %377 = tpu.concatenate %373, %376 in 0 : vector<1x256xf32>, vector<1x256xf32> -> vector<2x256xf32>
    %c1_263 = arith.constant 1 : index
    %c0_264 = arith.constant 0 : index
    %c0_265 = arith.constant 0 : index
    %378 = vector.load %arg11[%c1_263, %c0_264, %c0_265] : memref<3x256x64xf32, #tpu.memory_space<vmem>>, vector<1x256x64xf32>
    %379 = vector.shape_cast %378 : vector<1x256x64xf32> to vector<256x64xf32>
    %cst_266 = arith.constant dense<0.000000e+00> : vector<2x64xf32>
    %380 = tpu.matmul %377, %379, %cst_266 {dimension_numbers = #tpu.dot_dimension_numbers<[1], [0], [0], [1], [0, 0, 1, 1], [], []>} : vector<2x256xf32>, vector<256x64xf32>, vector<2x64xf32> -> vector<2x64xf32>
    %381 = vector.extract_strided_slice %380 {offsets = [0, 0], sizes = [1, 64], strides = [1, 1]} : vector<2x64xf32> to vector<1x64xf32>
    %382 = vector.extract_strided_slice %380 {offsets = [1, 0], sizes = [1, 64], strides = [1, 1]} : vector<2x64xf32> to vector<1x64xf32>
    %383 = arith.mulf %381, %381 : vector<1x64xf32>
    %384 = arith.subf %382, %383 : vector<1x64xf32>
    %cst_267 = arith.constant 9.99999974E-6 : f32
    %385 = vector.broadcast %cst_267 : f32 to vector<1x64xf32>
    %386 = arith.addf %384, %385 : vector<1x64xf32>
    %387 = math.rsqrt %386 : vector<1x64xf32>
    %388 = arith.mulf %381, %387 : vector<1x64xf32>
    %389 = tpu.concatenate %387, %388 in 0 : vector<1x64xf32>, vector<1x64xf32> -> vector<2x64xf32>
    %c1_268 = arith.constant 1 : index
    %c0_269 = arith.constant 0 : index
    %c0_270 = arith.constant 0 : index
    %390 = vector.load %arg12[%c1_268, %c0_269, %c0_270] : memref<3x64x256xf32, #tpu.memory_space<vmem>>, vector<1x64x256xf32>
    %391 = vector.shape_cast %390 : vector<1x64x256xf32> to vector<64x256xf32>
    %cst_271 = arith.constant dense<0.000000e+00> : vector<2x256xf32>
    %392 = tpu.matmul %389, %391, %cst_271 {dimension_numbers = #tpu.dot_dimension_numbers<[1], [0], [0], [1], [0, 0, 1, 1], [], []>} : vector<2x64xf32>, vector<64x256xf32>, vector<2x256xf32> -> vector<2x256xf32>
    %393 = vector.extract_strided_slice %392 {offsets = [0, 0], sizes = [1, 256], strides = [1, 1]} : vector<2x256xf32> to vector<1x256xf32>
    %394 = vector.broadcast %393 : vector<1x256xf32> to vector<16x256xf32>
    %395 = arith.mulf %371, %394 : vector<16x256xf32>
    %c1_272 = arith.constant 1 : index
    %c0_273 = arith.constant 0 : index
    %c0_274 = arith.constant 0 : index
    %396 = vector.load %arg13[%c1_272, %c0_273, %c0_274] : memref<3x1x256xf32, #tpu.memory_space<vmem>>, vector<1x1x256xf32>
    %397 = vector.shape_cast %396 : vector<1x1x256xf32> to vector<1x256xf32>
    %398 = vector.extract_strided_slice %392 {offsets = [1, 0], sizes = [1, 256], strides = [1, 1]} : vector<2x256xf32> to vector<1x256xf32>
    %399 = arith.subf %397, %398 : vector<1x256xf32>
    %400 = vector.broadcast %399 : vector<1x256xf32> to vector<16x256xf32>
    %401 = arith.addf %395, %400 : vector<16x256xf32>
    %cst_275 = arith.constant 0.000000e+00 : f32
    %402 = vector.broadcast %cst_275 : f32 to vector<16x256xf32>
    %403 = arith.cmpf ogt, %401, %402 : vector<16x256xf32>
    %cst_276 = arith.constant 2.000000e-01 : f32
    %404 = vector.broadcast %cst_276 : f32 to vector<16x256xf32>
    %405 = arith.mulf %404, %401 : vector<16x256xf32>
    %406 = arith.select %403, %401, %405 : vector<16x256xi1>, vector<16x256xf32>
    %407 = arith.truncf %406 : vector<16x256xf32> to vector<16x256xbf16>
    %c0_277 = arith.constant 0 : index
    %c0_278 = arith.constant 0 : index
    %408 = vector.load %arg7[%c0_277, %c0_278] : memref<32x16xbf16, #tpu.memory_space<vmem>>, vector<32x16xbf16>
    %cst_279 = arith.constant dense<0.000000e+00> : vector<32x256xf32>
    %409 = tpu.matmul %408, %407, %cst_279 {dimension_numbers = #tpu.dot_dimension_numbers<[1], [0], [0], [1], [0, 0, 1, 1], [], []>} : vector<32x16xbf16>, vector<16x256xbf16>, vector<32x256xf32> -> vector<32x256xf32>
    %410 = arith.truncf %409 : vector<32x256xf32> to vector<32x256xbf16>
    %411 = vector.extract_strided_slice %410 {offsets = [0, 0], sizes = [8, 256], strides = [1, 1]} : vector<32x256xbf16> to vector<8x256xbf16>
    %c3_280 = arith.constant 3 : index
    %c0_281 = arith.constant 0 : index
    %c0_282 = arith.constant 0 : index
    %c0_283 = arith.constant 0 : index
    %412 = vector.load %arg9[%c3_280, %c0_281, %c0_282, %c0_283] : memref<4x4x256x256xbf16, #tpu.memory_space<vmem>>, vector<1x1x256x256xbf16>
    %413 = vector.shape_cast %412 : vector<1x1x256x256xbf16> to vector<256x256xbf16>
    %cst_284 = arith.constant dense<0.000000e+00> : vector<8x256xf32>
    %414 = tpu.matmul %411, %413, %cst_284 {dimension_numbers = #tpu.dot_dimension_numbers<[1], [0], [0], [1], [0, 0, 1, 1], [], []>} : vector<8x256xbf16>, vector<256x256xbf16>, vector<8x256xf32> -> vector<8x256xf32>
    %415 = vector.extract_strided_slice %410 {offsets = [8, 0], sizes = [8, 256], strides = [1, 1]} : vector<32x256xbf16> to vector<8x256xbf16>
    %c3_285 = arith.constant 3 : index
    %c1_286 = arith.constant 1 : index
    %c0_287 = arith.constant 0 : index
    %c0_288 = arith.constant 0 : index
    %416 = vector.load %arg9[%c3_285, %c1_286, %c0_287, %c0_288] : memref<4x4x256x256xbf16, #tpu.memory_space<vmem>>, vector<1x1x256x256xbf16>
    %417 = vector.shape_cast %416 : vector<1x1x256x256xbf16> to vector<256x256xbf16>
    %cst_289 = arith.constant dense<0.000000e+00> : vector<8x256xf32>
    %418 = tpu.matmul %415, %417, %cst_289 {dimension_numbers = #tpu.dot_dimension_numbers<[1], [0], [0], [1], [0, 0, 1, 1], [], []>} : vector<8x256xbf16>, vector<256x256xbf16>, vector<8x256xf32> -> vector<8x256xf32>
    %419 = arith.addf %414, %418 : vector<8x256xf32>
    %420 = vector.extract_strided_slice %410 {offsets = [16, 0], sizes = [8, 256], strides = [1, 1]} : vector<32x256xbf16> to vector<8x256xbf16>
    %c3_290 = arith.constant 3 : index
    %c2_291 = arith.constant 2 : index
    %c0_292 = arith.constant 0 : index
    %c0_293 = arith.constant 0 : index
    %421 = vector.load %arg9[%c3_290, %c2_291, %c0_292, %c0_293] : memref<4x4x256x256xbf16, #tpu.memory_space<vmem>>, vector<1x1x256x256xbf16>
    %422 = vector.shape_cast %421 : vector<1x1x256x256xbf16> to vector<256x256xbf16>
    %cst_294 = arith.constant dense<0.000000e+00> : vector<8x256xf32>
    %423 = tpu.matmul %420, %422, %cst_294 {dimension_numbers = #tpu.dot_dimension_numbers<[1], [0], [0], [1], [0, 0, 1, 1], [], []>} : vector<8x256xbf16>, vector<256x256xbf16>, vector<8x256xf32> -> vector<8x256xf32>
    %424 = arith.addf %419, %423 : vector<8x256xf32>
    %425 = vector.extract_strided_slice %410 {offsets = [24, 0], sizes = [8, 256], strides = [1, 1]} : vector<32x256xbf16> to vector<8x256xbf16>
    %c3_295 = arith.constant 3 : index
    %c3_296 = arith.constant 3 : index
    %c0_297 = arith.constant 0 : index
    %c0_298 = arith.constant 0 : index
    %426 = vector.load %arg9[%c3_295, %c3_296, %c0_297, %c0_298] : memref<4x4x256x256xbf16, #tpu.memory_space<vmem>>, vector<1x1x256x256xbf16>
    %427 = vector.shape_cast %426 : vector<1x1x256x256xbf16> to vector<256x256xbf16>
    %cst_299 = arith.constant dense<0.000000e+00> : vector<8x256xf32>
    %428 = tpu.matmul %425, %427, %cst_299 {dimension_numbers = #tpu.dot_dimension_numbers<[1], [0], [0], [1], [0, 0, 1, 1], [], []>} : vector<8x256xbf16>, vector<256x256xbf16>, vector<8x256xf32> -> vector<8x256xf32>
    %429 = arith.addf %424, %428 : vector<8x256xf32>
    %cst_300 = arith.constant dense<0.000000e+00> : vector<256xf32>
    %430 = vector.multi_reduction <add>, %429, %cst_300 [0] : vector<8x256xf32> to vector<256xf32>
    %431 = vector.shape_cast %430 : vector<256xf32> to vector<1x256xf32>
    %432 = arith.mulf %429, %429 : vector<8x256xf32>
    %cst_301 = arith.constant dense<0.000000e+00> : vector<256xf32>
    %433 = vector.multi_reduction <add>, %432, %cst_301 [0] : vector<8x256xf32> to vector<256xf32>
    %434 = vector.shape_cast %433 : vector<256xf32> to vector<1x256xf32>
    %435 = tpu.concatenate %431, %434 in 0 : vector<1x256xf32>, vector<1x256xf32> -> vector<2x256xf32>
    %c2_302 = arith.constant 2 : index
    %c0_303 = arith.constant 0 : index
    %c0_304 = arith.constant 0 : index
    %436 = vector.load %arg11[%c2_302, %c0_303, %c0_304] : memref<3x256x64xf32, #tpu.memory_space<vmem>>, vector<1x256x64xf32>
    %437 = vector.shape_cast %436 : vector<1x256x64xf32> to vector<256x64xf32>
    %cst_305 = arith.constant dense<0.000000e+00> : vector<2x64xf32>
    %438 = tpu.matmul %435, %437, %cst_305 {dimension_numbers = #tpu.dot_dimension_numbers<[1], [0], [0], [1], [0, 0, 1, 1], [], []>} : vector<2x256xf32>, vector<256x64xf32>, vector<2x64xf32> -> vector<2x64xf32>
    %439 = vector.extract_strided_slice %438 {offsets = [0, 0], sizes = [1, 64], strides = [1, 1]} : vector<2x64xf32> to vector<1x64xf32>
    %440 = vector.extract_strided_slice %438 {offsets = [1, 0], sizes = [1, 64], strides = [1, 1]} : vector<2x64xf32> to vector<1x64xf32>
    %441 = arith.mulf %439, %439 : vector<1x64xf32>
    %442 = arith.subf %440, %441 : vector<1x64xf32>
    %cst_306 = arith.constant 9.99999974E-6 : f32
    %443 = vector.broadcast %cst_306 : f32 to vector<1x64xf32>
    %444 = arith.addf %442, %443 : vector<1x64xf32>
    %445 = math.rsqrt %444 : vector<1x64xf32>
    %446 = arith.mulf %439, %445 : vector<1x64xf32>
    %447 = tpu.concatenate %445, %446 in 0 : vector<1x64xf32>, vector<1x64xf32> -> vector<2x64xf32>
    %c2_307 = arith.constant 2 : index
    %c0_308 = arith.constant 0 : index
    %c0_309 = arith.constant 0 : index
    %448 = vector.load %arg12[%c2_307, %c0_308, %c0_309] : memref<3x64x256xf32, #tpu.memory_space<vmem>>, vector<1x64x256xf32>
    %449 = vector.shape_cast %448 : vector<1x64x256xf32> to vector<64x256xf32>
    %cst_310 = arith.constant dense<0.000000e+00> : vector<2x256xf32>
    %450 = tpu.matmul %447, %449, %cst_310 {dimension_numbers = #tpu.dot_dimension_numbers<[1], [0], [0], [1], [0, 0, 1, 1], [], []>} : vector<2x64xf32>, vector<64x256xf32>, vector<2x256xf32> -> vector<2x256xf32>
    %451 = vector.extract_strided_slice %450 {offsets = [0, 0], sizes = [1, 256], strides = [1, 1]} : vector<2x256xf32> to vector<1x256xf32>
    %452 = vector.broadcast %451 : vector<1x256xf32> to vector<8x256xf32>
    %453 = arith.mulf %429, %452 : vector<8x256xf32>
    %c2_311 = arith.constant 2 : index
    %c0_312 = arith.constant 0 : index
    %c0_313 = arith.constant 0 : index
    %454 = vector.load %arg13[%c2_311, %c0_312, %c0_313] : memref<3x1x256xf32, #tpu.memory_space<vmem>>, vector<1x1x256xf32>
    %455 = vector.shape_cast %454 : vector<1x1x256xf32> to vector<1x256xf32>
    %456 = vector.extract_strided_slice %450 {offsets = [1, 0], sizes = [1, 256], strides = [1, 1]} : vector<2x256xf32> to vector<1x256xf32>
    %457 = arith.subf %455, %456 : vector<1x256xf32>
    %458 = vector.broadcast %457 : vector<1x256xf32> to vector<8x256xf32>
    %459 = arith.addf %453, %458 : vector<8x256xf32>
    %cst_314 = arith.constant 0.000000e+00 : f32
    %460 = vector.broadcast %cst_314 : f32 to vector<8x256xf32>
    %461 = arith.cmpf ogt, %459, %460 : vector<8x256xf32>
    %cst_315 = arith.constant 2.000000e-01 : f32
    %462 = vector.broadcast %cst_315 : f32 to vector<8x256xf32>
    %463 = arith.mulf %462, %459 : vector<8x256xf32>
    %464 = arith.select %461, %459, %463 : vector<8x256xi1>, vector<8x256xf32>
    %465 = arith.truncf %464 : vector<8x256xf32> to vector<8x256xbf16>
    %c0_316 = arith.constant 0 : index
    %c0_317 = arith.constant 0 : index
    %466 = vector.load %arg8[%c0_316, %c0_317] : memref<8x8xbf16, #tpu.memory_space<vmem>>, vector<8x8xbf16>
    %cst_318 = arith.constant dense<0.000000e+00> : vector<8x256xf32>
    %467 = tpu.matmul %466, %465, %cst_318 {dimension_numbers = #tpu.dot_dimension_numbers<[1], [0], [0], [1], [0, 0, 1, 1], [], []>} : vector<8x8xbf16>, vector<8x256xbf16>, vector<8x256xf32> -> vector<8x256xf32>
    %468 = arith.truncf %467 : vector<8x256xf32> to vector<8x256xbf16>
    %469 = vector.extract_strided_slice %468 {offsets = [0, 0], sizes = [2, 256], strides = [1, 1]} : vector<8x256xbf16> to vector<2x256xbf16>
    %c0_319 = arith.constant 0 : index
    %c0_320 = arith.constant 0 : index
    %c0_321 = arith.constant 0 : index
    %470 = vector.load %arg10[%c0_319, %c0_320, %c0_321] : memref<4x256x1xbf16, #tpu.memory_space<vmem>>, vector<1x256x1xbf16>
    %471 = vector.shape_cast %470 : vector<1x256x1xbf16> to vector<256x1xbf16>
    %cst_322 = arith.constant dense<0.000000e+00> : vector<2x1xf32>
    %472 = tpu.matmul %469, %471, %cst_322 {dimension_numbers = #tpu.dot_dimension_numbers<[1], [0], [0], [1], [0, 0, 1, 1], [], []>} : vector<2x256xbf16>, vector<256x1xbf16>, vector<2x1xf32> -> vector<2x1xf32>
    %473 = vector.extract_strided_slice %468 {offsets = [2, 0], sizes = [2, 256], strides = [1, 1]} : vector<8x256xbf16> to vector<2x256xbf16>
    %c1_323 = arith.constant 1 : index
    %c0_324 = arith.constant 0 : index
    %c0_325 = arith.constant 0 : index
    %474 = vector.load %arg10[%c1_323, %c0_324, %c0_325] : memref<4x256x1xbf16, #tpu.memory_space<vmem>>, vector<1x256x1xbf16>
    %475 = vector.shape_cast %474 : vector<1x256x1xbf16> to vector<256x1xbf16>
    %cst_326 = arith.constant dense<0.000000e+00> : vector<2x1xf32>
    %476 = tpu.matmul %473, %475, %cst_326 {dimension_numbers = #tpu.dot_dimension_numbers<[1], [0], [0], [1], [0, 0, 1, 1], [], []>} : vector<2x256xbf16>, vector<256x1xbf16>, vector<2x1xf32> -> vector<2x1xf32>
    %477 = arith.addf %472, %476 : vector<2x1xf32>
    %478 = vector.extract_strided_slice %468 {offsets = [4, 0], sizes = [2, 256], strides = [1, 1]} : vector<8x256xbf16> to vector<2x256xbf16>
    %c2_327 = arith.constant 2 : index
    %c0_328 = arith.constant 0 : index
    %c0_329 = arith.constant 0 : index
    %479 = vector.load %arg10[%c2_327, %c0_328, %c0_329] : memref<4x256x1xbf16, #tpu.memory_space<vmem>>, vector<1x256x1xbf16>
    %480 = vector.shape_cast %479 : vector<1x256x1xbf16> to vector<256x1xbf16>
    %cst_330 = arith.constant dense<0.000000e+00> : vector<2x1xf32>
    %481 = tpu.matmul %478, %480, %cst_330 {dimension_numbers = #tpu.dot_dimension_numbers<[1], [0], [0], [1], [0, 0, 1, 1], [], []>} : vector<2x256xbf16>, vector<256x1xbf16>, vector<2x1xf32> -> vector<2x1xf32>
    %482 = arith.addf %477, %481 : vector<2x1xf32>
    %483 = vector.extract_strided_slice %468 {offsets = [6, 0], sizes = [2, 256], strides = [1, 1]} : vector<8x256xbf16> to vector<2x256xbf16>
    %c3_331 = arith.constant 3 : index
    %c0_332 = arith.constant 0 : index
    %c0_333 = arith.constant 0 : index
    %484 = vector.load %arg10[%c3_331, %c0_332, %c0_333] : memref<4x256x1xbf16, #tpu.memory_space<vmem>>, vector<1x256x1xbf16>
    %485 = vector.shape_cast %484 : vector<1x256x1xbf16> to vector<256x1xbf16>
    %cst_334 = arith.constant dense<0.000000e+00> : vector<2x1xf32>
    %486 = tpu.matmul %483, %485, %cst_334 {dimension_numbers = #tpu.dot_dimension_numbers<[1], [0], [0], [1], [0, 0, 1, 1], [], []>} : vector<2x256xbf16>, vector<256x1xbf16>, vector<2x1xf32> -> vector<2x1xf32>
    %487 = arith.addf %482, %486 : vector<2x1xf32>
    %488 = arith.negf %487 : vector<2x1xf32>
    %489 = math.exp %488 : vector<2x1xf32>
    %cst_335 = arith.constant 1.000000e+00 : f32
    %490 = vector.broadcast %cst_335 : f32 to vector<2x1xf32>
    %491 = arith.addf %490, %489 : vector<2x1xf32>
    %492 = arith.divf %490, %491 : vector<2x1xf32>
    %c0_336 = arith.constant 0 : index
    %c0_337 = arith.constant 0 : index
    %493 = vector.load %arg14[%c0_336, %c0_337] : memref<2x1xf32, #tpu.memory_space<vmem>>, vector<2x1xf32>
    tpu.vector_store %arg14[%c0_336, %c0_337], %492 {strides = array<i32>} : memref<2x1xf32, #tpu.memory_space<vmem>>, vector<2x1xf32>,
    return
  }
  func.func @transform_0(%arg0: i32) -> (i32, i32) {
    %c0_i32 = arith.constant 0 : i32
    %c0_i32_0 = arith.constant 0 : i32
    %c0_i32_1 = arith.constant 0 : i32
    return %c0_i32, %c0_i32_0 : i32, i32
  }
  func.func @transform_1(%arg0: i32) -> (i32, i32, i32, i32) {
    %c0_i32 = arith.constant 0 : i32
    %c0_i32_0 = arith.constant 0 : i32
    %c0_i32_1 = arith.constant 0 : i32
    %c0_i32_2 = arith.constant 0 : i32
    %c0_i32_3 = arith.constant 0 : i32
    return %c0_i32, %c0_i32_0, %c0_i32_1, %c0_i32_2 : i32, i32, i32, i32
  }
  func.func @transform_2(%arg0: i32) -> (i32, i32, i32) {
    %c0_i32 = arith.constant 0 : i32
    %c0_i32_0 = arith.constant 0 : i32
    %c0_i32_1 = arith.constant 0 : i32
    %c0_i32_2 = arith.constant 0 : i32
    return %c0_i32, %c0_i32_0, %c0_i32_1 : i32, i32, i32
  }
  func.func @transform_3(%arg0: i32) -> (i32, i32) {
    %c0_i32 = arith.constant 0 : i32
    %c0_i32_0 = arith.constant 0 : i32
    %c0_i32_1 = arith.constant 0 : i32
    return %c0_i32, %c0_i32_0 : i32, i32
  }
  func.func @transform_4(%arg0: i32) -> (i32, i32) {
    %c0_i32 = arith.constant 0 : i32
    %c0_i32_0 = arith.constant 0 : i32
    %c0_i32_1 = arith.constant 0 : i32
    return %c0_i32, %c0_i32_0 : i32, i32
  }
  func.func @transform_5(%arg0: i32) -> (i32, i32) {
    %c0_i32 = arith.constant 0 : i32
    %c0_i32_0 = arith.constant 0 : i32
    %c0_i32_1 = arith.constant 0 : i32
    return %c0_i32, %c0_i32_0 : i32, i32
  }
  func.func @transform_6(%arg0: i32) -> (i32, i32) {
    %c0_i32 = arith.constant 0 : i32
    %c0_i32_0 = arith.constant 0 : i32
    %c0_i32_1 = arith.constant 0 : i32
    return %c0_i32, %c0_i32_0 : i32, i32
  }
  func.func @transform_7(%arg0: i32) -> (i32, i32) {
    %c0_i32 = arith.constant 0 : i32
    %c0_i32_0 = arith.constant 0 : i32
    %c0_i32_1 = arith.constant 0 : i32
    return %c0_i32, %c0_i32_0 : i32, i32
  }
  func.func @transform_8(%arg0: i32) -> (i32, i32, i32, i32) {
    %c0_i32 = arith.constant 0 : i32
    %c0_i32_0 = arith.constant 0 : i32
    %c0_i32_1 = arith.constant 0 : i32
    %c0_i32_2 = arith.constant 0 : i32
    %c0_i32_3 = arith.constant 0 : i32
    return %c0_i32, %c0_i32_0, %c0_i32_1, %c0_i32_2 : i32, i32, i32, i32
  }
  func.func @transform_9(%arg0: i32) -> (i32, i32, i32) {
    %c0_i32 = arith.constant 0 : i32
    %c0_i32_0 = arith.constant 0 : i32
    %c0_i32_1 = arith.constant 0 : i32
    %c0_i32_2 = arith.constant 0 : i32
    return %c0_i32, %c0_i32_0, %c0_i32_1 : i32, i32, i32
  }
  func.func @transform_10(%arg0: i32) -> (i32, i32, i32) {
    %c0_i32 = arith.constant 0 : i32
    %c0_i32_0 = arith.constant 0 : i32
    %c0_i32_1 = arith.constant 0 : i32
    %c0_i32_2 = arith.constant 0 : i32
    return %c0_i32, %c0_i32_0, %c0_i32_1 : i32, i32, i32
  }
  func.func @transform_11(%arg0: i32) -> (i32, i32, i32) {
    %c0_i32 = arith.constant 0 : i32
    %c0_i32_0 = arith.constant 0 : i32
    %c0_i32_1 = arith.constant 0 : i32
    %c0_i32_2 = arith.constant 0 : i32
    return %c0_i32, %c0_i32_0, %c0_i32_1 : i32, i32, i32
  }
  func.func @transform_12(%arg0: i32) -> (i32, i32, i32) {
    %c0_i32 = arith.constant 0 : i32
    %c0_i32_0 = arith.constant 0 : i32
    %c0_i32_1 = arith.constant 0 : i32
    %c0_i32_2 = arith.constant 0 : i32
    return %c0_i32, %c0_i32_0, %c0_i32_1 : i32, i32, i32
  }
  func.func @transform_13(%arg0: i32) -> (i32, i32) {
    %c0_i32 = arith.constant 0 : i32
    %c0_i32_0 = arith.constant 0 : i32
    %c0_i32_1 = arith.constant 0 : i32
    return %c0_i32, %c0_i32_0 : i32, i32
  }
}

</mosaic_0001>

<bundles_post_ra>
// kernel: discriminator_forward.1
= control target key start
LH: loop header
LB: loop body
LE: loop exit
PB: predicated region body
PF: predicated region fallthrough
CT: control target
= control target key end

     0   :  { %18 = vsyncpa [#allocation3], 0  ;;  %s14039_s0 = inlined_call_operand.hbm [shape: f32[2,24], index: 0, kind: input, shape index: {}]   ;;  %s14040_s1 = inlined_call_operand.hbm [shape: f32[2,3,64,64], index: 1, kind: input, shape index: {}]   ;;  %s14041_s2 = inlined_call_operand.hbm [shape: f32[25,64,64], index: 2, kind: input, shape index: {}]   ;;  %s14042_s3 = inlined_call_operand.hbm [shape: bf16[256,128], index: 3, kind: input, shape index: {}]   ;;  %s14043_s4 = inlined_call_operand.vmem [shape: bf16[128,64], index: 4, kind: input, shape index: {}]   ;;  %s14044_s5 = inlined_call_operand.vmem [shape: bf16[64,32], index: 5, kind: input, shape index: {}]   ;;  %s14045_s6 = inlined_call_operand.vmem [shape: bf16[32,16], index: 6, kind: input, shape index: {}]   ;;  %s14046_s7 = inlined_call_operand.hbm [shape: bf16[8,8], index: 7, kind: input, shape index: {}]   ;;  %s14047_s8 = inlined_call_operand.hbm [shape: bf16[4,4,256,256], index: 8, kind: input, shape index: {}]   ;;  %s14048_s9 = inlined_call_operand.vmem [shape: bf16[4,256,1], index: 9, kind: input, shape index: {}]   ;;  %s14049_s10 = inlined_call_operand.vmem [shape: f32[3,256,64], index: 10, kind: input, shape index: {}]   ;;  %s14050_s11 = inlined_call_operand.hbm [shape: f32[3,64,256], index: 11, kind: input, shape index: {}]   ;;  %s14051_s12 = inlined_call_operand.hbm [shape: f32[3,1,256], index: 12, kind: input, shape index: {}]   ;;  %s14052_s13 = inlined_call_operand.vmem [shape: f32[2,1], index: 13, kind: output, shape index: {}]  }
   0x1   :  { %19 = vsyncpa [#allocation5], 0 }
   0x2   :  { %20 = vsyncpa [#allocation8], 0 }
   0x3   :  { %21 = vsyncpa [#allocation11], 0  ;;  %s38_s27 = sshll.u32 %s14040_s1, 4  ;;  %s39_s27 = int_to_ptr.hbm [resolvable:$true] %s38_s27 }
   0x4   :  { %22 = vsyncpa [#allocation14], 0  ;;  %s12126_s28 = smov [#allocation4]   ;;  %s64_s15 = sshll.u32 %s14042_s3, 4  ;;  %s65_s15 = int_to_ptr.hbm [resolvable:$true] %s64_s15 }
   0x5   :  { %s40_s29 = sshll.u32 %s12126_s28, 4  ;;  %s12127_s16 = smov 128   ;;  %s41_s29 = int_to_ptr.vmem [resolvable:$true] %s40_s29 }
   0x6   :  { %s12128_s17 = smov 8   ;;  %s12129_s18 = smov [#allocation7]  }
   0x7   :  { %46 = dma.hbm_to_vmem [thread:$0]  %s39_s27, 6144, %s41_s29, [#allocation5], %s12127_s16, %s12127_s16, %s12128_s17  }
   0x8   :  { %s66_s19 = sshll.u32 %s12129_s18, 4  ;;  %s12130_s1 = smov 64   ;;  %s67_s19 = int_to_ptr.vmem [resolvable:$true] %s66_s19 }
   0x9   :  { %s12131_s20 = smov 4   ;;  %s94_s23 = sshll.u32 %s14047_s8, 4  ;;  %s95_s23 = int_to_ptr.hbm [resolvable:$true] %s94_s23 }
   0xa   :  { %72 = dma.hbm_to_vmem [thread:$0]  %s65_s15, 2048, %s67_s19, [#allocation8], %s12130_s1, %s12130_s1, %s12131_s20  }
   0xb   :  { %s12132_s3 = smov [#allocation10]   ;;  %s28_s27 = sshll.u32 %s14039_s0, 4  ;;  %s29_s27 = int_to_ptr.hbm [resolvable:$true] %s28_s27 }
   0xc   :  { %s96_s24 = sshll.u32 %s12132_s3, 4  ;;  %s12133_s28 = smov [#allocation2]   ;;  %s97_s24 = int_to_ptr.vmem [resolvable:$true] %s96_s24 }
   0xd   :  { %102 = dma.hbm_to_vmem [thread:$0]  %s95_s23, 65536, %s97_s24, [#allocation11], %s12127_s16, %s12127_s16, %s12128_s17  }
   0xe   :  { %s30_s29 = sshll.u32 %s12133_s28, 4  ;;  %s51_s15 = sshll.u32 %s14041_s2, 4  ;;  %s31_s29 = int_to_ptr.vmem [resolvable:$true] %s30_s29  ;;  %s52_s15 = int_to_ptr.hbm [resolvable:$true] %s51_s15 }
   0xf   :  { %33 = dma.hbm_to_vmem [thread:$0]  %s29_s27, 32, %s31_s29, [#allocation3]  }
  0x10   :  { %s84_s19 = sshll.u32 %s14046_s7, 4  ;;  %s12134_s20 = smov [#allocation6]   ;;  %s85_s19 = int_to_ptr.hbm [resolvable:$true] %s84_s19 }
  0x11   :  { %s53_s0 = sshll.u32 %s12134_s20, 4  ;;  %s12135_s21 = smov [#allocation9]   ;;  %s54_s0 = int_to_ptr.vmem [resolvable:$true] %s53_s0 }
  0x12   :  { %59 = dma.hbm_to_vmem [thread:$0]  %s52_s15, 25600, %s54_s0, [#allocation5], %s12127_s16, %s12127_s16, %s12128_s17  }
  0x13   :  { %s86_s22 = sshll.u32 %s12135_s21, 4  ;;  %s111_s2 = sshll.u32 %s14050_s11, 4  ;;  %s87_s22 = int_to_ptr.vmem [resolvable:$true] %s86_s22  ;;  %s112_s2 = int_to_ptr.hbm [resolvable:$true] %s111_s2 }
  0x14   :  { %89 = dma.hbm_to_vmem [thread:$0]  %s85_s19, 64, %s87_s22, [#allocation8]  }
  0x15   :  { %s12136_s24 = smov [#allocation12]   ;;  %s124_s27 = sshll.u32 %s14051_s12, 4  ;;  %s125_s27 = int_to_ptr.hbm [resolvable:$true] %s124_s27 }
  0x16   :  { %s113_s25 = sshll.u32 %s12136_s24, 4  ;;  %s12137_s28 = smov 256   ;;  %s114_s25 = int_to_ptr.vmem [resolvable:$true] %s113_s25 }
  0x17   :  { %s12138_s29 = smov 16   ;;  %s12139_s16 = smov [#allocation13]  }
  0x18   :  { %119 = dma.hbm_to_vmem [thread:$0]  %s112_s2, 6144, %s114_s25, [#allocation11], %s12137_s28, %s12137_s28, %s12138_s29  }
  0x19   :  { %s126_s17 = sshll.u32 %s12139_s16, 4  ;;  %s12140_s30 = smov 32   ;;  %s127_s17 = int_to_ptr.vmem [resolvable:$true] %s126_s17 }
  0x1a   :  { %s12141_s14 = smov 2  }
  0x1b   :  { %132 = dma.hbm_to_vmem [thread:$0]  %s125_s27, 96, %s127_s17, [#allocation14], %s12140_s30, %s12140_s30, %s12141_s14  }
  0x1c   :  { %12116 = dma.done.wait [#allocation3], 32  }
  0x1d   :  { %12117 = vsyncadd [#allocation3], 4294967264 }
  0x1e   :  { %12118 = dma.done.wait [#allocation5], 31744  }
  0x1f   :  { %12119 = vsyncadd [#allocation5], 4294935552 }
  0x20   :  { %12120 = dma.done.wait [#allocation8], 2112  }
  0x21   :  { %12121 = vsyncadd [#allocation8], 4294965184 }
  0x22   :  { %12122 = dma.done.wait [#allocation11], 71680  }
  0x23   :  { %12123 = vsyncadd [#allocation11], 4294895616 }
  0x24   :  { %12124 = dma.done.wait [#allocation14], 96  }
  0x25   :  { %12125 = vsyncadd [#allocation14], 4294967200  ;;  %v12270_v0 = vld [vmem:[#allocation2] sm:$0x1]  ;;  %s12142_s11 = smov 126   ;;  %s12143_s12 = smov 127  }
  0x26   :  { %285 = vrot.lane.b32.xlu1 %v12270_v0, %s12142_s11  ;;  %234 = vrot.lane.b32.xlu0 %v12270_v0, %s12143_s12  ;;  %v12274_v1 = vld [vmem:[#allocation2 + $0x1] sm:$0x1]  ;;  %11699 = vpush %v12270_v0  ;;  %s12144_s15 = smov 125   ;;  %s12145_s8 = smov 124   ;;  %v175_v21 = vld [vmem:[#allocation6] sm:$0xff]  ;;  %v176_v22 = vld [vmem:[#allocation6 + $0x8] sm:$0xff] }
  0x27   :  { %336 = vrot.lane.b32.xlu2 %v12270_v0, %s12144_s15  ;;  %11701 = vpush %v12274_v1  ;;  %s12146_s18 = smov 123   ;;  %s12147_s19 = smov 122   ;;  %v177_v24 = vld [vmem:[#allocation6 + $0x10] sm:$0xff]  ;;  %v178_v25 = vld [vmem:[#allocation6 + $0x18] sm:$0xff]  ;;  %v179_v26 = vld [vmem:[#allocation6 + $0x20] sm:$0xff]  ;;  %vm1496_vm0 = vcmask 523264  }
  0x28   :  { %s12148_s20 = smov 121   ;;  %s12149_s0 = smov 120   ;;  %v180_v27 = vld [vmem:[#allocation6 + $0x28] sm:$0xff]  ;;  %v181_v28 = vld [vmem:[#allocation6 + $0x30] sm:$0xff]  ;;  %v167_v32 = vld [vmem:[#allocation6 + $0x600] sm:$0xff] }
  0x29   :  { %s12150_s21 = smov 119   ;;  %s12151_s22 = smov 118   ;;  %v168_v33 = vld [vmem:[#allocation6 + $0x608] sm:$0xff]  ;;  %v182_v34 = vld [vmem:[#allocation6 + $0x38] sm:$0xff]  ;;  %v169_v41 = vld [vmem:[#allocation6 + $0x610] sm:$0xff] }
  0x2a   :  { %s12152_s23 = smov 117   ;;  %s12153_s3 = smov 116   ;;  %v170_v42 = vld [vmem:[#allocation6 + $0x618] sm:$0xff]  ;;  %v171_v43 = vld [vmem:[#allocation6 + $0x620] sm:$0xff]  ;;  %v172_v45 = vld [vmem:[#allocation6 + $0x628] sm:$0xff] }
  0x2b   :  { %s12154_s2 = smov 115   ;;  %s12155_s24 = smov 114   ;;  %v173_v48 = vld [vmem:[#allocation6 + $0x630] sm:$0xff]  ;;  %v174_v49 = vld [vmem:[#allocation6 + $0x638] sm:$0xff]  ;;  %v226_v57 = vld [vmem:[#allocation6 + $0x40] sm:$0xff] }
  0x2c   :  { %s12156_s25 = smov 113   ;;  %s12157_s7 = smov 112   ;;  %v227_v58 = vld [vmem:[#allocation6 + $0x48] sm:$0xff]  ;;  %v228_v59 = vld [vmem:[#allocation6 + $0x50] sm:$0xff] }
  0x2d   :  { %s12158_s26 = smov 111   ;;  %s12159_s27 = smov 110  }
  0x2e   :  { %306 = vrot.lane.b32.xlu1 %v12274_v1, %s12142_s11  ;;  %255 = vrot.lane.b32.xlu0 %v12274_v1, %s12143_s12  ;;  %s12160_s28 = smov 109   ;;  %s12161_s29 = smov 108  }
  0x2f   :  { %357 = vrot.lane.b32.xlu2 %v12274_v1, %s12144_s15  ;;  %s12162_s16 = smov 107   ;;  %s12163_s17 = smov 106  }
  0x30   :  { %s12164_s30 = smov 105  }
  0x36   :  { %408 = vrot.lane.b32.xlu1 %v12274_v1, %s12145_s8  ;;  %387 = vrot.lane.b32.xlu0 %v12270_v0, %s12145_s8 }
  0x37   :  { %438 = vrot.lane.b32.xlu2 %v12270_v0, %s12146_s18 }
  0x3e   :  { %489 = vrot.lane.b32.xlu1 %v12270_v0, %s12147_s19  ;;  %459 = vrot.lane.b32.xlu0 %v12274_v1, %s12146_s18 }
  0x3f   :  { %510 = vrot.lane.b32.xlu2 %v12274_v1, %s12147_s19 }
  0x46   :  { %561 = vrot.lane.b32.xlu1 %v12274_v1, %s12148_s20  ;;  %540 = vrot.lane.b32.xlu0 %v12270_v0, %s12148_s20 }
  0x47   :  { %591 = vrot.lane.b32.xlu2 %v12270_v0, %s12149_s0 }
  0x4e   :  { %642 = vrot.lane.b32.xlu1 %v12270_v0, %s12150_s21  ;;  %612 = vrot.lane.b32.xlu0 %v12274_v1, %s12149_s0 }
  0x4f   :  { %663 = vrot.lane.b32.xlu2 %v12274_v1, %s12150_s21 }
  0x56   :  { %714 = vrot.lane.b32.xlu1 %v12274_v1, %s12151_s22  ;;  %693 = vrot.lane.b32.xlu0 %v12270_v0, %s12151_s22 }
  0x57   :  { %744 = vrot.lane.b32.xlu2 %v12270_v0, %s12152_s23  ;;  %s11700_s14 = spop %11699 }
  0x58   :  { %v186_v23 = vstv %s11700_s14  ;;  %s11702_s11 = spop %11701 }
  0x59   :  { %v188_v29 = vmul.f32 %v186_v23, %v175_v21  ;;  %v189_v30 = vmul.f32 %v186_v23, %v176_v22  ;;  %v207_v31 = vstv %s11702_s11  ;;  %v190_v35 = vmul.f32 %v186_v23, %v177_v24 }
  0x5a   :  { %v191_v36 = vmul.f32 %v186_v23, %v178_v25  ;;  %v192_v37 = vmul.f32 %v186_v23, %v179_v26  ;;  %v193_v44 = vmul.f32 %v186_v23, %v180_v27  ;;  %v194_v46 = vmul.f32 %v186_v23, %v181_v28 }
  0x5b   :  { %v209_v47 = vmul.f32 %v207_v31, %v175_v21  ;;  %v195_v50 = vmul.f32 %v186_v23, %v182_v34  ;;  %v196_v51 = vadd.f32 %v188_v29, %v167_v32  ;;  %v197_v52 = vadd.f32 %v189_v30, %v168_v33 }
  0x5c   :  { %v210_v53 = vmul.f32 %v207_v31, %v176_v22  ;;  %v198_v54 = vadd.f32 %v190_v35, %v169_v41  ;;  %v199_v55 = vadd.f32 %v191_v36, %v170_v42  ;;  %v200_v56 = vadd.f32 %v192_v37, %v171_v43 }
  0x5d   :  { %v201_v61 = vadd.f32 %v193_v44, %v172_v45  ;;  %v211_v62 = vmul.f32 %v207_v31, %v177_v24  ;;  %v212_v63 = vmul.f32 %v207_v31, %v178_v25 }
  0x5e   :  { %795 = vrot.lane.b32.xlu1 %v12270_v0, %s12153_s3  ;;  %765 = vrot.lane.b32.xlu0 %v12274_v1, %s12152_s23 }
  0x5f   :  { %816 = vrot.lane.b32.xlu2 %v12274_v1, %s12153_s3 }
  0x66   :  { %867 = vrot.lane.b32.xlu1 %v12274_v1, %s12154_s2  ;;  %846 = vrot.lane.b32.xlu0 %v12270_v0, %s12154_s2 }
  0x67   :  { %897 = vrot.lane.b32.xlu2 %v12270_v0, %s12155_s24 }
  0x6e   :  { %948 = vrot.lane.b32.xlu1 %v12270_v0, %s12156_s25  ;;  %918 = vrot.lane.b32.xlu0 %v12274_v1, %s12155_s24 }
  0x6f   :  { %969 = vrot.lane.b32.xlu2 %v12274_v1, %s12156_s25 }
  0x76   :  { %1020 = vrot.lane.b32.xlu1 %v12274_v1, %s12157_s7  ;;  %999 = vrot.lane.b32.xlu0 %v12270_v0, %s12157_s7 }
  0x77   :  { %1050 = vrot.lane.b32.xlu2 %v12270_v0, %s12158_s26 }
  0x7e   :  { %1101 = vrot.lane.b32.xlu1 %v12270_v0, %s12159_s27  ;;  %1071 = vrot.lane.b32.xlu0 %v12274_v1, %s12158_s26 }
  0x7f   :  { %1122 = vrot.lane.b32.xlu2 %v12274_v1, %s12159_s27 }
  0x81   :  { %v337_v2 = vpop.permute.xlu2 %336 }
  0x86   :  { %1173 = vrot.lane.b32.xlu1 %v12274_v1, %s12160_s28  ;;  %1152 = vrot.lane.b32.xlu0 %v12270_v0, %s12160_s28 }
  0x87   :  { %1203 = vrot.lane.b32.xlu2 %v12270_v0, %s12161_s29 }
  0x89   :  { %v358_v3 = vpop.permute.xlu2 %357 }
  0x8e   :  { %1254 = vrot.lane.b32.xlu1 %v12270_v0, %s12162_s16  ;;  %1224 = vrot.lane.b32.xlu0 %v12274_v1, %s12161_s29 }
  0x8f   :  { %1275 = vrot.lane.b32.xlu2 %v12274_v1, %s12162_s16 }
  0x91   :  { %v439_v4 = vpop.permute.xlu2 %438 }
  0x96   :  { %1326 = vrot.lane.b32.xlu1 %v12274_v1, %s12163_s17  ;;  %1305 = vrot.lane.b32.xlu0 %v12270_v0, %s12163_s17 }
  0x97   :  { %1356 = vrot.lane.b32.xlu2 %v12270_v0, %s12164_s30  ;;  %v213_v0 = vmul.f32 %v207_v31, %v179_v26 }
  0x98   :  { %v286_v5 = vpop.permute.xlu1 %285  ;;  %v235_v6 = vpop.permute.xlu0 %234 }
  0x99   :  { %11703 = vpush %v235_v6  ;;  %v511_v7 = vpop.permute.xlu2 %510  ;;  %v215_v6 = vmul.f32 %v207_v31, %v181_v28  ;;  %v221_v21 = vadd.f32 %v213_v0, %v171_v43 }
  0x9b   :  { %v223_v25 = vadd.f32 %v215_v6, %v173_v48 }
  0x9e   :  { %1377 = vrot.lane.b32.xlu0 %v12274_v1, %s12164_s30  ;;  %v229_v1 = vld [vmem:[#allocation6 + $0x58] sm:$0xff] }
  0xa0   :  { %v307_v8 = vpop.permute.xlu1 %306  ;;  %v256_v9 = vpop.permute.xlu0 %255 }
  0xa1   :  { %11705 = vpush %v256_v9  ;;  %v592_v12 = vpop.permute.xlu2 %591  ;;  %v232_v9 = vld [vmem:[#allocation6 + $0x70] sm:$0xff] }
  0xa2   :  { %11707 = vpush %v286_v5  ;;  %v214_v5 = vmul.f32 %v207_v31, %v180_v27 }
  0xa3   :  { %11709 = vpush %v307_v8  ;;  %v203_v8 = vadd.f32 %v195_v50, %v174_v49 }
  0xa4   :  { %11711 = vpush %v337_v2  ;;  %v230_v2 = vld [vmem:[#allocation6 + $0x60] sm:$0xff]  ;;  %v222_v24 = vadd.f32 %v214_v5, %v172_v45 }
  0xa5   :  { %11713 = vpush %v358_v3  ;;  %v231_v3 = vld [vmem:[#allocation6 + $0x68] sm:$0xff] }
  0xa8   :  { %v409_v10 = vpop.permute.xlu1 %408  ;;  %v388_v11 = vpop.permute.xlu0 %387 }
  0xa9   :  { %11715 = vpush %v388_v11  ;;  %v664_v15 = vpop.permute.xlu2 %663 }
  0xaa   :  { %11717 = vpush %v409_v10 }
  0xab   :  { %11719 = vpush %v439_v4  ;;  %v202_v4 = vadd.f32 %v194_v46, %v173_v48  ;;  %v277_v46 = vld [vmem:[#allocation6 + $0x80] sm:$0xff] }
  0xb0   :  { %v490_v13 = vpop.permute.xlu1 %489  ;;  %v460_v14 = vpop.permute.xlu0 %459 }
  0xb1   :  { %11721 = vpush %v460_v14  ;;  %v745_v18 = vpop.permute.xlu2 %744  ;;  %v233_v14 = vld [vmem:[#allocation6 + $0x78] sm:$0xff] }
  0xb2   :  { %11723 = vpush %v490_v13  ;;  %v217_v13 = vadd.f32 %v209_v47, %v167_v32 }
  0xb3   :  { %11725 = vpush %v511_v7  ;;  %v216_v7 = vmul.f32 %v207_v31, %v182_v34 }
  0xb5   :  { %v224_v26 = vadd.f32 %v216_v7, %v174_v49 }
  0xb8   :  { %v562_v16 = vpop.permute.xlu1 %561  ;;  %v541_v17 = vpop.permute.xlu0 %540 }
  0xb9   :  { %11727 = vpush %v541_v17  ;;  %v12322_v38 = vpop.permute.xlu2 %816 }
  0xba   :  { %11729 = vpush %v562_v16 }
  0xbb   :  { %11731 = vpush %v592_v12 }
  0xc0   :  { %v643_v19 = vpop.permute.xlu1 %642  ;;  %v613_v20 = vpop.permute.xlu0 %612 }
  0xc1   :  { %11733 = vpush %v613_v20  ;;  %v220_v20 = vadd.f32 %v212_v63, %v170_v42  ;;  %v898_v28 = vpop.permute.xlu2 %897 }
  0xc2   :  { %11735 = vpush %v643_v19  ;;  %v219_v19 = vadd.f32 %v211_v62, %v169_v41  ;;  %v284_v62 = vld [vmem:[#allocation6 + $0xb8] sm:$0xff] }
  0xc3   :  { %11737 = vpush %v664_v15 }
  0xc8   :  { %v715_v39 = vpop.permute.xlu1 %714  ;;  %v694_v40 = vpop.permute.xlu0 %693 }
  0xc9   :  { %11739 = vpush %v694_v40 }
  0xca   :  { %11741 = vpush %v715_v39  ;;  %s11704_s12 = spop %11703 }
  0xcb   :  { %v237_v60 = vstv %s11704_s12  ;;  %11743 = vpush %v745_v18  ;;  %v218_v18 = vadd.f32 %v210_v53, %v168_v33  ;;  %v280_v53 = vld [vmem:[#allocation6 + $0x98] sm:$0xff] }
  0xcc   :  { %v239_v10 = vmul.f32 %v237_v60, %v226_v57  ;;  %v240_v11 = vmul.f32 %v237_v60, %v227_v58  ;;  %v241_v12 = vmul.f32 %v237_v60, %v228_v59  ;;  %v242_v15 = vmul.f32 %v237_v60, %v229_v1 }
  0xcd   :  { %v243_v16 = vmul.f32 %v237_v60, %v230_v2  ;;  %v244_v17 = vmul.f32 %v237_v60, %v231_v3  ;;  %v245_v27 = vmul.f32 %v237_v60, %v232_v9  ;;  %v246_v29 = vmul.f32 %v237_v60, %v233_v14 }
  0xce   :  { %v247_v30 = vadd.f32 %v239_v10, %v196_v51  ;;  %v248_v31 = vadd.f32 %v240_v11, %v197_v52  ;;  %v249_v32 = vadd.f32 %v241_v12, %v198_v54  ;;  %v250_v34 = vadd.f32 %v242_v15, %v199_v55  ;;  %v278_v51 = vld [vmem:[#allocation6 + $0x88] sm:$0xff]  ;;  %v279_v52 = vld [vmem:[#allocation6 + $0x90] sm:$0xff]  ;;  %v970_v15 = vpop.permute.xlu2 %969 }
  0xcf   :  { %v251_v35 = vadd.f32 %v243_v16, %v200_v56  ;;  %v252_v33 = vadd.f32 %v244_v17, %v201_v61  ;;  %v253_v47 = vadd.f32 %v245_v27, %v202_v4  ;;  %v254_v48 = vadd.f32 %v246_v29, %v203_v8  ;;  %v283_v61 = vld [vmem:[#allocation6 + $0xb0] sm:$0xff]  ;;  %v328_v29 = vld [vmem:[#allocation6 + $0xc0] sm:$0xff] }
  0xd0   :  { %v796_v22 = vpop.permute.xlu1 %795  ;;  %v766_v23 = vpop.permute.xlu0 %765 }
  0xd1   :  { %11745 = vpush %v766_v23 }
  0xd2   :  { %11747 = vpush %v796_v22  ;;  %s11706_s15 = spop %11705 }
  0xd3   :  { %v258_v36 = vstv %s11706_s15  ;;  %s12324_s8 = spop %11707  ;;  %11749 = vpush %v12322_v38 }
  0xd4   :  { %v260_v37 = vmul.f32 %v258_v36, %v226_v57  ;;  %v261_v39 = vmul.f32 %v258_v36, %v227_v58  ;;  %v262_v40 = vmul.f32 %v258_v36, %v228_v59  ;;  %v263_v41 = vmul.f32 %v258_v36, %v229_v1  ;;  %s11710_s18 = spop %11709  ;;  %v281_v57 = vld [vmem:[#allocation6 + $0xa0] sm:$0xff]  ;;  %v282_v58 = vld [vmem:[#allocation6 + $0xa8] sm:$0xff] }
  0xd5   :  { %v264_v42 = vmul.f32 %v258_v36, %v230_v2  ;;  %v265_v43 = vmul.f32 %v258_v36, %v231_v3  ;;  %v266_v44 = vmul.f32 %v258_v36, %v232_v9  ;;  %v267_v45 = vmul.f32 %v258_v36, %v233_v14  ;;  %s11712_s19 = spop %11711  ;;  %v329_v36 = vld [vmem:[#allocation6 + $0xc8] sm:$0xff] }
  0xd6   :  { %v268_v49 = vadd.f32 %v260_v37, %v217_v13  ;;  %v269_v50 = vadd.f32 %v261_v39, %v218_v18  ;;  %v270_v38 = vadd.f32 %v262_v40, %v219_v19  ;;  %v271_v54 = vadd.f32 %v263_v41, %v220_v20  ;;  %s11714_s20 = spop %11713  ;;  %v330_v37 = vld [vmem:[#allocation6 + $0xd0] sm:$0xff]  ;;  %v331_v40 = vld [vmem:[#allocation6 + $0xd8] sm:$0xff] }
  0xd7   :  { %v272_v55 = vadd.f32 %v264_v42, %v221_v21  ;;  %v273_v56 = vadd.f32 %v265_v43, %v222_v24  ;;  %v274_v59 = vadd.f32 %v266_v44, %v223_v25  ;;  %v275_v60 = vadd.f32 %v267_v45, %v224_v26  ;;  %v334_v43 = vld [vmem:[#allocation6 + $0xf0] sm:$0xff]  ;;  %v335_v44 = vld [vmem:[#allocation6 + $0xf8] sm:$0xff] }
  0xd8   :  { %v288_v63 = vstv %s12324_s8  ;;  %v309_v0 = vstv %s11710_s18  ;;  %v868_v1 = vpop.permute.xlu1 %867  ;;  %v847_v2 = vpop.permute.xlu0 %846  ;;  %v339_v9 = vstv %s11712_s19  ;;  %v12328_v10 = vstv %s11714_s20 }
  0xd9   :  { %v290_v3 = vmul.f32 %v288_v63, %v277_v46  ;;  %v291_v4 = vmul.f32 %v288_v63, %v278_v51  ;;  %v292_v5 = vmul.f32 %v288_v63, %v279_v52  ;;  %v293_v6 = vmul.f32 %v288_v63, %v280_v53  ;;  %11751 = vpush %v847_v2  ;;  %v1051_v2 = vpop.permute.xlu2 %1050 }
  0xda   :  { %v294_v7 = vmul.f32 %v288_v63, %v281_v57  ;;  %v295_v8 = vmul.f32 %v288_v63, %v282_v58  ;;  %11753 = vpush %v868_v1  ;;  %v296_v11 = vmul.f32 %v288_v63, %v283_v61  ;;  %v297_v12 = vmul.f32 %v288_v63, %v284_v62  ;;  %s12330_s0 = spop %11715 }
  0xdb   :  { %v298_v13 = vadd.f32 %v290_v3, %v247_v30  ;;  %v299_v14 = vadd.f32 %v291_v4, %v248_v31  ;;  %11755 = vpush %v898_v28  ;;  %v300_v16 = vadd.f32 %v292_v5, %v249_v32  ;;  %v301_v17 = vadd.f32 %v293_v6, %v250_v34  ;;  %v332_v32 = vld [vmem:[#allocation6 + $0xe0] sm:$0xff]  ;;  %v333_v34 = vld [vmem:[#allocation6 + $0xe8] sm:$0xff]  ;;  %s11718_s21 = spop %11717 }
  0xdc   :  { %v302_v18 = vadd.f32 %v294_v7, %v251_v35  ;;  %v303_v19 = vadd.f32 %v295_v8, %v252_v33  ;;  %v311_v20 = vmul.f32 %v309_v0, %v277_v46  ;;  %v312_v21 = vmul.f32 %v309_v0, %v278_v51  ;;  %v379_v7 = vld [vmem:[#allocation6 + $0x100] sm:$0xff]  ;;  %s11720_s22 = spop %11719 }
  0xdd   :  { %v313_v22 = vmul.f32 %v309_v0, %v279_v52  ;;  %v314_v23 = vmul.f32 %v309_v0, %v280_v53  ;;  %v315_v24 = vmul.f32 %v309_v0, %v281_v57  ;;  %v316_v25 = vmul.f32 %v309_v0, %v282_v58 }
  0xde   :  { %v317_v26 = vmul.f32 %v309_v0, %v283_v61  ;;  %v318_v27 = vmul.f32 %v309_v0, %v284_v62  ;;  %v304_v39 = vadd.f32 %v296_v11, %v253_v47  ;;  %v305_v30 = vadd.f32 %v297_v12, %v254_v48 }
  0xdf   :  { %v319_v31 = vadd.f32 %v311_v20, %v268_v49  ;;  %v320_v28 = vadd.f32 %v312_v21, %v269_v50  ;;  %v321_v35 = vadd.f32 %v313_v22, %v270_v38  ;;  %v322_v33 = vadd.f32 %v314_v23, %v271_v54  ;;  %v383_v20 = vld [vmem:[#allocation6 + $0x120] sm:$0xff]  ;;  %v384_v21 = vld [vmem:[#allocation6 + $0x128] sm:$0xff] }
  0xe0   :  { %v323_v41 = vadd.f32 %v315_v24, %v272_v55  ;;  %v324_v42 = vadd.f32 %v316_v25, %v273_v56  ;;  %v949_v45 = vpop.permute.xlu1 %948  ;;  %v919_v46 = vpop.permute.xlu0 %918  ;;  %v325_v51 = vadd.f32 %v317_v26, %v274_v59  ;;  %v326_v52 = vadd.f32 %v318_v27, %v275_v60  ;;  %v385_v25 = vld [vmem:[#allocation6 + $0x130] sm:$0xff]  ;;  %v386_v26 = vld [vmem:[#allocation6 + $0x138] sm:$0xff] }
  0xe1   :  { %v341_v53 = vmul.f32 %v339_v9, %v328_v29  ;;  %v342_v57 = vmul.f32 %v339_v9, %v329_v36  ;;  %11757 = vpush %v919_v46  ;;  %v343_v47 = vmul.f32 %v339_v9, %v330_v37  ;;  %v344_v48 = vmul.f32 %v339_v9, %v331_v40 }
  0xe2   :  { %v345_v49 = vmul.f32 %v339_v9, %v332_v32  ;;  %v346_v50 = vmul.f32 %v339_v9, %v333_v34  ;;  %11759 = vpush %v949_v45  ;;  %v347_v58 = vmul.f32 %v339_v9, %v334_v43  ;;  %v348_v61 = vmul.f32 %v339_v9, %v335_v44  ;;  %s11722_s23 = spop %11721 }
  0xe3   :  { %v349_v38 = vadd.f32 %v341_v53, %v298_v13  ;;  %v350_v54 = vadd.f32 %v342_v57, %v299_v14  ;;  %11761 = vpush %v970_v15  ;;  %v351_v55 = vadd.f32 %v343_v47, %v300_v16  ;;  %v352_v56 = vadd.f32 %v344_v48, %v301_v17  ;;  %v380_v13 = vld [vmem:[#allocation6 + $0x108] sm:$0xff]  ;;  %v381_v14 = vld [vmem:[#allocation6 + $0x110] sm:$0xff]  ;;  %v382_v15 = vld [vmem:[#allocation6 + $0x118] sm:$0xff]  ;;  %s11724_s3 = spop %11723 }
  0xe4   :  { %v353_v62 = vadd.f32 %v345_v49, %v302_v18  ;;  %v354_v63 = vadd.f32 %v346_v50, %v303_v19  ;;  %v362_v59 = vmul.f32 %v12328_v10, %v328_v29  ;;  %v363_v60 = vmul.f32 %v12328_v10, %v329_v36  ;;  %v430_v57 = vld [vmem:[#allocation6 + $0x140] sm:$0xff]  ;;  %s11726_s2 = spop %11725 }
  0xe5   :  { %v364_v0 = vmul.f32 %v12328_v10, %v330_v37  ;;  %v365_v1 = vmul.f32 %v12328_v10, %v331_v40  ;;  %v366_v3 = vmul.f32 %v12328_v10, %v332_v32  ;;  %v367_v4 = vmul.f32 %v12328_v10, %v333_v34 }
  0xe6   :  { %v368_v5 = vmul.f32 %v12328_v10, %v334_v43  ;;  %v369_v6 = vmul.f32 %v12328_v10, %v335_v44  ;;  %v355_v8 = vadd.f32 %v347_v58, %v304_v39  ;;  %v356_v9 = vadd.f32 %v348_v61, %v305_v30  ;;  %v431_v58 = vld [vmem:[#allocation6 + $0x148] sm:$0xff]  ;;  %v432_v61 = vld [vmem:[#allocation6 + $0x150] sm:$0xff] }
  0xe7   :  { %v370_v11 = vadd.f32 %v362_v59, %v319_v31  ;;  %v371_v12 = vadd.f32 %v363_v60, %v320_v28  ;;  %v372_v16 = vadd.f32 %v364_v0, %v321_v35  ;;  %v373_v17 = vadd.f32 %v365_v1, %v322_v33  ;;  %v433_v59 = vld [vmem:[#allocation6 + $0x158] sm:$0xff]  ;;  %v1123_v60 = vpop.permute.xlu2 %1122 }
  0xe8   :  { %v374_v18 = vadd.f32 %v366_v3, %v323_v41  ;;  %v375_v19 = vadd.f32 %v367_v4, %v324_v42  ;;  %v1021_v22 = vpop.permute.xlu1 %1020  ;;  %v1000_v10 = vpop.permute.xlu0 %999  ;;  %v376_v23 = vadd.f32 %v368_v5, %v325_v51  ;;  %v377_v24 = vadd.f32 %v369_v6, %v326_v52  ;;  %v436_v6 = vld [vmem:[#allocation6 + $0x170] sm:$0xff] }
  0xe9   :  { %v390_v27 = vstv %s12330_s0  ;;  %v411_v29 = vstv %s11718_s21  ;;  %11763 = vpush %v1000_v10  ;;  %v441_v40 = vstv %s11720_s22  ;;  %v12341_v32 = vstv %s11722_s23 }
  0xea   :  { %v392_v36 = vmul.f32 %v390_v27, %v379_v7  ;;  %v393_v37 = vmul.f32 %v390_v27, %v380_v13  ;;  %v394_v39 = vmul.f32 %v390_v27, %v381_v14  ;;  %v395_v30 = vmul.f32 %v390_v27, %v382_v15  ;;  %11765 = vpush %v1021_v22  ;;  %s11728_s24 = spop %11727 }
  0xeb   :  { %v396_v31 = vmul.f32 %v390_v27, %v383_v20  ;;  %v397_v28 = vmul.f32 %v390_v27, %v384_v21  ;;  %11767 = vpush %v1051_v2  ;;  %v398_v34 = vmul.f32 %v390_v27, %v385_v25  ;;  %v399_v35 = vmul.f32 %v390_v27, %v386_v26  ;;  %s11730_s25 = spop %11729 }
  0xec   :  { %v400_v33 = vadd.f32 %v392_v36, %v349_v38  ;;  %v401_v41 = vadd.f32 %v393_v37, %v350_v54  ;;  %v402_v42 = vadd.f32 %v394_v39, %v351_v55  ;;  %v403_v43 = vadd.f32 %v395_v30, %v352_v56  ;;  %v434_v56 = vld [vmem:[#allocation6 + $0x160] sm:$0xff]  ;;  %s12351_s7 = spop %11731 }
  0xed   :  { %v404_v44 = vadd.f32 %v396_v31, %v353_v62  ;;  %v405_v45 = vadd.f32 %v397_v28, %v354_v63  ;;  %v413_v46 = vmul.f32 %v411_v29, %v379_v7  ;;  %v414_v51 = vmul.f32 %v411_v29, %v380_v13  ;;  %v435_v62 = vld [vmem:[#allocation6 + $0x168] sm:$0xff]  ;;  %v437_v7 = vld [vmem:[#allocation6 + $0x178] sm:$0xff]  ;;  %v481_v30 = vld [vmem:[#allocation6 + $0x180] sm:$0xff] }
  0xee   :  { %v415_v52 = vmul.f32 %v411_v29, %v381_v14  ;;  %v416_v53 = vmul.f32 %v411_v29, %v382_v15  ;;  %v417_v47 = vmul.f32 %v411_v29, %v383_v20  ;;  %v418_v48 = vmul.f32 %v411_v29, %v384_v21 }
  0xef   :  { %v419_v49 = vmul.f32 %v411_v29, %v385_v25  ;;  %v420_v50 = vmul.f32 %v411_v29, %v386_v26  ;;  %v406_v0 = vadd.f32 %v398_v34, %v355_v8  ;;  %v407_v38 = vadd.f32 %v399_v35, %v356_v9  ;;  %v482_v35 = vld [vmem:[#allocation6 + $0x188] sm:$0xff] }
  0xf0   :  { %v421_v54 = vadd.f32 %v413_v46, %v370_v11  ;;  %v422_v55 = vadd.f32 %v414_v51, %v371_v12  ;;  %v1102_v63 = vpop.permute.xlu1 %1101  ;;  %v1072_v1 = vpop.permute.xlu0 %1071  ;;  %v423_v2 = vadd.f32 %v415_v52, %v372_v16  ;;  %v424_v3 = vadd.f32 %v416_v53, %v373_v17  ;;  %v485_v46 = vld [vmem:[#allocation6 + $0x1a0] sm:$0xff]  ;;  %v486_v51 = vld [vmem:[#allocation6 + $0x1a8] sm:$0xff] }
  0xf1   :  { %v425_v4 = vadd.f32 %v417_v47, %v374_v18  ;;  %v426_v5 = vadd.f32 %v418_v48, %v375_v19  ;;  %11769 = vpush %v1072_v1  ;;  %v443_v13 = vmul.f32 %v441_v40, %v430_v57  ;;  %v444_v14 = vmul.f32 %v441_v40, %v431_v58 }
  0xf2   :  { %v445_v15 = vmul.f32 %v441_v40, %v432_v61  ;;  %v446_v20 = vmul.f32 %v441_v40, %v433_v59  ;;  %11771 = vpush %v1102_v63  ;;  %v427_v8 = vadd.f32 %v419_v49, %v376_v23  ;;  %v428_v9 = vadd.f32 %v420_v50, %v377_v24  ;;  %s12353_s26 = spop %11733 }
  0xf3   :  { %v447_v11 = vmul.f32 %v441_v40, %v434_v56  ;;  %v448_v12 = vmul.f32 %v441_v40, %v435_v62  ;;  %11773 = vpush %v1123_v60  ;;  %v449_v21 = vmul.f32 %v441_v40, %v436_v6  ;;  %v450_v22 = vmul.f32 %v441_v40, %v437_v7  ;;  %s11736_s27 = spop %11735 }
  0xf4   :  { %v451_v10 = vadd.f32 %v443_v13, %v400_v33  ;;  %v452_v16 = vadd.f32 %v444_v14, %v401_v41  ;;  %v453_v17 = vadd.f32 %v445_v15, %v402_v42  ;;  %v454_v18 = vadd.f32 %v446_v20, %v403_v43  ;;  %v483_v33 = vld [vmem:[#allocation6 + $0x190] sm:$0xff]  ;;  %v484_v41 = vld [vmem:[#allocation6 + $0x198] sm:$0xff]  ;;  %v532_v20 = vld [vmem:[#allocation6 + $0x1c0] sm:$0xff]  ;;  %s11738_s28 = spop %11737 }
  0xf5   :  { %v455_v19 = vadd.f32 %v447_v11, %v404_v44  ;;  %v456_v25 = vadd.f32 %v448_v12, %v405_v45  ;;  %v464_v26 = vmul.f32 %v12341_v32, %v430_v57  ;;  %v465_v27 = vmul.f32 %v12341_v32, %v431_v58  ;;  %v487_v57 = vld [vmem:[#allocation6 + $0x1b0] sm:$0xff] }
  0xf6   :  { %v466_v29 = vmul.f32 %v12341_v32, %v432_v61  ;;  %v467_v23 = vmul.f32 %v12341_v32, %v433_v59  ;;  %v468_v24 = vmul.f32 %v12341_v32, %v434_v56  ;;  %v469_v36 = vmul.f32 %v12341_v32, %v435_v62  ;;  %v1204_v56 = vpop.permute.xlu2 %1203 }
  0xf7   :  { %v470_v37 = vmul.f32 %v12341_v32, %v436_v6  ;;  %v471_v39 = vmul.f32 %v12341_v32, %v437_v7  ;;  %v457_v31 = vadd.f32 %v449_v21, %v406_v0  ;;  %v458_v28 = vadd.f32 %v450_v22, %v407_v38  ;;  %v488_v32 = vld [vmem:[#allocation6 + $0x1b8] sm:$0xff]  ;;  %v533_v21 = vld [vmem:[#allocation6 + $0x1c8] sm:$0xff]  ;;  %v534_v22 = vld [vmem:[#allocation6 + $0x1d0] sm:$0xff] }
  0xf8   :  { %v472_v40 = vadd.f32 %v464_v26, %v421_v54  ;;  %v473_v34 = vadd.f32 %v465_v27, %v422_v55  ;;  %v474_v42 = vadd.f32 %v466_v29, %v423_v2  ;;  %v475_v43 = vadd.f32 %v467_v23, %v424_v3  ;;  %v1174_v59 = vpop.permute.xlu1 %1173  ;;  %v1153_v60 = vpop.permute.xlu0 %1152  ;;  %v535_v26 = vld [vmem:[#allocation6 + $0x1d8] sm:$0xff] }
  0xf9   :  { %v476_v44 = vadd.f32 %v468_v24, %v425_v4  ;;  %v477_v45 = vadd.f32 %v469_v36, %v426_v5  ;;  %v478_v52 = vadd.f32 %v470_v37, %v427_v8  ;;  %v479_v53 = vadd.f32 %v471_v39, %v428_v9  ;;  %11775 = vpush %v1153_v60  ;;  %v538_v36 = vld [vmem:[#allocation6 + $0x1f0] sm:$0xff]  ;;  %v539_v37 = vld [vmem:[#allocation6 + $0x1f8] sm:$0xff] }
  0xfa   :  { %v492_v47 = vstv %s11724_s3  ;;  %v513_v48 = vstv %s11726_s2  ;;  %v543_v54 = vstv %s11728_s24  ;;  %v564_v55 = vstv %s11730_s25  ;;  %11777 = vpush %v1174_v59  ;;  %s12359_s29 = spop %11739 }
  0xfb   :  { %v494_v49 = vmul.f32 %v492_v47, %v481_v30  ;;  %v495_v50 = vmul.f32 %v492_v47, %v482_v35  ;;  %v496_v58 = vmul.f32 %v492_v47, %v483_v33  ;;  %v497_v61 = vmul.f32 %v492_v47, %v484_v41  ;;  %11779 = vpush %v1204_v56  ;;  %s11742_s16 = spop %11741 }
  0xfc   :  { %v498_v0 = vmul.f32 %v492_v47, %v485_v46  ;;  %v499_v38 = vmul.f32 %v492_v47, %v486_v51  ;;  %v500_v62 = vmul.f32 %v492_v47, %v487_v57  ;;  %v501_v63 = vmul.f32 %v492_v47, %v488_v32  ;;  %s11744_s17 = spop %11743 }
  0xfd   :  { %v502_v1 = vadd.f32 %v494_v49, %v451_v10  ;;  %v503_v2 = vadd.f32 %v495_v50, %v452_v16  ;;  %v504_v3 = vadd.f32 %v496_v58, %v453_v17  ;;  %v505_v4 = vadd.f32 %v497_v61, %v454_v18  ;;  %v536_v18 = vld [vmem:[#allocation6 + $0x1e0] sm:$0xff] }
  0xfe   :  { %v506_v5 = vadd.f32 %v498_v0, %v455_v19  ;;  %v507_v6 = vadd.f32 %v499_v38, %v456_v25  ;;  %v515_v7 = vmul.f32 %v513_v48, %v481_v30  ;;  %v516_v13 = vmul.f32 %v513_v48, %v482_v35  ;;  %v537_v19 = vld [vmem:[#allocation6 + $0x1e8] sm:$0xff]  ;;  %v583_v61 = vld [vmem:[#allocation6 + $0x200] sm:$0xff] }
  0xff   :  { %v517_v14 = vmul.f32 %v513_v48, %v483_v33  ;;  %v518_v15 = vmul.f32 %v513_v48, %v484_v41  ;;  %v519_v8 = vmul.f32 %v513_v48, %v485_v46  ;;  %v520_v9 = vmul.f32 %v513_v48, %v486_v51 }
 0x100   :  { %v521_v11 = vmul.f32 %v513_v48, %v487_v57  ;;  %v522_v12 = vmul.f32 %v513_v48, %v488_v32  ;;  %v508_v10 = vadd.f32 %v500_v62, %v457_v31  ;;  %v509_v16 = vadd.f32 %v501_v63, %v458_v28  ;;  %v1255_v59 = vpop.permute.xlu1 %1254  ;;  %v1225_v60 = vpop.permute.xlu0 %1224  ;;  %v584_v62 = vld [vmem:[#allocation6 + $0x208] sm:$0xff]  ;;  %v585_v63 = vld [vmem:[#allocation6 + $0x210] sm:$0xff] }
 0x101   :  { %v523_v27 = vadd.f32 %v515_v7, %v472_v40  ;;  %v524_v17 = vadd.f32 %v516_v13, %v473_v34  ;;  %v525_v25 = vadd.f32 %v517_v14, %v474_v42  ;;  %v526_v29 = vadd.f32 %v518_v15, %v475_v43  ;;  %11781 = vpush %v1225_v60  ;;  %v588_v7 = vld [vmem:[#allocation6 + $0x228] sm:$0xff]  ;;  %v589_v15 = vld [vmem:[#allocation6 + $0x230] sm:$0xff] }
 0x102   :  { %v527_v23 = vadd.f32 %v519_v8, %v476_v44  ;;  %v528_v24 = vadd.f32 %v520_v9, %v477_v45  ;;  %v545_v39 = vmul.f32 %v543_v54, %v532_v20  ;;  %v546_v30 = vmul.f32 %v543_v54, %v533_v21  ;;  %11783 = vpush %v1255_v59  ;;  %s11746_s30 = spop %11745 }
 0x103   :  { %v547_v35 = vmul.f32 %v543_v54, %v534_v22  ;;  %v548_v33 = vmul.f32 %v543_v54, %v535_v26  ;;  %v529_v41 = vadd.f32 %v521_v11, %v478_v52  ;;  %v530_v46 = vadd.f32 %v522_v12, %v479_v53  ;;  %s11748_s14 = spop %11747 }
 0x104   :  { %v549_v51 = vmul.f32 %v543_v54, %v536_v18  ;;  %v550_v57 = vmul.f32 %v543_v54, %v537_v19  ;;  %v551_v31 = vmul.f32 %v543_v54, %v538_v36  ;;  %v552_v28 = vmul.f32 %v543_v54, %v539_v37  ;;  %s11750_s11 = spop %11749 }
 0x105   :  { %v553_v40 = vadd.f32 %v545_v39, %v502_v1  ;;  %v554_v34 = vadd.f32 %v546_v30, %v503_v2  ;;  %v555_v32 = vadd.f32 %v547_v35, %v504_v3  ;;  %v556_v47 = vadd.f32 %v548_v33, %v505_v4  ;;  %v586_v1 = vld [vmem:[#allocation6 + $0x218] sm:$0xff]  ;;  %v1276_v2 = vpop.permute.xlu2 %1275  ;;  %v634_v33 = vld [vmem:[#allocation6 + $0x240] sm:$0xff] }
 0x106   :  { %v557_v42 = vadd.f32 %v549_v51, %v506_v5  ;;  %v558_v43 = vadd.f32 %v550_v57, %v507_v6  ;;  %v566_v44 = vmul.f32 %v564_v55, %v532_v20  ;;  %v567_v45 = vmul.f32 %v564_v55, %v533_v21  ;;  %v590_v20 = vld [vmem:[#allocation6 + $0x238] sm:$0xff]  ;;  %11785 = vpush %v1276_v2 }
 0x107   :  { %v568_v48 = vmul.f32 %v564_v55, %v534_v22  ;;  %v569_v49 = vmul.f32 %v564_v55, %v535_v26  ;;  %v570_v52 = vmul.f32 %v564_v55, %v536_v18  ;;  %v571_v53 = vmul.f32 %v564_v55, %v537_v19 }
 0x108   :  { %v572_v50 = vmul.f32 %v564_v55, %v538_v36  ;;  %v573_v58 = vmul.f32 %v564_v55, %v539_v37  ;;  %v559_v0 = vadd.f32 %v551_v31, %v508_v10  ;;  %v560_v38 = vadd.f32 %v552_v28, %v509_v16  ;;  %v587_v55 = vld [vmem:[#allocation6 + $0x220] sm:$0xff]  ;;  %v635_v31 = vld [vmem:[#allocation6 + $0x248] sm:$0xff]  ;;  %v636_v28 = vld [vmem:[#allocation6 + $0x250] sm:$0xff] }
 0x109   :  { %v574_v54 = vadd.f32 %v566_v44, %v523_v27  ;;  %v575_v56 = vadd.f32 %v567_v45, %v524_v17  ;;  %v576_v3 = vadd.f32 %v568_v48, %v525_v25  ;;  %v577_v4 = vadd.f32 %v569_v49, %v526_v29  ;;  %v637_v44 = vld [vmem:[#allocation6 + $0x258] sm:$0xff] }
 0x10a   :  { %v578_v5 = vadd.f32 %v570_v52, %v527_v23  ;;  %v579_v6 = vadd.f32 %v571_v53, %v528_v24  ;;  %v580_v13 = vadd.f32 %v572_v50, %v529_v41  ;;  %v581_v14 = vadd.f32 %v573_v58, %v530_v46  ;;  %v640_v53 = vld [vmem:[#allocation6 + $0x270] sm:$0xff]  ;;  %v641_v50 = vld [vmem:[#allocation6 + $0x278] sm:$0xff]  ;;  %s11752_s12 = spop %11751 }
 0x10b   :  { %v594_v8 = vstv %s12351_s7  ;;  %v615_v9 = vstv %s12353_s26  ;;  %v645_v16 = vstv %s11736_s27  ;;  %v12357_v27 = vstv %s11738_s28  ;;  %s11754_s15 = spop %11753 }
 0x10c   :  { %v596_v11 = vmul.f32 %v594_v8, %v583_v61  ;;  %v597_v12 = vmul.f32 %v594_v8, %v584_v62  ;;  %v598_v21 = vmul.f32 %v594_v8, %v585_v63  ;;  %v599_v22 = vmul.f32 %v594_v8, %v586_v1  ;;  %s11756_s8 = spop %11755 }
 0x10d   :  { %v600_v26 = vmul.f32 %v594_v8, %v587_v55  ;;  %v601_v10 = vmul.f32 %v594_v8, %v588_v7  ;;  %v602_v17 = vmul.f32 %v594_v8, %v589_v15  ;;  %v603_v18 = vmul.f32 %v594_v8, %v590_v20 }
 0x10e   :  { %v604_v19 = vadd.f32 %v596_v11, %v553_v40  ;;  %v605_v25 = vadd.f32 %v597_v12, %v554_v34  ;;  %v606_v29 = vadd.f32 %v598_v21, %v555_v32  ;;  %v607_v23 = vadd.f32 %v599_v22, %v556_v47  ;;  %v638_v32 = vld [vmem:[#allocation6 + $0x260] sm:$0xff]  ;;  %v639_v47 = vld [vmem:[#allocation6 + $0x268] sm:$0xff] }
 0x10f   :  { %v608_v24 = vadd.f32 %v600_v26, %v557_v42  ;;  %v609_v36 = vadd.f32 %v601_v10, %v558_v43  ;;  %v617_v37 = vmul.f32 %v615_v9, %v583_v61  ;;  %v618_v39 = vmul.f32 %v615_v9, %v584_v62  ;;  %v685_v22 = vld [vmem:[#allocation6 + $0x280] sm:$0xff] }
 0x110   :  { %v619_v30 = vmul.f32 %v615_v9, %v585_v63  ;;  %v620_v35 = vmul.f32 %v615_v9, %v586_v1  ;;  %v621_v41 = vmul.f32 %v615_v9, %v587_v55  ;;  %v622_v46 = vmul.f32 %v615_v9, %v588_v7 }
 0x111   :  { %v623_v51 = vmul.f32 %v615_v9, %v589_v15  ;;  %v624_v57 = vmul.f32 %v615_v9, %v590_v20  ;;  %v610_v45 = vadd.f32 %v602_v17, %v559_v0  ;;  %v611_v48 = vadd.f32 %v603_v18, %v560_v38  ;;  %v1327_v0 = vpop.permute.xlu1 %1326  ;;  %v1306_v38 = vpop.permute.xlu0 %1305  ;;  %v686_v18 = vld [vmem:[#allocation6 + $0x288] sm:$0xff] }
 0x112   :  { %v625_v40 = vadd.f32 %v617_v37, %v574_v54  ;;  %v626_v34 = vadd.f32 %v618_v39, %v575_v56  ;;  %v627_v42 = vadd.f32 %v619_v30, %v576_v3  ;;  %v628_v43 = vadd.f32 %v620_v35, %v577_v4  ;;  %11787 = vpush %v1306_v38  ;;  %v1357_v3 = vpop.permute.xlu2 %1356  ;;  %v689_v37 = vld [vmem:[#allocation6 + $0x2a0] sm:$0xff]  ;;  %v690_v39 = vld [vmem:[#allocation6 + $0x2a8] sm:$0xff]  ;;  %v691_v35 = vld [vmem:[#allocation6 + $0x2b0] sm:$0xff]  ;;  %s11758_s18 = spop %11757 }
 0x113   :  { %v629_v49 = vadd.f32 %v621_v41, %v578_v5  ;;  %v630_v52 = vadd.f32 %v622_v46, %v579_v6  ;;  %v647_v58 = vmul.f32 %v645_v16, %v634_v33  ;;  %v648_v61 = vmul.f32 %v645_v16, %v635_v31  ;;  %11789 = vpush %v1327_v0  ;;  %v737_v0 = vld [vmem:[#allocation6 + $0x2c8] sm:$0xff]  ;;  %v738_v38 = vld [vmem:[#allocation6 + $0x2d0] sm:$0xff]  ;;  %s11760_s19 = spop %11759 }
 0x114   :  { %v649_v59 = vmul.f32 %v645_v16, %v636_v28  ;;  %v650_v60 = vmul.f32 %v645_v16, %v637_v44  ;;  %v631_v62 = vadd.f32 %v623_v51, %v580_v13  ;;  %v632_v63 = vadd.f32 %v624_v57, %v581_v14  ;;  %11791 = vpush %v1357_v3  ;;  %s11762_s20 = spop %11761 }
 0x115   :  { %v651_v1 = vmul.f32 %v645_v16, %v638_v32  ;;  %v652_v2 = vmul.f32 %v645_v16, %v639_v47  ;;  %v653_v54 = vmul.f32 %v645_v16, %v640_v53  ;;  %v654_v56 = vmul.f32 %v645_v16, %v641_v50 }
 0x116   :  { %v655_v55 = vadd.f32 %v647_v58, %v604_v19  ;;  %v656_v7 = vadd.f32 %v648_v61, %v605_v25  ;;  %v657_v4 = vadd.f32 %v649_v59, %v606_v29  ;;  %v658_v5 = vadd.f32 %v650_v60, %v607_v23  ;;  %v687_v19 = vld [vmem:[#allocation6 + $0x290] sm:$0xff]  ;;  %v688_v25 = vld [vmem:[#allocation6 + $0x298] sm:$0xff]  ;;  %v736_v60 = vld [vmem:[#allocation6 + $0x2c0] sm:$0xff] }
 0x117   :  { %v659_v6 = vadd.f32 %v651_v1, %v608_v24  ;;  %v660_v15 = vadd.f32 %v652_v2, %v609_v36  ;;  %v668_v13 = vmul.f32 %v12357_v27, %v634_v33  ;;  %v669_v14 = vmul.f32 %v12357_v27, %v635_v31  ;;  %v692_v33 = vld [vmem:[#allocation6 + $0x2b8] sm:$0xff] }
 0x118   :  { %v670_v20 = vmul.f32 %v12357_v27, %v636_v28  ;;  %v671_v8 = vmul.f32 %v12357_v27, %v637_v44  ;;  %v672_v9 = vmul.f32 %v12357_v27, %v638_v32  ;;  %v673_v11 = vmul.f32 %v12357_v27, %v639_v47 }
 0x119   :  { %v674_v12 = vmul.f32 %v12357_v27, %v640_v53  ;;  %v675_v21 = vmul.f32 %v12357_v27, %v641_v50  ;;  %v661_v26 = vadd.f32 %v653_v54, %v610_v45  ;;  %v662_v10 = vadd.f32 %v654_v56, %v611_v48  ;;  %v739_v54 = vld [vmem:[#allocation6 + $0x2d8] sm:$0xff]  ;;  %v1378_v56 = vpop.permute.xlu0 %1377 }
 0x11a   :  { %v676_v16 = vadd.f32 %v668_v13, %v625_v40  ;;  %v677_v17 = vadd.f32 %v669_v14, %v626_v34  ;;  %v678_v29 = vadd.f32 %v670_v20, %v627_v42  ;;  %v679_v23 = vadd.f32 %v671_v8, %v628_v43  ;;  %11793 = vpush %v1378_v56  ;;  %v742_v8 = vld [vmem:[#allocation6 + $0x2f0] sm:$0xff]  ;;  %s12370_s0 = spop %11763 }
 0x11b   :  { %v680_v24 = vadd.f32 %v672_v9, %v629_v49  ;;  %v681_v36 = vadd.f32 %v673_v11, %v630_v52  ;;  %v682_v30 = vadd.f32 %v674_v12, %v631_v62  ;;  %v683_v27 = vadd.f32 %v675_v21, %v632_v63  ;;  %v743_v9 = vld [vmem:[#allocation6 + $0x2f8] sm:$0xff]  ;;  %s12372_s21 = spop %11765 }
 0x11c   :  { %v696_v41 = vstv %s12359_s29  ;;  %v717_v46 = vstv %s11742_s16  ;;  %v747_v48 = vstv %s11744_s17  ;;  %v768_v40 = vstv %s11746_s30  ;;  %s12374_s22 = spop %11767 }
 0x11d   :  { %v698_v51 = vmul.f32 %v696_v41, %v685_v22  ;;  %v699_v57 = vmul.f32 %v696_v41, %v686_v18  ;;  %v700_v31 = vmul.f32 %v696_v41, %v687_v19  ;;  %v701_v28 = vmul.f32 %v696_v41, %v688_v25 }
 0x11e   :  { %v702_v44 = vmul.f32 %v696_v41, %v689_v37  ;;  %v703_v45 = vmul.f32 %v696_v41, %v690_v39  ;;  %v704_v34 = vmul.f32 %v696_v41, %v691_v35  ;;  %v705_v32 = vmul.f32 %v696_v41, %v692_v33 }
 0x11f   :  { %v706_v47 = vadd.f32 %v698_v51, %v655_v55  ;;  %v707_v42 = vadd.f32 %v699_v57, %v656_v7  ;;  %v708_v43 = vadd.f32 %v700_v31, %v657_v4  ;;  %v709_v49 = vadd.f32 %v701_v28, %v658_v5  ;;  %v740_v5 = vld [vmem:[#allocation6 + $0x2e0] sm:$0xff] }
 0x120   :  { %v710_v52 = vadd.f32 %v702_v44, %v659_v6  ;;  %v711_v53 = vadd.f32 %v703_v45, %v660_v15  ;;  %v719_v50 = vmul.f32 %v717_v46, %v685_v22  ;;  %v720_v58 = vmul.f32 %v717_v46, %v686_v18  ;;  %v741_v6 = vld [vmem:[#allocation6 + $0x2e8] sm:$0xff]  ;;  %v787_v57 = vld [vmem:[#allocation6 + $0x300] sm:$0xff] }
 0x121   :  { %v721_v61 = vmul.f32 %v717_v46, %v687_v19  ;;  %v722_v59 = vmul.f32 %v717_v46, %v688_v25  ;;  %v723_v62 = vmul.f32 %v717_v46, %v689_v37  ;;  %v724_v63 = vmul.f32 %v717_v46, %v690_v39 }
 0x122   :  { %v725_v1 = vmul.f32 %v717_v46, %v691_v35  ;;  %v726_v2 = vmul.f32 %v717_v46, %v692_v33  ;;  %v712_v3 = vadd.f32 %v704_v34, %v661_v26  ;;  %v713_v55 = vadd.f32 %v705_v32, %v662_v10  ;;  %v789_v34 = vld [vmem:[#allocation6 + $0x310] sm:$0xff]  ;;  %v790_v32 = vld [vmem:[#allocation6 + $0x318] sm:$0xff]  ;;  %s12380_s23 = spop %11769 }
 0x123   :  { %v727_v7 = vadd.f32 %v719_v50, %v676_v16  ;;  %v728_v4 = vadd.f32 %v720_v58, %v677_v17  ;;  %v729_v15 = vadd.f32 %v721_v61, %v678_v29  ;;  %v730_v13 = vadd.f32 %v722_v59, %v679_v23  ;;  %v793_v61 = vld [vmem:[#allocation6 + $0x330] sm:$0xff]  ;;  %s12390_s3 = spop %11771 }
 0x124   :  { %v731_v14 = vadd.f32 %v723_v62, %v680_v24  ;;  %v732_v20 = vadd.f32 %v724_v63, %v681_v36  ;;  %v749_v11 = vmul.f32 %v747_v48, %v736_v60  ;;  %v750_v12 = vmul.f32 %v747_v48, %v737_v0  ;;  %s12392_s2 = spop %11773 }
 0x125   :  { %v751_v21 = vmul.f32 %v747_v48, %v738_v38  ;;  %v752_v22 = vmul.f32 %v747_v48, %v739_v54  ;;  %v733_v18 = vadd.f32 %v725_v1, %v682_v30  ;;  %v734_v19 = vadd.f32 %v726_v2, %v683_v27 }
 0x126   :  { %v753_v25 = vmul.f32 %v747_v48, %v740_v5  ;;  %v754_v26 = vmul.f32 %v747_v48, %v741_v6  ;;  %v755_v10 = vmul.f32 %v747_v48, %v742_v8  ;;  %v756_v16 = vmul.f32 %v747_v48, %v743_v9  ;;  %v788_v48 = vld [vmem:[#allocation6 + $0x308] sm:$0xff] }
 0x127   :  { %v757_v17 = vadd.f32 %v749_v11, %v706_v47  ;;  %v758_v37 = vadd.f32 %v750_v12, %v707_v42  ;;  %v759_v39 = vadd.f32 %v751_v21, %v708_v43  ;;  %v760_v35 = vadd.f32 %v752_v22, %v709_v49  ;;  %v838_v11 = vld [vmem:[#allocation6 + $0x340] sm:$0xff] }
 0x128   :  { %v761_v29 = vadd.f32 %v753_v25, %v710_v52  ;;  %v762_v23 = vadd.f32 %v754_v26, %v711_v53  ;;  %v770_v24 = vmul.f32 %v768_v40, %v736_v60  ;;  %v771_v36 = vmul.f32 %v768_v40, %v737_v0  ;;  %v791_v52 = vld [vmem:[#allocation6 + $0x320] sm:$0xff]  ;;  %v792_v53 = vld [vmem:[#allocation6 + $0x328] sm:$0xff]  ;;  %v840_v25 = vld [vmem:[#allocation6 + $0x350] sm:$0xff] }
 0x129   :  { %v772_v33 = vmul.f32 %v768_v40, %v738_v38  ;;  %v773_v41 = vmul.f32 %v768_v40, %v739_v54  ;;  %v774_v46 = vmul.f32 %v768_v40, %v740_v5  ;;  %v775_v51 = vmul.f32 %v768_v40, %v741_v6  ;;  %v841_v26 = vld [vmem:[#allocation6 + $0x358] sm:$0xff] }
 0x12a   :  { %v776_v30 = vmul.f32 %v768_v40, %v742_v8  ;;  %v777_v27 = vmul.f32 %v768_v40, %v743_v9  ;;  %v763_v31 = vadd.f32 %v755_v10, %v712_v3  ;;  %v764_v28 = vadd.f32 %v756_v16, %v713_v55  ;;  %v794_v40 = vld [vmem:[#allocation6 + $0x338] sm:$0xff]  ;;  %s12402_s24 = spop %11775 }
 0x12b   :  { %v778_v44 = vadd.f32 %v770_v24, %v727_v7  ;;  %v779_v45 = vadd.f32 %v771_v36, %v728_v4  ;;  %v780_v47 = vadd.f32 %v772_v33, %v729_v15  ;;  %v781_v42 = vadd.f32 %v773_v41, %v730_v13  ;;  %v844_v33 = vld [vmem:[#allocation6 + $0x370] sm:$0xff]  ;;  %v845_v41 = vld [vmem:[#allocation6 + $0x378] sm:$0xff]  ;;  %s12418_s25 = spop %11777 }
 0x12c   :  { %v782_v43 = vadd.f32 %v774_v46, %v731_v14  ;;  %v783_v49 = vadd.f32 %v775_v51, %v732_v20  ;;  %v784_v50 = vadd.f32 %v776_v30, %v733_v18  ;;  %v785_v58 = vadd.f32 %v777_v27, %v734_v19  ;;  %v839_v19 = vld [vmem:[#allocation6 + $0x348] sm:$0xff]  ;;  %s12426_s7 = spop %11779 }
 0x12d   :  { %v798_v59 = vstv %s11748_s14  ;;  %v819_v60 = vstv %s11750_s11  ;;  %v849_v54 = vstv %s11752_s12  ;;  %v870_v56 = vstv %s11754_s15 }
 0x12e   :  { %v800_v62 = vmul.f32 %v798_v59, %v787_v57  ;;  %v801_v63 = vmul.f32 %v798_v59, %v788_v48  ;;  %v802_v1 = vmul.f32 %v798_v59, %v789_v34  ;;  %v803_v2 = vmul.f32 %v798_v59, %v790_v32 }
 0x12f   :  { %v804_v0 = vmul.f32 %v798_v59, %v791_v52  ;;  %v805_v38 = vmul.f32 %v798_v59, %v792_v53  ;;  %v806_v3 = vmul.f32 %v798_v59, %v793_v61  ;;  %v807_v55 = vmul.f32 %v798_v59, %v794_v40 }
 0x130   :  { %v808_v7 = vadd.f32 %v800_v62, %v757_v17  ;;  %v809_v4 = vadd.f32 %v801_v63, %v758_v37  ;;  %v810_v5 = vadd.f32 %v802_v1, %v759_v39  ;;  %v811_v6 = vadd.f32 %v803_v2, %v760_v35  ;;  %v842_v39 = vld [vmem:[#allocation6 + $0x360] sm:$0xff]  ;;  %v843_v35 = vld [vmem:[#allocation6 + $0x368] sm:$0xff] }
 0x131   :  { %v812_v15 = vadd.f32 %v804_v0, %v761_v29  ;;  %v813_v13 = vadd.f32 %v805_v38, %v762_v23  ;;  %v821_v14 = vmul.f32 %v819_v60, %v787_v57  ;;  %v822_v20 = vmul.f32 %v819_v60, %v788_v48  ;;  %v889_v62 = vld [vmem:[#allocation6 + $0x380] sm:$0xff]  ;;  %v890_v38 = vld [vmem:[#allocation6 + $0x388] sm:$0xff] }
 0x132   :  { %v823_v8 = vmul.f32 %v819_v60, %v789_v34  ;;  %v824_v9 = vmul.f32 %v819_v60, %v790_v32  ;;  %v825_v12 = vmul.f32 %v819_v60, %v791_v52  ;;  %v826_v21 = vmul.f32 %v819_v60, %v792_v53  ;;  %s12436_s26 = spop %11781 }
 0x133   :  { %v827_v22 = vmul.f32 %v819_v60, %v793_v61  ;;  %v828_v18 = vmul.f32 %v819_v60, %v794_v40  ;;  %v814_v10 = vadd.f32 %v806_v3, %v763_v31  ;;  %v815_v16 = vadd.f32 %v807_v55, %v764_v28  ;;  %v892_v3 = vld [vmem:[#allocation6 + $0x398] sm:$0xff]  ;;  %s12454_s27 = spop %11783 }
 0x134   :  { %v829_v17 = vadd.f32 %v821_v14, %v778_v44  ;;  %v830_v37 = vadd.f32 %v822_v20, %v779_v45  ;;  %v831_v29 = vadd.f32 %v823_v8, %v780_v47  ;;  %v832_v23 = vadd.f32 %v824_v9, %v781_v42  ;;  %v895_v20 = vld [vmem:[#allocation6 + $0x3b0] sm:$0xff] }
 0x135   :  { %v833_v24 = vadd.f32 %v825_v12, %v782_v43  ;;  %v834_v36 = vadd.f32 %v826_v21, %v783_v49  ;;  %v851_v46 = vmul.f32 %v849_v54, %v838_v11  ;;  %v852_v51 = vmul.f32 %v849_v54, %v839_v19 }
 0x136   :  { %v853_v30 = vmul.f32 %v849_v54, %v840_v25  ;;  %v854_v27 = vmul.f32 %v849_v54, %v841_v26  ;;  %v835_v57 = vadd.f32 %v827_v22, %v784_v50  ;;  %v836_v48 = vadd.f32 %v828_v18, %v785_v58 }
 0x137   :  { %v855_v34 = vmul.f32 %v849_v54, %v842_v39  ;;  %v856_v32 = vmul.f32 %v849_v54, %v843_v35  ;;  %v857_v31 = vmul.f32 %v849_v54, %v844_v33  ;;  %v858_v28 = vmul.f32 %v849_v54, %v845_v41  ;;  %v891_v54 = vld [vmem:[#allocation6 + $0x390] sm:$0xff]  ;;  %s12460_s28 = spop %11785 }
 0x138   :  { %v859_v44 = vadd.f32 %v851_v46, %v808_v7  ;;  %v860_v45 = vadd.f32 %v852_v51, %v809_v4  ;;  %v861_v52 = vadd.f32 %v853_v30, %v810_v5  ;;  %v862_v53 = vadd.f32 %v854_v27, %v811_v6  ;;  %v893_v6 = vld [vmem:[#allocation6 + $0x3a0] sm:$0xff] }
 0x139   :  { %v863_v47 = vadd.f32 %v855_v34, %v812_v15  ;;  %v864_v42 = vadd.f32 %v856_v32, %v813_v13  ;;  %v872_v43 = vmul.f32 %v870_v56, %v838_v11  ;;  %v873_v49 = vmul.f32 %v870_v56, %v839_v19  ;;  %v894_v15 = vld [vmem:[#allocation6 + $0x3a8] sm:$0xff]  ;;  %v940_v46 = vld [vmem:[#allocation6 + $0x3c0] sm:$0xff]  ;;  %v942_v34 = vld [vmem:[#allocation6 + $0x3d0] sm:$0xff] }
 0x13a   :  { %v874_v61 = vmul.f32 %v870_v56, %v840_v25  ;;  %v875_v40 = vmul.f32 %v870_v56, %v841_v26  ;;  %v876_v59 = vmul.f32 %v870_v56, %v842_v39  ;;  %v877_v60 = vmul.f32 %v870_v56, %v843_v35  ;;  %v943_v32 = vld [vmem:[#allocation6 + $0x3d8] sm:$0xff] }
 0x13b   :  { %v878_v50 = vmul.f32 %v870_v56, %v844_v33  ;;  %v879_v58 = vmul.f32 %v870_v56, %v845_v41  ;;  %v865_v63 = vadd.f32 %v857_v31, %v814_v10  ;;  %v866_v1 = vadd.f32 %v858_v28, %v815_v16  ;;  %v896_v56 = vld [vmem:[#allocation6 + $0x3b8] sm:$0xff] }
 0x13c   :  { %v880_v2 = vadd.f32 %v872_v43, %v829_v17  ;;  %v881_v0 = vadd.f32 %v873_v49, %v830_v37  ;;  %v882_v55 = vadd.f32 %v874_v61, %v831_v29  ;;  %v883_v7 = vadd.f32 %v875_v40, %v832_v23  ;;  %v946_v61 = vld [vmem:[#allocation6 + $0x3f0] sm:$0xff]  ;;  %v947_v40 = vld [vmem:[#allocation6 + $0x3f8] sm:$0xff] }
 0x13d   :  { %v884_v4 = vadd.f32 %v876_v59, %v833_v24  ;;  %v885_v5 = vadd.f32 %v877_v60, %v834_v36  ;;  %v886_v13 = vadd.f32 %v878_v50, %v835_v57  ;;  %v887_v14 = vadd.f32 %v879_v58, %v836_v48  ;;  %v941_v48 = vld [vmem:[#allocation6 + $0x3c8] sm:$0xff] }
 0x13e   :  { %v900_v8 = vstv %s11756_s8  ;;  %v921_v9 = vstv %s11758_s18  ;;  %v951_v25 = vstv %s11760_s19  ;;  %v972_v26 = vstv %s11762_s20 }
 0x13f   :  { %v902_v11 = vmul.f32 %v900_v8, %v889_v62  ;;  %v903_v12 = vmul.f32 %v900_v8, %v890_v38  ;;  %v904_v21 = vmul.f32 %v900_v8, %v891_v54  ;;  %v905_v22 = vmul.f32 %v900_v8, %v892_v3 }
 0x140   :  { %v906_v18 = vmul.f32 %v900_v8, %v893_v6  ;;  %v907_v19 = vmul.f32 %v900_v8, %v894_v15  ;;  %v908_v10 = vmul.f32 %v900_v8, %v895_v20  ;;  %v909_v16 = vmul.f32 %v900_v8, %v896_v56 }
 0x141   :  { %v910_v17 = vadd.f32 %v902_v11, %v859_v44  ;;  %v911_v37 = vadd.f32 %v903_v12, %v860_v45  ;;  %v912_v39 = vadd.f32 %v904_v21, %v861_v52  ;;  %v913_v35 = vadd.f32 %v905_v22, %v862_v53  ;;  %v944_v52 = vld [vmem:[#allocation6 + $0x3e0] sm:$0xff]  ;;  %v945_v53 = vld [vmem:[#allocation6 + $0x3e8] sm:$0xff] }
 0x142   :  { %v914_v29 = vadd.f32 %v906_v18, %v863_v47  ;;  %v915_v23 = vadd.f32 %v907_v19, %v864_v42  ;;  %v923_v24 = vmul.f32 %v921_v9, %v889_v62  ;;  %v924_v36 = vmul.f32 %v921_v9, %v890_v38  ;;  %v991_v18 = vld [vmem:[#allocation6 + $0x400] sm:$0xff]  ;;  %v992_v19 = vld [vmem:[#allocation6 + $0x408] sm:$0xff] }
 0x143   :  { %v925_v33 = vmul.f32 %v921_v9, %v891_v54  ;;  %v926_v41 = vmul.f32 %v921_v9, %v892_v3  ;;  %v927_v51 = vmul.f32 %v921_v9, %v893_v6  ;;  %v928_v30 = vmul.f32 %v921_v9, %v894_v15  ;;  %s12470_s29 = spop %11787 }
 0x144   :  { %v929_v27 = vmul.f32 %v921_v9, %v895_v20  ;;  %v930_v57 = vmul.f32 %v921_v9, %v896_v56  ;;  %v916_v31 = vadd.f32 %v908_v10, %v865_v63  ;;  %v917_v28 = vadd.f32 %v909_v16, %v866_v1  ;;  %s11790_s16 = spop %11789 }
 0x145   :  { %v931_v44 = vadd.f32 %v923_v24, %v880_v2  ;;  %v932_v45 = vadd.f32 %v924_v36, %v881_v0  ;;  %v933_v47 = vadd.f32 %v925_v33, %v882_v55  ;;  %v934_v42 = vadd.f32 %v926_v41, %v883_v7  ;;  %v997_v24 = vld [vmem:[#allocation6 + $0x430] sm:$0xff]  ;;  %v998_v36 = vld [vmem:[#allocation6 + $0x438] sm:$0xff]  ;;  %s12494_s17 = spop %11791 }
 0x146   :  { %v935_v43 = vadd.f32 %v927_v51, %v884_v4  ;;  %v936_v49 = vadd.f32 %v928_v30, %v885_v5  ;;  %v953_v59 = vmul.f32 %v951_v25, %v940_v46  ;;  %v954_v60 = vmul.f32 %v951_v25, %v941_v48 }
 0x147   :  { %v955_v50 = vmul.f32 %v951_v25, %v942_v34  ;;  %v956_v58 = vmul.f32 %v951_v25, %v943_v32  ;;  %v937_v62 = vadd.f32 %v929_v27, %v886_v13  ;;  %v938_v63 = vadd.f32 %v930_v57, %v887_v14 }
 0x148   :  { %v957_v1 = vmul.f32 %v951_v25, %v944_v52  ;;  %v958_v2 = vmul.f32 %v951_v25, %v945_v53  ;;  %v959_v0 = vmul.f32 %v951_v25, %v946_v61  ;;  %v960_v38 = vmul.f32 %v951_v25, %v947_v40  ;;  %v993_v25 = vld [vmem:[#allocation6 + $0x410] sm:$0xff] }
 0x149   :  { %v12376_v54 = vadd.f32 %v953_v59, %v910_v17  ;;  %v12378_v3 = vadd.f32 %v954_v60, %v911_v37  ;;  %v12382_v55 = vadd.f32 %v955_v50, %v912_v39  ;;  %v12384_v7 = vadd.f32 %v956_v58, %v913_v35  ;;  %v994_v37 = vld [vmem:[#allocation6 + $0x418] sm:$0xff]  ;;  %v995_v39 = vld [vmem:[#allocation6 + $0x420] sm:$0xff]  ;;  %v996_v35 = vld [vmem:[#allocation6 + $0x428] sm:$0xff] }
 0x14a   :  { %v12386_v4 = vadd.f32 %v957_v1, %v914_v29  ;;  %v12388_v5 = vadd.f32 %v958_v2, %v915_v23  ;;  %v974_v6 = vmul.f32 %v972_v26, %v940_v46  ;;  %v975_v15 = vmul.f32 %v972_v26, %v941_v48  ;;  %v1048_v50 = vld [vmem:[#allocation6 + $0x470] sm:$0xff]  ;;  %v1049_v58 = vld [vmem:[#allocation6 + $0x478] sm:$0xff] }
 0x14b   :  { %14067 = vst [vmem:[#allocation20_spill] sm:$0xff] %v12376_v54  ;;  %v976_v13 = vmul.f32 %v972_v26, %v942_v34  ;;  %v977_v14 = vmul.f32 %v972_v26, %v943_v32  ;;  %v978_v20 = vmul.f32 %v972_v26, %v944_v52  ;;  %v979_v56 = vmul.f32 %v972_v26, %v945_v53  ;;  %s11794_s30 = spop %11793 }
 0x14c   :  { %14068 = vst [vmem:[#allocation21_spill] sm:$0xff] %v12378_v3  ;;  %v980_v8 = vmul.f32 %v972_v26, %v946_v61  ;;  %v981_v9 = vmul.f32 %v972_v26, %v947_v40  ;;  %v12394_v11 = vadd.f32 %v959_v0, %v916_v31  ;;  %v12396_v12 = vadd.f32 %v960_v38, %v917_v28  ;;  %v1042_v31 = vld [vmem:[#allocation6 + $0x440] sm:$0xff]  ;;  %v1043_v28 = vld [vmem:[#allocation6 + $0x448] sm:$0xff]  ;;  %v12520_v3 = vld [vmem:[#allocation6 + $0x4f8] sm:$0xff] }
 0x14d   :  { %14069 = vst [vmem:[#allocation22_spill] sm:$0xff] %v12382_v55  ;;  %v12398_v21 = vadd.f32 %v974_v6, %v931_v44  ;;  %v12400_v22 = vadd.f32 %v975_v15, %v932_v45  ;;  %v12404_v10 = vadd.f32 %v976_v13, %v933_v47  ;;  %v12406_v26 = vadd.f32 %v977_v14, %v934_v42  ;;  %v1044_v44 = vld [vmem:[#allocation6 + $0x450] sm:$0xff]  ;;  %v1045_v42 = vld [vmem:[#allocation6 + $0x458] sm:$0xff] }
 0x14e   :  { %14070 = vst [vmem:[#allocation23_spill] sm:$0xff] %v12384_v7  ;;  %v12408_v16 = vadd.f32 %v978_v20, %v935_v43  ;;  %v12410_v17 = vadd.f32 %v979_v56, %v936_v49  ;;  %v12412_v29 = vadd.f32 %v980_v8, %v937_v62  ;;  %v12414_v23 = vadd.f32 %v981_v9, %v938_v63  ;;  %v1046_v43 = vld [vmem:[#allocation6 + $0x460] sm:$0xff]  ;;  %v1047_v49 = vld [vmem:[#allocation6 + $0x468] sm:$0xff]  ;;  %v1529_v8 = vld [vmem:[#allocation4 + $0x130] sm:$0xff] }
 0x14f   :  { %14071 = vst [vmem:[#allocation24_spill] sm:$0xff] %v12386_v4  ;;  %v1002_v33 = vstv %s12370_s0  ;;  %v1023_v41 = vstv %s12372_s21  ;;  %v1053_v30 = vstv %s12374_s22  ;;  %v1074_v27 = vstv %s12380_s23  ;;  %v1530_v9 = vld [vmem:[#allocation4 + $0x138] sm:$0xff] }
 0x150   :  { %14072 = vst [vmem:[#allocation25_spill] sm:$0xff] %v12388_v5  ;;  %v12420_v46 = vmul.f32 %v1002_v33, %v991_v18  ;;  %v12422_v51 = vmul.f32 %v1002_v33, %v992_v19  ;;  %v12428_v57 = vmul.f32 %v1002_v33, %v993_v25  ;;  %v12430_v48 = vmul.f32 %v1002_v33, %v994_v37  ;;  %v12531_v7 = vld [vmem:[#allocation6 + $0x4b8] sm:$0xff] }
 0x151   :  { %14073 = vst [vmem:[#allocation26_spill] sm:$0xff] %v12398_v21  ;;  %v12432_v34 = vmul.f32 %v1002_v33, %v995_v39  ;;  %v12434_v32 = vmul.f32 %v1002_v33, %v996_v35  ;;  %v12438_v45 = vmul.f32 %v1002_v33, %v997_v24  ;;  %v12440_v52 = vmul.f32 %v1002_v33, %v998_v36  ;;  %v12562_v55 = vld [vmem:[#allocation6 + $0x578] sm:$0xff] }
 0x152   :  { %14074 = vst [vmem:[#allocation27_spill] sm:$0xff] %v12400_v22  ;;  %v12442_v53 = vmul.f32 %v1023_v41, %v991_v18  ;;  %v12444_v47 = vmul.f32 %v1023_v41, %v992_v19  ;;  %v12446_v61 = vmul.f32 %v1023_v41, %v993_v25  ;;  %v12448_v40 = vmul.f32 %v1023_v41, %v994_v37  ;;  %v12586_v22 = vld [vmem:[#allocation6 + $0x4a0] sm:$0xff] }
 0x153   :  { %14075 = vst [vmem:[#allocation28_spill] sm:$0xff] %v12420_v46  ;;  %v12450_v59 = vmul.f32 %v1023_v41, %v995_v39  ;;  %v12452_v60 = vmul.f32 %v1023_v41, %v996_v35  ;;  %v1031_v62 = vmul.f32 %v1023_v41, %v997_v24  ;;  %v1032_v63 = vmul.f32 %v1023_v41, %v998_v36  ;;  %v1527_v39 = vld [vmem:[#allocation4 + $0x120] sm:$0xff]  ;;  %v1528_v35 = vld [vmem:[#allocation4 + $0x128] sm:$0xff]  ;;  %v1525_v24 = vld [vmem:[#allocation4 + $0x110] sm:$0xff] }
 0x154   :  { %14076 = vst [vmem:[#allocation29_spill] sm:$0xff] %v12422_v51  ;;  %v12456_v1 = vmul.f32 %v1053_v30, %v1042_v31  ;;  %v12458_v2 = vmul.f32 %v1053_v30, %v1043_v28  ;;  %v12462_v0 = vmul.f32 %v1053_v30, %v1044_v44  ;;  %v12464_v38 = vmul.f32 %v1053_v30, %v1045_v42  ;;  %v12518_v51 = vld [vmem:[#allocation6 + $0x4f0] sm:$0xff] }
 0x155   :  { %14077 = vst [vmem:[#allocation30_spill] sm:$0xff] %v12428_v57  ;;  %v12466_v6 = vmul.f32 %v1053_v30, %v1046_v43  ;;  %v12468_v15 = vmul.f32 %v1053_v30, %v1047_v49  ;;  %v12472_v13 = vmul.f32 %v1053_v30, %v1048_v50  ;;  %v12474_v14 = vmul.f32 %v1053_v30, %v1049_v58 }
 0x156   :  { %14078 = vst [vmem:[#allocation31_spill] sm:$0xff] %v12430_v48  ;;  %v12476_v20 = vmul.f32 %v1074_v27, %v1042_v31  ;;  %v12478_v56 = vmul.f32 %v1074_v27, %v1043_v28  ;;  %v12480_v18 = vmul.f32 %v1074_v27, %v1044_v44  ;;  %v12482_v19 = vmul.f32 %v1074_v27, %v1045_v42  ;;  %v1526_v31 = vld [vmem:[#allocation4 + $0x118] sm:$0xff]  ;;  %v12496_v28 = vld [vmem:[#allocation4 + $0x100] sm:$0xff]  ;;  %v12498_v44 = vld [vmem:[#allocation4 + $0x108] sm:$0xff] }
 0x157   :  { %14079 = vst [vmem:[#allocation32_spill] sm:$0xff] %v12432_v34  ;;  %v12484_v25 = vmul.f32 %v1074_v27, %v1046_v43  ;;  %v12486_v37 = vmul.f32 %v1074_v27, %v1047_v49  ;;  %v1082_v36 = vmul.f32 %v1074_v27, %v1048_v50  ;;  %v1083_v33 = vmul.f32 %v1074_v27, %v1049_v58  ;;  %v12529_v48 = vld [vmem:[#allocation6 + $0x4b0] sm:$0xff] }
 0x158   :  { %14080 = vst [vmem:[#allocation33_spill] sm:$0xff] %v12434_v32  ;;  %v12489_v41 = vstv %s12390_s3  ;;  %v12492_v30 = vstv %s12392_s2  ;;  %v12501_v42 = vstv %s12402_s24  ;;  %v12504_v43 = vstv %s12418_s25  ;;  %v12568_v32 = vld [vmem:[#allocation6 + $0x4e0] sm:$0xff] }
 0x159   :  { %14081 = vst [vmem:[#allocation34_spill] sm:$0xff] %v12442_v53  ;;  %v12507_v49 = vstv %s12426_s7  ;;  %v12510_v50 = vstv %s12436_s26  ;;  %v12513_v27 = vstv %s12454_s27  ;;  %v12516_v58 = vstv %s12460_s28  ;;  %v12588_v53 = vld [vmem:[#allocation6 + $0x4a8] sm:$0xff] }
 0x15a   :  { %14082 = vst [vmem:[#allocation35_spill] sm:$0xff] %v12444_v47  ;;  %v12523_v46 = vstv %s12470_s29  ;;  %v12525_v54 = vstv %s11790_s16  ;;  %v1287_v5 = vmul.f32 %v12516_v58, %v12562_v55  ;;  %v1037_v47 = vadd.f32 %v12450_v59, %v12408_v16 }
 0x15b   :  { %14083 = vst [vmem:[#allocation36_spill] sm:$0xff] %v12456_v1  ;;  %v11839_v1 = vpack.i.bf16 %v1528_v35, %v1527_v39  ;;  %v1040_v39 = vadd.f32 %v1032_v63, %v12414_v23  ;;  %v1133_v35 = vmul.f32 %v12492_v30, %v12529_v48  ;;  %v12554_v23 = vld [vmem:[#allocation6 + $0x538] sm:$0xff]  ;;  %v12558_v63 = vld [vmem:[#allocation6 + $0x570] sm:$0xff]  ;;  %v1038_v21 = vadd.f32 %v12452_v60, %v12410_v17  ;;  %v12605_v60 = vld [vmem:[#allocation6 + $0x560] sm:$0xff] }
 0x15c   :  { %14084 = vst [vmem:[#allocation37_spill] sm:$0xff] %v12458_v2  ;;  %v11834_v2 = vpack.i.bf16 %v1530_v9, %v1529_v8  ;;  %v12535_v8 = vstv %s11794_s30  ;;  %v1039_v9 = vadd.f32 %v1031_v62, %v12412_v29  ;;  %v1185_v29 = vmul.f32 %v12504_v43, %v12520_v3 }
 0x15d   :  { %14085 = vst [vmem:[#allocation38_spill] sm:$0xff] %v12462_v0  ;;  %v11849_v0 = vpack.i.bf16 %v12498_v44, %v12496_v28  ;;  %11840 = vrot.lane.b32.xlu0 %v11839_v1, %s12130_s1  ;;  %v12545_v28 = vld [vmem:[#allocation6 + $0x5b8] sm:$0xff]  ;;  %v1134_v1 = vmul.f32 %v12492_v30, %v12531_v7  ;;  %v1091_v57 = vadd.f32 %v1083_v33, %v1040_v39  ;;  %v12580_v39 = vld [vmem:[#allocation6 + $0x4e8] sm:$0xff] }
 0x15e   :  { %14086 = vst [vmem:[#allocation39_spill] sm:$0xff] %v12464_v38  ;;  %v11844_v38 = vpack.i.bf16 %v1526_v31, %v1525_v24  ;;  %11835 = vrot.lane.b32.xlu1 %v11834_v2, %s12130_s1  ;;  %v12541_v24 = vld [vmem:[#allocation6 + $0x530] sm:$0xff]  ;;  %v1184_v2 = vmul.f32 %v12504_v43, %v12518_v51  ;;  %v1090_v44 = vadd.f32 %v1082_v36, %v1039_v9  ;;  %v12576_v33 = vld [vmem:[#allocation6 + $0x5f8] sm:$0xff] }
 0x15f   :  { %14087 = vst [vmem:[#allocation40_spill] sm:$0xff] %v12466_v6  ;;  %v12543_v31 = vld [vmem:[#allocation6 + $0x5b0] sm:$0xff]  ;;  %v1235_v62 = vmul.f32 %v12510_v50, %v12541_v24  ;;  %v1338_v36 = vmul.f32 %v12525_v54, %v12545_v28  ;;  %v1183_v17 = vmul.f32 %v12504_v43, %v12580_v39 }
 0x160   :  { %14088 = vst [vmem:[#allocation41_spill] sm:$0xff] %v12468_v15  ;;  %11845 = vrot.lane.b32.xlu2 %v11844_v38, %s12130_s1  ;;  %v1236_v38 = vmul.f32 %v12510_v50, %v12554_v23  ;;  %v1286_v15 = vmul.f32 %v12516_v58, %v12558_v63  ;;  %v12566_v6 = vld [vmem:[#allocation6 + $0x5f0] sm:$0xff]  ;;  %v1337_v34 = vmul.f32 %v12525_v54, %v12543_v31 }
 0x161   :  { %14089 = vst [vmem:[#allocation42_spill] sm:$0xff] %v12476_v20  ;;  %v1388_v9 = vmul.f32 %v12535_v8, %v12566_v6  ;;  %v1141_v4 = vadd.f32 %v1133_v35, %v1090_v44  ;;  %v1389_v20 = vmul.f32 %v12535_v8, %v12576_v33  ;;  %v1132_v35 = vmul.f32 %v12492_v30, %v12588_v53  ;;  %v12600_v44 = vld [vmem:[#allocation6 + $0x528] sm:$0xff] }
 0x162   :  { %14090 = vst [vmem:[#allocation43_spill] sm:$0xff] %v12478_v56  ;;  %v1142_v56 = vadd.f32 %v1134_v1, %v1091_v57  ;;  %v1182_v57 = vmul.f32 %v12504_v43, %v12568_v32  ;;  %v12598_v1 = vld [vmem:[#allocation6 + $0x520] sm:$0xff] }
 0x163   :  { %14091 = vst [vmem:[#allocation44_spill] sm:$0xff] %v12523_v46  ;;  %v1192_v16 = vadd.f32 %v1184_v2, %v1141_v4  ;;  %v1234_v4 = vmul.f32 %v12510_v50, %v12600_v44  ;;  %v12629_v46 = vld [vmem:[#allocation6 + $0x5e8] sm:$0xff] }
 0x164   :  { %14092 = vst [vmem:[#allocation45_spill] sm:$0xff] %v12545_v28  ;;  %v1193_v59 = vadd.f32 %v1185_v29, %v1142_v56  ;;  %v12609_v28 = vld [vmem:[#allocation6 + $0x5a8] sm:$0xff] }
 0x165   :  { %14093 = vst [vmem:[#allocation46_spill] sm:$0xff] %v12566_v6  ;;  %v1131_v6 = vmul.f32 %v12492_v30, %v12586_v22  ;;  %v12616_v56 = vld [vmem:[#allocation6 + $0x568] sm:$0xff] }
 0x166   :  { %14094 = vst [vmem:[#allocation47_spill] sm:$0xff] %v12568_v32  ;;  %v1233_v32 = vmul.f32 %v12510_v50, %v12598_v1  ;;  %11850 = vrot.lane.b32.xlu1 %v11849_v0, %s12130_s1  ;;  %v1244_v2 = vadd.f32 %v1236_v38, %v1193_v59  ;;  %v1035_v59 = vadd.f32 %v12446_v61, %v12404_v10 }
 0x167   :  { %14095 = vst [vmem:[#allocation48_spill] sm:$0xff] %v12576_v33  ;;  %v1088_v33 = vadd.f32 %v12484_v25, %v1037_v47  ;;  %v1284_v47 = vmul.f32 %v12516_v58, %v12605_v60  ;;  %v1243_v25 = vadd.f32 %v1235_v62, %v1192_v16  ;;  %v12635_v16 = vld [vmem:[#allocation6 + $0x490] sm:$0xff] }
 0x168   :  { %14096 = vst [vmem:[#allocation49_spill] sm:$0xff] %v12580_v39  ;;  %v1285_v39 = vmul.f32 %v12516_v58, %v12616_v56  ;;  %v1295_v38 = vadd.f32 %v1287_v5, %v1244_v2  ;;  %v1129_v5 = vmul.f32 %v12492_v30, %v12635_v16 }
 0x169   :  { %14097 = vst [vmem:[#allocation50_spill] sm:$0xff] %v12586_v22  ;;  %v12607_v22 = vld [vmem:[#allocation6 + $0x5a0] sm:$0xff]  ;;  %v1139_v29 = vadd.f32 %v1131_v6, %v1088_v33  ;;  %v1294_v62 = vadd.f32 %v1286_v15, %v1243_v25  ;;  %v1387_v33 = vmul.f32 %v12535_v8, %v12629_v46  ;;  %v12647_v15 = vld [vmem:[#allocation6 + $0x4d8] sm:$0xff] }
 0x16a   :  { %14098 = vst [vmem:[#allocation51_spill] sm:$0xff] %v12588_v53  ;;  %v1089_v53 = vadd.f32 %v12486_v37, %v1038_v21  ;;  %v12623_v21 = vld [vmem:[#allocation6 + $0x5e0] sm:$0xff]  ;;  %v1346_v25 = vadd.f32 %v1338_v36, %v1295_v38  ;;  %v12659_v38 = vld [vmem:[#allocation6 + $0x518] sm:$0xff] }
 0x16b   :  { %14099 = vst [vmem:[#allocation52_spill] sm:$0xff] %v12598_v1  ;;  %v1335_v1 = vmul.f32 %v12525_v54, %v12607_v22  ;;  %v1386_v0 = vmul.f32 %v12535_v8, %v12623_v21  ;;  %v1190_v6 = vadd.f32 %v1182_v57, %v1139_v29  ;;  %v1345_v57 = vadd.f32 %v1337_v34, %v1294_v62  ;;  %v12657_v34 = vld [vmem:[#allocation6 + $0x510] sm:$0xff] }
 0x16c   :  { %14100 = vst [vmem:[#allocation53_spill] sm:$0xff] %v12600_v44  ;;  %v1140_v37 = vadd.f32 %v1132_v35, %v1089_v53  ;;  %v1336_v44 = vmul.f32 %v12525_v54, %v12609_v28  ;;  %v12637_v53 = vld [vmem:[#allocation6 + $0x4d0] sm:$0xff] }
 0x16d   :  { %14101 = vst [vmem:[#allocation54_spill] sm:$0xff] %v12607_v22  ;;  %v12643_v22 = vld [vmem:[#allocation6 + $0x498] sm:$0xff]  ;;  %v1241_v2 = vadd.f32 %v1233_v32, %v1190_v6  ;;  %v1396_v61 = vadd.f32 %v1388_v9, %v1345_v57 }
 0x16e   :  { %14102 = vst [vmem:[#allocation55_spill] sm:$0xff] %v12609_v28  ;;  %v1191_v35 = vadd.f32 %v1183_v17, %v1140_v37  ;;  %v1036_v28 = vadd.f32 %v12448_v40, %v12406_v26  ;;  %v1130_v29 = vmul.f32 %v12492_v30, %v12643_v22  ;;  %v1086_v37 = vadd.f32 %v12480_v18, %v1035_v59  ;;  %v12669_v6 = vld [vmem:[#allocation6 + $0x598] sm:$0xff] }
 0x16f   :  { %14103 = vst [vmem:[#allocation56_spill] sm:$0xff] %v12629_v46  ;;  %v1180_v26 = vmul.f32 %v12504_v43, %v12637_v53  ;;  %v1397_v40 = vadd.f32 %v1389_v20, %v1346_v25  ;;  %v1292_v46 = vadd.f32 %v1284_v47, %v1241_v2  ;;  %v1231_v18 = vmul.f32 %v12510_v50, %v12657_v34  ;;  %v12667_v47 = vld [vmem:[#allocation6 + $0x550] sm:$0xff] }
 0x170   :  { %14104 = vst [vmem:[#allocation57_spill] sm:$0xff] %v12635_v16  ;;  %v1242_v17 = vadd.f32 %v1234_v4, %v1191_v35  ;;  %v1087_v10 = vadd.f32 %v12482_v19, %v1036_v28  ;;  %v1181_v16 = vmul.f32 %v12504_v43, %v12647_v15  ;;  %v1137_v36 = vadd.f32 %v1129_v5, %v1086_v37  ;;  %v12663_v19 = vld [vmem:[#allocation6 + $0x590] sm:$0xff]  ;;  %v12671_v5 = vld [vmem:[#allocation6 + $0x558] sm:$0xff] }
 0x171   :  { %v1546_v28 = vmax.f32 %v1396_v61, 0.0  ;;  %v1547_v4 = vmax.f32 %v1397_v40, 0.0  ;;  %v1343_v9 = vadd.f32 %v1335_v1, %v1292_v46  ;;  %v1232_v20 = vmul.f32 %v12510_v50, %v12659_v38 }
 0x172   :  { %v1293_v32 = vadd.f32 %v1285_v39, %v1242_v17  ;;  %v1138_v62 = vadd.f32 %v1130_v29, %v1087_v10  ;;  %v1188_v35 = vadd.f32 %v1180_v26, %v1137_v36  ;;  %v1282_v57 = vmul.f32 %v12516_v58, %v12667_v47  ;;  %v12683_v10 = vld [vmem:[#allocation6 + $0x5d8] sm:$0xff] }
 0x173   :  { %v11854_v25 = vpack.i.bf16 %v1547_v4, %v1546_v28  ;;  %v1394_v2 = vadd.f32 %v1386_v0, %v1343_v9  ;;  %v1283_v46 = vmul.f32 %v12516_v58, %v12671_v5  ;;  %v1333_v1 = vmul.f32 %v12525_v54, %v12663_v19 }
 0x174   :  { %v1344_v39 = vadd.f32 %v1336_v44, %v1293_v32  ;;  %v1189_v59 = vadd.f32 %v1181_v16, %v1138_v62  ;;  %v1239_v17 = vadd.f32 %v1231_v18, %v1188_v35  ;;  %v1334_v44 = vmul.f32 %v12525_v54, %v12669_v6  ;;  %v12681_v16 = vld [vmem:[#allocation6 + $0x5d0] sm:$0xff] }
 0x175   :  { %11855 = vrot.lane.b32.xlu2 %v11854_v25, %s12130_s1  ;;  %v1544_v26 = vmax.f32 %v1394_v2, 0.0  ;;  %v1384_v0 = vmul.f32 %v12535_v8, %v12681_v16  ;;  %v1385_v61 = vmul.f32 %v12535_v8, %v12683_v10  ;;  %v1019_v62 = vadd.f32 %v12440_v52, %v12396_v12 }
 0x176   :  { %v1395_v29 = vadd.f32 %v1387_v33, %v1344_v39  ;;  %v1240_v37 = vadd.f32 %v1232_v20, %v1189_v59  ;;  %v1018_v33 = vadd.f32 %v12438_v45, %v12394_v11  ;;  %v1290_v32 = vadd.f32 %v1282_v57, %v1239_v17 }
 0x177   :  { %v1112_v28 = vmul.f32 %v12489_v41, %v12529_v48  ;;  %v1113_v4 = vmul.f32 %v12489_v41, %v12531_v7  ;;  %v1163_v9 = vmul.f32 %v12501_v42, %v12518_v51  ;;  %v1070_v45 = vadd.f32 %v12474_v14, %v1019_v62 }
 0x178   :  { %v1545_v40 = vmax.f32 %v1395_v29, 0.0  ;;  %v1291_v36 = vadd.f32 %v1283_v46, %v1240_v37  ;;  %v1069_v18 = vadd.f32 %v12472_v13, %v1018_v33  ;;  %v1341_v39 = vadd.f32 %v1333_v1, %v1290_v32  ;;  %v14106_v29 = vld [vmem:[#allocation45_spill] sm:$0xff]  ;;  %v12720_v37 = vld [vmem:[#allocation6 + $0x480] sm:$0xff] }
 0x179   :  { %v12703_v35 = vstv %s12494_s17  ;;  %v1164_v12 = vmul.f32 %v12501_v42, %v12520_v3  ;;  %v1214_v48 = vmul.f32 %v12507_v49, %v12541_v24  ;;  %v1121_v13 = vadd.f32 %v1113_v4, %v1070_v45  ;;  %v14105_v3 = vld [vmem:[#allocation44_spill] sm:$0xff]  ;;  %v1414_v33 = vld [vmem:[#allocation4 + $0x78] sm:$0xff]  ;;  %v14112_v4 = vld [vmem:[#allocation35_spill] sm:$0xff] }
 0x17a   :  { %v11859_v20 = vpack.i.bf16 %v1545_v40, %v1544_v26  ;;  %v1342_v11 = vadd.f32 %v1334_v44, %v1291_v36  ;;  %v1120_v59 = vadd.f32 %v1112_v28, %v1069_v18  ;;  %v1392_v7 = vadd.f32 %v1384_v0, %v1341_v39  ;;  %v12722_v44 = vld [vmem:[#allocation6 + $0x4c0] sm:$0xff]  ;;  %v14108_v0 = vld [vmem:[#allocation48_spill] sm:$0xff] }
 0x17b   :  { %v1215_v51 = vmul.f32 %v12507_v49, %v12554_v23  ;;  %v1265_v14 = vmul.f32 %v12513_v27, %v12558_v63  ;;  %v1266_v25 = vmul.f32 %v12513_v27, %v12562_v55  ;;  %v1316_v2 = vmul.f32 %v14105_v3, %v12543_v31  ;;  %v14107_v26 = vld [vmem:[#allocation46_spill] sm:$0xff]  ;;  %v12730_v36 = vld [vmem:[#allocation6 + $0x4c8] sm:$0xff] }
 0x17c   :  { %11860 = vrot.lane.b32.xlu1 %v11859_v20, %s12130_s1  ;;  %v1393_v52 = vadd.f32 %v1385_v61, %v1342_v11  ;;  %v1171_v57 = vadd.f32 %v1163_v9, %v1120_v59  ;;  %v1542_v46 = vmax.f32 %v1392_v7, 0.0  ;;  %v1172_v1 = vadd.f32 %v1164_v12, %v1121_v13  ;;  %v1413_v61 = vld [vmem:[#allocation4 + $0x70] sm:$0xff]  ;;  %v14109_v31 = vld [vmem:[#allocation26_spill] sm:$0xff]  ;;  %v14111_v28 = vld [vmem:[#allocation27_spill] sm:$0xff] }
 0x17d   :  { %v1317_v17 = vmul.f32 %v14105_v3, %v14106_v29  ;;  %v1367_v63 = vmul.f32 %v12703_v35, %v14107_v26  ;;  %v1368_v55 = vmul.f32 %v12703_v35, %v14108_v0  ;;  %v14110_v40 = vld [vmem:[#allocation34_spill] sm:$0xff]  ;;  %v1034_v9 = vadd.f32 %v14112_v4, %v14111_v28  ;;  %v12734_v20 = vld [vmem:[#allocation6 + $0x488] sm:$0xff] }
 0x17e   :  { %v1543_v24 = vmax.f32 %v1393_v52, 0.0  ;;  %v1222_v23 = vadd.f32 %v1214_v48, %v1171_v57  ;;  %v1033_v32 = vadd.f32 %v14110_v40, %v14109_v31  ;;  %v1223_v18 = vadd.f32 %v1215_v51, %v1172_v1  ;;  %v14113_v45 = vld [vmem:[#allocation42_spill] sm:$0xff]  ;;  %v14114_v51 = vld [vmem:[#allocation43_spill] sm:$0xff] }
 0x17f   :  { %v1127_v39 = vmul.f32 %v12492_v30, %v12720_v37  ;;  %v1128_v12 = vmul.f32 %v12492_v30, %v12734_v20  ;;  %v1178_v48 = vmul.f32 %v12504_v43, %v12722_v44  ;;  %v12743_v7 = vld [vmem:[#allocation6 + $0x500] sm:$0xff]  ;;  %v11869_v13 = vpack.i.bf16 %v1414_v33, %v1413_v61  ;;  %v12753_v1 = vld [vmem:[#allocation6 + $0x588] sm:$0xff] }
 0x180   :  { %v11864_v62 = vpack.i.bf16 %v1543_v24, %v1542_v46  ;;  %v1273_v11 = vadd.f32 %v1265_v14, %v1222_v23  ;;  %v1084_v59 = vadd.f32 %v14113_v45, %v1033_v32  ;;  %v1274_v52 = vadd.f32 %v1266_v25, %v1223_v18  ;;  %v12749_v14 = vld [vmem:[#allocation6 + $0x508] sm:$0xff]  ;;  %v12751_v24 = vld [vmem:[#allocation6 + $0x580] sm:$0xff] }
 0x181   :  { %v1085_v57 = vadd.f32 %v14114_v51, %v1034_v9  ;;  %v1179_v46 = vmul.f32 %v12504_v43, %v12730_v36  ;;  %v1229_v23 = vmul.f32 %v12510_v50, %v12743_v7  ;;  %v1230_v25 = vmul.f32 %v12510_v50, %v12749_v14  ;;  %v12759_v26 = vld [vmem:[#allocation6 + $0x540] sm:$0xff]  ;;  %v12761_v0 = vld [vmem:[#allocation6 + $0x548] sm:$0xff] }
 0x182   :  { %11865 = vrot.lane.b32.xlu0 %v11864_v62, %s12130_s1  ;;  %v1324_v30 = vadd.f32 %v1316_v2, %v1273_v11  ;;  %v1135_v29 = vadd.f32 %v1127_v39, %v1084_v59  ;;  %v1325_v61 = vadd.f32 %v1317_v17, %v1274_v52  ;;  %v1280_v33 = vmul.f32 %v12516_v58, %v12759_v26  ;;  %v12771_v62 = vld [vmem:[#allocation6 + $0x5c0] sm:$0xff]  ;;  %v12773_v18 = vld [vmem:[#allocation6 + $0x5c8] sm:$0xff]  ;;  %v14117_v59 = vld [vmem:[#allocation25_spill] sm:$0xff] }
 0x183   :  { %v1136_v43 = vadd.f32 %v1128_v12, %v1085_v57  ;;  %v1281_v31 = vmul.f32 %v12516_v58, %v12761_v0  ;;  %v1331_v32 = vmul.f32 %v12525_v54, %v12751_v24  ;;  %v1332_v50 = vmul.f32 %v12525_v54, %v12753_v1  ;;  %v14115_v39 = vld [vmem:[#allocation24_spill] sm:$0xff]  ;;  %v14118_v12 = vld [vmem:[#allocation33_spill] sm:$0xff]  ;;  %v14119_v51 = vld [vmem:[#allocation50_spill] sm:$0xff] }
 0x184   :  { %v1375_v2 = vadd.f32 %v1367_v63, %v1324_v30  ;;  %v1186_v40 = vadd.f32 %v1178_v48, %v1135_v29  ;;  %v1376_v17 = vadd.f32 %v1368_v55, %v1325_v61  ;;  %v1382_v4 = vmul.f32 %v12535_v8, %v12771_v62  ;;  %v14116_v11 = vld [vmem:[#allocation32_spill] sm:$0xff]  ;;  %v14120_v57 = vld [vmem:[#allocation51_spill] sm:$0xff]  ;;  %v1410_v61 = vld [vmem:[#allocation4 + $0x58] sm:$0xff] }
 0x185   :  { %v1187_v28 = vadd.f32 %v1179_v46, %v1136_v43  ;;  %v1383_v58 = vmul.f32 %v12535_v8, %v12773_v18  ;;  %v1016_v45 = vadd.f32 %v14116_v11, %v14115_v39  ;;  %v1017_v54 = vadd.f32 %v14118_v12, %v14117_v59  ;;  %v1409_v29 = vld [vmem:[#allocation4 + $0x50] sm:$0xff] }
 0x186   :  { %v1430_v63 = vmax.f32 %v1375_v2, 0.0  ;;  %v1237_v9 = vadd.f32 %v1229_v23, %v1186_v40  ;;  %v1431_v48 = vmax.f32 %v1376_v17, 0.0  ;;  %v1110_v55 = vmul.f32 %v12489_v41, %v14119_v51  ;;  %v14121_v8 = vld [vmem:[#allocation40_spill] sm:$0xff]  ;;  %v14122_v23 = vld [vmem:[#allocation41_spill] sm:$0xff]  ;;  %v14123_v40 = vld [vmem:[#allocation47_spill] sm:$0xff] }
 0x187   :  { %v1238_v52 = vadd.f32 %v1230_v25, %v1187_v28  ;;  %v1111_v46 = vmul.f32 %v12489_v41, %v14120_v57  ;;  %v1067_v43 = vadd.f32 %v14121_v8, %v1016_v45  ;;  %v1068_v2 = vadd.f32 %v14122_v23, %v1017_v54  ;;  %v14124_v17 = vld [vmem:[#allocation49_spill] sm:$0xff]  ;;  %v14125_v59 = vld [vmem:[#allocation52_spill] sm:$0xff] }
 0x188   :  { %v1288_v30 = vadd.f32 %v1280_v33, %v1237_v9  ;;  %v1161_v39 = vmul.f32 %v12501_v42, %v14123_v40  ;;  %v11884_v11 = vpack.i.bf16 %v1431_v48, %v1430_v63  ;;  %v1162_v28 = vmul.f32 %v12501_v42, %v14124_v17  ;;  %v14126_v57 = vld [vmem:[#allocation53_spill] sm:$0xff]  ;;  %v1411_v63 = vld [vmem:[#allocation4 + $0x60] sm:$0xff]  ;;  %v1412_v48 = vld [vmem:[#allocation4 + $0x68] sm:$0xff] }
 0x189   :  { %v1289_v25 = vadd.f32 %v1281_v31, %v1238_v52  ;;  %v1212_v12 = vmul.f32 %v12507_v49, %v14125_v59  ;;  %v1118_v9 = vadd.f32 %v1110_v55, %v1067_v43  ;;  %v1119_v51 = vadd.f32 %v1111_v46, %v1068_v2  ;;  %v14127_v55 = vld [vmem:[#allocation54_spill] sm:$0xff]  ;;  %v14128_v43 = vld [vmem:[#allocation55_spill] sm:$0xff] }
 0x18a   :  { %11870 = vrot.lane.b32.xlu0 %v11869_v13, %s12130_s1  ;;  %v1339_v33 = vadd.f32 %v1331_v32, %v1288_v30  ;;  %v1213_v45 = vmul.f32 %v12507_v49, %v14126_v57  ;;  %11885 = vrot.lane.b32.xlu1 %v11884_v11, %s12130_s1  ;;  %v11889_v8 = vpack.i.bf16 %v1410_v61, %v1409_v29  ;;  %v14129_v29 = vld [vmem:[#allocation56_spill] sm:$0xff]  ;;  %v14133_v59 = vld [vmem:[#allocation31_spill] sm:$0xff] }
 0x18b   :  { %v1340_v54 = vadd.f32 %v1332_v50, %v1289_v25  ;;  %v1263_v13 = vmul.f32 %v12513_v27, %v12605_v60  ;;  %v1264_v31 = vmul.f32 %v12513_v27, %v12616_v56  ;;  %v1169_v23 = vadd.f32 %v1161_v39, %v1118_v9  ;;  %v14130_v39 = vld [vmem:[#allocation22_spill] sm:$0xff] }
 0x18c   :  { %v1390_v52 = vadd.f32 %v1382_v4, %v1339_v33  ;;  %v1170_v32 = vadd.f32 %v1162_v28, %v1119_v51  ;;  %v1314_v46 = vmul.f32 %v14105_v3, %v14127_v55  ;;  %v1315_v2 = vmul.f32 %v14105_v3, %v14128_v43  ;;  %v14131_v25 = vld [vmem:[#allocation30_spill] sm:$0xff]  ;;  %v14132_v28 = vld [vmem:[#allocation23_spill] sm:$0xff]  ;;  %v14134_v33 = vld [vmem:[#allocation57_spill] sm:$0xff] }
 0x18d   :  { %v1391_v30 = vadd.f32 %v1383_v58, %v1340_v54  ;;  %v1365_v50 = vmul.f32 %v12703_v35, %v12623_v21  ;;  %v1366_v60 = vmul.f32 %v12703_v35, %v14129_v29  ;;  %v1220_v56 = vadd.f32 %v1212_v12, %v1169_v23  ;;  %v14135_v54 = vld [vmem:[#allocation38_spill] sm:$0xff] }
 0x18e   :  { %v1540_v61 = vmax.f32 %v1390_v52, 0.0  ;;  %v1221_v40 = vadd.f32 %v1213_v45, %v1170_v32  ;;  %v11879_v11 = vpack.i.bf16 %v1412_v48, %v1411_v63  ;;  %v1014_v17 = vadd.f32 %v14131_v25, %v14130_v39  ;;  %v14136_v48 = vld [vmem:[#allocation39_spill] sm:$0xff]  ;;  %v14139_v39 = vld [vmem:[#allocation21_spill] sm:$0xff] }
 0x18f   :  { %v1541_v4 = vmax.f32 %v1391_v30, 0.0  ;;  %v1015_v58 = vadd.f32 %v14133_v59, %v14132_v28  ;;  %v1108_v9 = vmul.f32 %v12489_v41, %v14134_v33  ;;  %v1271_v51 = vadd.f32 %v1263_v13, %v1220_v56  ;;  %v14141_v28 = vld [vmem:[#allocation36_spill] sm:$0xff] }
 0x190   :  { %v1272_v57 = vadd.f32 %v1264_v31, %v1221_v40  ;;  %v1109_v21 = vmul.f32 %v12489_v41, %v12643_v22  ;;  %v1159_v12 = vmul.f32 %v12501_v42, %v12637_v53  ;;  %v1065_v63 = vadd.f32 %v14135_v54, %v1014_v17 }
 0x191   :  { %v11874_v45 = vpack.i.bf16 %v1541_v4, %v1540_v61  ;;  %v1066_v52 = vadd.f32 %v14136_v48, %v1015_v58  ;;  %v1160_v23 = vmul.f32 %v12501_v42, %v12647_v15  ;;  %v1322_v32 = vadd.f32 %v1314_v46, %v1271_v51 }
 0x192   :  { %v1323_v55 = vadd.f32 %v1315_v2, %v1272_v57  ;;  %v1210_v13 = vmul.f32 %v12507_v49, %v12657_v34  ;;  %v1211_v31 = vmul.f32 %v12507_v49, %v12659_v38  ;;  %11890 = vrot.lane.b32.xlu1 %v11889_v8, %s12130_s1  ;;  %v1116_v22 = vadd.f32 %v1108_v9, %v1065_v63  ;;  %v14142_v9 = vld [vmem:[#allocation37_spill] sm:$0xff] }
 0x193   :  { %11875 = vrot.lane.b32.xlu2 %v11874_v45, %s12130_s1  ;;  %v1117_v53 = vadd.f32 %v1109_v21, %v1066_v52  ;;  %v1261_v30 = vmul.f32 %v12513_v27, %v12667_v47  ;;  %v1373_v43 = vadd.f32 %v1365_v50, %v1322_v32  ;;  %v1262_v15 = vmul.f32 %v12513_v27, %v12671_v5  ;;  %v14137_v50 = vld [vmem:[#allocation20_spill] sm:$0xff] }
 0x194   :  { %v1374_v29 = vadd.f32 %v1366_v60, %v1323_v55  ;;  %v1312_v34 = vmul.f32 %v14105_v3, %v12663_v19  ;;  %v1167_v46 = vadd.f32 %v1159_v12, %v1116_v22  ;;  %v1313_v38 = vmul.f32 %v14105_v3, %v12669_v6  ;;  %v14138_v60 = vld [vmem:[#allocation28_spill] sm:$0xff]  ;;  %v14140_v19 = vld [vmem:[#allocation29_spill] sm:$0xff]  ;;  %v1407_v12 = vld [vmem:[#allocation4 + $0x40] sm:$0xff] }
 0x195   :  { %v1168_v2 = vadd.f32 %v1160_v23, %v1117_v53  ;;  %v1363_v8 = vmul.f32 %v12703_v35, %v12681_v16  ;;  %v1428_v61 = vmax.f32 %v1373_v43, 0.0  ;;  %v1364_v47 = vmul.f32 %v12703_v35, %v12683_v10 }
 0x196   :  { %v1429_v56 = vmax.f32 %v1374_v29, 0.0  ;;  %v1012_v40 = vadd.f32 %v14138_v60, %v14137_v50  ;;  %v1218_v5 = vadd.f32 %v1210_v13, %v1167_v46  ;;  %v1013_v25 = vadd.f32 %v14140_v19, %v14139_v39  ;;  %v1539_v46 = vld [vmem:[#allocation4 + $0x178] sm:$0xff]  ;;  %v1518_v60 = vld [vmem:[#allocation4 + $0xe0] sm:$0xff] }
 0x197   :  { %v1219_v4 = vadd.f32 %v1211_v31, %v1168_v2  ;;  %v1106_v17 = vmul.f32 %v12489_v41, %v12720_v37  ;;  %v1107_v16 = vmul.f32 %v12489_v41, %v12734_v20  ;;  %v1157_v10 = vmul.f32 %v12501_v42, %v12722_v44  ;;  %v1408_v41 = vld [vmem:[#allocation4 + $0x48] sm:$0xff]  ;;  %v1521_v50 = vld [vmem:[#allocation4 + $0xf8] sm:$0xff] }
 0x198   :  { %v11894_v6 = vpack.i.bf16 %v1429_v56, %v1428_v61  ;;  %v1063_v59 = vadd.f32 %v14141_v28, %v1012_v40  ;;  %v1269_v58 = vadd.f32 %v1261_v30, %v1218_v5  ;;  %v1064_v51 = vadd.f32 %v14142_v9, %v1013_v25  ;;  %v1519_v40 = vld [vmem:[#allocation4 + $0xe8] sm:$0xff] }
 0x199   :  { %v1270_v33 = vadd.f32 %v1262_v15, %v1219_v4  ;;  %v1158_v57 = vmul.f32 %v12501_v42, %v12730_v36  ;;  %v1208_v37 = vmul.f32 %v12507_v49, %v12743_v7  ;;  %v1209_v54 = vmul.f32 %v12507_v49, %v12749_v14 }
 0x19a   :  { %11895 = vrot.lane.b32.xlu0 %v11894_v6, %s12130_s1  ;;  %v1114_v21 = vadd.f32 %v1106_v17, %v1063_v59  ;;  %v1320_v20 = vadd.f32 %v1312_v34, %v1269_v58  ;;  %v1115_v44 = vadd.f32 %v1107_v16, %v1064_v51  ;;  %v1259_v42 = vmul.f32 %v12513_v27, %v12759_v26  ;;  %v1538_v34 = vld [vmem:[#allocation4 + $0x170] sm:$0xff] }
 0x19b   :  { %11880 = vrot.lane.b32.xlu2 %v11879_v11, %s12130_s1  ;;  %v1321_v45 = vadd.f32 %v1313_v38, %v1270_v33  ;;  %v1260_v7 = vmul.f32 %v12513_v27, %v12761_v0  ;;  %v11904_v23 = vpack.i.bf16 %v1408_v41, %v1407_v12  ;;  %v1310_v32 = vmul.f32 %v14105_v3, %v12751_v24  ;;  %v1516_v58 = vld [vmem:[#allocation4 + $0xd0] sm:$0xff]  ;;  %v1517_v33 = vld [vmem:[#allocation4 + $0xd8] sm:$0xff]  ;;  %v1515_v12 = vld [vmem:[#allocation4 + $0xc8] sm:$0xff] }
 0x19c   :  { %v1165_v63 = vadd.f32 %v1157_v10, %v1114_v21  ;;  %v1371_v36 = vadd.f32 %v1363_v8, %v1320_v20  ;;  %v1166_v52 = vadd.f32 %v1158_v57, %v1115_v44  ;;  %v1311_v49 = vmul.f32 %v14105_v3, %v12753_v1  ;;  %v1520_v8 = vld [vmem:[#allocation4 + $0xf0] sm:$0xff] }
 0x19d   :  { %v1372_v48 = vadd.f32 %v1364_v47, %v1321_v45  ;;  %v1361_v26 = vmul.f32 %v12703_v35, %v12771_v62  ;;  %v1362_v27 = vmul.f32 %v12703_v35, %v12773_v18 }
 0x19e   :  { %v1216_v11 = vadd.f32 %v1208_v37, %v1165_v63  ;;  %v1426_v55 = vmax.f32 %v1371_v36, 0.0  ;;  %v1217_v31 = vadd.f32 %v1209_v54, %v1166_v52  ;;  %v1514_v37 = vld [vmem:[#allocation4 + $0xc0] sm:$0xff] }
 0x19f   :  { %v1427_v13 = vmax.f32 %v1372_v48, 0.0  ;;  %v1536_v36 = vld [vmem:[#allocation4 + $0x160] sm:$0xff]  ;;  %v1537_v48 = vld [vmem:[#allocation4 + $0x168] sm:$0xff] }
 0x1a0   :  { %v1267_v14 = vadd.f32 %v1259_v42, %v1216_v11  ;;  %v1268_v53 = vadd.f32 %v1260_v7, %v1217_v31  ;;  %v1534_v31 = vld [vmem:[#allocation4 + $0x150] sm:$0xff] }
 0x1a1   :  { %v11899_v22 = vpack.i.bf16 %v1427_v13, %v1426_v55 }
 0x1a2   :  { %11905 = vrot.lane.b32.xlu0 %v11904_v23, %s12130_s1  ;;  %v1318_v0 = vadd.f32 %v1310_v32, %v1267_v14  ;;  %v1319_v24 = vadd.f32 %v1311_v49, %v1268_v53  ;;  %v1535_v49 = vld [vmem:[#allocation4 + $0x158] sm:$0xff] }
 0x1a3   :  { %11900 = vrot.lane.b32.xlu2 %v11899_v22, %s12130_s1 }
 0x1a4   :  { %v1369_v30 = vadd.f32 %v1361_v26, %v1318_v0  ;;  %v1370_v43 = vadd.f32 %v1362_v27, %v1319_v24  ;;  %v1532_v27 = vld [vmem:[#allocation4 + $0x140] sm:$0xff]  ;;  %v1533_v0 = vld [vmem:[#allocation4 + $0x148] sm:$0xff] }
 0x1a6   :  { %v1424_v29 = vmax.f32 %v1369_v30, 0.0  ;;  %v1425_v15 = vmax.f32 %v1370_v43, 0.0 }
 0x1a8   :  { %v11909_v3 = vpack.i.bf16 %v1425_v15, %v1424_v29 }
 0x1aa   :  { %11910 = vrot.lane.b32.xlu1 %v11909_v3, %s12130_s1 }
 0x1ba   :  { %v11846_v1 = vpop.permute.xlu2 %11845 }
 0x1bb   :  { %v11848_v25 = vunpack.i.h.bf16 %v11846_v1  ;;  %v11847_v17 = vunpack.i.l.bf16 %v11846_v1 }
 0x1bd   :  { %v1614_v51 = vsel %vm1496_vm0, %v1516_v58, %v11847_v17  ;;  %v1615_v57 = vsel %vm1496_vm0, %v1517_v33, %v11848_v25  ;;  %v1401_v58 = vld [vmem:[#allocation4 + $0x18] sm:$0xff] }
 0x1be   :  { %v1638_v45 = vpack.c.bf16 %v1615_v57, %v1614_v51 }
 0x1cf   :  { %v11856_v62 = vpop.permute.xlu2 %11855  ;;  %v11841_v47 = vpop.permute.xlu0 %11840 }
 0x1d0   :  { %v11858_v2 = vunpack.i.h.bf16 %v11856_v62  ;;  %v11857_v35 = vunpack.i.l.bf16 %v11856_v62  ;;  %v11836_v61 = vpop.permute.xlu1 %11835  ;;  %v11843_v39 = vunpack.i.h.bf16 %v11841_v47  ;;  %v11842_v19 = vunpack.i.l.bf16 %v11841_v47  ;;  %v1422_v47 = vld [vmem:[#allocation4 + $0xb0] sm:$0xff] }
 0x1d1   :  { %v11838_v5 = vunpack.i.h.bf16 %v11836_v61  ;;  %v11837_v4 = vunpack.i.l.bf16 %v11836_v61  ;;  %v1403_v61 = vld [vmem:[#allocation4 + $0x28] sm:$0xff] }
 0x1d2   :  { %v1626_v18 = vsel %vm1496_vm0, %v1538_v34, %v11857_v35  ;;  %v1627_v38 = vsel %vm1496_vm0, %v1539_v46, %v11858_v2  ;;  %v1616_v59 = vsel %vm1496_vm0, %v1518_v60, %v11842_v19  ;;  %v1617_v16 = vsel %vm1496_vm0, %v1519_v40, %v11843_v39  ;;  %v1404_v46 = vld [vmem:[#allocation4 + $0x30] sm:$0xff] }
 0x1d3   :  { %v1643_v56 = vpack.c.bf16 %v1627_v38, %v1626_v18  ;;  %v1618_v6 = vsel %vm1496_vm0, %v1520_v8, %v11837_v4  ;;  %v1619_v28 = vsel %vm1496_vm0, %v1521_v50, %v11838_v5  ;;  %v1640_v9 = vpack.c.bf16 %v1617_v16, %v1616_v59  ;;  %v1405_v38 = vld [vmem:[#allocation4 + $0x38] sm:$0xff]  ;;  %v1402_v8 = vld [vmem:[#allocation4 + $0x20] sm:$0xff] }
 0x1d4   :  { %v1642_v10 = vpack.c.bf16 %v1619_v28, %v1618_v6  ;;  %v1423_v50 = vld [vmem:[#allocation4 + $0xb8] sm:$0xff] }
 0x1d5   :  { %1861 = vmatpush.bf16.msra.mxu1 %v1643_v56 }
 0x1d6   :  { %1772 = vmatpush.bf16.msra.mxu0 %v1642_v10  ;;  %v1400_v10 = vld [vmem:[#allocation4 + $0x10] sm:$0xff] }
 0x1d8   :  { %v11851_v21 = vpop.permute.xlu1 %11850 }
 0x1d9   :  { %v11853_v41 = vunpack.i.h.bf16 %v11851_v21  ;;  %v11852_v20 = vunpack.i.l.bf16 %v11851_v21 }
 0x1da   :  { %1773 = vmatpush.bf16.msra.mxu0 %v1640_v9 }
 0x1db   :  { %v1612_v44 = vsel %vm1496_vm0, %v1514_v37, %v11852_v20  ;;  %v1613_v54 = vsel %vm1496_vm0, %v1515_v12, %v11853_v41  ;;  %v1420_v41 = vld [vmem:[#allocation4 + $0xa0] sm:$0xff]  ;;  %v1421_v20 = vld [vmem:[#allocation4 + $0xa8] sm:$0xff] }
 0x1dc   :  { %v1636_v63 = vpack.c.bf16 %v1613_v54, %v1612_v44 }
 0x1de   :  { %1774 = vmatpush.bf16.msra.mxu0 %v1638_v45 }
 0x1e2   :  { %1775 = vmatpush.bf16.msra.mxu0 %v1636_v63 }
 0x1ed   :  { %v11876_v23 = vpop.permute.xlu2 %11875 }
 0x1ee   :  { %v11861_v42 = vpop.permute.xlu1 %11860  ;;  %v11878_v14 = vunpack.i.h.bf16 %v11876_v23  ;;  %v11877_v26 = vunpack.i.l.bf16 %v11876_v23 }
 0x1ef   :  { %v11863_v52 = vunpack.i.h.bf16 %v11861_v42  ;;  %v11862_v7 = vunpack.i.l.bf16 %v11861_v42  ;;  %v1418_v42 = vld [vmem:[#allocation4 + $0x90] sm:$0xff] }
 0x1f0   :  { %v1620_v29 = vsel %vm1496_vm0, %v1532_v27, %v11877_v26  ;;  %v1621_v15 = vsel %vm1496_vm0, %v1533_v0, %v11878_v14  ;;  %v11093_v27 = vld [vmem:[#allocation7] sm:$0xff] }
 0x1f1   :  { %v1624_v11 = vsel %vm1496_vm0, %v1536_v36, %v11862_v7  ;;  %v1625_v32 = vsel %vm1496_vm0, %v1537_v48, %v11863_v52  ;;  %v1637_v2 = vpack.c.bf16 %v1621_v15, %v1620_v29  ;;  %v1419_v36 = vld [vmem:[#allocation4 + $0x98] sm:$0xff] }
 0x1f2   :  { %v1641_v55 = vpack.c.bf16 %v1625_v32, %v1624_v11 }
 0x1f4   :  { %v11866_v13 = vpop.permute.xlu0 %11865  ;;  %1862 = vmatpush.bf16.msra.mxu1 %v1641_v55 }
 0x1f5   :  { %v11868_v22 = vunpack.i.h.bf16 %v11866_v13  ;;  %v11867_v53 = vunpack.i.l.bf16 %v11866_v13  ;;  %v11881_v3 = vpop.permute.xlu2 %11880  ;;  %v1398_v13 = vld [vmem:[#allocation4] sm:$0xff] }
 0x1f6   :  { %v11883_v1 = vunpack.i.h.bf16 %v11881_v3  ;;  %v11882_v62 = vunpack.i.l.bf16 %v11881_v3 }
 0x1f7   :  { %v1622_v24 = vsel %vm1496_vm0, %v1534_v31, %v11867_v53  ;;  %v1623_v30 = vsel %vm1496_vm0, %v1535_v49, %v11868_v22  ;;  %v1399_v31 = vld [vmem:[#allocation4 + $0x8] sm:$0xff] }
 0x1f8   :  { %v1639_v43 = vpack.c.bf16 %v1623_v30, %v1622_v24  ;;  %v1501_v39 = vsel %vm1496_vm0, %v1402_v8, %v11882_v62  ;;  %v1502_v19 = vsel %vm1496_vm0, %v1403_v61, %v11883_v1  ;;  %v1416_v24 = vld [vmem:[#allocation4 + $0x80] sm:$0xff]  ;;  %v1417_v30 = vld [vmem:[#allocation4 + $0x88] sm:$0xff] }
 0x1f9   :  { %v1632_v59 = vpack.c.bf16 %v1502_v19, %v1501_v39  ;;  %v11094_v62 = vld [vmem:[#allocation7 + $0x8] sm:$0xff]  ;;  %v11101_v8 = vld [vmem:[#allocation7 + $0x40] sm:$0xff] }
 0x1fa   :  { %1863 = vmatpush.bf16.msra.mxu1 %v1639_v43 }
 0x1fc   :  { %v11871_v34 = vpop.permute.xlu0 %11870  ;;  %v11886_v56 = vpop.permute.xlu1 %11885 }
 0x1fd   :  { %v11873_v35 = vunpack.i.h.bf16 %v11871_v34  ;;  %v11872_v18 = vunpack.i.l.bf16 %v11871_v34  ;;  %v11888_v60 = vunpack.i.h.bf16 %v11886_v56  ;;  %v11887_v40 = vunpack.i.l.bf16 %v11886_v56  ;;  %v11901_v37 = vpop.permute.xlu2 %11900  ;;  %v11095_v34 = vld [vmem:[#allocation7 + $0x10] sm:$0xff] }
 0x1fe   :  { %1864 = vmatpush.bf16.msra.mxu1 %v1637_v2  ;;  %v11903_v45 = vunpack.i.h.bf16 %v11901_v37  ;;  %v11902_v44 = vunpack.i.l.bf16 %v11901_v37  ;;  %v11097_v2 = vld [vmem:[#allocation7 + $0x20] sm:$0xff]  ;;  %v11154_v37 = vld [vmem:[#allocation10 + $0x164] sm:$0xf0] }
 0x1ff   :  { %v1503_v5 = vsel %vm1496_vm0, %v1404_v46, %v11872_v18  ;;  %v1504_v4 = vsel %vm1496_vm0, %v1405_v38, %v11873_v35  ;;  %v1511_v17 = vsel %vm1496_vm0, %v1422_v47, %v11887_v40  ;;  %v1512_v6 = vsel %vm1496_vm0, %v1423_v50, %v11888_v60  ;;  %v11096_v46 = vld [vmem:[#allocation7 + $0x18] sm:$0xff]  ;;  %v11098_v35 = vld [vmem:[#allocation7 + $0x28] sm:$0xff]  ;;  %v11099_v18 = vld [vmem:[#allocation7 + $0x30] sm:$0xff] }
 0x200   :  { %v1634_v25 = vpack.c.bf16 %v1504_v4, %v1503_v5  ;;  %v1635_v28 = vpack.c.bf16 %v1512_v6, %v1511_v17  ;;  %v1507_v23 = vsel %vm1496_vm0, %v1418_v42, %v11902_v44  ;;  %v1508_v11 = vsel %vm1496_vm0, %v1419_v36, %v11903_v45  ;;  %v11100_v38 = vld [vmem:[#allocation7 + $0x38] sm:$0xff]  ;;  %v11102_v60 = vld [vmem:[#allocation7 + $0x48] sm:$0xff]  ;;  %v11103_v45 = vld [vmem:[#allocation7 + $0x50] sm:$0xff] }
 0x201   :  { %v1631_v55 = vpack.c.bf16 %v1508_v11, %v1507_v23  ;;  %v11168_v11 = vld [vmem:[#allocation10 + $0x1d4] sm:$0xf0] }
 0x202   :  { %1776 = vmatpush.bf16.msra.mxu0 %v1634_v25  ;;  %1865 = vmatpush.bf16.msra.mxu1 %v1635_v28 }
 0x204   :  { %v11891_v16 = vpop.permute.xlu1 %11890 }
 0x205   :  { %v11893_v33 = vunpack.i.h.bf16 %v11891_v16  ;;  %v11892_v9 = vunpack.i.l.bf16 %v11891_v16 }
 0x206   :  { %1777 = vmatpush.bf16.msra.mxu0 %v1632_v59 }
 0x207   :  { %v1499_v51 = vsel %vm1496_vm0, %v1400_v10, %v11892_v9  ;;  %v1500_v57 = vsel %vm1496_vm0, %v1401_v58, %v11893_v33  ;;  %v8594_v58 = vld [vmem:[#allocation10 + $0x170] sm:$0xf]  ;;  %v11156_v33 = vld [vmem:[#allocation10 + $0x174] sm:$0xf0] }
 0x208   :  { %v1630_v21 = vpack.c.bf16 %v1500_v57, %v1499_v51  ;;  %v8658_v9 = vld [vmem:[#allocation10 + $0x1f0] sm:$0xf]  ;;  %v8595_v51 = vor.u32 %v11156_v33, %v8594_v58  ;;  %v11172_v57 = vld [vmem:[#allocation10 + $0x1f4] sm:$0xf0] }
 0x20a   :  { %1778 = vmatpush.bf16.msra.mxu0 %v1630_v21  ;;  %v8586_v21 = vld [vmem:[#allocation10 + $0x160] sm:$0xf]  ;;  %2247 = vmatpush.bf16.msra.mxu2 %v8595_v51 }
 0x20b   :  { %v8587_v44 = vor.u32 %v11154_v37, %v8586_v21 }
 0x20c   :  { %v11896_v12 = vpop.permute.xlu0 %11895 }
 0x20d   :  { %v11898_v54 = vunpack.i.h.bf16 %v11896_v12  ;;  %v11897_v63 = vunpack.i.l.bf16 %v11896_v12  ;;  %v8659_v12 = vor.u32 %v11172_v57, %v8658_v9 }
 0x20e   :  { %2248 = vmatpush.bf16.msra.mxu2 %v8587_v44 }
 0x20f   :  { %v1509_v48 = vsel %vm1496_vm0, %v1420_v41, %v11897_v63  ;;  %v1510_v52 = vsel %vm1496_vm0, %v1421_v20, %v11898_v54  ;;  %v8650_v41 = vld [vmem:[#allocation10 + $0x1e0] sm:$0xf]  ;;  %v11170_v20 = vld [vmem:[#allocation10 + $0x1e4] sm:$0xf0]  ;;  %2276 = vmatpush.bf16.msra.mxu3 %v8659_v12 }
 0x210   :  { %v1633_v7 = vpack.c.bf16 %v1510_v52, %v1509_v48  ;;  %v8651_v63 = vor.u32 %v11170_v20, %v8650_v41  ;;  %v8578_v48 = vld [vmem:[#allocation10 + $0x150] sm:$0xf]  ;;  %v11152_v52 = vld [vmem:[#allocation10 + $0x154] sm:$0xf0]  ;;  %v11105_v12 = vld [vmem:[#allocation7 + $0x60] sm:$0xff] }
 0x211   :  { %v8579_v23 = vor.u32 %v11152_v52, %v8578_v48 }
 0x212   :  { %1866 = vmatpush.bf16.msra.mxu1 %v1633_v7  ;;  %v8642_v7 = vld [vmem:[#allocation10 + $0x1d0] sm:$0xf] }
 0x213   :  { %2277 = vmatpush.bf16.msra.mxu3 %v8651_v63  ;;  %2249 = vmatpush.bf16.msra.mxu2 %v8579_v23 }
 0x214   :  { %v11906_v32 = vpop.permute.xlu0 %11905 }
 0x215   :  { %v11908_v49 = vunpack.i.h.bf16 %v11906_v32  ;;  %v11907_v14 = vunpack.i.l.bf16 %v11906_v32  ;;  %v8643_v32 = vor.u32 %v11168_v11, %v8642_v7  ;;  %v11106_v7 = vld [vmem:[#allocation7 + $0x68] sm:$0xff] }
 0x216   :  { %1867 = vmatpush.bf16.msra.mxu1 %v1631_v55  ;;  %v8570_v55 = vld [vmem:[#allocation10 + $0x140] sm:$0xf] }
 0x217   :  { %v1497_v26 = vsel %vm1496_vm0, %v1398_v13, %v11907_v14  ;;  %v1498_v22 = vsel %vm1496_vm0, %v1399_v31, %v11908_v49  ;;  %v11150_v13 = vld [vmem:[#allocation10 + $0x144] sm:$0xf0]  ;;  %v8634_v31 = vld [vmem:[#allocation10 + $0x1c0] sm:$0xf]  ;;  %2278 = vmatpush.bf16.msra.mxu3 %v8643_v32 }
 0x218   :  { %v1628_v53 = vpack.c.bf16 %v1498_v22, %v1497_v26  ;;  %v11166_v49 = vld [vmem:[#allocation10 + $0x1c4] sm:$0xf0]  ;;  %v8571_v14 = vor.u32 %v11150_v13, %v8570_v55 }
 0x219   :  { %v8635_v22 = vor.u32 %v11166_v49, %v8634_v31 }
 0x21a   :  { %1779 = vmatpush.bf16.msra.mxu0 %v1628_v53  ;;  %2250 = vmatpush.bf16.msra.mxu2 %v8571_v14 }
 0x21b   :  { %2279 = vmatpush.bf16.msra.mxu3 %v8635_v22 }
 0x21c   :  { %v11911_v0 = vpop.permute.xlu1 %11910 }
 0x21d   :  { %1780 = vmatmul.bf16.vlgmr.msra.gmra.mxu0 %v11093_v27  ;;  %v11913_v43 = vunpack.i.h.bf16 %v11911_v0  ;;  %v11912_v29 = vunpack.i.l.bf16 %v11911_v0  ;;  %v8562_v0 = vld [vmem:[#allocation10 + $0x130] sm:$0xf] }
 0x21f   :  { %v1505_v15 = vsel %vm1496_vm0, %v1416_v24, %v11912_v29  ;;  %v1506_v3 = vsel %vm1496_vm0, %v1417_v30, %v11913_v43  ;;  %v11148_v24 = vld [vmem:[#allocation10 + $0x134] sm:$0xf0]  ;;  %v8626_v30 = vld [vmem:[#allocation10 + $0x1b0] sm:$0xf] }
 0x220   :  { %v1629_v1 = vpack.c.bf16 %v1506_v3, %v1505_v15  ;;  %v8563_v43 = vor.u32 %v11148_v24, %v8562_v0  ;;  %v11164_v29 = vld [vmem:[#allocation10 + $0x1b4] sm:$0xf0]  ;;  %v8554_v15 = vld [vmem:[#allocation10 + $0x120] sm:$0xf]  ;;  %v11146_v3 = vld [vmem:[#allocation10 + $0x124] sm:$0xf0] }
 0x222   :  { %1868 = vmatpush.bf16.msra.mxu1 %v1629_v1  ;;  %v8627_v1 = vor.u32 %v11164_v29, %v8626_v30  ;;  %2251 = vmatpush.bf16.msra.mxu2 %v8563_v43 }
 0x224   :  { %2280 = vmatpush.bf16.msra.mxu3 %v8627_v1  ;;  %v8596_v1 = vld [vmem:[#allocation10 + $0x178] sm:$0xf0] }
 0x225   :  { %1869 = vmatmul.bf16.vlgmr.msra.gmra.mxu1 %v11093_v27 }
 0x22d   :  { %1785 = vmatmul.bf16.gmra.mxu0 %v11094_v62 }
 0x235   :  { %1874 = vmatmul.bf16.gmra.mxu1 %v11094_v62  ;;  %v8618_v62 = vld [vmem:[#allocation10 + $0x1a0] sm:$0xf] }
 0x23d   :  { %1790 = vmatmul.bf16.gmra.mxu0 %v11095_v34 }
 0x245   :  { %1879 = vmatmul.bf16.gmra.mxu1 %v11095_v34  ;;  %v11162_v34 = vld [vmem:[#allocation10 + $0x1a4] sm:$0xf0] }
 0x24d   :  { %1795 = vmatmul.bf16.gmra.mxu0 %v11096_v46 }
 0x255   :  { %1884 = vmatmul.bf16.gmra.mxu1 %v11096_v46  ;;  %v11104_v46 = vld [vmem:[#allocation7 + $0x58] sm:$0xff] }
 0x25d   :  { %1800 = vmatmul.bf16.gmra.mxu0 %v11097_v2 }
 0x265   :  { %1889 = vmatmul.bf16.gmra.mxu1 %v11097_v2  ;;  %v8555_v2 = vor.u32 %v11146_v3, %v8554_v15  ;;  %v11155_v3 = vld [vmem:[#allocation10 + $0x174] sm:$0xf] }
 0x267   :  { %2252 = vmatpush.bf16.msra.mxu2 %v8555_v2  ;;  %v11153_v2 = vld [vmem:[#allocation10 + $0x164] sm:$0xf] }
 0x26d   :  { %1805 = vmatmul.bf16.gmra.mxu0 %v11098_v35 }
 0x275   :  { %1894 = vmatmul.bf16.gmra.mxu1 %v11098_v35 }
 0x27d   :  { %1810 = vmatmul.bf16.gmra.mxu0 %v11099_v18 }
 0x285   :  { %1899 = vmatmul.bf16.gmra.mxu1 %v11099_v18  ;;  %v8619_v18 = vor.u32 %v11162_v34, %v8618_v62  ;;  %v11171_v62 = vld [vmem:[#allocation10 + $0x1f4] sm:$0xf]  ;;  %v8599_v34 = vor.u32 %v11155_v3, %v8596_v1  ;;  %v8628_v3 = vld [vmem:[#allocation10 + $0x1b8] sm:$0xf0] }
 0x287   :  { %2281 = vmatpush.bf16.msra.mxu3 %v8619_v18 }
 0x28d   :  { %1815 = vmatmul.bf16.gmra.mxu0 %v11100_v38 }
 0x295   :  { %1904 = vmatmul.bf16.gmra.mxu1 %v11100_v38 }
 0x29a   :  { %v1781_v61 = vpop.f32.mrf.mxu0 }
 0x29d   :  { %1820 = vmatmul.bf16.gmra.mxu0 %v11101_v8 }
 0x2a2   :  { %v1783_v56 = vpop.f32.mrf.mxu0  ;;  %v1870_v47 = vpop.f32.mrf.mxu1 }
 0x2a3   :  { %v1950_v50 = vpack.c.bf16 %v1870_v47, %v1781_v61  ;;  %v8546_v61 = vld [vmem:[#allocation10 + $0x110] sm:$0xf] }
 0x2a4   :  { %v8610_v47 = vld [vmem:[#allocation10 + $0x190] sm:$0xf] }
 0x2a5   :  { %1909 = vmatmul.bf16.gmra.mxu1 %v11101_v8  ;;  %v2371_v39 = vunpack.c.l.b16 %v1950_v50  ;;  %v2372_v19 = vunpack.c.h.b16 %v1950_v50 }
 0x2aa   :  { %v1786_v40 = vpop.f32.mrf.mxu0  ;;  %v1872_v5 = vpop.f32.mrf.mxu1 }
 0x2ab   :  { %v1951_v4 = vpack.c.bf16 %v1872_v5, %v1783_v56  ;;  %v11144_v56 = vld [vmem:[#allocation10 + $0x114] sm:$0xf0]  ;;  %v8538_v5 = vld [vmem:[#allocation10 + $0x100] sm:$0xf] }
 0x2ac   :  { %v8547_v50 = vor.u32 %v11144_v56, %v8546_v61  ;;  %v12944_v56 = vld [vmem:[#allocation7 + $0x70] sm:$0xff] }
 0x2ad   :  { %1825 = vmatmul.bf16.gmra.mxu0 %v11102_v60  ;;  %v2373_v25 = vunpack.c.l.b16 %v1951_v4  ;;  %v2374_v17 = vunpack.c.h.b16 %v1951_v4  ;;  %v11142_v4 = vld [vmem:[#allocation10 + $0x104] sm:$0xf0] }
 0x2ae   :  { %2253 = vmatpush.bf16.msra.mxu2 %v8547_v50  ;;  %v8539_v58 = vor.u32 %v11142_v4, %v8538_v5  ;;  %v11151_v4 = vld [vmem:[#allocation10 + $0x154] sm:$0xf] }
 0x2af   :  { %v12910_v6 = vpack.c.b16 %v2373_v25, %v2371_v39  ;;  %v12912_v28 = vpack.c.b16 %v2374_v17, %v2372_v19  ;;  %v8602_v39 = vld [vmem:[#allocation10 + $0x180] sm:$0xf]  ;;  %v11158_v19 = vld [vmem:[#allocation10 + $0x184] sm:$0xf0] }
 0x2b0   :  { %v8603_v9 = vor.u32 %v11158_v19, %v8602_v39  ;;  %v8580_v39 = vld [vmem:[#allocation10 + $0x158] sm:$0xf0]  ;;  %v11167_v19 = vld [vmem:[#allocation10 + $0x1d4] sm:$0xf] }
 0x2b2   :  { %v1788_v59 = vpop.f32.mrf.mxu0  ;;  %v1875_v16 = vpop.f32.mrf.mxu1  ;;  %2254 = vmatpush.bf16.msra.mxu2 %v8539_v58  ;;  %v11188_v58 = vld [vmem:[#allocation10 + $0x274] sm:$0xf0] }
 0x2b3   :  { %v12914_v10 = vpack.c.bf16 %v1875_v16, %v1786_v40 }
 0x2b5   :  { %1914 = vmatmul.bf16.gmra.mxu1 %v11102_v60  ;;  %v11160_v60 = vld [vmem:[#allocation10 + $0x194] sm:$0xf0]  ;;  %v2375_v25 = vunpack.c.l.b16 %v12914_v10  ;;  %v2376_v17 = vunpack.c.h.b16 %v12914_v10 }
 0x2b6   :  { %v8611_v40 = vor.u32 %v11160_v60, %v8610_v47  ;;  %2305 = vmatpush.bf16.msrb.mxu2 %v8599_v34  ;;  %v11200_v34 = vld [vmem:[#allocation10 + $0x2d4] sm:$0xf0] }
 0x2b8   :  { %2282 = vmatpush.bf16.msra.mxu3 %v8611_v40 }
 0x2ba   :  { %v1791_v54 = vpop.f32.mrf.mxu0  ;;  %v1877_v42 = vpop.f32.mrf.mxu1 }
 0x2bb   :  { %v12916_v36 = vpack.c.bf16 %v1877_v42, %v1788_v59 }
 0x2bc   :  { %2283 = vmatpush.bf16.msra.mxu3 %v8603_v9 }
 0x2bd   :  { %1830 = vmatmul.bf16.gmra.mxu0 %v11103_v45  ;;  %v2377_v59 = vunpack.c.l.b16 %v12916_v36  ;;  %v2378_v16 = vunpack.c.h.b16 %v12916_v36 }
 0x2bf   :  { %v12924_v51 = vpack.c.b16 %v2377_v59, %v2375_v25  ;;  %v12926_v57 = vpack.c.b16 %v2378_v16, %v2376_v17  ;;  %v8583_v17 = vor.u32 %v11151_v4, %v8580_v39  ;;  %v8644_v59 = vld [vmem:[#allocation10 + $0x1d8] sm:$0xf0]  ;;  %v8850_v16 = vld [vmem:[#allocation10 + $0x270] sm:$0xf]  ;;  %v11108_v39 = vld [vmem:[#allocation7 + $0x78] sm:$0xff] }
 0x2c2   :  { %v1793_v26 = vpop.f32.mrf.mxu0  ;;  %v1880_v53 = vpop.f32.mrf.mxu1 }
 0x2c3   :  { %v12918_v27 = vpack.c.bf16 %v1880_v53, %v1791_v54 }
 0x2c5   :  { %1919 = vmatmul.bf16.gmra.mxu1 %v11103_v45  ;;  %v2379_v45 = vunpack.c.l.b16 %v12918_v27  ;;  %v2380_v44 = vunpack.c.h.b16 %v12918_v27 }
 0x2ca   :  { %v1796_v35 = vpop.f32.mrf.mxu0  ;;  %v1882_v38 = vpop.f32.mrf.mxu1 }
 0x2cb   :  { %v1955_v8 = vpack.c.bf16 %v1882_v38, %v1793_v26  ;;  %v11169_v38 = vld [vmem:[#allocation10 + $0x1e4] sm:$0xf] }
 0x2cd   :  { %1835 = vmatmul.bf16.gmra.mxu0 %v11104_v46  ;;  %v2381_v54 = vunpack.c.l.b16 %v1955_v8  ;;  %v2382_v63 = vunpack.c.h.b16 %v1955_v8  ;;  %v8652_v8 = vld [vmem:[#allocation10 + $0x1e8] sm:$0xf0] }
 0x2ce   :  { %v8655_v60 = vor.u32 %v11169_v38, %v8652_v8  ;;  %v8826_v38 = vld [vmem:[#allocation10 + $0x240] sm:$0xf]  ;;  %v11182_v8 = vld [vmem:[#allocation10 + $0x244] sm:$0xf0] }
 0x2cf   :  { %v12930_v36 = vpack.c.b16 %v2381_v54, %v2379_v45  ;;  %v12932_v48 = vpack.c.b16 %v2382_v63, %v2380_v44  ;;  %v8572_v44 = vld [vmem:[#allocation10 + $0x148] sm:$0xf0]  ;;  %v11165_v54 = vld [vmem:[#allocation10 + $0x1c4] sm:$0xf]  ;;  %v8827_v4 = vor.u32 %v11182_v8, %v8826_v38  ;;  %v11192_v38 = vld [vmem:[#allocation10 + $0x294] sm:$0xf0] }
 0x2d0   :  { %v8794_v8 = vld [vmem:[#allocation10 + $0x200] sm:$0xf] }
 0x2d2   :  { %v1798_v33 = vpop.f32.mrf.mxu0  ;;  %v1885_v21 = vpop.f32.mrf.mxu1 }
 0x2d3   :  { %v1956_v37 = vpack.c.bf16 %v1885_v21, %v1796_v35  ;;  %v8588_v35 = vld [vmem:[#allocation10 + $0x168] sm:$0xf0] }
 0x2d4   :  { %v8591_v47 = vor.u32 %v11153_v2, %v8588_v35  ;;  %v11145_v35 = vld [vmem:[#allocation10 + $0x124] sm:$0xf] }
 0x2d5   :  { %1924 = vmatmul.bf16.gmra.mxu1 %v11104_v46  ;;  %v2383_v26 = vunpack.c.l.b16 %v1956_v37  ;;  %v2384_v22 = vunpack.c.h.b16 %v1956_v37  ;;  %v8660_v46 = vld [vmem:[#allocation10 + $0x1f8] sm:$0xf0]  ;;  %v8851_v37 = vor.u32 %v11188_v58, %v8850_v16  ;;  %v11143_v58 = vld [vmem:[#allocation10 + $0x114] sm:$0xf] }
 0x2d6   :  { %v8663_v18 = vor.u32 %v11171_v62, %v8660_v46  ;;  %2306 = vmatpush.bf16.msrb.mxu2 %v8591_v47  ;;  %v8898_v62 = vld [vmem:[#allocation10 + $0x2d0] sm:$0xf]  ;;  %v8890_v47 = vld [vmem:[#allocation10 + $0x2c0] sm:$0xf] }
 0x2d7   :  { %2912 = vmatpush.bf16.msrb.mxu0 %v8851_v37  ;;  %v8899_v2 = vor.u32 %v11200_v34, %v8898_v62  ;;  %v11159_v37 = vld [vmem:[#allocation10 + $0x194] sm:$0xf]  ;;  %v11176_v62 = vld [vmem:[#allocation10 + $0x214] sm:$0xf0] }
 0x2d8   :  { %2334 = vmatpush.bf16.msrb.mxu3 %v8663_v18  ;;  %v8556_v18 = vld [vmem:[#allocation10 + $0x128] sm:$0xf0] }
 0x2da   :  { %v1801_v10 = vpop.f32.mrf.mxu0  ;;  %v1887_v41 = vpop.f32.mrf.mxu1  ;;  %2307 = vmatpush.bf16.msrb.mxu2 %v8583_v17  ;;  %v11180_v17 = vld [vmem:[#allocation10 + $0x234] sm:$0xf0] }
 0x2db   :  { %v1957_v20 = vpack.c.bf16 %v1887_v41, %v1798_v33  ;;  %v11149_v41 = vld [vmem:[#allocation10 + $0x144] sm:$0xf] }
 0x2dc   :  { %2335 = vmatpush.bf16.msrb.mxu3 %v8655_v60  ;;  %v11198_v60 = vld [vmem:[#allocation10 + $0x2c4] sm:$0xf0] }
 0x2dd   :  { %1840 = vmatmul.bf16.gmra.mxu0 %v11105_v12  ;;  %v2385_v0 = vunpack.c.l.b16 %v1957_v20  ;;  %v2386_v24 = vunpack.c.h.b16 %v1957_v20  ;;  %v8647_v20 = vor.u32 %v11167_v19, %v8644_v59  ;;  %v8559_v19 = vor.u32 %v11145_v35, %v8556_v18  ;;  %v8866_v18 = vld [vmem:[#allocation10 + $0x290] sm:$0xf] }
 0x2de   :  { %v8891_v16 = vor.u32 %v11198_v60, %v8890_v47  ;;  %v8867_v47 = vor.u32 %v11192_v38, %v8866_v18  ;;  %v11236_v38 = vld [vmem:[#allocation10 + $0x3f4] sm:$0xf0] }
 0x2df   :  { %v12940_v43 = vpack.c.b16 %v2385_v0, %v2383_v26  ;;  %v12942_v29 = vpack.c.b16 %v2386_v24, %v2384_v22  ;;  %v8564_v26 = vld [vmem:[#allocation10 + $0x138] sm:$0xf0]  ;;  %v11163_v24 = vld [vmem:[#allocation10 + $0x1b4] sm:$0xf] }
 0x2e0   :  { %2336 = vmatpush.bf16.msrb.mxu3 %v8647_v20  ;;  %v8882_v20 = vld [vmem:[#allocation10 + $0x2b0] sm:$0xf] }
 0x2e2   :  { %v1803_v42 = vpop.f32.mrf.mxu0  ;;  %v1890_v52 = vpop.f32.mrf.mxu1 }
 0x2e3   :  { %v1958_v23 = vpack.c.bf16 %v1890_v52, %v1801_v10  ;;  %v11204_v10 = vld [vmem:[#allocation10 + $0x2f4] sm:$0xf0]  ;;  %v8636_v52 = vld [vmem:[#allocation10 + $0x1c8] sm:$0xf0] }
 0x2e4   :  { %v8639_v0 = vor.u32 %v11165_v54, %v8636_v52  ;;  %v8810_v54 = vld [vmem:[#allocation10 + $0x220] sm:$0xf] }
 0x2e5   :  { %1929 = vmatmul.bf16.gmra.mxu1 %v11105_v12  ;;  %v2055_v13 = vunpack.c.l.b16 %v1958_v23  ;;  %v2056_v31 = vunpack.c.h.b16 %v1958_v23  ;;  %v8914_v12 = vld [vmem:[#allocation10 + $0x2f0] sm:$0xf]  ;;  %v11186_v23 = vld [vmem:[#allocation10 + $0x264] sm:$0xf0] }
 0x2e6   :  { %v8915_v45 = vor.u32 %v11204_v10, %v8914_v12  ;;  %2337 = vmatpush.bf16.msrb.mxu3 %v8639_v0  ;;  %v8612_v10 = vld [vmem:[#allocation10 + $0x198] sm:$0xf0] }
 0x2e8   :  { %2941 = vmatpush.bf16.msrb.mxu1 %v8915_v45  ;;  %v11196_v45 = vld [vmem:[#allocation10 + $0x2b4] sm:$0xf0] }
 0x2ea   :  { %v1806_v11 = vpop.f32.mrf.mxu0  ;;  %v1892_v32 = vpop.f32.mrf.mxu1 }
 0x2eb   :  { %v1959_v55 = vpack.c.bf16 %v1892_v32, %v1803_v42 }
 0x2ed   :  { %1845 = vmatmul.bf16.gmra.mxu0 %v11106_v7  ;;  %v2057_v49 = vunpack.c.l.b16 %v1959_v55  ;;  %v2058_v14 = vunpack.c.h.b16 %v1959_v55  ;;  %v8906_v55 = vld [vmem:[#allocation10 + $0x2e0] sm:$0xf] }
 0x2ef   :  { %v12934_v53 = vpack.c.b16 %v2057_v49, %v2055_v13  ;;  %v12936_v27 = vpack.c.b16 %v2058_v14, %v2056_v31  ;;  %v11202_v13 = vld [vmem:[#allocation10 + $0x2e4] sm:$0xf0]  ;;  %v11147_v14 = vld [vmem:[#allocation10 + $0x134] sm:$0xf] }
 0x2f0   :  { %v8907_v49 = vor.u32 %v11202_v13, %v8906_v55  ;;  %v8567_v46 = vor.u32 %v11147_v14, %v8564_v26  ;;  %v8540_v55 = vld [vmem:[#allocation10 + $0x108] sm:$0xf0]  ;;  %v8615_v13 = vor.u32 %v11159_v37, %v8612_v10 }
 0x2f1   :  { %2255 = vmatmul.bf16.vlgmr.msra.gmra.mxu2 %v12934_v53  ;;  %2284 = vmatmul.bf16.vlgmr.msra.gmra.mxu3 %v12936_v27 }
 0x2f2   :  { %v1808_v30 = vpop.f32.mrf.mxu0  ;;  %v1895_v15 = vpop.f32.mrf.mxu1  ;;  %2942 = vmatpush.bf16.msrb.mxu1 %v8907_v49  ;;  %v11157_v49 = vld [vmem:[#allocation10 + $0x184] sm:$0xf] }
 0x2f3   :  { %v1960_v61 = vpack.c.bf16 %v1895_v15, %v1806_v11  ;;  %v8575_v11 = vor.u32 %v11149_v41, %v8572_v44  ;;  %v11184_v15 = vld [vmem:[#allocation10 + $0x254] sm:$0xf0] }
 0x2f5   :  { %1934 = vmatmul.bf16.gmra.mxu1 %v11106_v7  ;;  %v2059_v25 = vunpack.c.l.b16 %v1960_v61  ;;  %v2060_v33 = vunpack.c.h.b16 %v1960_v61  ;;  %v8842_v7 = vld [vmem:[#allocation10 + $0x260] sm:$0xf]  ;;  %2308 = vmatpush.bf16.msrb.mxu2 %v8575_v11  ;;  %v8631_v61 = vor.u32 %v11163_v24, %v8628_v3 }
 0x2f6   :  { %v8843_v32 = vor.u32 %v11186_v23, %v8842_v7  ;;  %2943 = vmatpush.bf16.msrb.mxu1 %v8899_v2  ;;  %v8874_v24 = vld [vmem:[#allocation10 + $0x2a0] sm:$0xf] }
 0x2f7   :  { %2338 = vmatpush.bf16.msrb.mxu3 %v8631_v61  ;;  %v11174_v61 = vld [vmem:[#allocation10 + $0x204] sm:$0xf0] }
 0x2f8   :  { %2913 = vmatpush.bf16.msrb.mxu0 %v8843_v32  ;;  %v11141_v32 = vld [vmem:[#allocation10 + $0x104] sm:$0xf]  ;;  %v8795_v60 = vor.u32 %v11174_v61, %v8794_v8 }
 0x2f9   :  { %2309 = vmatpush.bf16.msrb.mxu2 %v8567_v46 }
 0x2fa   :  { %v12946_v50 = vpop.f32.mrf.mxu0  ;;  %v1897_v40 = vpop.f32.mrf.mxu1  ;;  %2944 = vmatpush.bf16.msrb.mxu1 %v8891_v16 }
 0x2fb   :  { %v1961_v5 = vpack.c.bf16 %v1897_v40, %v1808_v30  ;;  %v8834_v30 = vld [vmem:[#allocation10 + $0x250] sm:$0xf]  ;;  %v11161_v40 = vld [vmem:[#allocation10 + $0x1a4] sm:$0xf] }
 0x2fc   :  { %v8835_v1 = vor.u32 %v11184_v15, %v8834_v30  ;;  %v11194_v30 = vld [vmem:[#allocation10 + $0x2a4] sm:$0xf0]  ;;  %v8543_v15 = vor.u32 %v11141_v32, %v8540_v55  ;;  %v11124_v32 = vld [vmem:[#allocation10 + $0x74] sm:$0xf0]  ;;  %v8786_v55 = vld [vmem:[#allocation10 + $0xf0] sm:$0xf] }
 0x2fd   :  { %1850 = vmatmul.bf16.gmra.mxu0 %v12944_v56  ;;  %v2061_v9 = vunpack.c.l.b16 %v1961_v5  ;;  %v2062_v21 = vunpack.c.h.b16 %v1961_v5  ;;  %v8620_v5 = vld [vmem:[#allocation10 + $0x1a8] sm:$0xf0]  ;;  %2310 = vmatpush.bf16.msrb.mxu2 %v8559_v19  ;;  %v8875_v2 = vor.u32 %v11194_v30, %v8874_v24  ;;  %v8778_v30 = vld [vmem:[#allocation10 + $0xe0] sm:$0xf] }
 0x2fe   :  { %2914 = vmatpush.bf16.msrb.mxu0 %v8835_v1  ;;  %v8802_v1 = vld [vmem:[#allocation10 + $0x210] sm:$0xf] }
 0x2ff   :  { %v12949_v63 = vpack.c.b16 %v2061_v9, %v2059_v25  ;;  %v12951_v42 = vpack.c.b16 %v2062_v21, %v2060_v33  ;;  %v8818_v25 = vld [vmem:[#allocation10 + $0x230] sm:$0xf]  ;;  %v8548_v33 = vld [vmem:[#allocation10 + $0x118] sm:$0xf0]  ;;  %v8623_v21 = vor.u32 %v11161_v40, %v8620_v5  ;;  %v8803_v35 = vor.u32 %v11176_v62, %v8802_v1  ;;  %v8858_v40 = vld [vmem:[#allocation10 + $0x280] sm:$0xf] }
 0x300   :  { %v8819_v41 = vor.u32 %v11180_v17, %v8818_v25  ;;  %v8551_v44 = vor.u32 %v11143_v58, %v8548_v33  ;;  %v11190_v5 = vld [vmem:[#allocation10 + $0x284] sm:$0xf0]  ;;  %v8978_v62 = vld [vmem:[#allocation10 + $0x370] sm:$0xf] }
 0x301   :  { %2260 = vmatmul.bf16.gmra.mxu2 %v12949_v63  ;;  %2289 = vmatmul.bf16.gmra.mxu3 %v12951_v42  ;;  %v8859_v17 = vor.u32 %v11190_v5, %v8858_v40  ;;  %v11218_v40 = vld [vmem:[#allocation10 + $0x364] sm:$0xf0]  ;;  %v9034_v5 = vld [vmem:[#allocation10 + $0x3e0] sm:$0xf] }
 0x302   :  { %v1813_v31 = vpop.f32.mrf.mxu0  ;;  %v1900_v22 = vpop.f32.mrf.mxu1  ;;  %2915 = vmatpush.bf16.msrb.mxu0 %v8827_v4  ;;  %2339 = vmatpush.bf16.msrb.mxu3 %v8623_v21 }
 0x303   :  { %v1962_v59 = vpack.c.bf16 %v1900_v22, %v12946_v50  ;;  %v11178_v50 = vld [vmem:[#allocation10 + $0x224] sm:$0xf0]  ;;  %v8604_v22 = vld [vmem:[#allocation10 + $0x188] sm:$0xf0]  ;;  %2311 = vmatpush.bf16.msrb.mxu2 %v8551_v44 }
 0x304   :  { %v8811_v0 = vor.u32 %v11178_v50, %v8810_v54  ;;  %v8607_v46 = vor.u32 %v11157_v49, %v8604_v22  ;;  %v11140_v49 = vld [vmem:[#allocation10 + $0xf4] sm:$0xf0]  ;;  %v8714_v22 = vld [vmem:[#allocation10 + $0x60] sm:$0xf] }
 0x305   :  { %1939 = vmatmul.bf16.gmra.mxu1 %v12944_v56  ;;  %v2063_v52 = vunpack.c.l.b16 %v1962_v59  ;;  %v2064_v7 = vunpack.c.h.b16 %v1962_v59  ;;  %v8787_v24 = vor.u32 %v11140_v49, %v8786_v55  ;;  %v8754_v55 = vld [vmem:[#allocation10 + $0xb0] sm:$0xf]  ;;  %v11132_v49 = vld [vmem:[#allocation10 + $0xb4] sm:$0xf0] }
 0x306   :  { %2916 = vmatpush.bf16.msrb.mxu0 %v8819_v41  ;;  %2340 = vmatpush.bf16.msrb.mxu3 %v8615_v13 }
 0x307   :  { %2312 = vmatpush.bf16.msrb.mxu2 %v8543_v15  ;;  %v11138_v15 = vld [vmem:[#allocation10 + $0xe4] sm:$0xf0] }
 0x308   :  { %v8779_v1 = vor.u32 %v11138_v15, %v8778_v30  ;;  %v9026_v15 = vld [vmem:[#allocation10 + $0x3d0] sm:$0xf] }
 0x30a   :  { %v12957_v56 = vpop.f32.mrf.mxu0  ;;  %v1902_v9 = vpop.f32.mrf.mxu1  ;;  %2917 = vmatpush.bf16.msrb.mxu0 %v8811_v0  ;;  %2341 = vmatpush.bf16.msrb.mxu3 %v8607_v46  ;;  %v11122_v0 = vld [vmem:[#allocation10 + $0x64] sm:$0xf0]  ;;  %v9042_v46 = vld [vmem:[#allocation10 + $0x3f0] sm:$0xf] }
 0x30b   :  { %v1963_v12 = vpack.c.bf16 %v1902_v9, %v1813_v31  ;;  %v8883_v31 = vor.u32 %v11196_v45, %v8882_v20  ;;  %v9043_v61 = vor.u32 %v11236_v38, %v9042_v46  ;;  %v11214_v46 = vld [vmem:[#allocation10 + $0x344] sm:$0xf0]  ;;  %v8674_v38 = vld [vmem:[#allocation10 + $0x10] sm:$0xf] }
 0x30d   :  { %1855 = vmatmul.bf16.gmra.mxu0 %v11108_v39  ;;  %v2065_v23 = vunpack.c.l.b16 %v1963_v12  ;;  %v2066_v11 = vunpack.c.h.b16 %v1963_v12  ;;  %2945 = vmatpush.bf16.msrb.mxu1 %v8883_v31 }
 0x30e   :  { %2918 = vmatpush.bf16.msrb.mxu0 %v8803_v35  ;;  %2592 = vmatpush.bf16.msra.mxu3 %v8787_v24  ;;  %v11136_v35 = vld [vmem:[#allocation10 + $0xd4] sm:$0xf0]  ;;  %v8755_v24 = vor.u32 %v11132_v49, %v8754_v55  ;;  %v11210_v55 = vld [vmem:[#allocation10 + $0x324] sm:$0xf0]  ;;  %v9002_v49 = vld [vmem:[#allocation10 + $0x3a0] sm:$0xf] }
 0x30f   :  { %v12959_v14 = vpack.c.b16 %v2065_v23, %v2063_v52  ;;  %v12961_v26 = vpack.c.b16 %v2066_v11, %v2064_v7  ;;  %v8722_v11 = vld [vmem:[#allocation10 + $0x70] sm:$0xf] }
 0x310   :  { %v8723_v31 = vor.u32 %v11124_v32, %v8722_v11  ;;  %v8690_v11 = vld [vmem:[#allocation10 + $0x30] sm:$0xf]  ;;  %v11116_v32 = vld [vmem:[#allocation10 + $0x34] sm:$0xf0] }
 0x311   :  { %2265 = vmatmul.bf16.gmra.mxu2 %v12959_v14  ;;  %2294 = vmatmul.bf16.gmra.mxu3 %v12961_v26 }
 0x312   :  { %v1818_v3 = vpop.f32.mrf.mxu0  ;;  %v1905_v34 = vpop.f32.mrf.mxu1  ;;  %2946 = vmatpush.bf16.msrb.mxu1 %v8875_v2  ;;  %2919 = vmatpush.bf16.msrb.mxu0 %v8795_v60  ;;  %v8770_v2 = vld [vmem:[#allocation10 + $0xd0] sm:$0xf] }
 0x313   :  { %v1964_v4 = vpack.c.bf16 %v1905_v34, %v12957_v56  ;;  %2563 = vmatpush.bf16.msra.mxu2 %v8723_v31  ;;  %v11220_v34 = vld [vmem:[#allocation10 + $0x374] sm:$0xf0]  ;;  %2593 = vmatpush.bf16.msra.mxu3 %v8779_v1  ;;  %v8691_v31 = vor.u32 %v11116_v32, %v8690_v11  ;;  %v11130_v1 = vld [vmem:[#allocation10 + $0xa4] sm:$0xf0]  ;;  %v8938_v32 = vld [vmem:[#allocation10 + $0x320] sm:$0xf] }
 0x314   :  { %v8979_v18 = vor.u32 %v11220_v34, %v8978_v62  ;;  %v8954_v34 = vld [vmem:[#allocation10 + $0x340] sm:$0xf]  ;;  %v11126_v11 = vld [vmem:[#allocation10 + $0x84] sm:$0xf0] }
 0x315   :  { %1944 = vmatmul.bf16.gmra.mxu1 %v11108_v39  ;;  %v2067_v16 = vunpack.c.l.b16 %v1964_v4  ;;  %v2068_v58 = vunpack.c.h.b16 %v1964_v4  ;;  %v11234_v4 = vld [vmem:[#allocation10 + $0x3e4] sm:$0xf0] }
 0x316   :  { %2947 = vmatpush.bf16.msrb.mxu1 %v8867_v47  ;;  %v8970_v47 = vld [vmem:[#allocation10 + $0x360] sm:$0xf]  ;;  %3277 = vmatpush.bf16.msra.mxu0 %v8979_v18  ;;  %v11230_v18 = vld [vmem:[#allocation10 + $0x3c4] sm:$0xf0] }
 0x31a   :  { %v1821_v19 = vpop.f32.mrf.mxu0  ;;  %v1907_v25 = vpop.f32.mrf.mxu1  ;;  %2948 = vmatpush.bf16.msrb.mxu1 %v8859_v17  ;;  %v8698_v17 = vld [vmem:[#allocation10 + $0x40] sm:$0xf] }
 0x31b   :  { %v1965_v59 = vpack.c.bf16 %v1907_v25, %v1818_v3  ;;  %v8706_v3 = vld [vmem:[#allocation10 + $0x50] sm:$0xf]  ;;  %v8771_v25 = vor.u32 %v11136_v35, %v8770_v2  ;;  %v9018_v2 = vld [vmem:[#allocation10 + $0x3c0] sm:$0xf]  ;;  %v8955_v35 = vor.u32 %v11214_v46, %v8954_v34  ;;  %v11206_v46 = vld [vmem:[#allocation10 + $0x304] sm:$0xf0] }
 0x31c   :  { %v8922_v34 = vld [vmem:[#allocation10 + $0x300] sm:$0xf] }
 0x31d   :  { %v2069_v33 = vunpack.c.l.b16 %v1965_v59  ;;  %v2070_v9 = vunpack.c.h.b16 %v1965_v59  ;;  %v11118_v59 = vld [vmem:[#allocation10 + $0x44] sm:$0xf0]  ;;  %2594 = vmatpush.bf16.msra.mxu3 %v8771_v25 }
 0x31e   :  { %3306 = vmatpush.bf16.msra.mxu1 %v9043_v61 }
 0x31f   :  { %v12966_v39 = vpack.c.b16 %v2069_v33, %v2067_v16  ;;  %v12968_v21 = vpack.c.b16 %v2070_v9, %v2068_v58  ;;  %v8971_v16 = vor.u32 %v11218_v40, %v8970_v47  ;;  %v9035_v58 = vor.u32 %v11234_v4, %v9034_v5  ;;  %v8738_v40 = vld [vmem:[#allocation10 + $0x90] sm:$0xf]  ;;  %v11128_v5 = vld [vmem:[#allocation10 + $0x94] sm:$0xf0] }
 0x320   :  { %v8946_v4 = vld [vmem:[#allocation10 + $0x330] sm:$0xf] }
 0x321   :  { %2270 = vmatmul.bf16.gmra.mxu2 %v12966_v39  ;;  %2299 = vmatmul.bf16.gmra.mxu3 %v12968_v21 }
 0x322   :  { %v1823_v56 = vpop.f32.mrf.mxu0  ;;  %v1910_v37 = vpop.f32.mrf.mxu1  ;;  %3278 = vmatpush.bf16.msra.mxu0 %v8971_v16  ;;  %3307 = vmatpush.bf16.msra.mxu1 %v9035_v58  ;;  %v11228_v16 = vld [vmem:[#allocation10 + $0x3b4] sm:$0xf0] }
 0x323   :  { %v1966_v12 = vpack.c.bf16 %v1910_v37, %v1821_v19 }
 0x325   :  { %v2720_v20 = vunpack.c.l.b16 %v1966_v12  ;;  %v2721_v45 = vunpack.c.h.b16 %v1966_v12  ;;  %v8699_v12 = vor.u32 %v11118_v59, %v8698_v17  ;;  %v11212_v17 = vld [vmem:[#allocation10 + $0x334] sm:$0xf0]  ;;  %v9010_v59 = vld [vmem:[#allocation10 + $0x3b0] sm:$0xf] }
 0x32a   :  { %v1826_v10 = vpop.f32.mrf.mxu0  ;;  %v1912_v41 = vpop.f32.mrf.mxu1 }
 0x32b   :  { %v1967_v44 = vpack.c.bf16 %v1912_v41, %v1823_v56  ;;  %v11134_v41 = vld [vmem:[#allocation10 + $0xc4] sm:$0xf0] }
 0x32d   :  { %v2722_v54 = vunpack.c.l.b16 %v1967_v44  ;;  %v2723_v50 = vunpack.c.h.b16 %v1967_v44 }
 0x32f   :  { %v12972_v52 = vpack.c.b16 %v2722_v54, %v2720_v20  ;;  %v12974_v7 = vpack.c.b16 %v2723_v50, %v2721_v45 }
 0x331   :  { %2313 = vmatmul.bf16.vlgmr.msrb.gmra.mxu2 %v12934_v53  ;;  %2342 = vmatmul.bf16.vlgmr.msrb.gmra.mxu3 %v12936_v27  ;;  %v8715_v53 = vor.u32 %v11122_v0, %v8714_v22  ;;  %v11120_v27 = vld [vmem:[#allocation10 + $0x54] sm:$0xf0]  ;;  %v8962_v22 = vld [vmem:[#allocation10 + $0x350] sm:$0xf] }
 0x332   :  { %v1828_v23 = vpop.f32.mrf.mxu0  ;;  %2920 = vmatmul.bf16.vlgmr.msrb.gmra.mxu0 %v12972_v52  ;;  %2949 = vmatmul.bf16.vlgmr.msrb.gmra.mxu1 %v12974_v7  ;;  %v1915_v13 = vpop.f32.mrf.mxu1  ;;  %v8707_v60 = vor.u32 %v11120_v27, %v8706_v3  ;;  %v11216_v0 = vld [vmem:[#allocation10 + $0x354] sm:$0xf0]  ;;  %v11114_v3 = vld [vmem:[#allocation10 + $0x24] sm:$0xf0]  ;;  %v8746_v27 = vld [vmem:[#allocation10 + $0xa0] sm:$0xf] }
 0x333   :  { %v1968_v8 = vpack.c.bf16 %v1915_v13, %v1826_v10  ;;  %2564 = vmatpush.bf16.msra.mxu2 %v8715_v53  ;;  %v8762_v10 = vld [vmem:[#allocation10 + $0xc0] sm:$0xf]  ;;  %v8963_v30 = vor.u32 %v11216_v0, %v8962_v22  ;;  %v8747_v47 = vor.u32 %v11130_v1, %v8746_v27  ;;  %v11226_v22 = vld [vmem:[#allocation10 + $0x3a4] sm:$0xf0]  ;;  %v8994_v27 = vld [vmem:[#allocation10 + $0x390] sm:$0xf] }
 0x334   :  { %v8763_v50 = vor.u32 %v11134_v41, %v8762_v10  ;;  %v8682_v53 = vld [vmem:[#allocation10 + $0x20] sm:$0xf] }
 0x335   :  { %v2724_v9 = vunpack.c.l.b16 %v1968_v8  ;;  %v2725_v56 = vunpack.c.h.b16 %v1968_v8  ;;  %3279 = vmatpush.bf16.msra.mxu0 %v8963_v30  ;;  %v8683_v62 = vor.u32 %v11114_v3, %v8682_v53  ;;  %v11112_v8 = vld [vmem:[#allocation10 + $0x14] sm:$0xf0]  ;;  %v8939_v30 = vor.u32 %v11210_v55, %v8938_v32  ;;  %v8788_v55 = vld [vmem:[#allocation10 + $0xf8] sm:$0xf0] }
 0x336   :  { %2595 = vmatpush.bf16.msra.mxu3 %v8763_v50  ;;  %v8675_v25 = vor.u32 %v11112_v8, %v8674_v38  ;;  %v11208_v3 = vld [vmem:[#allocation10 + $0x314] sm:$0xf0] }
 0x337   :  { %2565 = vmatpush.bf16.msra.mxu2 %v8707_v60  ;;  %v9019_v60 = vor.u32 %v11230_v18, %v9018_v2  ;;  %v8923_v18 = vor.u32 %v11206_v46, %v8922_v34  ;;  %v8772_v34 = vld [vmem:[#allocation10 + $0xd8] sm:$0xf0] }
 0x339   :  { %3280 = vmatpush.bf16.msra.mxu0 %v8955_v35  ;;  %v8986_v35 = vld [vmem:[#allocation10 + $0x380] sm:$0xf] }
 0x33a   :  { %v1831_v19 = vpop.f32.mrf.mxu0  ;;  %v1917_v33 = vpop.f32.mrf.mxu1  ;;  %2596 = vmatpush.bf16.msra.mxu3 %v8755_v24 }
 0x33b   :  { %v1969_v37 = vpack.c.bf16 %v1917_v33, %v1828_v23  ;;  %2566 = vmatpush.bf16.msra.mxu2 %v8699_v12  ;;  %v8947_v33 = vor.u32 %v11212_v17, %v8946_v4  ;;  %v9011_v12 = vor.u32 %v11228_v16, %v9010_v59 }
 0x33d   :  { %v2726_v20 = vunpack.c.l.b16 %v1969_v37  ;;  %v2727_v45 = vunpack.c.h.b16 %v1969_v37  ;;  %3281 = vmatpush.bf16.msra.mxu0 %v8947_v33 }
 0x33e   :  { %2597 = vmatpush.bf16.msra.mxu3 %v8747_v47 }
 0x33f   :  { %v12980_v44 = vpack.c.b16 %v2726_v20, %v2724_v9  ;;  %v12982_v54 = vpack.c.b16 %v2727_v45, %v2725_v56  ;;  %2567 = vmatpush.bf16.msra.mxu2 %v8691_v31  ;;  %v8666_v9 = vld [vmem:[#allocation10] sm:$0xf]  ;;  %v11110_v56 = vld [vmem:[#allocation10 + $0x4] sm:$0xf0]  ;;  %v8739_v20 = vor.u32 %v11128_v5, %v8738_v40 }
 0x340   :  { %v8730_v45 = vld [vmem:[#allocation10 + $0x80] sm:$0xf]  ;;  %v8667_v50 = vor.u32 %v11110_v56, %v8666_v9 }
 0x341   :  { %2318 = vmatmul.bf16.gmra.mxu2 %v12949_v63  ;;  %2347 = vmatmul.bf16.gmra.mxu3 %v12951_v42  ;;  %v11232_v63 = vld [vmem:[#allocation10 + $0x3d4] sm:$0xf0] }
 0x342   :  { %v1833_v23 = vpop.f32.mrf.mxu0  ;;  %2925 = vmatmul.bf16.gmra.mxu0 %v12980_v44  ;;  %2954 = vmatmul.bf16.gmra.mxu1 %v12982_v54  ;;  %v1920_v13 = vpop.f32.mrf.mxu1  ;;  %v9027_v42 = vor.u32 %v11232_v63, %v9026_v15  ;;  %v9003_v15 = vor.u32 %v11226_v22, %v9002_v49 }
 0x343   :  { %v1970_v61 = vpack.c.bf16 %v1920_v13, %v1831_v19  ;;  %2568 = vmatpush.bf16.msra.mxu2 %v8683_v62  ;;  %2598 = vmatpush.bf16.msra.mxu3 %v8739_v20  ;;  %v11224_v62 = vld [vmem:[#allocation10 + $0x394] sm:$0xf0] }
 0x344   :  { %3308 = vmatpush.bf16.msra.mxu1 %v9027_v42  ;;  %3282 = vmatpush.bf16.msra.mxu0 %v8939_v30  ;;  %v8930_v42 = vld [vmem:[#allocation10 + $0x310] sm:$0xf]  ;;  %v8716_v30 = vld [vmem:[#allocation10 + $0x68] sm:$0xf0] }
 0x345   :  { %v2728_v19 = vunpack.c.l.b16 %v1970_v61  ;;  %v2729_v10 = vunpack.c.h.b16 %v1970_v61  ;;  %v8931_v1 = vor.u32 %v11208_v3, %v8930_v42  ;;  %v11119_v42 = vld [vmem:[#allocation10 + $0x54] sm:$0xf]  ;;  %v8708_v3 = vld [vmem:[#allocation10 + $0x58] sm:$0xf0] }
 0x346   :  { %v8711_v46 = vor.u32 %v11119_v42, %v8708_v3 }
 0x347   :  { %2569 = vmatpush.bf16.msra.mxu2 %v8675_v25 }
 0x348   :  { %3309 = vmatpush.bf16.msra.mxu1 %v9019_v60  ;;  %3283 = vmatpush.bf16.msra.mxu0 %v8931_v1 }
 0x34a   :  { %v1836_v58 = vpop.f32.mrf.mxu0  ;;  %v1922_v37 = vpop.f32.mrf.mxu1 }
 0x34b   :  { %v1971_v41 = vpack.c.bf16 %v1922_v37, %v1833_v23  ;;  %v8731_v23 = vor.u32 %v11126_v11, %v8730_v45  ;;  %2570 = vmatpush.bf16.msra.mxu2 %v8667_v50  ;;  %v8724_v45 = vld [vmem:[#allocation10 + $0x78] sm:$0xf0]  ;;  %v11139_v50 = vld [vmem:[#allocation10 + $0xf4] sm:$0xf] }
 0x34c   :  { %3310 = vmatpush.bf16.msra.mxu1 %v9011_v12  ;;  %3284 = vmatpush.bf16.msra.mxu0 %v8923_v18 }
 0x34d   :  { %v2730_v13 = vunpack.c.l.b16 %v1971_v41  ;;  %v2731_v31 = vunpack.c.h.b16 %v1971_v41  ;;  %2599 = vmatpush.bf16.msra.mxu3 %v8731_v23  ;;  %v11121_v23 = vld [vmem:[#allocation10 + $0x64] sm:$0xf] }
 0x34f   :  { %v12988_v0 = vpack.c.b16 %v2730_v13, %v2728_v19  ;;  %v12990_v24 = vpack.c.b16 %v2731_v31, %v2729_v10  ;;  %v8791_v13 = vor.u32 %v11139_v50, %v8788_v55 }
 0x350   :  { %3311 = vmatpush.bf16.msra.mxu1 %v9003_v15  ;;  %v11137_v15 = vld [vmem:[#allocation10 + $0xe4] sm:$0xf] }
 0x351   :  { %2323 = vmatmul.bf16.gmra.mxu2 %v12959_v14  ;;  %2352 = vmatmul.bf16.gmra.mxu3 %v12961_v26  ;;  %v8995_v14 = vor.u32 %v11224_v62, %v8994_v27  ;;  %v11222_v26 = vld [vmem:[#allocation10 + $0x384] sm:$0xf0]  ;;  %v11135_v62 = vld [vmem:[#allocation10 + $0xd4] sm:$0xf] }
 0x352   :  { %v1838_v63 = vpop.f32.mrf.mxu0  ;;  %2930 = vmatmul.bf16.gmra.mxu0 %v12988_v0  ;;  %2959 = vmatmul.bf16.gmra.mxu1 %v12990_v24  ;;  %v1925_v53 = vpop.f32.mrf.mxu1  ;;  %v8987_v8 = vor.u32 %v11222_v26, %v8986_v35 }
 0x353   :  { %v1972_v2 = vpack.c.bf16 %v1925_v53, %v1836_v58  ;;  %2650 = vmatpush.bf16.msrb.mxu3 %v8791_v13  ;;  %v8780_v53 = vld [vmem:[#allocation10 + $0xe8] sm:$0xf0]  ;;  %v11113_v13 = vld [vmem:[#allocation10 + $0x24] sm:$0xf] }
 0x354   :  { %3312 = vmatpush.bf16.msra.mxu1 %v8995_v14  ;;  %v8783_v1 = vor.u32 %v11137_v15, %v8780_v53  ;;  %v8775_v14 = vor.u32 %v11135_v62, %v8772_v34  ;;  %v11111_v15 = vld [vmem:[#allocation10 + $0x14] sm:$0xf] }
 0x355   :  { %v2732_v47 = vunpack.c.l.b16 %v1972_v2  ;;  %v2733_v60 = vunpack.c.h.b16 %v1972_v2 }
 0x357   :  { %2651 = vmatpush.bf16.msrb.mxu3 %v8783_v1  ;;  %v8740_v1 = vld [vmem:[#allocation10 + $0x98] sm:$0xf0] }
 0x358   :  { %3313 = vmatpush.bf16.msra.mxu1 %v8987_v8 }
 0x35a   :  { %v1841_v38 = vpop.f32.mrf.mxu0  ;;  %v1927_v61 = vpop.f32.mrf.mxu1 }
 0x35b   :  { %v1973_v40 = vpack.c.bf16 %v1927_v61, %v1838_v63  ;;  %v8719_v63 = vor.u32 %v11121_v23, %v8716_v30  ;;  %2652 = vmatpush.bf16.msrb.mxu3 %v8775_v14  ;;  %v8748_v30 = vld [vmem:[#allocation10 + $0xa8] sm:$0xf0] }
 0x35d   :  { %v2734_v5 = vunpack.c.l.b16 %v1973_v40  ;;  %v2735_v4 = vunpack.c.h.b16 %v1973_v40 }
 0x35f   :  { %v12996_v25 = vpack.c.b16 %v2734_v5, %v2732_v47  ;;  %v12998_v17 = vpack.c.b16 %v2735_v4, %v2733_v60  ;;  %v11117_v5 = vld [vmem:[#allocation10 + $0x44] sm:$0xf]  ;;  %v8700_v4 = vld [vmem:[#allocation10 + $0x48] sm:$0xf0] }
 0x361   :  { %2328 = vmatmul.bf16.gmra.mxu2 %v12966_v39  ;;  %2357 = vmatmul.bf16.gmra.mxu3 %v12968_v21  ;;  %v11123_v21 = vld [vmem:[#allocation10 + $0x74] sm:$0xf] }
 0x362   :  { %v1843_v59 = vpop.f32.mrf.mxu0  ;;  %2935 = vmatmul.bf16.gmra.mxu0 %v12996_v25  ;;  %2964 = vmatmul.bf16.gmra.mxu1 %v12998_v17  ;;  %v1930_v16 = vpop.f32.mrf.mxu1  ;;  %v8727_v32 = vor.u32 %v11123_v21, %v8724_v45  ;;  %v8756_v21 = vld [vmem:[#allocation10 + $0xb8] sm:$0xf0] }
 0x363   :  { %v1974_v58 = vpack.c.bf16 %v1930_v16, %v1841_v38  ;;  %v8703_v16 = vor.u32 %v11117_v5, %v8700_v4 }
 0x364   :  { %2621 = vmatpush.bf16.msrb.mxu2 %v8727_v32 }
 0x365   :  { %v3085_v56 = vunpack.c.l.b16 %v1974_v58  ;;  %v3086_v37 = vunpack.c.h.b16 %v1974_v58  ;;  %v8764_v58 = vld [vmem:[#allocation10 + $0xc8] sm:$0xf0] }
 0x368   :  { %2622 = vmatpush.bf16.msrb.mxu2 %v8719_v63  ;;  %v8676_v63 = vld [vmem:[#allocation10 + $0x18] sm:$0xf0] }
 0x369   :  { %v8679_v3 = vor.u32 %v11111_v15, %v8676_v63 }
 0x36a   :  { %v1846_v33 = vpop.f32.mrf.mxu0  ;;  %v1932_v9 = vpop.f32.mrf.mxu1 }
 0x36b   :  { %v1975_v12 = vpack.c.bf16 %v1932_v9, %v1843_v59  ;;  %v11133_v59 = vld [vmem:[#allocation10 + $0xc4] sm:$0xf] }
 0x36c   :  { %2623 = vmatpush.bf16.msrb.mxu2 %v8711_v46 }
 0x36d   :  { %v3087_v19 = vunpack.c.l.b16 %v1975_v12  ;;  %v3088_v10 = vunpack.c.h.b16 %v1975_v12  ;;  %v8692_v12 = vld [vmem:[#allocation10 + $0x38] sm:$0xf0] }
 0x36f   :  { %v13004_v41 = vpack.c.b16 %v3087_v19, %v3085_v56  ;;  %v13006_v20 = vpack.c.b16 %v3088_v10, %v3086_v37  ;;  %v8767_v56 = vor.u32 %v11133_v59, %v8764_v58  ;;  %v11115_v37 = vld [vmem:[#allocation10 + $0x34] sm:$0xf]  ;;  %v8732_v59 = vld [vmem:[#allocation10 + $0x88] sm:$0xf0] }
 0x370   :  { %2624 = vmatpush.bf16.msrb.mxu2 %v8703_v16  ;;  %v11131_v19 = vld [vmem:[#allocation10 + $0xb4] sm:$0xf] }
 0x371   :  { %2571 = vmatmul.bf16.vlgmr.msra.gmra.mxu2 %v12910_v6  ;;  %2600 = vmatmul.bf16.vlgmr.msra.gmra.mxu3 %v12912_v28  ;;  %v8759_v50 = vor.u32 %v11131_v19, %v8756_v21 }
 0x372   :  { %v1848_v39 = vpop.f32.mrf.mxu0  ;;  %3285 = vmatmul.bf16.vlgmr.msra.gmra.mxu0 %v13004_v41  ;;  %3314 = vmatmul.bf16.vlgmr.msra.gmra.mxu1 %v13006_v20  ;;  %v1935_v11 = vpop.f32.mrf.mxu1 }
 0x373   :  { %v1976_v27 = vpack.c.bf16 %v1935_v11, %v1846_v33  ;;  %2653 = vmatpush.bf16.msrb.mxu3 %v8767_v56 }
 0x374   :  { %v2256_v31 = vpop.f32.mrf.mxu2  ;;  %v2285_v49 = vpop.f32.mrf.mxu3 }
 0x375   :  { %v13012_v22 = vadd.f32 %v2285_v49, %v2256_v31  ;;  %v3089_v26 = vunpack.c.l.b16 %v1976_v27  ;;  %v3090_v18 = vunpack.c.h.b16 %v1976_v27  ;;  %v8684_v31 = vld [vmem:[#allocation10 + $0x28] sm:$0xf0]  ;;  %v11129_v49 = vld [vmem:[#allocation10 + $0xa4] sm:$0xf]  ;;  %v11127_v27 = vld [vmem:[#allocation10 + $0x94] sm:$0xf] }
 0x376   :  { %v8687_v23 = vor.u32 %v11113_v13, %v8684_v31  ;;  %v8751_v42 = vor.u32 %v11129_v49, %v8748_v30 }
 0x377   :  { %2654 = vmatpush.bf16.msrb.mxu3 %v8759_v50 }
 0x37a   :  { %v1851_v2 = vpop.f32.mrf.mxu0  ;;  %v1937_v35 = vpop.f32.mrf.mxu1 }
 0x37b   :  { %v1977_v38 = vpack.c.bf16 %v1937_v35, %v1848_v39  ;;  %v8695_v39 = vor.u32 %v11115_v37, %v8692_v12  ;;  %2655 = vmatpush.bf16.msrb.mxu3 %v8751_v42  ;;  %v8743_v35 = vor.u32 %v11127_v27, %v8740_v1 }
 0x37c   :  { %v2258_v8 = vpop.f32.mrf.mxu2  ;;  %v2287_v61 = vpop.f32.mrf.mxu3 }
 0x37d   :  { %v13014_v47 = vadd.f32 %v2287_v61, %v2258_v8  ;;  %v3091_v60 = vunpack.c.l.b16 %v1977_v38  ;;  %v3092_v40 = vunpack.c.h.b16 %v1977_v38  ;;  %2625 = vmatpush.bf16.msrb.mxu2 %v8695_v39 }
 0x37f   :  { %v13016_v33 = vpack.c.b16 %v3091_v60, %v3089_v26  ;;  %v13018_v9 = vpack.c.b16 %v3092_v40, %v3090_v18  ;;  %v8668_v60 = vld [vmem:[#allocation10 + $0x8] sm:$0xf0]  ;;  %v11125_v40 = vld [vmem:[#allocation10 + $0x84] sm:$0xf]  ;;  %2656 = vmatpush.bf16.msrb.mxu3 %v8743_v35  ;;  %v11187_v35 = vld [vmem:[#allocation10 + $0x274] sm:$0xf] }
 0x380   :  { %v8735_v56 = vor.u32 %v11125_v40, %v8732_v59  ;;  %v8844_v59 = vld [vmem:[#allocation10 + $0x268] sm:$0xf0] }
 0x381   :  { %2576 = vmatmul.bf16.gmra.mxu2 %v12924_v51  ;;  %2605 = vmatmul.bf16.gmra.mxu3 %v12926_v57 }
 0x382   :  { %3290 = vmatmul.bf16.gmra.mxu0 %v13016_v33  ;;  %3319 = vmatmul.bf16.gmra.mxu1 %v13018_v9  ;;  %v1940_v10 = vpop.f32.mrf.mxu1  ;;  %v1853_v45 = vpop.f32.mrf.mxu0 }
 0x383   :  { %v1978_v53 = vpack.c.bf16 %v1940_v10, %v1851_v2  ;;  %2626 = vmatpush.bf16.msrb.mxu2 %v8687_v23  ;;  %v11109_v2 = vld [vmem:[#allocation10 + $0x4] sm:$0xf]  ;;  %2657 = vmatpush.bf16.msrb.mxu3 %v8735_v56 }
 0x384   :  { %v2261_v11 = vpop.f32.mrf.mxu2  ;;  %v2290_v32 = vpop.f32.mrf.mxu3  ;;  %v8671_v4 = vor.u32 %v11109_v2, %v8668_v60  ;;  %v11201_v56 = vld [vmem:[#allocation10 + $0x2e4] sm:$0xf] }
 0x385   :  { %v13024_v55 = vadd.f32 %v2290_v32, %v2261_v11  ;;  %v3093_v34 = vunpack.c.l.b16 %v1978_v53  ;;  %v3094_v46 = vunpack.c.h.b16 %v1978_v53 }
 0x387   :  { %2627 = vmatpush.bf16.msrb.mxu2 %v8679_v3 }
 0x38a   :  { %v1942_v62 = vpop.f32.mrf.mxu1  ;;  %v1856_v5 = vpop.f32.mrf.mxu0 }
 0x38b   :  { %v1979_v14 = vpack.c.bf16 %v1942_v62, %v1853_v45  ;;  %2628 = vmatpush.bf16.msrb.mxu2 %v8671_v4  ;;  %v11185_v4 = vld [vmem:[#allocation10 + $0x264] sm:$0xf] }
 0x38c   :  { %v2263_v26 = vpop.f32.mrf.mxu2  ;;  %v2292_v18 = vpop.f32.mrf.mxu3 }
 0x38d   :  { %v13026_v38 = vadd.f32 %v2292_v18, %v2263_v26  ;;  %v3095_v8 = vunpack.c.l.b16 %v1979_v14  ;;  %v3096_v61 = vunpack.c.h.b16 %v1979_v14  ;;  %v8852_v26 = vld [vmem:[#allocation10 + $0x278] sm:$0xf0]  ;;  %v11203_v18 = vld [vmem:[#allocation10 + $0x2f4] sm:$0xf] }
 0x38f   :  { %v13028_v16 = vpack.c.b16 %v3095_v8, %v3093_v34  ;;  %v13030_v58 = vpack.c.b16 %v3096_v61, %v3094_v46  ;;  %v8855_v8 = vor.u32 %v11187_v35, %v8852_v26  ;;  %v8916_v61 = vld [vmem:[#allocation10 + $0x2f8] sm:$0xf0] }
 0x390   :  { %v8919_v2 = vor.u32 %v11203_v18, %v8916_v61  ;;  %v11179_v18 = vld [vmem:[#allocation10 + $0x234] sm:$0xf] }
 0x391   :  { %2581 = vmatmul.bf16.gmra.mxu2 %v12930_v36  ;;  %2610 = vmatmul.bf16.gmra.mxu3 %v12932_v48  ;;  %v11195_v61 = vld [vmem:[#allocation10 + $0x2b4] sm:$0xf] }
 0x392   :  { %3295 = vmatmul.bf16.gmra.mxu0 %v13028_v16  ;;  %3324 = vmatmul.bf16.gmra.mxu1 %v13030_v58  ;;  %v1945_v37 = vpop.f32.mrf.mxu1  ;;  %v1858_v21 = vpop.f32.mrf.mxu0 }
 0x393   :  { %v1980_v39 = vpack.c.bf16 %v1945_v37, %v1856_v5  ;;  %2970 = vmatpush.bf16.msra.mxu2 %v8855_v8  ;;  %2999 = vmatpush.bf16.msra.mxu3 %v8919_v2  ;;  %v8847_v37 = vor.u32 %v11185_v4, %v8844_v59  ;;  %v8820_v8 = vld [vmem:[#allocation10 + $0x238] sm:$0xf0] }
 0x394   :  { %v2266_v12 = vpop.f32.mrf.mxu2  ;;  %v2295_v19 = vpop.f32.mrf.mxu3  ;;  %v8823_v2 = vor.u32 %v11179_v18, %v8820_v8  ;;  %v8860_v18 = vld [vmem:[#allocation10 + $0x288] sm:$0xf0] }
 0x395   :  { %v13036_v10 = vadd.f32 %v2295_v19, %v2266_v12  ;;  %v3097_v50 = vunpack.c.l.b16 %v1980_v39  ;;  %v3098_v11 = vunpack.c.h.b16 %v1980_v39  ;;  %v8908_v12 = vld [vmem:[#allocation10 + $0x2e8] sm:$0xf0]  ;;  %v8836_v19 = vld [vmem:[#allocation10 + $0x258] sm:$0xf0] }
 0x397   :  { %2971 = vmatpush.bf16.msra.mxu2 %v8847_v37  ;;  %v11177_v37 = vld [vmem:[#allocation10 + $0x224] sm:$0xf] }
 0x39a   :  { %v1947_v45 = vpop.f32.mrf.mxu1 }
 0x39b   :  { %v1981_v32 = vpack.c.bf16 %v1947_v45, %v1858_v21  ;;  %v8911_v21 = vor.u32 %v11201_v56, %v8908_v12  ;;  %v11199_v45 = vld [vmem:[#allocation10 + $0x2d4] sm:$0xf]  ;;  %v8812_v12 = vld [vmem:[#allocation10 + $0x228] sm:$0xf0] }
 0x39c   :  { %v2268_v13 = vpop.f32.mrf.mxu2  ;;  %v2297_v31 = vpop.f32.mrf.mxu3 }
 0x39d   :  { %v13038_v49 = vadd.f32 %v2297_v31, %v2268_v13  ;;  %v3099_v23 = vunpack.c.l.b16 %v1981_v32  ;;  %v3100_v30 = vunpack.c.h.b16 %v1981_v32  ;;  %3000 = vmatpush.bf16.msra.mxu3 %v8911_v21  ;;  %v11175_v21 = vld [vmem:[#allocation10 + $0x214] sm:$0xf] }
 0x39f   :  { %v13040_v15 = vpack.c.b16 %v3099_v23, %v3097_v50  ;;  %v13042_v63 = vpack.c.b16 %v3100_v30, %v3098_v11  ;;  %v8900_v50 = vld [vmem:[#allocation10 + $0x2d8] sm:$0xf0]  ;;  %v11181_v30 = vld [vmem:[#allocation10 + $0x244] sm:$0xf] }
 0x3a0   :  { %v8903_v32 = vor.u32 %v11199_v45, %v8900_v50 }
 0x3a1   :  { %2586 = vmatmul.bf16.gmra.mxu2 %v12940_v43  ;;  %2615 = vmatmul.bf16.gmra.mxu3 %v12942_v29 }
 0x3a2   :  { %3300 = vmatmul.bf16.gmra.mxu0 %v13040_v15  ;;  %3329 = vmatmul.bf16.gmra.mxu1 %v13042_v63 }
 0x3a3   :  { %3001 = vmatpush.bf16.msra.mxu3 %v8903_v32  ;;  %v11191_v32 = vld [vmem:[#allocation10 + $0x294] sm:$0xf] }
 0x3a4   :  { %v2271_v53 = vpop.f32.mrf.mxu2  ;;  %v2300_v42 = vpop.f32.mrf.mxu3 }
 0x3a5   :  { %v13048_v3 = vadd.f32 %v2300_v42, %v2271_v53  ;;  %v8828_v53 = vld [vmem:[#allocation10 + $0x248] sm:$0xf0]  ;;  %v11197_v42 = vld [vmem:[#allocation10 + $0x2c4] sm:$0xf] }
 0x3ac   :  { %v2273_v27 = vpop.f32.mrf.mxu2  ;;  %v2302_v1 = vpop.f32.mrf.mxu3 }
 0x3ad   :  { %v13050_v62 = vadd.f32 %v2302_v1, %v2273_v27  ;;  %v8831_v27 = vor.u32 %v11181_v30, %v8828_v53  ;;  %v8892_v1 = vld [vmem:[#allocation10 + $0x2c8] sm:$0xf0] }
 0x3ae   :  { %v8895_v35 = vor.u32 %v11197_v42, %v8892_v1  ;;  %v11173_v1 = vld [vmem:[#allocation10 + $0x204] sm:$0xf] }
 0x3af   :  { %v2921_v34 = vpop.f32.mrf.mxu0  ;;  %v2950_v46 = vpop.f32.mrf.mxu1 }
 0x3b0   :  { %v13052_v14 = vadd.f32 %v2950_v46, %v2921_v34  ;;  %3002 = vmatpush.bf16.msra.mxu3 %v8895_v35 }
 0x3b1   :  { %2629 = vmatmul.bf16.vlgmr.msrb.gmra.mxu2 %v12910_v6  ;;  %2658 = vmatmul.bf16.vlgmr.msrb.gmra.mxu3 %v12912_v28  ;;  %v11183_v6 = vld [vmem:[#allocation10 + $0x254] sm:$0xf] }
 0x3b2   :  { %v8839_v11 = vor.u32 %v11183_v6, %v8836_v19  ;;  %v11193_v6 = vld [vmem:[#allocation10 + $0x2a4] sm:$0xf]  ;;  %v8815_v19 = vor.u32 %v11177_v37, %v8812_v12 }
 0x3b4   :  { %v2314_v60 = vpop.f32.mrf.mxu2  ;;  %v2343_v40 = vpop.f32.mrf.mxu3  ;;  %2972 = vmatpush.bf16.msra.mxu2 %v8839_v11 }
 0x3b5   :  { %v13056_v5 = vadd.f32 %v2343_v40, %v2314_v60  ;;  %v8884_v60 = vld [vmem:[#allocation10 + $0x2b8] sm:$0xf0] }
 0x3b6   :  { %v8887_v40 = vor.u32 %v11195_v61, %v8884_v60 }
 0x3b7   :  { %v13058_v28 = vpop.f32.mrf.mxu0  ;;  %v13060_v39 = vpop.f32.mrf.mxu1 }
 0x3b8   :  { %2973 = vmatpush.bf16.msra.mxu2 %v8831_v27  ;;  %3003 = vmatpush.bf16.msra.mxu3 %v8887_v40 }
 0x3bc   :  { %v2316_v13 = vpop.f32.mrf.mxu2  ;;  %v2345_v31 = vpop.f32.mrf.mxu3  ;;  %2974 = vmatpush.bf16.msra.mxu2 %v8823_v2 }
 0x3bd   :  { %v13062_v23 = vadd.f32 %v2345_v31, %v2316_v13  ;;  %v8868_v13 = vld [vmem:[#allocation10 + $0x298] sm:$0xf0] }
 0x3be   :  { %v8871_v30 = vor.u32 %v11191_v32, %v8868_v13 }
 0x3bf   :  { %v2926_v34 = vpop.f32.mrf.mxu0  ;;  %v2955_v46 = vpop.f32.mrf.mxu1 }
 0x3c0   :  { %v13064_v26 = vadd.f32 %v2955_v46, %v2926_v34  ;;  %2975 = vmatpush.bf16.msra.mxu2 %v8815_v19  ;;  %v8796_v34 = vld [vmem:[#allocation10 + $0x208] sm:$0xf0]  ;;  %v11189_v46 = vld [vmem:[#allocation10 + $0x284] sm:$0xf] }
 0x3c1   :  { %2634 = vmatmul.bf16.gmra.mxu2 %v12924_v51  ;;  %2663 = vmatmul.bf16.gmra.mxu3 %v12926_v57  ;;  %v8876_v51 = vld [vmem:[#allocation10 + $0x2a8] sm:$0xf0]  ;;  %v8804_v57 = vld [vmem:[#allocation10 + $0x218] sm:$0xf0]  ;;  %v8799_v35 = vor.u32 %v11173_v1, %v8796_v34  ;;  %v8863_v2 = vor.u32 %v11189_v46, %v8860_v18  ;;  %v11219_v18 = vld [vmem:[#allocation10 + $0x374] sm:$0xf] }
 0x3c2   :  { %v8879_v11 = vor.u32 %v11193_v6, %v8876_v51  ;;  %v8807_v31 = vor.u32 %v11175_v21, %v8804_v57 }
 0x3c4   :  { %v2319_v4 = vpop.f32.mrf.mxu2  ;;  %v2348_v59 = vpop.f32.mrf.mxu3  ;;  %3004 = vmatpush.bf16.msra.mxu3 %v8879_v11  ;;  %2976 = vmatpush.bf16.msra.mxu2 %v8807_v31 }
 0x3c5   :  { %v13068_v56 = vadd.f32 %v2348_v59, %v2319_v4 }
 0x3c7   :  { %v13070_v45 = vpop.f32.mrf.mxu0  ;;  %v13072_v50 = vpop.f32.mrf.mxu1 }
 0x3c8   :  { %3005 = vmatpush.bf16.msra.mxu3 %v8871_v30  ;;  %2977 = vmatpush.bf16.msra.mxu2 %v8799_v35 }
 0x3cc   :  { %v2321_v53 = vpop.f32.mrf.mxu2  ;;  %v2350_v42 = vpop.f32.mrf.mxu3  ;;  %3006 = vmatpush.bf16.msra.mxu3 %v8863_v2 }
 0x3cd   :  { %v13074_v27 = vadd.f32 %v2350_v42, %v2321_v53 }
 0x3cf   :  { %v2931_v8 = vpop.f32.mrf.mxu0  ;;  %v2960_v61 = vpop.f32.mrf.mxu1 }
 0x3d0   :  { %v13076_v60 = vadd.f32 %v2960_v61, %v2931_v8  ;;  %v8980_v8 = vld [vmem:[#allocation10 + $0x378] sm:$0xf0]  ;;  %v11235_v61 = vld [vmem:[#allocation10 + $0x3f4] sm:$0xf] }
 0x3d1   :  { %2639 = vmatmul.bf16.gmra.mxu2 %v12930_v36  ;;  %2668 = vmatmul.bf16.gmra.mxu3 %v12932_v48  ;;  %v8983_v2 = vor.u32 %v11219_v18, %v8980_v8  ;;  %v9028_v18 = vld [vmem:[#allocation10 + $0x3d8] sm:$0xf0] }
 0x3d3   :  { %3335 = vmatpush.bf16.msrb.mxu2 %v8983_v2 }
 0x3d4   :  { %v2324_v40 = vpop.f32.mrf.mxu2  ;;  %v2353_v4 = vpop.f32.mrf.mxu3 }
 0x3d5   :  { %v13080_v59 = vadd.f32 %v2353_v4, %v2324_v40  ;;  %v9044_v40 = vld [vmem:[#allocation10 + $0x3f8] sm:$0xf0] }
 0x3d7   :  { %v13082_v37 = vpop.f32.mrf.mxu0  ;;  %v13084_v12 = vpop.f32.mrf.mxu1 }
 0x3dc   :  { %v2326_v6 = vpop.f32.mrf.mxu2  ;;  %v2355_v19 = vpop.f32.mrf.mxu3 }
 0x3dd   :  { %v13086_v51 = vadd.f32 %v2355_v19, %v2326_v6 }
 0x3df   :  { %v2936_v21 = vpop.f32.mrf.mxu0  ;;  %v2965_v57 = vpop.f32.mrf.mxu1 }
 0x3e0   :  { %v13088_v11 = vadd.f32 %v2965_v57, %v2936_v21  ;;  %v9047_v21 = vor.u32 %v11235_v61, %v9044_v40  ;;  %v8972_v57 = vld [vmem:[#allocation10 + $0x368] sm:$0xf0] }
 0x3e1   :  { %2644 = vmatmul.bf16.gmra.mxu2 %v12940_v43  ;;  %2673 = vmatmul.bf16.gmra.mxu3 %v12942_v29  ;;  %v8956_v40 = vld [vmem:[#allocation10 + $0x348] sm:$0xf0] }
 0x3e2   :  { %3364 = vmatpush.bf16.msrb.mxu3 %v9047_v21 }
 0x3e4   :  { %v2329_v36 = vpop.f32.mrf.mxu2  ;;  %v2358_v48 = vpop.f32.mrf.mxu3 }
 0x3e5   :  { %v13092_v32 = vadd.f32 %v2358_v48, %v2329_v36  ;;  %v11233_v36 = vld [vmem:[#allocation10 + $0x3e4] sm:$0xf] }
 0x3e7   :  { %v13094_v13 = vpop.f32.mrf.mxu0  ;;  %v13096_v31 = vpop.f32.mrf.mxu1 }
 0x3ec   :  { %v2331_v30 = vpop.f32.mrf.mxu2  ;;  %v2360_v53 = vpop.f32.mrf.mxu3 }
 0x3ed   :  { %v13098_v42 = vadd.f32 %v2360_v53, %v2331_v30 }
 0x3ef   :  { %v3286_v1 = vpop.f32.mrf.mxu0  ;;  %v3315_v34 = vpop.f32.mrf.mxu1 }
 0x3f0   :  { %v3316_v46 = vadd.f32 %v3315_v34, %v3286_v1 }
 0x3f1   :  { %2978 = vmatmul.bf16.vlgmr.msra.gmra.mxu2 %v12972_v52  ;;  %3007 = vmatmul.bf16.vlgmr.msra.gmra.mxu3 %v12974_v7  ;;  %v11217_v7 = vld [vmem:[#allocation10 + $0x364] sm:$0xf] }
 0x3f2   :  { %v8975_v48 = vor.u32 %v11217_v7, %v8972_v57 }
 0x3f4   :  { %v2572_v43 = vpop.f32.mrf.mxu2  ;;  %v2601_v29 = vpop.f32.mrf.mxu3  ;;  %3336 = vmatpush.bf16.msrb.mxu2 %v8975_v48 }
 0x3f5   :  { %v2573_v35 = vadd.f32 %v2572_v43, %v13012_v22  ;;  %v9036_v22 = vld [vmem:[#allocation10 + $0x3e8] sm:$0xf0]  ;;  %v11215_v43 = vld [vmem:[#allocation10 + $0x354] sm:$0xf] }
 0x3f6   :  { %v9039_v53 = vor.u32 %v11233_v36, %v9036_v22 }
 0x3f7   :  { %v2602_v4 = vadd.f32 %v2601_v29, %v2573_v35  ;;  %v13103_v6 = vpop.f32.mrf.mxu0  ;;  %v13105_v19 = vpop.f32.mrf.mxu1  ;;  %v8964_v29 = vld [vmem:[#allocation10 + $0x358] sm:$0xf0]  ;;  %v11231_v35 = vld [vmem:[#allocation10 + $0x3d4] sm:$0xf] }
 0x3f8   :  { %3365 = vmatpush.bf16.msrb.mxu3 %v9039_v53  ;;  %v8967_v61 = vor.u32 %v11215_v43, %v8964_v29  ;;  %v9031_v2 = vor.u32 %v11231_v35, %v9028_v18  ;;  %v11211_v53 = vld [vmem:[#allocation10 + $0x334] sm:$0xf]  ;;  %v8948_v43 = vld [vmem:[#allocation10 + $0x338] sm:$0xf0] }
 0x3f9   :  { %v3028_v52 = vadd.f32 %v13052_v14, %v2602_v4  ;;  %v11229_v4 = vld [vmem:[#allocation10 + $0x3c4] sm:$0xf]  ;;  %v9012_v29 = vld [vmem:[#allocation10 + $0x3b8] sm:$0xf0] }
 0x3fa   :  { %3337 = vmatpush.bf16.msrb.mxu2 %v8967_v61 }
 0x3fb   :  { %v13108_v30 = vadd.f32 %v3316_v46, %v3028_v52  ;;  %v11213_v46 = vld [vmem:[#allocation10 + $0x344] sm:$0xf]  ;;  %v9020_v52 = vld [vmem:[#allocation10 + $0x3c8] sm:$0xf0] }
 0x3fc   :  { %v2574_v1 = vpop.f32.mrf.mxu2  ;;  %v2603_v34 = vpop.f32.mrf.mxu3  ;;  %3366 = vmatpush.bf16.msrb.mxu3 %v9031_v2  ;;  %v8959_v21 = vor.u32 %v11213_v46, %v8956_v40  ;;  %v9023_v7 = vor.u32 %v11229_v4, %v9020_v52  ;;  %v2953_v46 = vadd.f32 %v13060_v39, %v13058_v28  ;;  %v9004_v52 = vld [vmem:[#allocation10 + $0x3a8] sm:$0xf0] }
 0x3fd   :  { %v2575_v48 = vadd.f32 %v2574_v1, %v13014_v47  ;;  %v11209_v47 = vld [vmem:[#allocation10 + $0x324] sm:$0xf]  ;;  %v8940_v1 = vld [vmem:[#allocation10 + $0x328] sm:$0xf0]  ;;  %vm3409_vm1 = vcmp.gt.f32.partialorder %v13108_v30, 0.0 }
 0x3fe   :  { %3338 = vmatpush.bf16.msrb.mxu2 %v8959_v21  ;;  %v8943_v21 = vor.u32 %v11209_v47, %v8940_v1  ;;  %v8988_v47 = vld [vmem:[#allocation10 + $0x388] sm:$0xf0] }
 0x3ff   :  { %v13110_v8 = vpop.f32.mrf.mxu0  ;;  %v13112_v14 = vpop.f32.mrf.mxu1  ;;  %v2604_v40 = vadd.f32 %v2603_v34, %v2575_v48  ;;  %v8932_v34 = vld [vmem:[#allocation10 + $0x318] sm:$0xf0]  ;;  %v11223_v48 = vld [vmem:[#allocation10 + $0x394] sm:$0xf] }
 0x400   :  { %3367 = vmatpush.bf16.msrb.mxu3 %v9023_v7 }
 0x401   :  { %2983 = vmatmul.bf16.gmra.mxu2 %v12980_v44  ;;  %3012 = vmatmul.bf16.gmra.mxu3 %v12982_v54  ;;  %v8951_v44 = vor.u32 %v11211_v53, %v8948_v43  ;;  %v11227_v54 = vld [vmem:[#allocation10 + $0x3b4] sm:$0xf] }
 0x402   :  { %v9015_v2 = vor.u32 %v11227_v54, %v9012_v29  ;;  %v8996_v54 = vld [vmem:[#allocation10 + $0x398] sm:$0xf0] }
 0x403   :  { %3339 = vmatpush.bf16.msrb.mxu2 %v8951_v44 }
 0x404   :  { %v2577_v57 = vpop.f32.mrf.mxu2  ;;  %v2606_v36 = vpop.f32.mrf.mxu3  ;;  %3368 = vmatpush.bf16.msrb.mxu3 %v9015_v2  ;;  %v11205_v2 = vld [vmem:[#allocation10 + $0x304] sm:$0xf] }
 0x405   :  { %v2578_v22 = vadd.f32 %v2577_v57, %v13024_v55  ;;  %v11225_v55 = vld [vmem:[#allocation10 + $0x3a4] sm:$0xf] }
 0x406   :  { %v9007_v7 = vor.u32 %v11225_v55, %v9004_v52  ;;  %v3425_v52 = vmul.f32 0.2, %v13108_v30 }
 0x407   :  { %v2607_v35 = vadd.f32 %v2606_v36, %v2578_v22  ;;  %v3293_v18 = vpop.f32.mrf.mxu0  ;;  %v3322_v61 = vpop.f32.mrf.mxu1  ;;  %v3030_v36 = vadd.f32 %v2953_v46, %v2604_v40  ;;  %v3318_v22 = vadd.f32 %v13105_v19, %v13103_v6  ;;  %3340 = vmatpush.bf16.msrb.mxu2 %v8943_v21  ;;  %v8924_v46 = vld [vmem:[#allocation10 + $0x308] sm:$0xf0]  ;;  %v11221_v6 = vld [vmem:[#allocation10 + $0x384] sm:$0xf] }
 0x408   :  { %3369 = vmatpush.bf16.msrb.mxu3 %v9007_v7  ;;  %v8927_v40 = vor.u32 %v11205_v2, %v8924_v46  ;;  %v8991_v1 = vor.u32 %v11221_v6, %v8988_v47  ;;  %v3321_v7 = vadd.f32 %v13112_v14, %v13110_v8 }
 0x409   :  { %v3032_v4 = vadd.f32 %v13064_v26, %v2607_v35  ;;  %v11207_v26 = vld [vmem:[#allocation10 + $0x314] sm:$0xf]  ;;  %v3395_v29 = vadd.f32 %v3318_v22, %v3030_v36  ;;  %v8999_v35 = vor.u32 %v11223_v48, %v8996_v54  ;;  %v2963_v48 = vadd.f32 %v13084_v12, %v13082_v37 }
 0x40a   :  { %v8935_v44 = vor.u32 %v11207_v26, %v8932_v34 }
 0x40b   :  { %vm3411_vm2 = vcmp.gt.f32.partialorder %v3395_v29, 0.0 }
 0x40c   :  { %v2579_v57 = vpop.f32.mrf.mxu2  ;;  %v2608_v53 = vpop.f32.mrf.mxu3  ;;  %3341 = vmatpush.bf16.msrb.mxu2 %v8935_v44  ;;  %3370 = vmatpush.bf16.msrb.mxu3 %v8999_v35 }
 0x40d   :  { %v2580_v43 = vadd.f32 %v2579_v57, %v13026_v38  ;;  %v2958_v38 = vadd.f32 %v13072_v50, %v13070_v45  ;;  %v3323_v45 = vadd.f32 %v3322_v61, %v3293_v18 }
 0x40f   :  { %v3296_v28 = vpop.f32.mrf.mxu0  ;;  %v3325_v39 = vpop.f32.mrf.mxu1  ;;  %v2609_v19 = vadd.f32 %v2608_v53, %v2580_v43  ;;  %v13135_v43 = vsel %vm3409_vm1, %v13108_v30, %v3425_v52 }
 0x410   :  { %3342 = vmatpush.bf16.msrb.mxu2 %v8927_v40  ;;  %3371 = vmatpush.bf16.msrb.mxu3 %v8991_v1  ;;  %v3326_v14 = vadd.f32 %v3325_v39, %v3296_v28 }
 0x411   :  { %2988 = vmatmul.bf16.gmra.mxu2 %v12988_v0  ;;  %3017 = vmatmul.bf16.gmra.mxu3 %v12990_v24  ;;  %v3427_v0 = vmul.f32 0.2, %v3395_v29  ;;  %v3034_v57 = vadd.f32 %v2958_v38, %v2609_v19 }
 0x413   :  { %v13137_v26 = vsel %vm3411_vm2, %v3395_v29, %v3427_v0  ;;  %v3399_v34 = vadd.f32 %v3323_v45, %v3034_v57  ;;  %v2968_v57 = vadd.f32 %v13096_v31, %v13094_v13  ;;  %vm4875_vm2 = vcmask 1040384  }
 0x414   :  { %v2582_v55 = vpop.f32.mrf.mxu2  ;;  %v2611_v21 = vpop.f32.mrf.mxu3  ;;  %v3457_v8 = vpack.c.bf16 %v13137_v26, %v13135_v43 }
 0x415   :  { %v2583_v24 = vadd.f32 %v2582_v55, %v13036_v10  ;;  %v3397_v10 = vadd.f32 %v3321_v7, %v3032_v4  ;;  %vm3415_vm4 = vcmp.gt.f32.partialorder %v3399_v34, 0.0 }
 0x417   :  { %v2612_v50 = vadd.f32 %v2611_v21, %v2583_v24  ;;  %v3298_v53 = vpop.f32.mrf.mxu0  ;;  %v3327_v36 = vpop.f32.mrf.mxu1  ;;  %v3429_v54 = vmul.f32 0.2, %v3397_v10  ;;  %vm3413_vm3 = vcmp.gt.f32.partialorder %v3397_v10, 0.0 }
 0x418   :  { %v3328_v29 = vadd.f32 %v3327_v36, %v3298_v53 }
 0x419   :  { %v3036_v22 = vadd.f32 %v13076_v60, %v2612_v50  ;;  %v3431_v60 = vmul.f32 0.2, %v3399_v34  ;;  %v3445_v39 = vsel %vm3413_vm3, %v3397_v10, %v3429_v54 }
 0x41b   :  { %v3401_v30 = vadd.f32 %v3326_v14, %v3036_v22  ;;  %v3447_v46 = vsel %vm3415_vm4, %v3399_v34, %v3431_v60 }
 0x41c   :  { %v2584_v18 = vpop.f32.mrf.mxu2  ;;  %v2613_v61 = vpop.f32.mrf.mxu3  ;;  %v3459_v12 = vpack.c.bf16 %v3447_v46, %v3445_v39 }
 0x41d   :  { %v2585_v44 = vadd.f32 %v2584_v18, %v13038_v49  ;;  %v3433_v6 = vmul.f32 0.2, %v3401_v30  ;;  %vm3417_vm5 = vcmp.gt.f32.partialorder %v3401_v30, 0.0 }
 0x41f   :  { %v2614_v35 = vadd.f32 %v2613_v61, %v2585_v44  ;;  %v3301_v4 = vpop.f32.mrf.mxu0  ;;  %v3330_v28 = vpop.f32.mrf.mxu1  ;;  %v3449_v1 = vsel %vm3417_vm5, %v3401_v30, %v3433_v6 }
 0x420   :  { %v3331_v21 = vadd.f32 %v3330_v28, %v3301_v4 }
 0x421   :  { %v3038_v2 = vadd.f32 %v2963_v48, %v2614_v35  ;;  %2993 = vmatmul.bf16.gmra.mxu2 %v12996_v25  ;;  %3022 = vmatmul.bf16.gmra.mxu3 %v12998_v17 }
 0x423   :  { %v3403_v37 = vadd.f32 %v3328_v29, %v3038_v2 }
 0x424   :  { %v2587_v49 = vpop.f32.mrf.mxu2  ;;  %v2616_v38 = vpop.f32.mrf.mxu3 }
 0x425   :  { %v3435_v19 = vmul.f32 0.2, %v3403_v37  ;;  %v2588_v40 = vadd.f32 %v2587_v49, %v13048_v3  ;;  %vm3419_vm6 = vcmp.gt.f32.partialorder %v3403_v37, 0.0 }
 0x427   :  { %v2617_v47 = vadd.f32 %v2616_v38, %v2588_v40  ;;  %v3451_v25 = vsel %vm3419_vm6, %v3403_v37, %v3435_v19  ;;  %v3303_v52 = vpop.f32.mrf.mxu0  ;;  %v3332_v0 = vpop.f32.mrf.mxu1 }
 0x428   :  { %v3461_v55 = vpack.c.bf16 %v3451_v25, %v3449_v1  ;;  %v3333_v3 = vadd.f32 %v3332_v0, %v3303_v52 }
 0x429   :  { %v3040_v17 = vadd.f32 %v13088_v11, %v2617_v47 }
 0x42b   :  { %v3405_v50 = vadd.f32 %v3331_v21, %v3040_v17 }
 0x42c   :  { %v2589_v24 = vpop.f32.mrf.mxu2  ;;  %v2618_v7 = vpop.f32.mrf.mxu3 }
 0x42d   :  { %v2590_v45 = vadd.f32 %v2589_v24, %v13050_v62  ;;  %v3437_v22 = vmul.f32 0.2, %v3405_v50  ;;  %vm3421_vm7 = vcmp.gt.f32.partialorder %v3405_v50, 0.0 }
 0x42f   :  { %v2619_v53 = vadd.f32 %v2618_v7, %v2590_v45  ;;  %v3453_v13 = vsel %vm3421_vm7, %v3405_v50, %v3437_v22 }
 0x431   :  { %v3042_v36 = vadd.f32 %v2968_v57, %v2619_v53  ;;  %3343 = vmatmul.bf16.vlgmr.msrb.gmra.mxu2 %v13004_v41  ;;  %3372 = vmatmul.bf16.vlgmr.msrb.gmra.mxu3 %v13006_v20 }
 0x433   :  { %v3407_v11 = vadd.f32 %v3333_v3, %v3042_v36 }
 0x434   :  { %v2630_v10 = vpop.f32.mrf.mxu2  ;;  %v2659_v34 = vpop.f32.mrf.mxu3 }
 0x435   :  { %vm3423_vm8 = vcmp.gt.f32.partialorder %v3407_v11, 0.0  ;;  %v3439_v14 = vmul.f32 0.2, %v3407_v11  ;;  %v2631_v18 = vadd.f32 %v2630_v10, %v13056_v5 }
 0x437   :  { %v3455_v31 = vsel %vm3423_vm8, %v3407_v11, %v3439_v14  ;;  %v2660_v62 = vadd.f32 %v2659_v34, %v2631_v18 }
 0x438   :  { %v3463_v61 = vpack.c.bf16 %v3455_v31, %v3453_v13 }
 0x43a   :  { %3549 = vmatpush.bf16.msrb.mxu0 %v3463_v61 }
 0x43c   :  { %v2632_v48 = vpop.f32.mrf.mxu2  ;;  %v2661_v44 = vpop.f32.mrf.mxu3 }
 0x43d   :  { %v2633_v10 = vadd.f32 %v2632_v48, %v13062_v23 }
 0x43e   :  { %3550 = vmatpush.bf16.msrb.mxu0 %v3461_v55 }
 0x43f   :  { %v2662_v14 = vadd.f32 %v2661_v44, %v2633_v10 }
 0x441   :  { %3348 = vmatmul.bf16.gmra.mxu2 %v13016_v33  ;;  %3377 = vmatmul.bf16.gmra.mxu3 %v13018_v9 }
 0x442   :  { %3551 = vmatpush.bf16.msrb.mxu0 %v3459_v12 }
 0x444   :  { %v2635_v41 = vpop.f32.mrf.mxu2  ;;  %v2664_v20 = vpop.f32.mrf.mxu3 }
 0x445   :  { %v2636_v54 = vadd.f32 %v2635_v41, %v13068_v56 }
 0x446   :  { %3552 = vmatpush.bf16.msrb.mxu0 %v3457_v8 }
 0x447   :  { %v2665_v5 = vadd.f32 %v2664_v20, %v2636_v54 }
 0x44c   :  { %v2637_v60 = vpop.f32.mrf.mxu2  ;;  %v2666_v30 = vpop.f32.mrf.mxu3 }
 0x44d   :  { %v2638_v13 = vadd.f32 %v2637_v60, %v13074_v27 }
 0x44f   :  { %v2667_v54 = vadd.f32 %v2666_v30, %v2638_v13 }
 0x451   :  { %3353 = vmatmul.bf16.gmra.mxu2 %v13028_v16  ;;  %3382 = vmatmul.bf16.gmra.mxu3 %v13030_v58 }
 0x454   :  { %v2640_v35 = vpop.f32.mrf.mxu2  ;;  %v2669_v33 = vpop.f32.mrf.mxu3 }
 0x455   :  { %v2641_v9 = vadd.f32 %v2640_v35, %v13080_v59 }
 0x457   :  { %v2670_v29 = vadd.f32 %v2669_v33, %v2641_v9 }
 0x45c   :  { %v13163_v2 = vpop.f32.mrf.mxu2  ;;  %v13165_v4 = vpop.f32.mrf.mxu3 }
 0x45d   :  { %v2643_v60 = vadd.f32 %v13163_v2, %v13086_v51  ;;  %v11237_v2 = vld [vmem:[%s14043_s4] sm:$0xff] }
 0x45e   :  { %9080 = vmatmul.msk.bf16.vlgmr.msrb.gmra.mxu0 %vm1496_vm0, %v11237_v2 }
 0x461   :  { %3358 = vmatmul.bf16.gmra.mxu2 %v13040_v15  ;;  %3387 = vmatmul.bf16.gmra.mxu3 %v13042_v63 }
 0x464   :  { %v2645_v56 = vpop.f32.mrf.mxu2  ;;  %v2674_v43 = vpop.f32.mrf.mxu3 }
 0x465   :  { %v2646_v26 = vadd.f32 %v2645_v56, %v13092_v32 }
 0x467   :  { %v2675_v16 = vadd.f32 %v2674_v43, %v2646_v26 }
 0x46c   :  { %v13170_v8 = vpop.f32.mrf.mxu2  ;;  %v13172_v58 = vpop.f32.mrf.mxu3 }
 0x474   :  { %v2979_v28 = vpop.f32.mrf.mxu2  ;;  %v3008_v59 = vpop.f32.mrf.mxu3 }
 0x475   :  { %v3009_v39 = vadd.f32 %v3008_v59, %v2979_v28 }
 0x477   :  { %v3029_v46 = vadd.f32 %v3009_v39, %v2660_v62  ;;  %v2672_v39 = vadd.f32 %v13165_v4, %v2643_v60  ;;  %v11304_v60 = vld [vmem:[#allocation10 + $0x5d4] sm:$0xf0] }
 0x47c   :  { %v2981_v6 = vpop.f32.mrf.mxu2  ;;  %v3010_v37 = vpop.f32.mrf.mxu3 }
 0x47d   :  { %v3011_v34 = vadd.f32 %v3010_v37, %v2981_v6 }
 0x47f   :  { %v3031_v31 = vadd.f32 %v3011_v34, %v2662_v14  ;;  %v11242_v34 = vld [vmem:[%s14043_s4 + $0x28] sm:$0xff]  ;;  %v11243_v14 = vld [vmem:[%s14043_s4 + $0x30] sm:$0xff] }
 0x484   :  { %v2984_v12 = vpop.f32.mrf.mxu2  ;;  %v3013_v49 = vpop.f32.mrf.mxu3 }
 0x485   :  { %v3014_v15 = vadd.f32 %v3013_v49, %v2984_v12 }
 0x487   :  { %v3033_v38 = vadd.f32 %v3014_v15, %v2665_v5 }
 0x48c   :  { %v2986_v63 = vpop.f32.mrf.mxu2  ;;  %v3015_v19 = vpop.f32.mrf.mxu3 }
 0x48d   :  { %v3016_v41 = vadd.f32 %v3015_v19, %v2986_v63 }
 0x48f   :  { %v3035_v33 = vadd.f32 %v3016_v41, %v2667_v54  ;;  %v9218_v41 = vld [vmem:[#allocation10 + $0x5f0] sm:$0xf]  ;;  %v11308_v54 = vld [vmem:[#allocation10 + $0x5f4] sm:$0xf0] }
 0x494   :  { %v2989_v40 = vpop.f32.mrf.mxu2  ;;  %v3018_v47 = vpop.f32.mrf.mxu3 }
 0x495   :  { %v3019_v32 = vadd.f32 %v3018_v47, %v2989_v40 }
 0x497   :  { %v3037_v1 = vadd.f32 %v3019_v32, %v2670_v29 }
 0x49c   :  { %v2991_v25 = vpop.f32.mrf.mxu2  ;;  %v3020_v55 = vpop.f32.mrf.mxu3 }
 0x49d   :  { %v3021_v59 = vadd.f32 %v3020_v55, %v2991_v25  ;;  %v2648_v55 = vadd.f32 %v13170_v8, %v13098_v42 }
 0x4a4   :  { %v2994_v17 = vpop.f32.mrf.mxu2  ;;  %v3023_v21 = vpop.f32.mrf.mxu3 }
 0x4a5   :  { %v3024_v52 = vadd.f32 %v3023_v21, %v2994_v17 }
 0x4a7   :  { %v13174_v0 = vadd.f32 %v3024_v52, %v2675_v16  ;;  %v2677_v52 = vadd.f32 %v13172_v58, %v2648_v55  ;;  %v11239_v58 = vld [vmem:[%s14043_s4 + $0x10] sm:$0xff] }
 0x4ac   :  { %v13176_v24 = vpop.f32.mrf.mxu2  ;;  %v13178_v7 = vpop.f32.mrf.mxu3 }
 0x4ad   :  { %v3026_v21 = vadd.f32 %v13178_v7, %v13176_v24  ;;  %v11241_v7 = vld [vmem:[%s14043_s4 + $0x20] sm:$0xff] }
 0x4b4   :  { %v3344_v57 = vpop.f32.mrf.mxu2  ;;  %v3373_v45 = vpop.f32.mrf.mxu3 }
 0x4b5   :  { %v3374_v50 = vadd.f32 %v3373_v45, %v3344_v57 }
 0x4b7   :  { %v3394_v53 = vadd.f32 %v3374_v50, %v3029_v46 }
 0x4b9   :  { %v3426_v9 = vmul.f32 0.2, %v3394_v53  ;;  %vm3410_vm9 = vcmp.gt.f32.partialorder %v3394_v53, 0.0 }
 0x4bb   :  { %v3442_v44 = vsel %vm3410_vm9, %v3394_v53, %v3426_v9  ;;  %v3043_v53 = vadd.f32 %v3026_v21, %v2677_v52  ;;  %v9210_v9 = vld [vmem:[#allocation10 + $0x5e0] sm:$0xf]  ;;  %v9106_v21 = vld [vmem:[#allocation10 + $0x510] sm:$0xf]  ;;  %v11280_v52 = vld [vmem:[#allocation10 + $0x514] sm:$0xf0] }
 0x4bc   :  { %v3346_v3 = vpop.f32.mrf.mxu2  ;;  %v3375_v36 = vpop.f32.mrf.mxu3 }
 0x4bd   :  { %v3376_v18 = vadd.f32 %v3375_v36, %v3346_v3 }
 0x4bf   :  { %v3396_v20 = vadd.f32 %v3376_v18, %v3031_v31  ;;  %v11244_v18 = vld [vmem:[%s14043_s4 + $0x38] sm:$0xff] }
 0x4c1   :  { %v3428_v29 = vmul.f32 0.2, %v3396_v20  ;;  %vm3412_vm10 = vcmp.gt.f32.partialorder %v3396_v20, 0.0 }
 0x4c3   :  { %v3444_v26 = vsel %vm3412_vm10, %v3396_v20, %v3428_v29  ;;  %v11306_v29 = vld [vmem:[#allocation10 + $0x5e4] sm:$0xf0] }
 0x4c4   :  { %v3349_v22 = vpop.f32.mrf.mxu2  ;;  %v3378_v11 = vpop.f32.mrf.mxu3  ;;  %v3458_v27 = vpack.c.bf16 %v3444_v26, %v3442_v44  ;;  %v11288_v44 = vld [vmem:[#allocation10 + $0x554] sm:$0xf0]  ;;  %v9202_v26 = vld [vmem:[#allocation10 + $0x5d0] sm:$0xf] }
 0x4c5   :  { %v3379_v5 = vadd.f32 %v3378_v11, %v3349_v22  ;;  %v11238_v11 = vld [vmem:[%s14043_s4 + $0x8] sm:$0xff] }
 0x4c6   :  { %9081 = vmatmul.msk.bf16.gmra.mxu0 %vm1496_vm0, %v11238_v11 }
 0x4c7   :  { %v3398_v56 = vadd.f32 %v3379_v5, %v3033_v38  ;;  %v3039_v38 = vadd.f32 %v3021_v59, %v2672_v39  ;;  %v9146_v5 = vld [vmem:[#allocation10 + $0x560] sm:$0xf]  ;;  %v11302_v39 = vld [vmem:[#allocation10 + $0x5c4] sm:$0xf0] }
 0x4c8   :  { %v9194_v59 = vld [vmem:[#allocation10 + $0x5c0] sm:$0xf] }
 0x4c9   :  { %v3430_v16 = vmul.f32 0.2, %v3398_v56  ;;  %vm3414_vm11 = vcmp.gt.f32.partialorder %v3398_v56, 0.0 }
 0x4cb   :  { %v3446_v6 = vsel %vm3414_vm11, %v3398_v56, %v3430_v16  ;;  %v9130_v16 = vld [vmem:[#allocation10 + $0x540] sm:$0xf] }
 0x4cc   :  { %v3351_v62 = vpop.f32.mrf.mxu2  ;;  %v3380_v61 = vpop.f32.mrf.mxu3 }
 0x4cd   :  { %v3381_v35 = vadd.f32 %v3380_v61, %v3351_v62  ;;  %v9154_v62 = vld [vmem:[#allocation10 + $0x570] sm:$0xf]  ;;  %v11292_v61 = vld [vmem:[#allocation10 + $0x574] sm:$0xf0] }
 0x4ce   :  { %v9155_v20 = vor.u32 %v11292_v61, %v9154_v62  ;;  %v11305_v61 = vld [vmem:[#allocation10 + $0x5e4] sm:$0xf] }
 0x4cf   :  { %v3400_v43 = vadd.f32 %v3381_v35, %v3035_v33  ;;  %v11290_v35 = vld [vmem:[#allocation10 + $0x564] sm:$0xf0]  ;;  %v9219_v33 = vor.u32 %v11308_v54, %v9218_v41  ;;  %v9212_v41 = vld [vmem:[#allocation10 + $0x5e8] sm:$0xf0] }
 0x4d0   :  { %3905 = vmatpush.bf16.msra.mxu2 %v9155_v20  ;;  %v9215_v54 = vor.u32 %v11305_v61, %v9212_v41  ;;  %v9108_v61 = vld [vmem:[#allocation10 + $0x518] sm:$0xf0] }
 0x4d1   :  { %v3432_v28 = vmul.f32 0.2, %v3400_v43  ;;  %vm3416_vm12 = vcmp.gt.f32.partialorder %v3400_v43, 0.0  ;;  %3924 = vmatpush.bf16.msra.mxu3 %v9219_v33  ;;  %v11287_v33 = vld [vmem:[#allocation10 + $0x554] sm:$0xf] }
 0x4d3   :  { %v3448_v37 = vsel %vm3416_vm12, %v3400_v43, %v3432_v28  ;;  %v9147_v43 = vor.u32 %v11290_v35, %v9146_v5  ;;  %v11286_v28 = vld [vmem:[#allocation10 + $0x544] sm:$0xf0] }
 0x4d4   :  { %v3354_v23 = vpop.f32.mrf.mxu2  ;;  %v3383_v48 = vpop.f32.mrf.mxu3  ;;  %v3460_v15 = vpack.c.bf16 %v3448_v37, %v3446_v6  ;;  %v9195_v6 = vor.u32 %v11302_v39, %v9194_v59  ;;  %v9132_v39 = vld [vmem:[#allocation10 + $0x548] sm:$0xf0] }
 0x4d5   :  { %v3384_v30 = vadd.f32 %v3383_v48, %v3354_v23  ;;  %v9211_v23 = vor.u32 %v11306_v29, %v9210_v9  ;;  %3906 = vmatpush.bf16.msra.mxu2 %v9147_v43  ;;  %v9138_v48 = vld [vmem:[#allocation10 + $0x550] sm:$0xf]  ;;  %v9140_v9 = vld [vmem:[#allocation10 + $0x558] sm:$0xf0]  ;;  %v11303_v29 = vld [vmem:[#allocation10 + $0x5d4] sm:$0xf] }
 0x4d6   :  { %9082 = vmatmul.msk.bf16.gmra.mxu0 %vm1496_vm0, %v11239_v58  ;;  %v9143_v43 = vor.u32 %v11287_v33, %v9140_v9  ;;  %v9172_v9 = vld [vmem:[#allocation10 + $0x598] sm:$0xf0] }
 0x4d7   :  { %v3402_v46 = vadd.f32 %v3384_v30, %v3037_v1  ;;  %3925 = vmatpush.bf16.msra.mxu3 %v9211_v23  ;;  %v9203_v30 = vor.u32 %v11304_v60, %v9202_v26  ;;  %v9204_v23 = vld [vmem:[#allocation10 + $0x5d8] sm:$0xf0]  ;;  %v9474_v60 = vld [vmem:[#allocation10 + $0x6f0] sm:$0xf] }
 0x4d8   :  { %v9207_v26 = vor.u32 %v11303_v29, %v9204_v23  ;;  %v9378_v29 = vld [vmem:[#allocation10 + $0x630] sm:$0xf] }
 0x4d9   :  { %v3434_v19 = vmul.f32 0.2, %v3402_v46  ;;  %vm3418_vm13 = vcmp.gt.f32.partialorder %v3402_v46, 0.0 }
 0x4db   :  { %v3450_v47 = vsel %vm3418_vm13, %v3402_v46, %v3434_v19  ;;  %v13229_v13 = vpop.f32.mrf.mxu0  ;;  %v9131_v46 = vor.u32 %v11286_v28, %v9130_v16  ;;  %3926 = vmatpush.bf16.msra.mxu3 %v9203_v30  ;;  %v11300_v19 = vld [vmem:[#allocation10 + $0x5b4] sm:$0xf0]  ;;  %v11285_v28 = vld [vmem:[#allocation10 + $0x544] sm:$0xf] }
 0x4dc   :  { %v3356_v12 = vpop.f32.mrf.mxu2  ;;  %v3385_v49 = vpop.f32.mrf.mxu3  ;;  %v11340_v16 = vld [vmem:[#allocation10 + $0x6f4] sm:$0xf0] }
 0x4dd   :  { %v3386_v63 = vadd.f32 %v3385_v49, %v3356_v12  ;;  %v9122_v49 = vld [vmem:[#allocation10 + $0x530] sm:$0xf]  ;;  %v9475_v59 = vor.u32 %v11340_v16, %v9474_v60  ;;  %v11277_v16 = vld [vmem:[#allocation10 + $0x504] sm:$0xf] }
 0x4df   :  { %v3404_v40 = vadd.f32 %v3386_v63, %v3039_v38  ;;  %3927 = vmatpush.bf16.msra.mxu3 %v9195_v6  ;;  %v9186_v38 = vld [vmem:[#allocation10 + $0x5b0] sm:$0xf]  ;;  %v9196_v6 = vld [vmem:[#allocation10 + $0x5c8] sm:$0xf0] }
 0x4e1   :  { %v3436_v51 = vmul.f32 0.2, %v3404_v40  ;;  %vm3420_vm14 = vcmp.gt.f32.partialorder %v3404_v40, 0.0 }
 0x4e3   :  { %v3452_v32 = vsel %vm3420_vm14, %v3404_v40, %v3436_v51  ;;  %v3556_v31 = vpop.f32.mrf.mxu0  ;;  %v9114_v40 = vld [vmem:[#allocation10 + $0x520] sm:$0xf]  ;;  %v11282_v51 = vld [vmem:[#allocation10 + $0x524] sm:$0xf0]  ;;  %vm5121_vm14 = vcmask 261120  }
 0x4e4   :  { %v3359_v4 = vpop.f32.mrf.mxu2  ;;  %v3388_v1 = vpop.f32.mrf.mxu3  ;;  %v3462_v25 = vpack.c.bf16 %v3452_v32, %v3450_v47  ;;  %v9178_v47 = vld [vmem:[#allocation10 + $0x5a0] sm:$0xf]  ;;  %v11298_v32 = vld [vmem:[#allocation10 + $0x5a4] sm:$0xf0] }
 0x4e5   :  { %v3389_v17 = vadd.f32 %v3388_v1, %v3359_v4  ;;  %v9115_v4 = vor.u32 %v11282_v51, %v9114_v40  ;;  %v9179_v1 = vor.u32 %v11298_v32, %v9178_v47  ;;  %v11338_v51 = vld [vmem:[#allocation10 + $0x6e4] sm:$0xf0]  ;;  %v9124_v47 = vld [vmem:[#allocation10 + $0x538] sm:$0xf0] }
 0x4e7   :  { %v3406_v57 = vadd.f32 %v3389_v17, %v13174_v0  ;;  %v11240_v0 = vld [vmem:[%s14043_s4 + $0x18] sm:$0xff] }
 0x4e8   :  { %9083 = vmatmul.msk.bf16.gmra.mxu0 %vm1496_vm0, %v11240_v0 }
 0x4e9   :  { %v3438_v36 = vmul.f32 0.2, %v3406_v57  ;;  %vm3422_vm15 = vcmp.gt.f32.partialorder %v3406_v57, 0.0 }
 0x4eb   :  { %v3454_v8 = vsel %vm3422_vm15, %v3406_v57, %v3438_v36  ;;  %v9170_v57 = vld [vmem:[#allocation10 + $0x590] sm:$0xf] }
 0x4ec   :  { %v3361_v45 = vpop.f32.mrf.mxu2  ;;  %v3390_v50 = vpop.f32.mrf.mxu3 }
 0x4ed   :  { %v3391_v3 = vadd.f32 %v3390_v50, %v3361_v45  ;;  %v9107_v45 = vor.u32 %v11280_v52, %v9106_v21  ;;  %v11296_v50 = vld [vmem:[#allocation10 + $0x594] sm:$0xf0] }
 0x4ee   :  { %v9171_v36 = vor.u32 %v11296_v50, %v9170_v57  ;;  %v11320_v52 = vld [vmem:[#allocation10 + $0x654] sm:$0xf0]  ;;  %v9458_v57 = vld [vmem:[#allocation10 + $0x6d0] sm:$0xf] }
 0x4ef   :  { %v3408_v22 = vadd.f32 %v3391_v3, %v3043_v53  ;;  %v9098_v53 = vld [vmem:[#allocation10 + $0x500] sm:$0xf]  ;;  %v11278_v3 = vld [vmem:[#allocation10 + $0x504] sm:$0xf0] }
 0x4f1   :  { %vm3424_vm1 = vcmp.gt.f32.partialorder %v3408_v22, 0.0  ;;  %v3440_v42 = vmul.f32 0.2, %v3408_v22 }
 0x4f3   :  { %v3456_v10 = vsel %vm3424_vm1, %v3408_v22, %v3440_v42  ;;  %v9162_v22 = vld [vmem:[#allocation10 + $0x580] sm:$0xf] }
 0x4f4   :  { %v3464_v24 = vpack.c.bf16 %v3456_v10, %v3454_v8  ;;  %v9099_v8 = vor.u32 %v11278_v3, %v9098_v53  ;;  %v11281_v3 = vld [vmem:[#allocation10 + $0x524] sm:$0xf] }
 0x4f6   :  { %3598 = vmatpush.bf16.msrb.mxu1 %v3464_v24  ;;  %v11291_v24 = vld [vmem:[#allocation10 + $0x574] sm:$0xf] }
 0x4f8   :  { %9084 = vmatmul.msk.bf16.gmra.mxu0 %vm1496_vm0, %v11241_v7 }
 0x4fa   :  { %3599 = vmatpush.bf16.msrb.mxu1 %v3462_v25 }
 0x4fe   :  { %3600 = vmatpush.bf16.msrb.mxu1 %v3460_v15  ;;  %v11284_v15 = vld [vmem:[#allocation10 + $0x534] sm:$0xf0] }
 0x4ff   :  { %v9123_v63 = vor.u32 %v11284_v15, %v9122_v49  ;;  %v9402_v15 = vld [vmem:[#allocation10 + $0x660] sm:$0xf] }
 0x502   :  { %3601 = vmatpush.bf16.msrb.mxu1 %v3458_v27  ;;  %v9139_v27 = vor.u32 %v11288_v44, %v9138_v48  ;;  %v9410_v48 = vld [vmem:[#allocation10 + $0x670] sm:$0xf]  ;;  %v11324_v44 = vld [vmem:[#allocation10 + $0x674] sm:$0xf0] }
 0x504   :  { %3907 = vmatpush.bf16.msra.mxu2 %v9139_v27  ;;  %v9411_v27 = vor.u32 %v11324_v44, %v9410_v48  ;;  %v11332_v48 = vld [vmem:[#allocation10 + $0x6b4] sm:$0xf0] }
 0x505   :  { %9088 = vmatmul.msk.bf16.vlgmr.msrb.gmra.mxu1 %vm1496_vm0, %v11237_v2  ;;  %v9187_v2 = vor.u32 %v11300_v19, %v9186_v38  ;;  %v11322_v38 = vld [vmem:[#allocation10 + $0x664] sm:$0xf0] }
 0x506   :  { %4450 = vmatpush.bf16.msra.mxu0 %v9411_v27  ;;  %4469 = vmatpush.bf16.msra.mxu1 %v9475_v59  ;;  %v9403_v40 = vor.u32 %v11322_v38, %v9402_v15  ;;  %v9370_v15 = vld [vmem:[#allocation10 + $0x620] sm:$0xf]  ;;  %v11314_v38 = vld [vmem:[#allocation10 + $0x624] sm:$0xf0] }
 0x507   :  { %3928 = vmatpush.bf16.msra.mxu3 %v9187_v2  ;;  %v11283_v2 = vld [vmem:[#allocation10 + $0x534] sm:$0xf] }
 0x508   :  { %9085 = vmatmul.msk.bf16.gmra.mxu0 %vm1496_vm0, %v11242_v34  ;;  %3908 = vmatpush.bf16.msra.mxu2 %v9131_v46  ;;  %v11301_v46 = vld [vmem:[#allocation10 + $0x5c4] sm:$0xf]  ;;  %v9127_v21 = vor.u32 %v11283_v2, %v9124_v47  ;;  %v11260_v2 = vld [vmem:[#allocation10 + $0x474] sm:$0xf0]  ;;  %v9346_v47 = vld [vmem:[#allocation10 + $0x4f0] sm:$0xf] }
 0x509   :  { %v9199_v49 = vor.u32 %v11301_v46, %v9196_v6  ;;  %v11293_v46 = vld [vmem:[#allocation10 + $0x584] sm:$0xf] }
 0x50a   :  { %4451 = vmatpush.bf16.msra.mxu0 %v9403_v40  ;;  %v11330_v40 = vld [vmem:[#allocation10 + $0x6a4] sm:$0xf0] }
 0x50b   :  { %3929 = vmatpush.bf16.msra.mxu3 %v9179_v1  ;;  %v9188_v1 = vld [vmem:[#allocation10 + $0x5b8] sm:$0xf0] }
 0x50c   :  { %3909 = vmatpush.bf16.msra.mxu2 %v9123_v63  ;;  %v9466_v63 = vld [vmem:[#allocation10 + $0x6e0] sm:$0xf] }
 0x50d   :  { %v9467_v32 = vor.u32 %v11338_v51, %v9466_v63  ;;  %v9282_v51 = vld [vmem:[#allocation10 + $0x470] sm:$0xf] }
 0x50f   :  { %3930 = vmatpush.bf16.msra.mxu3 %v9171_v36  ;;  %v9116_v36 = vld [vmem:[#allocation10 + $0x528] sm:$0xf0]  ;;  %4470 = vmatpush.bf16.msra.mxu1 %v9467_v32 }
 0x510   :  { %3910 = vmatpush.bf16.msra.mxu2 %v9115_v4  ;;  %v11299_v4 = vld [vmem:[#allocation10 + $0x5b4] sm:$0xf] }
 0x511   :  { %v9191_v50 = vor.u32 %v11299_v4, %v9188_v1 }
 0x514   :  { %3911 = vmatpush.bf16.msra.mxu2 %v9107_v45  ;;  %v11336_v45 = vld [vmem:[#allocation10 + $0x6d4] sm:$0xf0] }
 0x515   :  { %9089 = vmatmul.msk.bf16.gmra.mxu1 %vm1496_vm0, %v11238_v11  ;;  %v11294_v11 = vld [vmem:[#allocation10 + $0x584] sm:$0xf0] }
 0x516   :  { %v9163_v10 = vor.u32 %v11294_v11, %v9162_v22  ;;  %v11297_v22 = vld [vmem:[#allocation10 + $0x5a4] sm:$0xf]  ;;  %v9459_v11 = vor.u32 %v11336_v45, %v9458_v57  ;;  %v9362_v57 = vld [vmem:[#allocation10 + $0x610] sm:$0xf]  ;;  %v11312_v45 = vld [vmem:[#allocation10 + $0x614] sm:$0xf0] }
 0x518   :  { %9086 = vmatmul.msk.bf16.gmra.mxu0 %vm1496_vm0, %v11243_v14  ;;  %3912 = vmatpush.bf16.msra.mxu2 %v9099_v8  ;;  %v9180_v8 = vld [vmem:[#allocation10 + $0x5a8] sm:$0xf0] }
 0x519   :  { %3931 = vmatpush.bf16.msra.mxu3 %v9163_v10  ;;  %v9386_v10 = vld [vmem:[#allocation10 + $0x640] sm:$0xf]  ;;  %4471 = vmatpush.bf16.msra.mxu1 %v9459_v11  ;;  %v11258_v11 = vld [vmem:[#allocation10 + $0x464] sm:$0xf0] }
 0x525   :  { %9090 = vmatmul.msk.bf16.gmra.mxu1 %vm1496_vm0, %v11239_v58  ;;  %v9156_v58 = vld [vmem:[#allocation10 + $0x578] sm:$0xf0] }
 0x528   :  { %9087 = vmatmul.msk.bf16.gmra.mxu0 %vm1496_vm0, %v11244_v18 }
 0x535   :  { %9091 = vmatmul.msk.bf16.gmra.mxu1 %vm1496_vm0, %v11240_v0  ;;  %v11307_v0 = vld [vmem:[#allocation10 + $0x5f4] sm:$0xf] }
 0x543   :  { %v13233_v56 = vpop.f32.mrf.mxu0 }
 0x545   :  { %9092 = vmatmul.msk.bf16.gmra.mxu1 %vm1496_vm0, %v11241_v7 }
 0x54b   :  { %v3561_v12 = vpop.f32.mrf.mxu0 }
 0x553   :  { %v13239_v17 = vpop.f32.mrf.mxu0 }
 0x555   :  { %9093 = vmatmul.msk.bf16.gmra.mxu1 %vm1496_vm0, %v11242_v34  ;;  %v9159_v34 = vor.u32 %v11291_v24, %v9156_v58  ;;  %v11318_v24 = vld [vmem:[#allocation10 + $0x644] sm:$0xf0]  ;;  %v9450_v58 = vld [vmem:[#allocation10 + $0x6c0] sm:$0xf] }
 0x557   :  { %3943 = vmatpush.bf16.msrb.mxu2 %v9159_v34  ;;  %v9119_v34 = vor.u32 %v11281_v3, %v9116_v36  ;;  %v9426_v3 = vld [vmem:[#allocation10 + $0x690] sm:$0xf]  ;;  %v11328_v36 = vld [vmem:[#allocation10 + $0x694] sm:$0xf0] }
 0x55b   :  { %v13243_v7 = vpop.f32.mrf.mxu0 }
 0x565   :  { %9094 = vmatmul.msk.bf16.gmra.mxu1 %vm1496_vm0, %v11243_v14  ;;  %v9220_v14 = vld [vmem:[#allocation10 + $0x5f8] sm:$0xf0]  ;;  %v13247_v30 = vpop.f32.mrf.mxu0 }
 0x566   :  { %v9223_v62 = vor.u32 %v11307_v0, %v9220_v14  ;;  %v11334_v0 = vld [vmem:[#allocation10 + $0x6c4] sm:$0xf0] }
 0x568   :  { %3962 = vmatpush.bf16.msrb.mxu3 %v9223_v62  ;;  %v11279_v62 = vld [vmem:[#allocation10 + $0x514] sm:$0xf] }
 0x569   :  { %v9111_v23 = vor.u32 %v11279_v62, %v9108_v61  ;;  %v11310_v62 = vld [vmem:[#allocation10 + $0x604] sm:$0xf0]  ;;  %v9418_v61 = vld [vmem:[#allocation10 + $0x680] sm:$0xf] }
 0x56c   :  { %3963 = vmatpush.bf16.msrb.mxu3 %v9215_v54  ;;  %v9451_v54 = vor.u32 %v11334_v0, %v9450_v58  ;;  %v9363_v58 = vor.u32 %v11312_v45, %v9362_v57  ;;  %v9354_v0 = vld [vmem:[#allocation10 + $0x600] sm:$0xf]  ;;  %v11252_v57 = vld [vmem:[#allocation10 + $0x434] sm:$0xf0]  ;;  %v9314_v45 = vld [vmem:[#allocation10 + $0x4b0] sm:$0xf] }
 0x56e   :  { %4472 = vmatpush.bf16.msra.mxu1 %v9451_v54  ;;  %v9330_v54 = vld [vmem:[#allocation10 + $0x4d0] sm:$0xf] }
 0x570   :  { %3964 = vmatpush.bf16.msrb.mxu3 %v9207_v26 }
 0x574   :  { %3965 = vmatpush.bf16.msrb.mxu3 %v9199_v49  ;;  %v9164_v49 = vld [vmem:[#allocation10 + $0x588] sm:$0xf0] }
 0x575   :  { %9095 = vmatmul.msk.bf16.gmra.mxu1 %vm1496_vm0, %v11244_v18  ;;  %v11289_v18 = vld [vmem:[#allocation10 + $0x564] sm:$0xf]  ;;  %v9167_v1 = vor.u32 %v11293_v46, %v9164_v49  ;;  %v9322_v46 = vld [vmem:[#allocation10 + $0x4c0] sm:$0xf] }
 0x576   :  { %v9530_v49 = vld [vmem:[#allocation10 + $0x760] sm:$0xf] }
 0x578   :  { %3966 = vmatpush.bf16.msrb.mxu3 %v9191_v50 }
 0x582   :  { %v13235_v37 = vpop.f32.mrf.mxu1 }
 0x58a   :  { %v3605_v25 = vpop.f32.mrf.mxu1 }
 0x58b   :  { %v13237_v55 = vpack.c.bf16 %v3605_v25, %v3556_v31  ;;  %v9148_v31 = vld [vmem:[#allocation10 + $0x568] sm:$0xf0]  ;;  %v9394_v25 = vld [vmem:[#allocation10 + $0x650] sm:$0xf] }
 0x58c   :  { %v9151_v20 = vor.u32 %v11289_v18, %v9148_v31  ;;  %v9395_v53 = vor.u32 %v11320_v52, %v9394_v25  ;;  %v9183_v18 = vor.u32 %v11297_v22, %v9180_v8  ;;  %v9387_v31 = vor.u32 %v11318_v24, %v9386_v10  ;;  %v11276_v52 = vld [vmem:[#allocation10 + $0x4f4] sm:$0xf0]  ;;  %v9274_v22 = vld [vmem:[#allocation10 + $0x460] sm:$0xf]  ;;  %v11274_v10 = vld [vmem:[#allocation10 + $0x4e4] sm:$0xf0] }
 0x58d   :  { %v9371_v25 = vor.u32 %v11314_v38, %v9370_v15  ;;  %v9338_v8 = vld [vmem:[#allocation10 + $0x4e0] sm:$0xf]  ;;  %v9275_v24 = vor.u32 %v11258_v11, %v9274_v22  ;;  %v11352_v22 = vld [vmem:[#allocation10 + $0x754] sm:$0xf0] }
 0x58e   :  { %3944 = vmatpush.bf16.msrb.mxu2 %v9151_v20  ;;  %4452 = vmatpush.bf16.msra.mxu0 %v9395_v53  ;;  %v13250_v20 = vpop.f32.mrf.mxu0  ;;  %v9347_v53 = vor.u32 %v11276_v52, %v9346_v47  ;;  %v9250_v52 = vld [vmem:[#allocation10 + $0x430] sm:$0xf] }
 0x58f   :  { %3967 = vmatpush.bf16.msrb.mxu3 %v9183_v18  ;;  %v9427_v18 = vor.u32 %v11328_v36, %v9426_v3  ;;  %v11268_v3 = vld [vmem:[#allocation10 + $0x4b4] sm:$0xf0]  ;;  %v9522_v36 = vld [vmem:[#allocation10 + $0x750] sm:$0xf] }
 0x590   :  { %v9315_v11 = vor.u32 %v11268_v3, %v9314_v45 }
 0x592   :  { %v13241_v42 = vpop.f32.mrf.mxu1  ;;  %3945 = vmatpush.bf16.msrb.mxu2 %v9143_v43  ;;  %v11316_v43 = vld [vmem:[#allocation10 + $0x634] sm:$0xf0]  ;;  %4453 = vmatpush.bf16.msra.mxu0 %v9387_v31  ;;  %v9339_v31 = vor.u32 %v11274_v10, %v9338_v8  ;;  %v9586_v8 = vld [vmem:[#allocation10 + $0x7d0] sm:$0xf] }
 0x593   :  { %v11368_v10 = vld [vmem:[#allocation10 + $0x7d4] sm:$0xf0] }
 0x596   :  { %v13259_v4 = vpop.f32.mrf.mxu0 }
 0x59a   :  { %v3610_v5 = vpop.f32.mrf.mxu1 }
 0x59b   :  { %v13245_v35 = vpack.c.bf16 %v3610_v5, %v3561_v12  ;;  %v9135_v12 = vor.u32 %v11285_v28, %v9132_v39  ;;  %v11295_v5 = vld [vmem:[#allocation10 + $0x594] sm:$0xf]  ;;  %v9100_v28 = vld [vmem:[#allocation10 + $0x508] sm:$0xf0]  ;;  %v9379_v39 = vor.u32 %v11316_v43, %v9378_v29  ;;  %v11356_v43 = vld [vmem:[#allocation10 + $0x774] sm:$0xf0] }
 0x59c   :  { %v9175_v59 = vor.u32 %v11295_v5, %v9172_v9  ;;  %v9103_v63 = vor.u32 %v11277_v16, %v9100_v28  ;;  %v11272_v5 = vld [vmem:[#allocation10 + $0x4d4] sm:$0xf0]  ;;  %v9258_v16 = vld [vmem:[#allocation10 + $0x440] sm:$0xf]  ;;  %v11254_v28 = vld [vmem:[#allocation10 + $0x444] sm:$0xf0] }
 0x59d   :  { %3946 = vmatpush.bf16.msrb.mxu2 %v9135_v12  ;;  %4454 = vmatpush.bf16.msra.mxu0 %v9379_v39 }
 0x59e   :  { %3968 = vmatpush.bf16.msrb.mxu3 %v9175_v59  ;;  %v13263_v59 = vpop.f32.mrf.mxu0 }
 0x5a1   :  { %3947 = vmatpush.bf16.msrb.mxu2 %v9127_v21  ;;  %v9283_v21 = vor.u32 %v11260_v2, %v9282_v51  ;;  %4455 = vmatpush.bf16.msra.mxu0 %v9371_v25  ;;  %v11370_v51 = vld [vmem:[#allocation10 + $0x7e4] sm:$0xf0]  ;;  %v9259_v2 = vor.u32 %v11254_v28, %v9258_v16  ;;  %v11364_v16 = vld [vmem:[#allocation10 + $0x7b4] sm:$0xf0] }
 0x5a2   :  { %v3613_v19 = vpop.f32.mrf.mxu1  ;;  %3969 = vmatpush.bf16.msrb.mxu3 %v9167_v1 }
 0x5a3   :  { %v3647_v14 = vpack.c.bf16 %v3613_v19, %v13239_v17  ;;  %v9442_v17 = vld [vmem:[#allocation10 + $0x6b0] sm:$0xf]  ;;  %v9434_v19 = vld [vmem:[#allocation10 + $0x6a0] sm:$0xf] }
 0x5a4   :  { %v9443_v12 = vor.u32 %v11332_v48, %v9442_v17  ;;  %v9435_v50 = vor.u32 %v11330_v40, %v9434_v19  ;;  %v11372_v17 = vld [vmem:[#allocation10 + $0x7f4] sm:$0xf0]  ;;  %v11354_v40 = vld [vmem:[#allocation10 + $0x764] sm:$0xf0] }
 0x5a5   :  { %3948 = vmatpush.bf16.msrb.mxu2 %v9119_v34  ;;  %v3729_v44 = vunpack.c.l.b16 %v3647_v14  ;;  %v3730_v26 = vunpack.c.h.b16 %v3647_v14  ;;  %v9266_v34 = vld [vmem:[#allocation10 + $0x450] sm:$0xf]  ;;  %v11256_v14 = vld [vmem:[#allocation10 + $0x454] sm:$0xf0]  ;;  %4456 = vmatpush.bf16.msra.mxu0 %v9363_v58  ;;  %v9531_v25 = vor.u32 %v11354_v40, %v9530_v49  ;;  %v9523_v58 = vor.u32 %v11352_v22, %v9522_v36  ;;  %v9226_v49 = vld [vmem:[#allocation10 + $0x400] sm:$0xf] }
 0x5a6   :  { %4473 = vmatpush.bf16.msra.mxu1 %v9443_v12  ;;  %v9267_v29 = vor.u32 %v11256_v14, %v9266_v34  ;;  %v11270_v12 = vld [vmem:[#allocation10 + $0x4c4] sm:$0xf0]  ;;  %v9306_v14 = vld [vmem:[#allocation10 + $0x4a0] sm:$0xf]  ;;  %v11259_v36 = vld [vmem:[#allocation10 + $0x474] sm:$0xf] }
 0x5a7   :  { %v9323_v1 = vor.u32 %v11270_v12, %v9322_v46  ;;  %v11250_v34 = vld [vmem:[#allocation10 + $0x424] sm:$0xf0]  ;;  %v9284_v22 = vld [vmem:[#allocation10 + $0x478] sm:$0xf0] }
 0x5a8   :  { %v11262_v40 = vld [vmem:[#allocation10 + $0x484] sm:$0xf0] }
 0x5a9   :  { %3949 = vmatpush.bf16.msrb.mxu2 %v9111_v23  ;;  %v9602_v23 = vld [vmem:[#allocation10 + $0x7f0] sm:$0xf] }
 0x5aa   :  { %v3615_v41 = vpop.f32.mrf.mxu1  ;;  %4474 = vmatpush.bf16.msra.mxu1 %v9435_v50 }
 0x5ab   :  { %v3648_v33 = vpack.c.bf16 %v3615_v41, %v13243_v7  ;;  %v11326_v41 = vld [vmem:[#allocation10 + $0x684] sm:$0xf0] }
 0x5ad   :  { %v3731_v27 = vunpack.c.l.b16 %v3648_v33  ;;  %v3732_v60 = vunpack.c.h.b16 %v3648_v33  ;;  %3950 = vmatpush.bf16.msrb.mxu2 %v9103_v63  ;;  %v9538_v33 = vld [vmem:[#allocation10 + $0x770] sm:$0xf] }
 0x5ae   :  { %4475 = vmatpush.bf16.msra.mxu1 %v9427_v18  ;;  %v9539_v39 = vor.u32 %v11356_v43, %v9538_v33  ;;  %v11266_v18 = vld [vmem:[#allocation10 + $0x4a4] sm:$0xf0]  ;;  %v11248_v43 = vld [vmem:[#allocation10 + $0x414] sm:$0xf0] }
 0x5af   :  { %v13253_v7 = vpack.c.b16 %v3731_v27, %v3729_v44  ;;  %v13255_v6 = vpack.c.b16 %v3732_v60, %v3730_v26  ;;  %v9355_v44 = vor.u32 %v11310_v62, %v9354_v0  ;;  %v9419_v27 = vor.u32 %v11326_v41, %v9418_v61  ;;  %v11350_v62 = vld [vmem:[#allocation10 + $0x744] sm:$0xf0]  ;;  %v9578_v61 = vld [vmem:[#allocation10 + $0x7c0] sm:$0xf]  ;;  %v13271_v41 = vpop.f32.mrf.mxu0 }
 0x5b0   :  { %v9331_v60 = vor.u32 %v11272_v5, %v9330_v54  ;;  %v9587_v0 = vor.u32 %v11368_v10, %v9586_v8  ;;  %v11366_v5 = vld [vmem:[#allocation10 + $0x7c4] sm:$0xf0]  ;;  %v9287_v10 = vor.u32 %v11259_v36, %v9284_v22  ;;  %v11249_v36 = vld [vmem:[#allocation10 + $0x424] sm:$0xf] }
 0x5b1   :  { %3913 = vmatmul.bf16.vlgmr.msra.gmra.mxu2 %v13253_v7  ;;  %3932 = vmatmul.bf16.vlgmr.msra.gmra.mxu3 %v13255_v6 }
 0x5b2   :  { %v3618_v32 = vpop.f32.mrf.mxu1  ;;  %4161 = vmatpush.bf16.msra.mxu2 %v9283_v21  ;;  %4180 = vmatpush.bf16.msra.mxu3 %v9347_v53  ;;  %v9251_v53 = vor.u32 %v11252_v57, %v9250_v52 }
 0x5b3   :  { %v3649_v9 = vpack.c.bf16 %v3618_v32, %v13247_v30  ;;  %v9603_v30 = vor.u32 %v11372_v17, %v9602_v23  ;;  %4457 = vmatpush.bf16.msra.mxu0 %v9355_v44  ;;  %4476 = vmatpush.bf16.msra.mxu1 %v9419_v27  ;;  %v9579_v17 = vor.u32 %v11366_v5, %v9578_v61  ;;  %v11264_v44 = vld [vmem:[#allocation10 + $0x494] sm:$0xf0]  ;;  %v11273_v61 = vld [vmem:[#allocation10 + $0x4e4] sm:$0xf] }
 0x5b4   :  { %v11348_v27 = vld [vmem:[#allocation10 + $0x734] sm:$0xf0] }
 0x5b5   :  { %v3733_v15 = vunpack.c.l.b16 %v3649_v9  ;;  %v3734_v38 = vunpack.c.h.b16 %v3649_v9  ;;  %v9307_v9 = vor.u32 %v11266_v18, %v9306_v14  ;;  %v9554_v14 = vld [vmem:[#allocation10 + $0x790] sm:$0xf]  ;;  %v11360_v18 = vld [vmem:[#allocation10 + $0x794] sm:$0xf0] }
 0x5b6   :  { %4162 = vmatpush.bf16.msra.mxu2 %v9275_v24  ;;  %4181 = vmatpush.bf16.msra.mxu3 %v9339_v31  ;;  %v9242_v24 = vld [vmem:[#allocation10 + $0x420] sm:$0xf] }
 0x5b7   :  { %4747 = vmatpush.bf16.msrb.mxu0 %v9539_v39  ;;  %4766 = vmatpush.bf16.msrb.mxu1 %v9603_v30  ;;  %v9514_v31 = vld [vmem:[#allocation10 + $0x740] sm:$0xf]  ;;  %v9243_v54 = vor.u32 %v11250_v34, %v9242_v24  ;;  %v9348_v24 = vld [vmem:[#allocation10 + $0x4f8] sm:$0xf0] }
 0x5b8   :  { %v9515_v23 = vor.u32 %v11350_v62, %v9514_v31  ;;  %v9555_v31 = vor.u32 %v11360_v18, %v9554_v14  ;;  %v9276_v62 = vld [vmem:[#allocation10 + $0x468] sm:$0xf0]  ;;  %v11263_v14 = vld [vmem:[#allocation10 + $0x494] sm:$0xf]  ;;  %v9300_v18 = vld [vmem:[#allocation10 + $0x498] sm:$0xf0] }
 0x5ba   :  { %v3620_v48 = vpop.f32.mrf.mxu1  ;;  %4163 = vmatpush.bf16.msra.mxu2 %v9267_v29  ;;  %4182 = vmatpush.bf16.msra.mxu3 %v9331_v60  ;;  %v9234_v29 = vld [vmem:[#allocation10 + $0x410] sm:$0xf] }
 0x5bb   :  { %v3650_v26 = vpack.c.bf16 %v3620_v48, %v13250_v20  ;;  %v9594_v20 = vld [vmem:[#allocation10 + $0x7e0] sm:$0xf]  ;;  %4748 = vmatpush.bf16.msrb.mxu0 %v9531_v25  ;;  %v9298_v48 = vld [vmem:[#allocation10 + $0x490] sm:$0xf]  ;;  %v9235_v39 = vor.u32 %v11248_v43, %v9234_v29  ;;  %v11342_v29 = vld [vmem:[#allocation10 + $0x704] sm:$0xf0] }
 0x5bc   :  { %v9595_v21 = vor.u32 %v11370_v51, %v9594_v20  ;;  %v9570_v60 = vld [vmem:[#allocation10 + $0x7b0] sm:$0xf]  ;;  %v9299_v12 = vor.u32 %v11264_v44, %v9298_v48  ;;  %v9498_v20 = vld [vmem:[#allocation10 + $0x720] sm:$0xf]  ;;  %v9268_v48 = vld [vmem:[#allocation10 + $0x458] sm:$0xf0] }
 0x5bd   :  { %v3735_v63 = vunpack.c.l.b16 %v3650_v26  ;;  %v3736_v19 = vunpack.c.h.b16 %v3650_v26  ;;  %v9506_v26 = vld [vmem:[#allocation10 + $0x730] sm:$0xf]  ;;  %v9562_v25 = vld [vmem:[#allocation10 + $0x7a0] sm:$0xf] }
 0x5be   :  { %4164 = vmatpush.bf16.msra.mxu2 %v9259_v2  ;;  %4183 = vmatpush.bf16.msra.mxu3 %v9323_v1  ;;  %v11346_v1 = vld [vmem:[#allocation10 + $0x724] sm:$0xf0]  ;;  %v9546_v43 = vld [vmem:[#allocation10 + $0x780] sm:$0xf] }
 0x5bf   :  { %v13265_v47 = vpack.c.b16 %v3735_v63, %v3733_v15  ;;  %v13267_v32 = vpack.c.b16 %v3736_v19, %v3734_v38  ;;  %4767 = vmatpush.bf16.msrb.mxu1 %v9595_v21  ;;  %4749 = vmatpush.bf16.msrb.mxu0 %v9523_v58  ;;  %v11246_v15 = vld [vmem:[#allocation10 + $0x404] sm:$0xf0]  ;;  %v9507_v38 = vor.u32 %v11348_v27, %v9506_v26  ;;  %v9290_v19 = vld [vmem:[#allocation10 + $0x480] sm:$0xf]  ;;  %v9490_v58 = vld [vmem:[#allocation10 + $0x710] sm:$0xf] }
 0x5c0   :  { %v9571_v63 = vor.u32 %v11364_v16, %v9570_v60  ;;  %v11362_v21 = vld [vmem:[#allocation10 + $0x7a4] sm:$0xf0]  ;;  %v9227_v57 = vor.u32 %v11246_v15, %v9226_v49  ;;  %v9291_v45 = vor.u32 %v11262_v40, %v9290_v19  ;;  %v11271_v26 = vld [vmem:[#allocation10 + $0x4d4] sm:$0xf]  ;;  %v9332_v27 = vld [vmem:[#allocation10 + $0x4d8] sm:$0xf0] }
 0x5c1   :  { %3918 = vmatmul.bf16.gmra.mxu2 %v13265_v47  ;;  %3937 = vmatmul.bf16.gmra.mxu3 %v13267_v32  ;;  %v9563_v3 = vor.u32 %v11362_v21, %v9562_v25  ;;  %v11253_v15 = vld [vmem:[#allocation10 + $0x444] sm:$0xf]  ;;  %v11251_v25 = vld [vmem:[#allocation10 + $0x434] sm:$0xf]  ;;  %v9252_v21 = vld [vmem:[#allocation10 + $0x438] sm:$0xf0] }
 0x5c2   :  { %v3623_v50 = vpop.f32.mrf.mxu1  ;;  %4165 = vmatpush.bf16.msra.mxu2 %v9251_v53  ;;  %4184 = vmatpush.bf16.msra.mxu3 %v9315_v11  ;;  %v9499_v53 = vor.u32 %v11346_v1, %v9498_v20  ;;  %v11275_v11 = vld [vmem:[#allocation10 + $0x4f4] sm:$0xf] }
 0x5c3   :  { %v3651_v33 = vpack.c.bf16 %v3623_v50, %v13259_v4  ;;  %4768 = vmatpush.bf16.msrb.mxu1 %v9587_v0  ;;  %4750 = vmatpush.bf16.msrb.mxu0 %v9515_v23  ;;  %v3581_v50 = vpop.f32.mrf.mxu0  ;;  %v11344_v0 = vld [vmem:[#allocation10 + $0x714] sm:$0xf0]  ;;  %v9351_v34 = vor.u32 %v11275_v11, %v9348_v24  ;;  %v11358_v23 = vld [vmem:[#allocation10 + $0x784] sm:$0xf0]  ;;  %v9244_v11 = vld [vmem:[#allocation10 + $0x428] sm:$0xf0] }
 0x5c4   :  { %v9547_v16 = vor.u32 %v11358_v23, %v9546_v43 }
 0x5c5   :  { %v4274_v30 = vunpack.c.l.b16 %v3651_v33  ;;  %v4275_v46 = vunpack.c.h.b16 %v3651_v33 }
 0x5c6   :  { %4166 = vmatpush.bf16.msra.mxu2 %v9243_v54  ;;  %4185 = vmatpush.bf16.msra.mxu3 %v9307_v9  ;;  %v9340_v54 = vld [vmem:[#allocation10 + $0x4e8] sm:$0xf0]  ;;  %v9482_v9 = vld [vmem:[#allocation10 + $0x700] sm:$0xf] }
 0x5c7   :  { %4769 = vmatpush.bf16.msrb.mxu1 %v9579_v17  ;;  %4751 = vmatpush.bf16.msrb.mxu0 %v9507_v38  ;;  %v9343_v33 = vor.u32 %v11273_v61, %v9340_v54  ;;  %v11255_v17 = vld [vmem:[#allocation10 + $0x454] sm:$0xf]  ;;  %v9483_v60 = vor.u32 %v11342_v29, %v9482_v9  ;;  %v9260_v38 = vld [vmem:[#allocation10 + $0x448] sm:$0xf0]  ;;  %v11245_v9 = vld [vmem:[#allocation10 + $0x404] sm:$0xf] }
 0x5c8   :  { %v9228_v29 = vld [vmem:[#allocation10 + $0x408] sm:$0xf0] }
 0x5ca   :  { %v3625_v28 = vpop.f32.mrf.mxu1  ;;  %4167 = vmatpush.bf16.msra.mxu2 %v9235_v39  ;;  %4186 = vmatpush.bf16.msra.mxu3 %v9299_v12  ;;  %v9335_v39 = vor.u32 %v11271_v26, %v9332_v27  ;;  %v9231_v27 = vor.u32 %v11245_v9, %v9228_v29  ;;  %v9444_v29 = vld [vmem:[#allocation10 + $0x6b8] sm:$0xf0] }
 0x5cb   :  { %v3652_v4 = vpack.c.bf16 %v3625_v28, %v13263_v59  ;;  %4770 = vmatpush.bf16.msrb.mxu1 %v9571_v63  ;;  %4752 = vmatpush.bf16.msrb.mxu0 %v9499_v53  ;;  %v9271_v28 = vor.u32 %v11255_v17, %v9268_v48  ;;  %v9324_v63 = vld [vmem:[#allocation10 + $0x4c8] sm:$0xf0]  ;;  %v9255_v53 = vor.u32 %v11251_v25, %v9252_v21  ;;  %v9396_v25 = vld [vmem:[#allocation10 + $0x658] sm:$0xf0]  ;;  %v11335_v21 = vld [vmem:[#allocation10 + $0x6d4] sm:$0xf] }
 0x5cd   :  { %v4276_v51 = vunpack.c.l.b16 %v3652_v4  ;;  %v4277_v2 = vunpack.c.h.b16 %v3652_v4 }
 0x5ce   :  { %4168 = vmatpush.bf16.msra.mxu2 %v9227_v57  ;;  %4187 = vmatpush.bf16.msra.mxu3 %v9291_v45  ;;  %v11267_v57 = vld [vmem:[#allocation10 + $0x4b4] sm:$0xf] }
 0x5cf   :  { %v13275_v52 = vpack.c.b16 %v4276_v51, %v4274_v30  ;;  %v13277_v59 = vpack.c.b16 %v4277_v2, %v4275_v46  ;;  %4771 = vmatpush.bf16.msrb.mxu1 %v9563_v3  ;;  %v3584_v46 = vpop.f32.mrf.mxu0  ;;  %v9263_v2 = vor.u32 %v11253_v15, %v9260_v38  ;;  %v11321_v15 = vld [vmem:[#allocation10 + $0x664] sm:$0xf]  ;;  %v9404_v38 = vld [vmem:[#allocation10 + $0x668] sm:$0xf0] }
 0x5d1   :  { %3951 = vmatmul.bf16.vlgmr.msrb.gmra.mxu2 %v13253_v7  ;;  %3970 = vmatmul.bf16.vlgmr.msrb.gmra.mxu3 %v13255_v6  ;;  %v11257_v7 = vld [vmem:[#allocation10 + $0x464] sm:$0xf]  ;;  %v9491_v6 = vor.u32 %v11344_v0, %v9490_v58  ;;  %v11247_v58 = vld [vmem:[#allocation10 + $0x414] sm:$0xf]  ;;  %v3643_v0 = vpack.c.bf16 %v13235_v37, %v13229_v13  ;;  %v9292_v37 = vld [vmem:[#allocation10 + $0x488] sm:$0xf0] }
 0x5d2   :  { %4458 = vmatmul.bf16.vlgmr.msra.gmra.mxu0 %v13275_v52  ;;  %4477 = vmatmul.bf16.vlgmr.msra.gmra.mxu1 %v13277_v59  ;;  %v3628_v8 = vpop.f32.mrf.mxu1  ;;  %v9279_v5 = vor.u32 %v11257_v7, %v9276_v62  ;;  %v3987_v7 = vunpack.c.l.b16 %v13237_v55  ;;  %v11261_v13 = vld [vmem:[#allocation10 + $0x484] sm:$0xf] }
 0x5d3   :  { %4199 = vmatpush.bf16.msrb.mxu2 %v9287_v10  ;;  %4218 = vmatpush.bf16.msrb.mxu3 %v9351_v34  ;;  %v3653_v44 = vpack.c.bf16 %v3628_v8, %v13271_v41  ;;  %v11269_v41 = vld [vmem:[#allocation10 + $0x4c4] sm:$0xf]  ;;  %v9236_v34 = vld [vmem:[#allocation10 + $0x418] sm:$0xf0]  ;;  %v3985_v43 = vunpack.c.l.b16 %v3643_v0  ;;  %v3986_v23 = vunpack.c.h.b16 %v3643_v0 }
 0x5d4   :  { %4753 = vmatpush.bf16.msrb.mxu0 %v9491_v6  ;;  %4772 = vmatpush.bf16.msrb.mxu1 %v9555_v31  ;;  %v9327_v1 = vor.u32 %v11269_v41, %v9324_v63  ;;  %v11265_v8 = vld [vmem:[#allocation10 + $0x4a4] sm:$0xf]  ;;  %v3988_v6 = vunpack.c.h.b16 %v13237_v55 }
 0x5d5   :  { %v4278_v4 = vunpack.c.l.b16 %v3653_v44  ;;  %v4279_v12 = vunpack.c.h.b16 %v3653_v44  ;;  %v13296_v44 = vpack.c.b16 %v3987_v7, %v3985_v43  ;;  %v11337_v63 = vld [vmem:[#allocation10 + $0x6e4] sm:$0xf] }
 0x5d6   :  { %v13298_v26 = vpack.c.b16 %v3988_v6, %v3986_v23  ;;  %v11313_v43 = vld [vmem:[#allocation10 + $0x624] sm:$0xf]  ;;  %v9372_v23 = vld [vmem:[#allocation10 + $0x628] sm:$0xf0] }
 0x5d7   :  { %4200 = vmatpush.bf16.msrb.mxu2 %v9279_v5  ;;  %4219 = vmatpush.bf16.msrb.mxu3 %v9343_v33  ;;  %v3586_v22 = vpop.f32.mrf.mxu0  ;;  %v9239_v5 = vor.u32 %v11247_v58, %v9236_v34  ;;  %v9303_v33 = vor.u32 %v11263_v14, %v9300_v18  ;;  %v11333_v14 = vld [vmem:[#allocation10 + $0x6c4] sm:$0xf] }
 0x5d8   :  { %4754 = vmatpush.bf16.msrb.mxu0 %v9483_v60  ;;  %4773 = vmatpush.bf16.msrb.mxu1 %v9547_v16 }
 0x5da   :  { %v3630_v30 = vpop.f32.mrf.mxu1 }
 0x5db   :  { %v3654_v49 = vpack.c.bf16 %v3630_v30, %v3581_v50  ;;  %4201 = vmatpush.bf16.msrb.mxu2 %v9271_v28  ;;  %4220 = vmatpush.bf16.msrb.mxu3 %v9335_v39  ;;  %v9316_v50 = vld [vmem:[#allocation10 + $0x4b8] sm:$0xf0]  ;;  %v9295_v28 = vor.u32 %v11261_v13, %v9292_v37  ;;  %v11323_v39 = vld [vmem:[#allocation10 + $0x674] sm:$0xf]  ;;  %v9375_v37 = vor.u32 %v11313_v43, %v9372_v23 }
 0x5dc   :  { %v9319_v3 = vor.u32 %v11267_v57, %v9316_v50  ;;  %v9412_v30 = vld [vmem:[#allocation10 + $0x678] sm:$0xf0]  ;;  %v3645_v50 = vpack.c.bf16 %v13241_v42, %v13233_v56  ;;  %v9452_v56 = vld [vmem:[#allocation10 + $0x6c8] sm:$0xf0]  ;;  %v11343_v43 = vld [vmem:[#allocation10 + $0x714] sm:$0xf] }
 0x5dd   :  { %v4280_v19 = vunpack.c.l.b16 %v3654_v49  ;;  %v4281_v40 = vunpack.c.h.b16 %v3654_v49  ;;  %v9476_v49 = vld [vmem:[#allocation10 + $0x6f8] sm:$0xf0] }
 0x5de   :  { %v9460_v57 = vld [vmem:[#allocation10 + $0x6d8] sm:$0xf0]  ;;  %v3989_v0 = vunpack.c.l.b16 %v3645_v50  ;;  %v3990_v42 = vunpack.c.h.b16 %v3645_v50  ;;  %v11369_v50 = vld [vmem:[#allocation10 + $0x7e4] sm:$0xf] }
 0x5df   :  { %v13284_v20 = vpack.c.b16 %v4280_v19, %v4278_v4  ;;  %v13286_v51 = vpack.c.b16 %v4281_v40, %v4279_v12  ;;  %4202 = vmatpush.bf16.msrb.mxu2 %v9263_v2  ;;  %4221 = vmatpush.bf16.msrb.mxu3 %v9327_v1  ;;  %v3589_v55 = vpop.f32.mrf.mxu0  ;;  %v9415_v12 = vor.u32 %v11323_v39, %v9412_v30  ;;  %v9468_v19 = vld [vmem:[#allocation10 + $0x6e8] sm:$0xf0]  ;;  %v11319_v1 = vld [vmem:[#allocation10 + $0x654] sm:$0xf]  ;;  %v9492_v23 = vld [vmem:[#allocation10 + $0x718] sm:$0xf0] }
 0x5e0   :  { %v9407_v40 = vor.u32 %v11321_v15, %v9404_v38  ;;  %v9471_v2 = vor.u32 %v11337_v63, %v9468_v19  ;;  %v11327_v30 = vld [vmem:[#allocation10 + $0x694] sm:$0xf]  ;;  %v11325_v38 = vld [vmem:[#allocation10 + $0x684] sm:$0xf] }
 0x5e1   :  { %3956 = vmatmul.bf16.gmra.mxu2 %v13265_v47  ;;  %3975 = vmatmul.bf16.gmra.mxu3 %v13267_v32  ;;  %v9308_v47 = vld [vmem:[#allocation10 + $0x4a8] sm:$0xf0]  ;;  %v9247_v32 = vor.u32 %v11249_v36, %v9244_v11  ;;  %v9463_v36 = vor.u32 %v11335_v21, %v9460_v57  ;;  %v11355_v19 = vld [vmem:[#allocation10 + $0x774] sm:$0xf]  ;;  %v11353_v57 = vld [vmem:[#allocation10 + $0x764] sm:$0xf] }
 0x5e2   :  { %4463 = vmatmul.bf16.gmra.mxu0 %v13284_v20  ;;  %4482 = vmatmul.bf16.gmra.mxu1 %v13286_v51  ;;  %v3633_v45 = vpop.f32.mrf.mxu1  ;;  %v9311_v24 = vor.u32 %v11265_v8, %v9308_v47  ;;  %v9388_v11 = vld [vmem:[#allocation10 + $0x648] sm:$0xf0]  ;;  %v3991_v8 = vunpack.c.l.b16 %v13245_v35 }
 0x5e3   :  { %v3655_v10 = vpack.c.bf16 %v3633_v45, %v3584_v46  ;;  %4203 = vmatpush.bf16.msrb.mxu2 %v9255_v53  ;;  %4222 = vmatpush.bf16.msrb.mxu3 %v9319_v3  ;;  %v11339_v46 = vld [vmem:[#allocation10 + $0x6f4] sm:$0xf]  ;;  %v9399_v3 = vor.u32 %v11319_v1, %v9396_v25  ;;  %v9604_v25 = vld [vmem:[#allocation10 + $0x7f8] sm:$0xf0] }
 0x5e4   :  { %v9479_v41 = vor.u32 %v11339_v46, %v9476_v49  ;;  %v13312_v6 = vpack.c.b16 %v3991_v8, %v3989_v0  ;;  %v9428_v46 = vld [vmem:[#allocation10 + $0x698] sm:$0xf0]  ;;  %v9580_v0 = vld [vmem:[#allocation10 + $0x7c8] sm:$0xf0] }
 0x5e5   :  { %v4571_v31 = vunpack.c.l.b16 %v3655_v10  ;;  %v4572_v61 = vunpack.c.h.b16 %v3655_v10  ;;  %v3992_v10 = vunpack.c.h.b16 %v13245_v35  ;;  %v9455_v35 = vor.u32 %v11333_v14, %v9452_v56  ;;  %v9588_v8 = vld [vmem:[#allocation10 + $0x7d8] sm:$0xf0]  ;;  %v11347_v14 = vld [vmem:[#allocation10 + $0x734] sm:$0xf] }
 0x5e6   :  { %v9431_v49 = vor.u32 %v11327_v30, %v9428_v46  ;;  %v9508_v56 = vld [vmem:[#allocation10 + $0x738] sm:$0xf0] }
 0x5e7   :  { %4204 = vmatpush.bf16.msrb.mxu2 %v9247_v32  ;;  %4223 = vmatpush.bf16.msrb.mxu3 %v9311_v24  ;;  %v3591_v53 = vpop.f32.mrf.mxu0 }
 0x5ea   :  { %v3635_v62 = vpop.f32.mrf.mxu1 }
 0x5eb   :  { %v3656_v54 = vpack.c.bf16 %v3635_v62, %v3586_v22  ;;  %4205 = vmatpush.bf16.msrb.mxu2 %v9239_v5  ;;  %4224 = vmatpush.bf16.msrb.mxu3 %v9303_v33  ;;  %v11317_v22 = vld [vmem:[#allocation10 + $0x644] sm:$0xf]  ;;  %v9380_v5 = vld [vmem:[#allocation10 + $0x638] sm:$0xf0]  ;;  %v11331_v33 = vld [vmem:[#allocation10 + $0x6b4] sm:$0xf] }
 0x5ec   :  { %v9391_v34 = vor.u32 %v11317_v22, %v9388_v11  ;;  %v9447_v13 = vor.u32 %v11331_v33, %v9444_v29  ;;  %v9524_v22 = vld [vmem:[#allocation10 + $0x758] sm:$0xf0]  ;;  %v11361_v33 = vld [vmem:[#allocation10 + $0x7a4] sm:$0xf]  ;;  %v9564_v29 = vld [vmem:[#allocation10 + $0x7a8] sm:$0xf0] }
 0x5ed   :  { %v4573_v17 = vunpack.c.l.b16 %v3656_v54  ;;  %v4574_v48 = vunpack.c.h.b16 %v3656_v54  ;;  %v11315_v54 = vld [vmem:[#allocation10 + $0x634] sm:$0xf] }
 0x5ee   :  { %v9383_v9 = vor.u32 %v11315_v54, %v9380_v5  ;;  %v11345_v54 = vld [vmem:[#allocation10 + $0x724] sm:$0xf]  ;;  %v9500_v5 = vld [vmem:[#allocation10 + $0x728] sm:$0xf0] }
 0x5ef   :  { %v13300_v60 = vpack.c.b16 %v4573_v17, %v4571_v31  ;;  %v13302_v16 = vpack.c.b16 %v4574_v48, %v4572_v61  ;;  %4206 = vmatpush.bf16.msrb.mxu2 %v9231_v27  ;;  %4225 = vmatpush.bf16.msrb.mxu3 %v9295_v28  ;;  %v13314_v31 = vpack.c.b16 %v3992_v10, %v3990_v42  ;;  %v11329_v17 = vld [vmem:[#allocation10 + $0x6a4] sm:$0xf]  ;;  %v9436_v48 = vld [vmem:[#allocation10 + $0x6a8] sm:$0xf0]  ;;  %v9364_v27 = vld [vmem:[#allocation10 + $0x618] sm:$0xf0] }
 0x5f0   :  { %v9439_v28 = vor.u32 %v11329_v17, %v9436_v48  ;;  %v11349_v10 = vld [vmem:[#allocation10 + $0x744] sm:$0xf]  ;;  %v11363_v42 = vld [vmem:[#allocation10 + $0x7b4] sm:$0xf] }
 0x5f1   :  { %4169 = vmatmul.bf16.vlgmr.msra.gmra.mxu2 %v13296_v44  ;;  %4188 = vmatmul.bf16.vlgmr.msra.gmra.mxu3 %v13298_v26  ;;  %v11341_v48 = vld [vmem:[#allocation10 + $0x704] sm:$0xf] }
 0x5f2   :  { %4755 = vmatmul.bf16.vlgmr.msrb.gmra.mxu0 %v13300_v60  ;;  %4774 = vmatmul.bf16.vlgmr.msrb.gmra.mxu1 %v13302_v16  ;;  %v3638_v4 = vpop.f32.mrf.mxu1 }
 0x5f3   :  { %4488 = vmatpush.bf16.msra.mxu2 %v9415_v12  ;;  %4507 = vmatpush.bf16.msra.mxu3 %v9479_v41  ;;  %v3657_v45 = vpack.c.bf16 %v3638_v4, %v3589_v55  ;;  %v11311_v55 = vld [vmem:[#allocation10 + $0x614] sm:$0xf]  ;;  %v11309_v4 = vld [vmem:[#allocation10 + $0x604] sm:$0xf]  ;;  %v9356_v12 = vld [vmem:[#allocation10 + $0x608] sm:$0xf0] }
 0x5f4   :  { %v9367_v39 = vor.u32 %v11311_v55, %v9364_v27  ;;  %v9359_v15 = vor.u32 %v11309_v4, %v9356_v12  ;;  %v9420_v41 = vld [vmem:[#allocation10 + $0x688] sm:$0xf0]  ;;  %v11357_v27 = vld [vmem:[#allocation10 + $0x784] sm:$0xf] }
 0x5f5   :  { %v4575_v32 = vunpack.c.l.b16 %v3657_v45  ;;  %v4576_v24 = vunpack.c.h.b16 %v3657_v45  ;;  %v9423_v63 = vor.u32 %v11325_v38, %v9420_v41  ;;  %v9532_v45 = vld [vmem:[#allocation10 + $0x768] sm:$0xf0] }
 0x5f6   :  { %v9484_v55 = vld [vmem:[#allocation10 + $0x708] sm:$0xf0] }
 0x5f7   :  { %4489 = vmatpush.bf16.msra.mxu2 %v9407_v40  ;;  %4508 = vmatpush.bf16.msra.mxu3 %v9471_v2  ;;  %v9540_v40 = vld [vmem:[#allocation10 + $0x778] sm:$0xf0]  ;;  %v11371_v2 = vld [vmem:[#allocation10 + $0x7f4] sm:$0xf] }
 0x5f8   :  { %v9543_v1 = vor.u32 %v11355_v19, %v9540_v40  ;;  %v9607_v21 = vor.u32 %v11371_v2, %v9604_v25 }
 0x5fa   :  { %v3640_v47 = vpop.f32.mrf.mxu1 }
 0x5fb   :  { %v3658_v58 = vpack.c.bf16 %v3640_v47, %v3591_v53  ;;  %4490 = vmatpush.bf16.msra.mxu2 %v9399_v3  ;;  %4509 = vmatpush.bf16.msra.mxu3 %v9463_v36  ;;  %v9535_v53 = vor.u32 %v11353_v57, %v9532_v45  ;;  %v9596_v3 = vld [vmem:[#allocation10 + $0x7e8] sm:$0xf0]  ;;  %v11351_v36 = vld [vmem:[#allocation10 + $0x754] sm:$0xf] }
 0x5fc   :  { %v9599_v11 = vor.u32 %v11369_v50, %v9596_v3  ;;  %v4893_v3 = vld [vmem:[%s14049_s10 + $0x78] sm:$0xff] }
 0x5fd   :  { %v4577_v18 = vunpack.c.l.b16 %v3658_v58  ;;  %v4578_v7 = vunpack.c.h.b16 %v3658_v58  ;;  %4910 = vmatpush.msra.mxu0 %v4893_v3 }
 0x5ff   :  { %v13316_v62 = vpack.c.b16 %v4577_v18, %v4575_v32  ;;  %v13318_v61 = vpack.c.b16 %v4578_v7, %v4576_v24  ;;  %4491 = vmatpush.bf16.msra.mxu2 %v9391_v34  ;;  %4510 = vmatpush.bf16.msra.mxu3 %v9455_v35  ;;  %v9516_v32 = vld [vmem:[#allocation10 + $0x748] sm:$0xf0]  ;;  %v11365_v24 = vld [vmem:[#allocation10 + $0x7c4] sm:$0xf]  ;;  %v9511_v18 = vor.u32 %v11347_v14, %v9508_v56  ;;  %v9572_v7 = vld [vmem:[#allocation10 + $0x7b8] sm:$0xf0] }
 0x600   :  { %v9519_v58 = vor.u32 %v11349_v10, %v9516_v32  ;;  %v9583_v34 = vor.u32 %v11365_v24, %v9580_v0  ;;  %v9575_v35 = vor.u32 %v11363_v42, %v9572_v7  ;;  %v4888_v0 = vld [vmem:[%s14049_s10 + $0x50] sm:$0xff]  ;;  %v4886_v42 = vld [vmem:[%s14049_s10 + $0x40] sm:$0xff] }
 0x601   :  { %4174 = vmatmul.bf16.gmra.mxu2 %v13312_v6  ;;  %4193 = vmatmul.bf16.gmra.mxu3 %v13314_v31 }
 0x602   :  { %4760 = vmatmul.bf16.gmra.mxu0 %v13316_v62  ;;  %4779 = vmatmul.bf16.gmra.mxu1 %v13318_v61 }
 0x603   :  { %4492 = vmatpush.bf16.msra.mxu2 %v9383_v9  ;;  %4511 = vmatpush.bf16.msra.mxu3 %v9447_v13  ;;  %v9503_v9 = vor.u32 %v11345_v54, %v9500_v5  ;;  %v9567_v13 = vor.u32 %v11361_v33, %v9564_v29 }
 0x607   :  { %4493 = vmatpush.bf16.msra.mxu2 %v9375_v37  ;;  %4512 = vmatpush.bf16.msra.mxu3 %v9439_v28  ;;  %v9556_v37 = vld [vmem:[#allocation10 + $0x798] sm:$0xf0]  ;;  %v9487_v28 = vor.u32 %v11341_v48, %v9484_v55 }
 0x60b   :  { %4494 = vmatpush.bf16.msra.mxu2 %v9367_v39  ;;  %4513 = vmatpush.bf16.msra.mxu3 %v9431_v49  ;;  %v9548_v39 = vld [vmem:[#allocation10 + $0x788] sm:$0xf0] }
 0x60c   :  { %v9551_v30 = vor.u32 %v11357_v27, %v9548_v39  ;;  %v4882_v27 = vld [vmem:[%s14049_s10 + $0x20] sm:$0xff] }
 0x60f   :  { %4495 = vmatpush.bf16.msra.mxu2 %v9359_v15  ;;  %4514 = vmatpush.bf16.msra.mxu3 %v9423_v63 }
 0x611   :  { %4207 = vmatmul.bf16.vlgmr.msrb.gmra.mxu2 %v13296_v44  ;;  %4226 = vmatmul.bf16.vlgmr.msrb.gmra.mxu3 %v13298_v26  ;;  %v11367_v44 = vld [vmem:[#allocation10 + $0x7d4] sm:$0xf]  ;;  %v9527_v26 = vor.u32 %v11351_v36, %v9524_v22 }
 0x612   :  { %v9591_v47 = vor.u32 %v11367_v44, %v9588_v8  ;;  %v4891_v8 = vld [vmem:[%s14049_s10 + $0x68] sm:$0xff] }
 0x613   :  { %4785 = vmatpush.bf16.msrb.mxu2 %v9543_v1  ;;  %4804 = vmatpush.bf16.msrb.mxu3 %v9607_v21 }
 0x617   :  { %4786 = vmatpush.bf16.msrb.mxu2 %v9535_v53  ;;  %4805 = vmatpush.bf16.msrb.mxu3 %v9599_v11 }
 0x61b   :  { %4787 = vmatpush.bf16.msrb.mxu2 %v9527_v26  ;;  %4806 = vmatpush.bf16.msrb.mxu3 %v9591_v47  ;;  %v4890_v26 = vld [vmem:[%s14049_s10 + $0x60] sm:$0xff]  ;;  %v4889_v47 = vld [vmem:[%s14049_s10 + $0x58] sm:$0xff] }
 0x61f   :  { %4788 = vmatpush.bf16.msrb.mxu2 %v9519_v58  ;;  %4807 = vmatpush.bf16.msrb.mxu3 %v9583_v34  ;;  %v4887_v34 = vld [vmem:[%s14049_s10 + $0x48] sm:$0xff] }
 0x621   :  { %4212 = vmatmul.bf16.gmra.mxu2 %v13312_v6  ;;  %4231 = vmatmul.bf16.gmra.mxu3 %v13314_v31  ;;  %v11359_v6 = vld [vmem:[#allocation10 + $0x794] sm:$0xf]  ;;  %v9495_v31 = vor.u32 %v11343_v43, %v9492_v23 }
 0x622   :  { %v9559_v17 = vor.u32 %v11359_v6, %v9556_v37 }
 0x623   :  { %4789 = vmatpush.bf16.msrb.mxu2 %v9511_v18  ;;  %4808 = vmatpush.bf16.msrb.mxu3 %v9575_v35  ;;  %v4885_v35 = vld [vmem:[%s14049_s10 + $0x38] sm:$0xff] }
 0x627   :  { %4790 = vmatpush.bf16.msrb.mxu2 %v9503_v9  ;;  %4809 = vmatpush.bf16.msrb.mxu3 %v9567_v13  ;;  %v4884_v9 = vld [vmem:[%s14049_s10 + $0x30] sm:$0xff]  ;;  %v4883_v13 = vld [vmem:[%s14049_s10 + $0x28] sm:$0xff] }
 0x62b   :  { %4791 = vmatpush.bf16.msrb.mxu2 %v9495_v31  ;;  %4810 = vmatpush.bf16.msrb.mxu3 %v9559_v17 }
 0x62f   :  { %4792 = vmatpush.bf16.msrb.mxu2 %v9487_v28  ;;  %4811 = vmatpush.bf16.msrb.mxu3 %v9551_v30 }
 0x631   :  { %4496 = vmatmul.bf16.vlgmr.msra.gmra.mxu2 %v13275_v52  ;;  %4515 = vmatmul.bf16.vlgmr.msra.gmra.mxu3 %v13277_v59 }
 0x634   :  { %v3914_v46 = vpop.f32.mrf.mxu2  ;;  %v3933_v4 = vpop.f32.mrf.mxu3 }
 0x635   :  { %v3934_v18 = vadd.f32 %v3933_v4, %v3914_v46  ;;  %v4881_v46 = vld [vmem:[%s14049_s10 + $0x18] sm:$0xff] }
 0x63c   :  { %v3916_v12 = vpop.f32.mrf.mxu2  ;;  %v3935_v49 = vpop.f32.mrf.mxu3 }
 0x63d   :  { %v3936_v15 = vadd.f32 %v3935_v49, %v3916_v12 }
 0x641   :  { %4501 = vmatmul.bf16.gmra.mxu2 %v13284_v20  ;;  %4520 = vmatmul.bf16.gmra.mxu3 %v13286_v51 }
 0x644   :  { %v3919_v38 = vpop.f32.mrf.mxu2  ;;  %v3938_v41 = vpop.f32.mrf.mxu3 }
 0x645   :  { %v3939_v29 = vadd.f32 %v3938_v41, %v3919_v38  ;;  %v4880_v38 = vld [vmem:[%s14049_s10 + $0x10] sm:$0xff] }
 0x64c   :  { %v13332_v63 = vpop.f32.mrf.mxu2  ;;  %v13334_v19 = vpop.f32.mrf.mxu3 }
 0x64d   :  { %v3941_v41 = vadd.f32 %v13334_v19, %v13332_v63  ;;  %v4878_v63 = vld [vmem:[%s14049_s10] sm:$0xff] }
 0x64f   :  { %v4459_v40 = vpop.f32.mrf.mxu0  ;;  %v4478_v52 = vpop.f32.mrf.mxu1 }
 0x650   :  { %v4479_v31 = vadd.f32 %v4478_v52, %v4459_v40 }
 0x651   :  { %4793 = vmatmul.bf16.vlgmr.msrb.gmra.mxu2 %v13300_v60  ;;  %4812 = vmatmul.bf16.vlgmr.msrb.gmra.mxu3 %v13302_v16 }
 0x654   :  { %v13338_v59 = vpop.f32.mrf.mxu2  ;;  %v13340_v2 = vpop.f32.mrf.mxu3 }
 0x657   :  { %v4461_v1 = vpop.f32.mrf.mxu0  ;;  %v4480_v20 = vpop.f32.mrf.mxu1 }
 0x658   :  { %v4481_v43 = vadd.f32 %v4480_v20, %v4461_v1  ;;  %v4879_v20 = vld [vmem:[%s14049_s10 + $0x8] sm:$0xff] }
 0x65c   :  { %v3954_v25 = vpop.f32.mrf.mxu2  ;;  %v3973_v51 = vpop.f32.mrf.mxu3 }
 0x65d   :  { %v13342_v21 = vadd.f32 %v3973_v51, %v3954_v25 }
 0x65f   :  { %v4464_v57 = vpop.f32.mrf.mxu0  ;;  %v4483_v45 = vpop.f32.mrf.mxu1 }
 0x660   :  { %v4484_v17 = vadd.f32 %v4483_v45, %v4464_v57 }
 0x661   :  { %4798 = vmatmul.bf16.gmra.mxu2 %v13316_v62  ;;  %4817 = vmatmul.bf16.gmra.mxu3 %v13318_v61  ;;  %v4892_v61 = vld [vmem:[%s14049_s10 + $0x70] sm:$0xff] }
 0x662   :  { %4911 = vmatpush.msra.mxu0 %v4892_v61 }
 0x664   :  { %v13346_v50 = vpop.f32.mrf.mxu2  ;;  %v13348_v60 = vpop.f32.mrf.mxu3  ;;  %4912 = vmatpush.msra.mxu0 %v4891_v8  ;;  %v3972_v8 = vadd.f32 %v13340_v2, %v13338_v59 }
 0x666   :  { %4913 = vmatpush.msra.mxu0 %v4890_v26 }
 0x667   :  { %v13350_v16 = vpop.f32.mrf.mxu0  ;;  %v13352_v53 = vpop.f32.mrf.mxu1 }
 0x668   :  { %4914 = vmatpush.msra.mxu0 %v4889_v47  ;;  %v4486_v57 = vadd.f32 %v13352_v53, %v13350_v16 }
 0x66a   :  { %4915 = vmatpush.msra.mxu0 %v4888_v0 }
 0x66c   :  { %v3959_v36 = vpop.f32.mrf.mxu2  ;;  %v3978_v22 = vpop.f32.mrf.mxu3  ;;  %4916 = vmatpush.msra.mxu0 %v4887_v34 }
 0x66d   :  { %v13357_v11 = vadd.f32 %v3978_v22, %v3959_v36 }
 0x66e   :  { %4917 = vmatpush.msra.mxu0 %v4886_v42 }
 0x66f   :  { %v4756_v62 = vpop.f32.mrf.mxu0  ;;  %v4775_v44 = vpop.f32.mrf.mxu1 }
 0x670   :  { %4918 = vmatpush.msra.mxu0 %v4885_v35  ;;  %v4776_v12 = vadd.f32 %v4775_v44, %v4756_v62 }
 0x672   :  { %4919 = vmatpush.msra.mxu0 %v4884_v9 }
 0x674   :  { %v4170_v10 = vpop.f32.mrf.mxu2  ;;  %v4189_v32 = vpop.f32.mrf.mxu3  ;;  %4920 = vmatpush.msra.mxu0 %v4883_v13  ;;  %v3977_v13 = vadd.f32 %v13348_v60, %v13346_v50 }
 0x675   :  { %v4171_v54 = vadd.f32 %v4170_v10, %v3934_v18 }
 0x676   :  { %4921 = vmatpush.msra.mxu0 %v4882_v27 }
 0x677   :  { %v4758_v24 = vpop.f32.mrf.mxu0  ;;  %v4777_v58 = vpop.f32.mrf.mxu1  ;;  %v4190_v48 = vadd.f32 %v4189_v32, %v4171_v54 }
 0x678   :  { %v4778_v39 = vadd.f32 %v4777_v58, %v4758_v24  ;;  %4922 = vmatpush.msra.mxu0 %v4881_v46 }
 0x679   :  { %v4526_v4 = vadd.f32 %v4479_v31, %v4190_v48 }
 0x67a   :  { %4923 = vmatpush.msra.mxu0 %v4880_v38  ;;  %v4907_v38 = vld [vmem:[%s14049_s10 + $0xe8] sm:$0xff] }
 0x67b   :  { %v13407_v45 = vadd.f32 %v4776_v12, %v4526_v4 }
 0x67c   :  { %v4172_v14 = vpop.f32.mrf.mxu2  ;;  %v4191_v56 = vpop.f32.mrf.mxu3  ;;  %4924 = vmatpush.msra.mxu0 %v4879_v20  ;;  %v4905_v20 = vld [vmem:[%s14049_s10 + $0xd8] sm:$0xff] }
 0x67d   :  { %v4173_v7 = vadd.f32 %v4172_v14, %v3936_v15  ;;  %v4849_v44 = vmul.f32 %v13407_v45, %v13407_v45 }
 0x67e   :  { %4925 = vmatpush.msra.mxu0 %v4878_v63  ;;  %v4902_v63 = vld [vmem:[%s14049_s10 + $0xc0] sm:$0xff] }
 0x67f   :  { %v4761_v5 = vpop.f32.mrf.mxu0  ;;  %v4780_v33 = vpop.f32.mrf.mxu1  ;;  %v4192_v23 = vadd.f32 %v4191_v56, %v4173_v7 }
 0x680   :  { %v4781_v15 = vadd.f32 %v4780_v33, %v4761_v5 }
 0x681   :  { %v4528_v28 = vadd.f32 %v4481_v43, %v4192_v23 }
 0x683   :  { %v13400_v40 = vadd.f32 %v4778_v39, %v4528_v28 }
 0x684   :  { %v4175_v6 = vpop.f32.mrf.mxu2  ;;  %v4194_v37 = vpop.f32.mrf.mxu3 }
 0x685   :  { %v4176_v55 = vadd.f32 %v4175_v6, %v3939_v29  ;;  %v4851_v19 = vmul.f32 %v13400_v40, %v13400_v40  ;;  %v4831_v16 = vadd.f32 %v13400_v40, %v13407_v45 }
 0x687   :  { %v4195_v30 = vadd.f32 %v4194_v37, %v4176_v55  ;;  %v4763_v52 = vpop.f32.mrf.mxu0  ;;  %v4782_v1 = vpop.f32.mrf.mxu1  ;;  %v4857_v26 = vadd.f32 %v4851_v19, %v4849_v44 }
 0x688   :  { %v4783_v62 = vadd.f32 %v4782_v1, %v4763_v52  ;;  %v4906_v1 = vld [vmem:[%s14049_s10 + $0xe0] sm:$0xff] }
 0x689   :  { %v4530_v49 = vadd.f32 %v4484_v17, %v4195_v30 }
 0x68b   :  { %v13409_v3 = vadd.f32 %v4781_v15, %v4530_v49  ;;  %v4909_v49 = vld [vmem:[%s14049_s10 + $0xf8] sm:$0xff]  ;;  %v4908_v15 = vld [vmem:[%s14049_s10 + $0xf0] sm:$0xff] }
 0x68c   :  { %v4177_v25 = vpop.f32.mrf.mxu2  ;;  %v4196_v51 = vpop.f32.mrf.mxu3  ;;  %4930 = vmatpush.msra.mxu1 %v4909_v49 }
 0x68d   :  { %v4178_v36 = vadd.f32 %v4177_v25, %v3941_v41  ;;  %v4853_v53 = vmul.f32 %v13409_v3, %v13409_v3  ;;  %v4832_v47 = vadd.f32 %v4831_v16, %v13409_v3  ;;  %v4900_v16 = vld [vmem:[%s14049_s10 + $0xb0] sm:$0xff] }
 0x68e   :  { %4931 = vmatpush.msra.mxu1 %v4908_v15 }
 0x68f   :  { %v4197_v22 = vadd.f32 %v4196_v51, %v4178_v36  ;;  %v4858_v58 = vadd.f32 %v4857_v26, %v4853_v53  ;;  %v4903_v36 = vld [vmem:[%s14049_s10 + $0xc8] sm:$0xff] }
 0x690   :  { %4932 = vmatpush.msra.mxu1 %v4907_v38 }
 0x691   :  { %v4532_v61 = vadd.f32 %v4486_v57, %v4197_v22  ;;  %v4904_v57 = vld [vmem:[%s14049_s10 + $0xd0] sm:$0xff] }
 0x692   :  { %4933 = vmatpush.msra.mxu1 %v4906_v1 }
 0x693   :  { %v13425_v10 = vadd.f32 %v4783_v62, %v4532_v61  ;;  %v4901_v62 = vld [vmem:[%s14049_s10 + $0xb8] sm:$0xff]  ;;  %v4899_v61 = vld [vmem:[%s14049_s10 + $0xa8] sm:$0xff] }
 0x694   :  { %v4208_v32 = vpop.f32.mrf.mxu2  ;;  %v4227_v24 = vpop.f32.mrf.mxu3  ;;  %4934 = vmatpush.msra.mxu1 %v4905_v20 }
 0x695   :  { %v4833_v0 = vadd.f32 %v4832_v47, %v13425_v10  ;;  %v4855_v34 = vmul.f32 %v13425_v10, %v13425_v10  ;;  %v4209_v14 = vadd.f32 %v4208_v32, %v3972_v8 }
 0x696   :  { %4935 = vmatpush.msra.mxu1 %v4904_v57 }
 0x697   :  { %v4834_v56 = vrot.slane %v4833_v0, 4  ;;  %v4859_v42 = vadd.f32 %v4858_v58, %v4855_v34  ;;  %v13430_v18 = vadd.f32 %v4227_v24, %v4209_v14  ;;  %v4898_v24 = vld [vmem:[%s14049_s10 + $0xa0] sm:$0xff] }
 0x698   :  { %4936 = vmatpush.msra.mxu1 %v4903_v36 }
 0x699   :  { %v4835_v7 = vadd.f32 %v4834_v56, %v4833_v0  ;;  %v4860_v59 = vrot.slane %v4859_v42, 4  ;;  %v4897_v56 = vld [vmem:[%s14049_s10 + $0x98] sm:$0xff] }
 0x69a   :  { %4937 = vmatpush.msra.mxu1 %v4902_v63 }
 0x69b   :  { %v4836_v2 = vrot.slane %v4835_v7, 2  ;;  %v4861_v35 = vadd.f32 %v4860_v59, %v4859_v42 }
 0x69c   :  { %v4210_v54 = vpop.f32.mrf.mxu2  ;;  %v4229_v5 = vpop.f32.mrf.mxu3  ;;  %4938 = vmatpush.msra.mxu1 %v4901_v62  ;;  %v4986_v62 = vld [vmem:[#allocation12 + $0x60] sm:$0xff] }
 0x69d   :  { %v4837_v33 = vadd.f32 %v4836_v2, %v4835_v7  ;;  %v4862_v9 = vrot.slane %v4861_v35, 2  ;;  %v4211_v44 = vadd.f32 %v4210_v54, %v13342_v21 }
 0x69e   :  { %4939 = vmatpush.msra.mxu1 %v4900_v16 }
 0x69f   :  { %v4838_v29 = vrot.slane %v4837_v33, 1  ;;  %v4863_v43 = vadd.f32 %v4862_v9, %v4861_v35  ;;  %v4230_v8 = vadd.f32 %v4229_v5, %v4211_v44  ;;  %v4896_v35 = vld [vmem:[%s14049_s10 + $0x90] sm:$0xff] }
 0x6a0   :  { %4940 = vmatpush.msra.mxu1 %v4899_v61  ;;  %v4987_v44 = vld [vmem:[#allocation12 + $0x68] sm:$0xff]  ;;  %v4985_v61 = vld [vmem:[#allocation12 + $0x58] sm:$0xff] }
 0x6a1   :  { %v4864_v23 = vrot.slane %v4863_v43, 1  ;;  %v4839_v6 = vadd.f32 %v4838_v29, %v4837_v33  ;;  %v4894_v29 = vld [vmem:[%s14049_s10 + $0x80] sm:$0xff] }
 0x6a2   :  { %4941 = vmatpush.msra.mxu1 %v4898_v24  ;;  %v4980_v24 = vld [vmem:[#allocation12 + $0x30] sm:$0xff] }
 0x6a3   :  { %v4865_v37 = vadd.f32 %v4864_v23, %v4863_v43 }
 0x6a4   :  { %v4213_v31 = vpop.f32.mrf.mxu2  ;;  %v4232_v17 = vpop.f32.mrf.mxu3  ;;  %4942 = vmatpush.msra.mxu1 %v4897_v56  ;;  %v4977_v56 = vld [vmem:[#allocation12 + $0x18] sm:$0xff] }
 0x6a5   :  { %v4214_v48 = vadd.f32 %v4213_v31, %v3977_v13  ;;  %v4876_v55 = vsel %vm4875_vm2, %v4839_v6, %v4865_v37 }
 0x6a6   :  { %4926 = vmatmul.f32.vlgmr.msra.gmra.mxu0 %v4876_v55  ;;  %4943 = vmatpush.msra.mxu1 %v4896_v35 }
 0x6a7   :  { %v4233_v27 = vadd.f32 %v4232_v17, %v4214_v48 }
 0x6ac   :  { %v4215_v28 = vpop.f32.mrf.mxu2  ;;  %v4234_v39 = vpop.f32.mrf.mxu3 }
 0x6ad   :  { %v4216_v42 = vadd.f32 %v4215_v28, %v13357_v11  ;;  %v4895_v11 = vld [vmem:[%s14049_s10 + $0x88] sm:$0xff] }
 0x6ae   :  { %4944 = vmatpush.msra.mxu1 %v4895_v11 }
 0x6af   :  { %v4235_v9 = vadd.f32 %v4234_v39, %v4216_v42  ;;  %v4974_v42 = vld [vmem:[#allocation12] sm:$0xff] }
 0x6b0   :  { %4945 = vmatpush.msra.mxu1 %v4894_v29 }
 0x6b4   :  { %v4497_v30 = vpop.f32.mrf.mxu2  ;;  %v4516_v46 = vpop.f32.mrf.mxu3 }
 0x6b5   :  { %v4517_v26 = vadd.f32 %v4516_v46, %v4497_v30 }
 0x6b7   :  { %v4527_v7 = vadd.f32 %v4517_v26, %v13430_v18  ;;  %v4982_v26 = vld [vmem:[#allocation12 + $0x40] sm:$0xff] }
 0x6bc   :  { %v4499_v4 = vpop.f32.mrf.mxu2  ;;  %v4518_v12 = vpop.f32.mrf.mxu3 }
 0x6bd   :  { %v4519_v53 = vadd.f32 %v4518_v12, %v4499_v4 }
 0x6bf   :  { %v4529_v0 = vadd.f32 %v4519_v53, %v4230_v8  ;;  %v4984_v53 = vld [vmem:[#allocation12 + $0x50] sm:$0xff] }
 0x6c4   :  { %v4502_v50 = vpop.f32.mrf.mxu2  ;;  %v4521_v60 = vpop.f32.mrf.mxu3 }
 0x6c5   :  { %v4522_v47 = vadd.f32 %v4521_v60, %v4502_v50 }
 0x6c7   :  { %v4531_v59 = vadd.f32 %v4522_v47, %v4233_v27  ;;  %v4983_v47 = vld [vmem:[#allocation12 + $0x48] sm:$0xff] }
 0x6cc   :  { %v4504_v41 = vpop.f32.mrf.mxu2  ;;  %v4523_v52 = vpop.f32.mrf.mxu3 }
 0x6cd   :  { %v4524_v54 = vadd.f32 %v4523_v52, %v4504_v41 }
 0x6cf   :  { %v4533_v43 = vadd.f32 %v4524_v54, %v4235_v9 }
 0x6d4   :  { %v4794_v25 = vpop.f32.mrf.mxu2  ;;  %v4813_v51 = vpop.f32.mrf.mxu3 }
 0x6d5   :  { %v4814_v34 = vadd.f32 %v4813_v51, %v4794_v25 }
 0x6d7   :  { %v13482_v5 = vadd.f32 %v4814_v34, %v4527_v7  ;;  %v4979_v34 = vld [vmem:[#allocation12 + $0x28] sm:$0xff] }
 0x6d8   :  { %v4975_v7 = vld [vmem:[#allocation12 + $0x8] sm:$0xff] }
 0x6d9   :  { %v4850_v6 = vmul.f32 %v13482_v5, %v13482_v5 }
 0x6dc   :  { %v4796_v19 = vpop.f32.mrf.mxu2  ;;  %v4815_v22 = vpop.f32.mrf.mxu3 }
 0x6dd   :  { %v4816_v32 = vadd.f32 %v4815_v22, %v4796_v19  ;;  %v4988_v19 = vld [vmem:[#allocation12 + $0x70] sm:$0xff]  ;;  %v4989_v22 = vld [vmem:[#allocation12 + $0x78] sm:$0xff] }
 0x6de   :  { %5001 = vmatpush.msra.mxu2 %v4988_v19  ;;  %5021 = vmatpush.msra.mxu3 %v4989_v22 }
 0x6df   :  { %v13477_v2 = vadd.f32 %v4816_v32, %v4529_v0  ;;  %v4978_v0 = vld [vmem:[#allocation12 + $0x20] sm:$0xff] }
 0x6e0   :  { %5002 = vmatpush.msra.mxu2 %v4986_v62  ;;  %5022 = vmatpush.msra.mxu3 %v4987_v44 }
 0x6e1   :  { %v4852_v18 = vmul.f32 %v13477_v2, %v13477_v2  ;;  %v4840_v37 = vadd.f32 %v13477_v2, %v13482_v5 }
 0x6e2   :  { %5003 = vmatpush.msra.mxu2 %v4984_v53  ;;  %5023 = vmatpush.msra.mxu3 %v4985_v61 }
 0x6e3   :  { %v4866_v48 = vadd.f32 %v4852_v18, %v4850_v6 }
 0x6e4   :  { %v4799_v21 = vpop.f32.mrf.mxu2  ;;  %v4818_v58 = vpop.f32.mrf.mxu3  ;;  %5004 = vmatpush.msra.mxu2 %v4982_v26  ;;  %5024 = vmatpush.msra.mxu3 %v4983_v47 }
 0x6e5   :  { %v4819_v14 = vadd.f32 %v4818_v58, %v4799_v21  ;;  %v4981_v21 = vld [vmem:[#allocation12 + $0x38] sm:$0xff] }
 0x6e6   :  { %5005 = vmatpush.msra.mxu2 %v4980_v24  ;;  %5025 = vmatpush.msra.mxu3 %v4981_v21  ;;  %v11373_v21 = vld [vmem:[%s14044_s5] sm:$0xff] }
 0x6e7   :  { %v13484_v33 = vadd.f32 %v4819_v14, %v4531_v59  ;;  %v4976_v14 = vld [vmem:[#allocation12 + $0x10] sm:$0xff] }
 0x6e8   :  { %5006 = vmatpush.msra.mxu2 %v4978_v0  ;;  %5026 = vmatpush.msra.mxu3 %v4979_v34  ;;  %v9692_v0 = vld [vmem:[#allocation10 + $0x970] sm:$0xf]  ;;  %v11424_v34 = vld [vmem:[#allocation10 + $0x974] sm:$0xf0] }
 0x6e9   :  { %v4854_v31 = vmul.f32 %v13484_v33, %v13484_v33  ;;  %v4841_v55 = vadd.f32 %v4840_v37, %v13484_v33 }
 0x6ea   :  { %5007 = vmatpush.msra.mxu2 %v4976_v14  ;;  %5027 = vmatpush.msra.mxu3 %v4977_v56  ;;  %v9756_v14 = vld [vmem:[#allocation10 + $0x9f0] sm:$0xf]  ;;  %v9693_v56 = vor.u32 %v11424_v34, %v9692_v0  ;;  %v11430_v0 = vld [vmem:[#allocation10 + $0x9a4] sm:$0xf0]  ;;  %v9780_v34 = vld [vmem:[#allocation10 + $0x820] sm:$0xf] }
 0x6eb   :  { %v4867_v28 = vadd.f32 %v4866_v48, %v4854_v31  ;;  %v5043_v48 = vld [vmem:[#allocation13] sm:$0x3] }
 0x6ec   :  { %v4801_v23 = vpop.f32.mrf.mxu2  ;;  %v4820_v13 = vpop.f32.mrf.mxu3  ;;  %5008 = vmatpush.msra.mxu2 %v4974_v42  ;;  %5028 = vmatpush.msra.mxu3 %v4975_v7  ;;  %v11440_v42 = vld [vmem:[#allocation10 + $0x9f4] sm:$0xf0]  ;;  %v9820_v7 = vld [vmem:[#allocation10 + $0x870] sm:$0xf] }
 0x6ed   :  { %v4821_v17 = vadd.f32 %v4820_v13, %v4801_v23 }
 0x6ee   :  { %5436 = vmatpush.bf16.msrb.mxu2 %v9693_v56  ;;  %v9844_v56 = vld [vmem:[#allocation10 + $0x8a0] sm:$0xf] }
 0x6ef   :  { %v13501_v27 = vadd.f32 %v4821_v17, %v4533_v43 }
 0x6f1   :  { %v4842_v39 = vadd.f32 %v4841_v55, %v13501_v27  ;;  %v4856_v30 = vmul.f32 %v13501_v27, %v13501_v27 }
 0x6f3   :  { %v4843_v46 = vrot.slane %v4842_v39, 4  ;;  %v4868_v4 = vadd.f32 %v4867_v28, %v4856_v30 }
 0x6f5   :  { %v4844_v12 = vadd.f32 %v4843_v46, %v4842_v39  ;;  %v4869_v49 = vrot.slane %v4868_v4, 4 }
 0x6f7   :  { %v4845_v50 = vrot.slane %v4844_v12, 2  ;;  %v4870_v60 = vadd.f32 %v4869_v49, %v4868_v4 }
 0x6f9   :  { %v4846_v15 = vadd.f32 %v4845_v50, %v4844_v12  ;;  %v4871_v38 = vrot.slane %v4870_v60, 2 }
 0x6fb   :  { %v4847_v41 = vrot.slane %v4846_v15, 1  ;;  %v4872_v52 = vadd.f32 %v4871_v38, %v4870_v60 }
 0x6fd   :  { %v4873_v1 = vrot.slane %v4872_v52, 1  ;;  %v4848_v20 = vadd.f32 %v4847_v41, %v4846_v15 }
 0x6ff   :  { %v4874_v25 = vadd.f32 %v4873_v1, %v4872_v52 }
 0x701   :  { %v4877_v51 = vsel %vm4875_vm2, %v4848_v20, %v4874_v25 }
 0x702   :  { %4946 = vmatmul.f32.vlgmr.msra.gmra.mxu1 %v4877_v51 }
 0x723   :  { %v4927_v57 = vpop.f32.mrf.mxu0 }
 0x77f   :  { %v4947_v36 = vpop.f32.mrf.mxu1 }
 0x780   :  { %v4948_v63 = vadd.f32 %v4947_v36, %v4927_v57 }
 0x782   :  { %v4950_v16 = vmul.f32 %v4948_v63, %v4948_v63 }
 0x784   :  { %v4952_v8 = vrot.slane %v4950_v16, 7 }
 0x786   :  { %v4954_v32 = vsub.f32 %v4948_v63, %v4952_v8 }
 0x788   :  { %v4955_v58 = vadd.f32 1e-05, %v4954_v32 }
 0x78a   :  { %11914 = vrsqrt.f32 %v4955_v58  ;;  %vm4962_vm4 = vweird.f32 %v4955_v58 }
 0x790   :  { %v11915_v59 = vpop.eup %11914 }
 0x791   :  { %v4957_v35 = vmul.f32 %v11915_v59, %v4955_v58  ;;  %vm4963_vm3 = vweird.f32 %v11915_v59  ;;  %v11374_v58 = vld [vmem:[%s14044_s5 + $0x8] sm:$0xff] }
 0x792   :  { %vm4964_vm5 = vmor %vm4962_vm4, %vm4963_vm3 }
 0x793   :  { %v4958_v54 = vmul.f32 %v11915_v59, %v4957_v35  ;;  %v9757_v35 = vor.u32 %v11440_v42, %v9756_v14  ;;  %v11382_v14 = vld [vmem:[#allocation10 + $0x824] sm:$0xf0] }
 0x794   :  { %v11398_v42 = vld [vmem:[#allocation10 + $0x8a4] sm:$0xf0] }
 0x795   :  { %v4959_v11 = vmul.f32 0.5, %v4958_v54  ;;  %5450 = vmatpush.bf16.msrb.mxu3 %v9757_v35  ;;  %v9644_v35 = vld [vmem:[#allocation10 + $0x910] sm:$0xf] }
 0x797   :  { %v4960_v9 = vsub.f32 1.5, %v4959_v11  ;;  %v9884_v11 = vld [vmem:[#allocation10 + $0x8f0] sm:$0xf] }
 0x799   :  { %v4961_v18 = vmul.f32 %v11915_v59, %v4960_v9  ;;  %v11408_v9 = vld [vmem:[#allocation10 + $0x8f4] sm:$0xf0] }
 0x79b   :  { %v4965_v29 = vsel %vm4964_vm5, %v11915_v59, %v4961_v18  ;;  %v11392_v59 = vld [vmem:[#allocation10 + $0x874] sm:$0xf0]  ;;  %v9684_v18 = vld [vmem:[#allocation10 + $0x960] sm:$0xf] }
 0x79c   :  { %v4967_v43 = vrot.slane %v4965_v29, 1  ;;  %v9821_v54 = vor.u32 %v11392_v59, %v9820_v7  ;;  %v9885_v29 = vor.u32 %v11408_v9, %v9884_v11  ;;  %v9781_v11 = vor.u32 %v11382_v14, %v9780_v34 }
 0x79d   :  { %v9845_v9 = vor.u32 %v11398_v42, %v9844_v56  ;;  %v9996_v56 = vld [vmem:[#allocation10 + $0xad0] sm:$0xf]  ;;  %v11468_v42 = vld [vmem:[#allocation10 + $0xad4] sm:$0xf0] }
 0x79e   :  { %v4969_v23 = vmul.f32 %v4967_v43, %v4948_v63 }
 0x7a0   :  { %v4971_v13 = vrot.slane %v4969_v23, 7  ;;  %v9748_v23 = vld [vmem:[#allocation10 + $0x9e0] sm:$0xf] }
 0x7a2   :  { %v4973_v6 = vsel %vm4875_vm2, %v4967_v43, %v4971_v13  ;;  %v11422_v43 = vld [vmem:[#allocation10 + $0x964] sm:$0xf0] }
 0x7a3   :  { %9608 = vmatmul.msk.f32.vlgmr.msra.gmra.mxu2 %vm1496_vm0, %v4973_v6  ;;  %9609 = vmatmul.msk.f32.vlgmr.msra.gmra.mxu3 %vm1496_vm0, %v4973_v6  ;;  %v11438_v13 = vld [vmem:[#allocation10 + $0x9e4] sm:$0xf0]  ;;  %v9685_v6 = vor.u32 %v11422_v43, %v9684_v18  ;;  %v9708_v18 = vld [vmem:[#allocation10 + $0x990] sm:$0xf] }
 0x7a4   :  { %v9772_v43 = vld [vmem:[#allocation10 + $0x810] sm:$0xf] }
 0x7a5   :  { %5437 = vmatpush.bf16.msrb.mxu2 %v9685_v6  ;;  %v11396_v6 = vld [vmem:[#allocation10 + $0x894] sm:$0xf0] }
 0x826   :  { %v5010_v37 = vpop.f32.mrf.mxu2  ;;  %v5030_v31 = vpop.f32.mrf.mxu3 }
 0x827   :  { %5046 = vst [vmem:[#allocation1] sm:$0xff] %v5010_v37  ;;  %v5033_v17 = vperm.slane %v5010_v37, 0  ;;  %v5034_v55 = vperm.slane %v5030_v31, 0  ;;  %v9749_v37 = vor.u32 %v11438_v13, %v9748_v23  ;;  %v11380_v23 = vld [vmem:[#allocation10 + $0x814] sm:$0xf0] }
 0x828   :  { %5047 = vst [vmem:[#allocation1 + $0x9] sm:$0xff] %v5030_v31  ;;  %v9812_v31 = vld [vmem:[#allocation10 + $0x860] sm:$0xf]  ;;  %v9836_v13 = vld [vmem:[#allocation10 + $0x890] sm:$0xf] }
 0x829   :  { %v5039_v30 = vmul.f32 %v5033_v17, %v13409_v3  ;;  %v5041_v46 = vmul.f32 %v5033_v17, %v13425_v10  ;;  %v5040_v4 = vmul.f32 %v5034_v55, %v13484_v33  ;;  %v5042_v12 = vmul.f32 %v5034_v55, %v13501_v27  ;;  %5451 = vmatpush.bf16.msrb.mxu3 %v9749_v37 }
 0x82a   :  { %v5035_v60 = vmul.f32 %v5033_v17, %v13407_v45  ;;  %v5037_v15 = vmul.f32 %v5033_v17, %v13400_v40  ;;  %v5036_v38 = vmul.f32 %v5034_v55, %v13482_v5  ;;  %v5038_v41 = vmul.f32 %v5034_v55, %v13477_v2  ;;  %v11390_v17 = vld [vmem:[#allocation10 + $0x864] sm:$0xf0] }
 0x82b   :  { %v9813_v55 = vor.u32 %v11390_v17, %v9812_v31  ;;  %v9773_v17 = vor.u32 %v11380_v23, %v9772_v43  ;;  %v11450_v43 = vld [vmem:[#allocation10 + $0xa44] sm:$0xf0]  ;;  %v9988_v23 = vld [vmem:[#allocation10 + $0xac0] sm:$0xf] }
 0x82f   :  { %v5049_v28 = vld [vmem:[#allocation1 + $0x1] ss:$9 sm:$0xff] }
 0x830   :  { %v5051_v39 = vsub.f32 %v5043_v48, %v5049_v28  ;;  %v9876_v48 = vld [vmem:[#allocation10 + $0x8e0] sm:$0xf]  ;;  %v11406_v28 = vld [vmem:[#allocation10 + $0x8e4] sm:$0xf0] }
 0x832   :  { %v5053_v49 = vperm.slane %v5051_v39, 0  ;;  %v5054_v50 = vperm.slane %v5051_v39, 1  ;;  %v9676_v39 = vld [vmem:[#allocation10 + $0x950] sm:$0xf] }
 0x834   :  { %v5061_v52 = vadd.f32 %v5053_v49, %v5039_v30  ;;  %v5063_v1 = vadd.f32 %v5053_v49, %v5041_v46  ;;  %v5062_v20 = vadd.f32 %v5054_v50, %v5040_v4  ;;  %v5064_v3 = vadd.f32 %v5054_v50, %v5042_v12  ;;  %v11420_v30 = vld [vmem:[#allocation10 + $0x954] sm:$0xf0]  ;;  %v9740_v4 = vld [vmem:[#allocation10 + $0x9d0] sm:$0xf] }
 0x835   :  { %v5057_v25 = vadd.f32 %v5053_v49, %v5035_v60  ;;  %v5059_v10 = vadd.f32 %v5053_v49, %v5037_v15  ;;  %v5058_v51 = vadd.f32 %v5054_v50, %v5036_v38  ;;  %v5060_v33 = vadd.f32 %v5054_v50, %v5038_v41  ;;  %v11436_v12 = vld [vmem:[#allocation10 + $0x9d4] sm:$0xf0]  ;;  %v9804_v49 = vld [vmem:[#allocation10 + $0x850] sm:$0xf] }
 0x836   :  { %vm5069_vm6 = vcmp.gt.f32.partialorder %v5061_v52, 0.0  ;;  %vm5071_vm7 = vcmp.gt.f32.partialorder %v5063_v1, 0.0  ;;  %v5077_v27 = vmul.f32 0.2, %v5061_v52  ;;  %v5079_v57 = vmul.f32 0.2, %v5063_v1 }
 0x837   :  { %vm5070_vm8 = vcmp.gt.f32.partialorder %v5062_v20, 0.0  ;;  %vm5072_vm9 = vcmp.gt.f32.partialorder %v5064_v3, 0.0  ;;  %v5078_v45 = vmul.f32 0.2, %v5062_v20  ;;  %v5080_v40 = vmul.f32 0.2, %v5064_v3 }
 0x838   :  { %v5085_v36 = vsel %vm5069_vm6, %v5061_v52, %v5077_v27  ;;  %v5087_v5 = vsel %vm5071_vm7, %v5063_v1, %v5079_v57  ;;  %vm5065_vm10 = vcmp.gt.f32.partialorder %v5057_v25, 0.0  ;;  %vm5067_vm11 = vcmp.gt.f32.partialorder %v5059_v10, 0.0  ;;  %v11388_v60 = vld [vmem:[#allocation10 + $0x854] sm:$0xf0]  ;;  %v9868_v15 = vld [vmem:[#allocation10 + $0x8d0] sm:$0xf] }
 0x839   :  { %v5091_v2 = vpack.c.bf16 %v5087_v5, %v5085_v36  ;;  %v5086_v63 = vsel %vm5070_vm8, %v5062_v20, %v5078_v45  ;;  %v5088_v19 = vsel %vm5072_vm9, %v5064_v3, %v5080_v40  ;;  %v5073_v22 = vmul.f32 0.2, %v5057_v25  ;;  %v11404_v38 = vld [vmem:[#allocation10 + $0x8d4] sm:$0xf0]  ;;  %v9668_v1 = vld [vmem:[#allocation10 + $0x940] sm:$0xf] }
 0x83a   :  { %v5092_v62 = vpack.c.bf16 %v5088_v19, %v5086_v63  ;;  %v5075_v44 = vmul.f32 0.2, %v5059_v10  ;;  %vm5066_vm12 = vcmp.gt.f32.partialorder %v5058_v51, 0.0  ;;  %vm5068_vm13 = vcmp.gt.f32.partialorder %v5060_v33, 0.0  ;;  %v11418_v20 = vld [vmem:[#allocation10 + $0x944] sm:$0xf0] }
 0x83b   :  { %5140 = vmatpush.bf16.msrb.mxu0 %v5091_v2  ;;  %v5081_v16 = vsel %vm5065_vm10, %v5057_v25, %v5073_v22  ;;  %v5074_v53 = vmul.f32 0.2, %v5058_v51  ;;  %v5076_v61 = vmul.f32 0.2, %v5060_v33  ;;  %v9877_v46 = vor.u32 %v11406_v28, %v9876_v48  ;;  %v9732_v25 = vld [vmem:[#allocation10 + $0x9c0] sm:$0xf] }
 0x83c   :  { %5169 = vmatpush.bf16.msrb.mxu1 %v5092_v62  ;;  %v5083_v8 = vsel %vm5067_vm11, %v5059_v10, %v5075_v44  ;;  %v9677_v50 = vor.u32 %v11420_v30, %v9676_v39  ;;  %v9741_v41 = vor.u32 %v11436_v12, %v9740_v4  ;;  %v9805_v52 = vor.u32 %v11388_v60, %v9804_v49  ;;  %v11434_v10 = vld [vmem:[#allocation10 + $0x9c4] sm:$0xf0]  ;;  %v9860_v27 = vld [vmem:[#allocation10 + $0x8c0] sm:$0xf]  ;;  %v9660_v5 = vld [vmem:[#allocation10 + $0x930] sm:$0xf] }
 0x83d   :  { %v5089_v26 = vpack.c.bf16 %v5083_v8, %v5081_v16  ;;  %v5082_v47 = vsel %vm5066_vm12, %v5058_v51, %v5074_v53  ;;  %v5084_v32 = vsel %vm5068_vm13, %v5060_v33, %v5076_v61  ;;  %v9869_v3 = vor.u32 %v11404_v38, %v9868_v15  ;;  %v9796_v51 = vld [vmem:[#allocation10 + $0x840] sm:$0xf]  ;;  %v11386_v33 = vld [vmem:[#allocation10 + $0x844] sm:$0xf0]  ;;  %v11416_v2 = vld [vmem:[#allocation10 + $0x934] sm:$0xf0] }
 0x83e   :  { %v5090_v24 = vpack.c.bf16 %v5084_v32, %v5082_v47  ;;  %v11402_v57 = vld [vmem:[#allocation10 + $0x8c4] sm:$0xf0]  ;;  %5438 = vmatpush.bf16.msrb.mxu2 %v9677_v50  ;;  %v9669_v40 = vor.u32 %v11418_v20, %v9668_v1  ;;  %5452 = vmatpush.bf16.msrb.mxu3 %v9741_v41  ;;  %v9733_v36 = vor.u32 %v11434_v10, %v9732_v25  ;;  %v9724_v22 = vld [vmem:[#allocation10 + $0x9b0] sm:$0xf]  ;;  %v11432_v62 = vld [vmem:[#allocation10 + $0x9b4] sm:$0xf0] }
 0x83f   :  { %5141 = vmatpush.bf16.msrb.mxu0 %v5089_v26  ;;  %v11375_v45 = vld [vmem:[%s14044_s5 + $0x10] sm:$0xff]  ;;  %v9797_v63 = vor.u32 %v11386_v33, %v9796_v51  ;;  %v9861_v19 = vor.u32 %v11402_v57, %v9860_v27  ;;  %v9788_v44 = vld [vmem:[#allocation10 + $0x830] sm:$0xf]  ;;  %v11384_v16 = vld [vmem:[#allocation10 + $0x834] sm:$0xf0]  ;;  %v9661_v8 = vor.u32 %v11416_v2, %v9660_v5  ;;  %v9725_v26 = vor.u32 %v11432_v62, %v9724_v22 }
 0x840   :  { %5170 = vmatpush.bf16.msrb.mxu1 %v5090_v24  ;;  %v9852_v53 = vld [vmem:[#allocation10 + $0x8b0] sm:$0xf]  ;;  %v11400_v61 = vld [vmem:[#allocation10 + $0x8b4] sm:$0xf0]  ;;  %v9652_v47 = vld [vmem:[#allocation10 + $0x920] sm:$0xf]  ;;  %v9789_v24 = vor.u32 %v11384_v16, %v9788_v44  ;;  %v9837_v48 = vor.u32 %v11396_v6, %v9836_v13 }
 0x841   :  { %v11414_v32 = vld [vmem:[#allocation10 + $0x924] sm:$0xf0]  ;;  %v9636_v28 = vld [vmem:[#allocation10 + $0x900] sm:$0xf]  ;;  %v11423_v12 = vld [vmem:[#allocation10 + $0x974] sm:$0xf] }
 0x842   :  { %9626 = vmatmul.msk.bf16.vlgmr.msrb.gmra.mxu0 %vm5121_vm14, %v11373_v21  ;;  %5439 = vmatpush.bf16.msrb.mxu2 %v9669_v40  ;;  %v9653_v7 = vor.u32 %v11414_v32, %v9652_v47  ;;  %v11410_v39 = vld [vmem:[#allocation10 + $0x904] sm:$0xf0]  ;;  %v9700_v30 = vld [vmem:[#allocation10 + $0x980] sm:$0xf]  ;;  %v9694_v49 = vld [vmem:[#allocation10 + $0x978] sm:$0xf0] }
 0x843   :  { %9630 = vmatmul.msk.bf16.vlgmr.msrb.gmra.mxu1 %vm5121_vm14, %v11373_v21  ;;  %5662 = vmatpush.bf16.msra.mxu0 %v9821_v54  ;;  %v9853_v21 = vor.u32 %v11400_v61, %v9852_v53  ;;  %v11412_v54 = vld [vmem:[#allocation10 + $0x914] sm:$0xf0]  ;;  %v11426_v4 = vld [vmem:[#allocation10 + $0x984] sm:$0xf0]  ;;  %v9697_v60 = vor.u32 %v11423_v12, %v9694_v49  ;;  %v11439_v15 = vld [vmem:[#allocation10 + $0x9f4] sm:$0xf] }
 0x844   :  { %5676 = vmatpush.bf16.msra.mxu1 %v9885_v29  ;;  %5453 = vmatpush.bf16.msrb.mxu3 %v9733_v36  ;;  %v11428_v29 = vld [vmem:[#allocation10 + $0x994] sm:$0xf0]  ;;  %v9645_v37 = vor.u32 %v11412_v54, %v9644_v35  ;;  %v9701_v50 = vor.u32 %v11426_v4, %v9700_v30  ;;  %v9758_v38 = vld [vmem:[#allocation10 + $0x9f8] sm:$0xf0]  ;;  %v9764_v41 = vld [vmem:[#allocation10 + $0x800] sm:$0xf] }
 0x845   :  { %v9709_v31 = vor.u32 %v11428_v29, %v9708_v18  ;;  %v11378_v1 = vld [vmem:[#allocation10 + $0x804] sm:$0xf0]  ;;  %v9828_v20 = vld [vmem:[#allocation10 + $0x880] sm:$0xf]  ;;  %v9948_v51 = vld [vmem:[#allocation10 + $0xa70] sm:$0xf] }
 0x846   :  { %5440 = vmatpush.bf16.msrb.mxu2 %v9661_v8  ;;  %v9765_v25 = vor.u32 %v11378_v1, %v9764_v41  ;;  %v11456_v33 = vld [vmem:[#allocation10 + $0xa74] sm:$0xf0]  ;;  %v10012_v27 = vld [vmem:[#allocation10 + $0xaf0] sm:$0xf]  ;;  %v11421_v40 = vld [vmem:[#allocation10 + $0x964] sm:$0xf] }
 0x847   :  { %5663 = vmatpush.bf16.msra.mxu0 %v9813_v55  ;;  %v11376_v55 = vld [vmem:[%s14044_s5 + $0x18] sm:$0xff]  ;;  %v9949_v57 = vor.u32 %v11456_v33, %v9948_v51  ;;  %v9940_v22 = vld [vmem:[#allocation10 + $0xa60] sm:$0xf]  ;;  %v9678_v47 = vld [vmem:[#allocation10 + $0x958] sm:$0xf0]  ;;  %vm6488_vm8 = vcmask 130048  }
 0x848   :  { %5677 = vmatpush.bf16.msra.mxu1 %v9877_v46  ;;  %5454 = vmatpush.bf16.msrb.mxu3 %v9725_v26  ;;  %v9637_v46 = vor.u32 %v11410_v39, %v9636_v28  ;;  %v9686_v36 = vld [vmem:[#allocation10 + $0x968] sm:$0xf0]  ;;  %v11454_v44 = vld [vmem:[#allocation10 + $0xa64] sm:$0xf0]  ;;  %v10004_v16 = vld [vmem:[#allocation10 + $0xae0] sm:$0xf] }
 0x849   :  { %v9689_v2 = vor.u32 %v11421_v40, %v9686_v36  ;;  %v11470_v53 = vld [vmem:[#allocation10 + $0xae4] sm:$0xf0]  ;;  %v9941_v61 = vor.u32 %v11454_v44, %v9940_v22  ;;  %v11419_v26 = vld [vmem:[#allocation10 + $0x954] sm:$0xf]  ;;  %v9670_v35 = vld [vmem:[#allocation10 + $0x948] sm:$0xf0] }
 0x84a   :  { %5441 = vmatpush.bf16.msrb.mxu2 %v9653_v7  ;;  %v10005_v8 = vor.u32 %v11470_v53, %v10004_v16  ;;  %v11435_v32 = vld [vmem:[#allocation10 + $0x9d4] sm:$0xf]  ;;  %v11417_v7 = vld [vmem:[#allocation10 + $0x944] sm:$0xf]  ;;  %v9924_v29 = vld [vmem:[#allocation10 + $0xa40] sm:$0xf] }
 0x84b   :  { %5664 = vmatpush.bf16.msra.mxu0 %v9805_v52  ;;  %v9761_v52 = vor.u32 %v11439_v15, %v9758_v38  ;;  %v11433_v54 = vld [vmem:[#allocation10 + $0x9c4] sm:$0xf]  ;;  %v9925_v13 = vor.u32 %v11450_v43, %v9924_v29  ;;  %v11466_v6 = vld [vmem:[#allocation10 + $0xac4] sm:$0xf0]  ;;  %v9726_v28 = vld [vmem:[#allocation10 + $0x9b8] sm:$0xf0] }
 0x84c   :  { %5678 = vmatpush.bf16.msra.mxu1 %v9869_v3  ;;  %v11394_v3 = vld [vmem:[#allocation10 + $0x884] sm:$0xf0]  ;;  %v9916_v39 = vld [vmem:[#allocation10 + $0xa30] sm:$0xf]  ;;  %v11448_v30 = vld [vmem:[#allocation10 + $0xa34] sm:$0xf0] }
 0x84d   :  { %v9829_v10 = vor.u32 %v11394_v3, %v9828_v20  ;;  %v9980_v4 = vld [vmem:[#allocation10 + $0xab0] sm:$0xf]  ;;  %v11464_v12 = vld [vmem:[#allocation10 + $0xab4] sm:$0xf0]  ;;  %v11413_v49 = vld [vmem:[#allocation10 + $0x924] sm:$0xf] }
 0x84e   :  { %5442 = vmatpush.bf16.msrb.mxu2 %v9645_v37  ;;  %v9989_v37 = vor.u32 %v11466_v6, %v9988_v23  ;;  %v11429_v15 = vld [vmem:[#allocation10 + $0x9a4] sm:$0xf]  ;;  %v9718_v38 = vld [vmem:[#allocation10 + $0x9a8] sm:$0xf0]  ;;  %v9981_v41 = vor.u32 %v11464_v12, %v9980_v4  ;;  %v11446_v1 = vld [vmem:[#allocation10 + $0xa24] sm:$0xf0] }
 0x84f   :  { %5665 = vmatpush.bf16.msra.mxu0 %v9797_v63  ;;  %v11437_v63 = vld [vmem:[#allocation10 + $0x9e4] sm:$0xf]  ;;  %v9972_v3 = vld [vmem:[#allocation10 + $0xaa0] sm:$0xf]  ;;  %v9710_v36 = vld [vmem:[#allocation10 + $0x998] sm:$0xf0] }
 0x850   :  { %5679 = vmatpush.bf16.msra.mxu1 %v9861_v19  ;;  %v9750_v19 = vld [vmem:[#allocation10 + $0x9e8] sm:$0xf0]  ;;  %v11460_v44 = vld [vmem:[#allocation10 + $0xa94] sm:$0xf0]  ;;  %v11409_v16 = vld [vmem:[#allocation10 + $0x904] sm:$0xf] }
 0x851   :  { %v9753_v62 = vor.u32 %v11437_v63, %v9750_v19  ;;  %vm7768_vm12 = vcmask 1043456   ;;  %vm7764_vm13 = vcmask 64512  }
 0x852   :  { %9627 = vmatmul.msk.bf16.gmra.mxu0 %vm5121_vm14, %v11374_v58  ;;  %5443 = vmatpush.bf16.msrb.mxu2 %v9637_v46 }
 0x853   :  { %9631 = vmatmul.msk.bf16.gmra.mxu1 %vm5121_vm14, %v11374_v58  ;;  %v9716_v58 = vld [vmem:[#allocation10 + $0x9a0] sm:$0xf]  ;;  %5666 = vmatpush.bf16.msra.mxu0 %v9789_v24  ;;  %v9681_v24 = vor.u32 %v11419_v26, %v9678_v47  ;;  %v11425_v26 = vld [vmem:[#allocation10 + $0x984] sm:$0xf]  ;;  %v9702_v47 = vld [vmem:[#allocation10 + $0x988] sm:$0xf0] }
 0x854   :  { %v9717_v59 = vor.u32 %v11430_v0, %v9716_v58  ;;  %5680 = vmatpush.bf16.msra.mxu1 %v9853_v21  ;;  %v9742_v21 = vld [vmem:[#allocation10 + $0x9d8] sm:$0xf0]  ;;  %v9932_v58 = vld [vmem:[#allocation10 + $0xa50] sm:$0xf]  ;;  %v11452_v0 = vld [vmem:[#allocation10 + $0xa54] sm:$0xf0] }
 0x855   :  { %v9745_v34 = vor.u32 %v11435_v32, %v9742_v21  ;;  %v9933_v14 = vor.u32 %v11452_v0, %v9932_v58  ;;  %v9892_v21 = vld [vmem:[#allocation10 + $0xa00] sm:$0xf]  ;;  %v11442_v58 = vld [vmem:[#allocation10 + $0xa04] sm:$0xf0] }
 0x856   :  { %5455 = vmatpush.bf16.msrb.mxu3 %v9717_v59  ;;  %5464 = vmatpush.bf16.msra.mxu2 %v9697_v60  ;;  %v9997_v59 = vor.u32 %v11468_v42, %v9996_v56  ;;  %v9654_v60 = vld [vmem:[#allocation10 + $0x928] sm:$0xf0]  ;;  %v9893_v0 = vor.u32 %v11442_v58, %v9892_v21  ;;  %v11405_v21 = vld [vmem:[#allocation10 + $0x8e4] sm:$0xf] }
 0x857   :  { %5667 = vmatpush.bf16.msra.mxu0 %v9781_v11  ;;  %v9734_v11 = vld [vmem:[#allocation10 + $0x9c8] sm:$0xf0]  ;;  %v9657_v20 = vor.u32 %v11413_v49, %v9654_v60  ;;  %v10060_v49 = vld [vmem:[#allocation10 + $0xb50] sm:$0xf] }
 0x858   :  { %5681 = vmatpush.bf16.msra.mxu1 %v9845_v9  ;;  %v9673_v9 = vor.u32 %v11417_v7, %v9670_v35  ;;  %v9737_v18 = vor.u32 %v11433_v54, %v9734_v11  ;;  %v10076_v35 = vld [vmem:[#allocation10 + $0xb70] sm:$0xf]  ;;  %v11488_v11 = vld [vmem:[#allocation10 + $0xb74] sm:$0xf0]  ;;  %v9878_v58 = vld [vmem:[#allocation10 + $0x8e8] sm:$0xf0] }
 0x859   :  { %v10077_v6 = vor.u32 %v11488_v11, %v10076_v35  ;;  %v10124_v60 = vld [vmem:[#allocation10 + $0xbd0] sm:$0xf]  ;;  %v9881_v11 = vor.u32 %v11405_v21, %v9878_v58 }
 0x85a   :  { %5456 = vmatpush.bf16.msrb.mxu3 %v9709_v31  ;;  %5465 = vmatpush.bf16.msra.mxu2 %v9689_v2  ;;  %v11415_v31 = vld [vmem:[#allocation10 + $0x934] sm:$0xf]  ;;  %v11444_v2 = vld [vmem:[#allocation10 + $0xa14] sm:$0xf0] }
 0x85b   :  { %5668 = vmatpush.bf16.msra.mxu0 %v9773_v17  ;;  %v9662_v17 = vld [vmem:[#allocation10 + $0x938] sm:$0xf0] }
 0x85c   :  { %5682 = vmatpush.bf16.msra.mxu1 %v9837_v48  ;;  %v11431_v48 = vld [vmem:[#allocation10 + $0x9b4] sm:$0xf] }
 0x85d   :  { %v9729_v46 = vor.u32 %v11431_v48, %v9726_v28  ;;  %v10132_v28 = vld [vmem:[#allocation10 + $0xbe0] sm:$0xf] }
 0x85e   :  { %5457 = vmatpush.bf16.msrb.mxu3 %v9701_v50  ;;  %5466 = vmatpush.bf16.msra.mxu2 %v9681_v24  ;;  %v9917_v50 = vor.u32 %v11448_v30, %v9916_v39  ;;  %v9705_v24 = vor.u32 %v11425_v26, %v9702_v47  ;;  %v11502_v39 = vld [vmem:[#allocation10 + $0xbe4] sm:$0xf0]  ;;  %v11389_v26 = vld [vmem:[#allocation10 + $0x864] sm:$0xf]  ;;  %v9814_v47 = vld [vmem:[#allocation10 + $0x868] sm:$0xf0] }
 0x85f   :  { %5669 = vmatpush.bf16.msra.mxu0 %v9765_v25  ;;  %v11462_v25 = vld [vmem:[#allocation10 + $0xaa4] sm:$0xf0]  ;;  %v10133_v12 = vor.u32 %v11502_v39, %v10132_v28 }
 0x860   :  { %5683 = vmatpush.bf16.msra.mxu1 %v9829_v10  ;;  %v9721_v10 = vor.u32 %v11429_v15, %v9718_v38  ;;  %v9973_v33 = vor.u32 %v11462_v25, %v9972_v3  ;;  %v11500_v15 = vld [vmem:[#allocation10 + $0xbd4] sm:$0xf0]  ;;  %v11498_v3 = vld [vmem:[#allocation10 + $0xbc4] sm:$0xf0] }
 0x862   :  { %9628 = vmatmul.msk.bf16.gmra.mxu0 %vm5121_vm14, %v11375_v45  ;;  %5478 = vmatpush.bf16.msra.mxu3 %v9761_v52  ;;  %v9908_v52 = vld [vmem:[#allocation10 + $0xa20] sm:$0xf] }
 0x863   :  { %9632 = vmatmul.msk.bf16.gmra.mxu1 %vm5121_vm14, %v11375_v45  ;;  %v11472_v45 = vld [vmem:[#allocation10 + $0xaf4] sm:$0xf0]  ;;  %5921 = vmatpush.bf16.msrb.mxu0 %v9949_v57  ;;  %v9909_v51 = vor.u32 %v11446_v1, %v9908_v52  ;;  %v9646_v57 = vld [vmem:[#allocation10 + $0x918] sm:$0xf0]  ;;  %v10052_v52 = vld [vmem:[#allocation10 + $0xb40] sm:$0xf] }
 0x864   :  { %v10013_v5 = vor.u32 %v11472_v45, %v10012_v27  ;;  %5467 = vmatpush.bf16.msra.mxu2 %v9673_v9  ;;  %v11411_v27 = vld [vmem:[#allocation10 + $0x914] sm:$0xf]  ;;  %v10140_v9 = vld [vmem:[#allocation10 + $0xbf0] sm:$0xf]  ;;  %v11482_v1 = vld [vmem:[#allocation10 + $0xb44] sm:$0xf0] }
 0x865   :  { %v11427_v45 = vld [vmem:[#allocation10 + $0x994] sm:$0xf]  ;;  %v9649_v40 = vor.u32 %v11411_v27, %v9646_v57  ;;  %v9822_v27 = vld [vmem:[#allocation10 + $0x878] sm:$0xf0]  ;;  %v10053_v57 = vor.u32 %v11482_v1, %v10052_v52  ;;  %v11490_v52 = vld [vmem:[#allocation10 + $0xb84] sm:$0xf0] }
 0x866   :  { %5935 = vmatpush.bf16.msrb.mxu1 %v10013_v5  ;;  %5479 = vmatpush.bf16.msra.mxu3 %v9753_v62  ;;  %v9900_v5 = vld [vmem:[#allocation10 + $0xa10] sm:$0xf]  ;;  %v9713_v19 = vor.u32 %v11427_v45, %v9710_v36  ;;  %v11407_v36 = vld [vmem:[#allocation10 + $0x8f4] sm:$0xf] }
 0x867   :  { %5922 = vmatpush.bf16.msrb.mxu0 %v9941_v61  ;;  %v9901_v22 = vor.u32 %v11444_v2, %v9900_v5  ;;  %v9964_v62 = vld [vmem:[#allocation10 + $0xa90] sm:$0xf]  ;;  %v9886_v5 = vld [vmem:[#allocation10 + $0x8f8] sm:$0xf0] }
 0x868   :  { %v9965_v61 = vor.u32 %v11460_v44, %v9964_v62  ;;  %v10044_v2 = vld [vmem:[#allocation10 + $0xb30] sm:$0xf] }
 0x86a   :  { %5936 = vmatpush.bf16.msrb.mxu1 %v10005_v8  ;;  %5480 = vmatpush.bf16.msra.mxu3 %v9745_v34  ;;  %v9638_v8 = vld [vmem:[#allocation10 + $0x908] sm:$0xf0]  ;;  %v9956_v34 = vld [vmem:[#allocation10 + $0xa80] sm:$0xf] }
 0x86b   :  { %5923 = vmatpush.bf16.msrb.mxu0 %v9933_v14  ;;  %v9641_v32 = vor.u32 %v11409_v16, %v9638_v8  ;;  %v11458_v14 = vld [vmem:[#allocation10 + $0xa84] sm:$0xf0]  ;;  %v9889_v8 = vor.u32 %v11407_v36, %v9886_v5  ;;  %v9854_v36 = vld [vmem:[#allocation10 + $0x8b8] sm:$0xf0] }
 0x86c   :  { %v9957_v56 = vor.u32 %v11458_v14, %v9956_v34  ;;  %v10036_v14 = vld [vmem:[#allocation10 + $0xb20] sm:$0xf] }
 0x86e   :  { %5937 = vmatpush.bf16.msrb.mxu1 %v9997_v59  ;;  %5481 = vmatpush.bf16.msra.mxu3 %v9737_v18  ;;  %v11504_v18 = vld [vmem:[#allocation10 + $0xbf4] sm:$0xf0] }
 0x86f   :  { %5924 = vmatpush.bf16.msrb.mxu0 %v9925_v13 }
 0x872   :  { %9629 = vmatmul.msk.bf16.gmra.mxu0 %vm5121_vm14, %v11376_v55  ;;  %5938 = vmatpush.bf16.msrb.mxu1 %v9989_v37  ;;  %v10141_v37 = vor.u32 %v11504_v18, %v10140_v9  ;;  %v11387_v9 = vld [vmem:[#allocation10 + $0x854] sm:$0xf]  ;;  %v9806_v18 = vld [vmem:[#allocation10 + $0x858] sm:$0xf0] }
 0x873   :  { %9633 = vmatmul.msk.bf16.gmra.mxu1 %vm5121_vm14, %v11376_v55  ;;  %v9665_v55 = vor.u32 %v11415_v31, %v9662_v17  ;;  %5482 = vmatpush.bf16.msra.mxu3 %v9729_v46  ;;  %v10068_v31 = vld [vmem:[#allocation10 + $0xb60] sm:$0xf]  ;;  %v9809_v28 = vor.u32 %v11387_v9, %v9806_v18  ;;  %v9950_v9 = vld [vmem:[#allocation10 + $0xa78] sm:$0xf0]  ;;  %v11471_v18 = vld [vmem:[#allocation10 + $0xaf4] sm:$0xf] }
 0x874   :  { %5925 = vmatpush.bf16.msrb.mxu0 %v9917_v50  ;;  %v11484_v50 = vld [vmem:[#allocation10 + $0xb54] sm:$0xf0] }
 0x875   :  { %5468 = vmatpush.bf16.msra.mxu2 %v9665_v55  ;;  %v11486_v55 = vld [vmem:[#allocation10 + $0xb64] sm:$0xf0]  ;;  %v10061_v38 = vor.u32 %v11484_v50, %v10060_v49  ;;  %v9862_v49 = vld [vmem:[#allocation10 + $0x8c8] sm:$0xf0] }
 0x876   :  { %5939 = vmatpush.bf16.msrb.mxu1 %v9981_v41  ;;  %v10069_v4 = vor.u32 %v11486_v55, %v10068_v31  ;;  %v10125_v41 = vor.u32 %v11500_v15, %v10124_v60  ;;  %v10092_v31 = vld [vmem:[#allocation10 + $0xb90] sm:$0xf]  ;;  %v11492_v55 = vld [vmem:[#allocation10 + $0xb94] sm:$0xf0]  ;;  %v10020_v15 = vld [vmem:[#allocation10 + $0xb00] sm:$0xf] }
 0x877   :  { %5483 = vmatpush.bf16.msra.mxu3 %v9721_v10  ;;  %v10093_v60 = vor.u32 %v11492_v55, %v10092_v31 }
 0x878   :  { %5926 = vmatpush.bf16.msrb.mxu0 %v9909_v51 }
 0x879   :  { %5469 = vmatpush.bf16.msra.mxu2 %v9657_v20  ;;  %v10116_v20 = vld [vmem:[#allocation10 + $0xbc0] sm:$0xf] }
 0x87a   :  { %5940 = vmatpush.bf16.msrb.mxu1 %v9973_v33  ;;  %v11391_v33 = vld [vmem:[#allocation10 + $0x874] sm:$0xf]  ;;  %v10117_v45 = vor.u32 %v11498_v3, %v10116_v20 }
 0x87b   :  { %5484 = vmatpush.bf16.msra.mxu3 %v9713_v19  ;;  %v10108_v19 = vld [vmem:[#allocation10 + $0xbb0] sm:$0xf] }
 0x87c   :  { %5927 = vmatpush.bf16.msrb.mxu0 %v9901_v22  ;;  %v11496_v22 = vld [vmem:[#allocation10 + $0xbb4] sm:$0xf0] }
 0x87d   :  { %5470 = vmatpush.bf16.msra.mxu2 %v9649_v40  ;;  %v10109_v34 = vor.u32 %v11496_v22, %v10108_v19 }
 0x87e   :  { %5941 = vmatpush.bf16.msrb.mxu1 %v9965_v61  ;;  %v9825_v61 = vor.u32 %v11391_v33, %v9822_v27 }
 0x87f   :  { %5485 = vmatpush.bf16.msra.mxu3 %v9705_v24 }
 0x880   :  { %5928 = vmatpush.bf16.msrb.mxu0 %v9893_v0 }
 0x881   :  { %5471 = vmatpush.bf16.msra.mxu2 %v9641_v32 }
 0x882   :  { %5942 = vmatpush.bf16.msrb.mxu1 %v9957_v56  ;;  %v11478_v56 = vld [vmem:[#allocation10 + $0xb24] sm:$0xf0] }
 0x8bf   :  { %v5143_v63 = vpop.f32.mrf.mxu0 }
 0x8c0   :  { %v5172_v53 = vpop.f32.mrf.mxu1 }
 0x8c1   :  { %v5192_v42 = vpack.c.bf16 %v5172_v53, %v5143_v63  ;;  %v11480_v63 = vld [vmem:[#allocation10 + $0xb34] sm:$0xf0] }
 0x8c2   :  { %v10045_v0 = vor.u32 %v11480_v63, %v10044_v2 }
 0x8c3   :  { %v5494_v29 = vunpack.c.l.b16 %v5192_v42  ;;  %v5495_v43 = vunpack.c.h.b16 %v5192_v42  ;;  %v10100_v42 = vld [vmem:[#allocation10 + $0xba0] sm:$0xf] }
 0x8c7   :  { %v5145_v7 = vpop.f32.mrf.mxu0 }
 0x8c8   :  { %v5174_v59 = vpop.f32.mrf.mxu1 }
 0x8c9   :  { %v5193_v54 = vpack.c.bf16 %v5174_v59, %v5145_v7  ;;  %v11494_v7 = vld [vmem:[#allocation10 + $0xba4] sm:$0xf0] }
 0x8cb   :  { %v5496_v23 = vunpack.c.l.b16 %v5193_v54  ;;  %v5497_v13 = vunpack.c.h.b16 %v5193_v54  ;;  %v9817_v54 = vor.u32 %v11389_v26, %v9814_v47 }
 0x8cd   :  { %v13538_v17 = vpack.c.b16 %v5496_v23, %v5494_v29  ;;  %v13540_v48 = vpack.c.b16 %v5497_v13, %v5495_v43  ;;  %v11403_v29 = vld [vmem:[#allocation10 + $0x8d4] sm:$0xf]  ;;  %v9870_v43 = vld [vmem:[#allocation10 + $0x8d8] sm:$0xf0]  ;;  %v10037_v23 = vor.u32 %v11478_v56, %v10036_v14  ;;  %v10101_v13 = vor.u32 %v11494_v7, %v10100_v42  ;;  %v11377_v7 = vld [vmem:[#allocation10 + $0x804] sm:$0xf] }
 0x8ce   :  { %v9873_v39 = vor.u32 %v11403_v29, %v9870_v43  ;;  %v11395_v14 = vld [vmem:[#allocation10 + $0x894] sm:$0xf]  ;;  %v9838_v56 = vld [vmem:[#allocation10 + $0x898] sm:$0xf0] }
 0x8cf   :  { %5670 = vmatmul.bf16.vlgmr.msra.gmra.mxu0 %v13538_v17  ;;  %5684 = vmatmul.bf16.vlgmr.msra.gmra.mxu1 %v13540_v48  ;;  %v5148_v30 = vpop.f32.mrf.mxu0  ;;  %v10014_v29 = vld [vmem:[#allocation10 + $0xaf8] sm:$0xf0] }
 0x8d0   :  { %v5177_v46 = vpop.f32.mrf.mxu1  ;;  %6184 = vmatpush.bf16.msra.mxu0 %v10077_v6  ;;  %6198 = vmatpush.bf16.msra.mxu1 %v10141_v37  ;;  %v10028_v6 = vld [vmem:[#allocation10 + $0xb10] sm:$0xf]  ;;  %v11476_v37 = vld [vmem:[#allocation10 + $0xb14] sm:$0xf0] }
 0x8d1   :  { %v5194_v25 = vpack.c.bf16 %v5177_v46, %v5148_v30  ;;  %v11385_v30 = vld [vmem:[#allocation10 + $0x844] sm:$0xf]  ;;  %v9798_v46 = vld [vmem:[#allocation10 + $0x848] sm:$0xf0]  ;;  %v10029_v50 = vor.u32 %v11476_v37, %v10028_v6 }
 0x8d2   :  { %v9801_v3 = vor.u32 %v11385_v30, %v9798_v46  ;;  %v11453_v30 = vld [vmem:[#allocation10 + $0xa64] sm:$0xf] }
 0x8d3   :  { %v5268_v62 = vunpack.c.l.b16 %v5194_v25  ;;  %v5269_v44 = vunpack.c.h.b16 %v5194_v25 }
 0x8d4   :  { %6185 = vmatpush.bf16.msra.mxu0 %v10069_v4  ;;  %6199 = vmatpush.bf16.msra.mxu1 %v10133_v12  ;;  %v11401_v4 = vld [vmem:[#allocation10 + $0x8c4] sm:$0xf] }
 0x8d5   :  { %v9865_v25 = vor.u32 %v11401_v4, %v9862_v49  ;;  %v11469_v49 = vld [vmem:[#allocation10 + $0xae4] sm:$0xf] }
 0x8d7   :  { %v5150_v10 = vpop.f32.mrf.mxu0 }
 0x8d8   :  { %v5179_v51 = vpop.f32.mrf.mxu1  ;;  %6186 = vmatpush.bf16.msra.mxu0 %v10061_v38  ;;  %6200 = vmatpush.bf16.msra.mxu1 %v10125_v41  ;;  %v11474_v38 = vld [vmem:[#allocation10 + $0xb04] sm:$0xf0]  ;;  %v10084_v41 = vld [vmem:[#allocation10 + $0xb80] sm:$0xf] }
 0x8d9   :  { %v5195_v40 = vpack.c.bf16 %v5179_v51, %v5150_v10  ;;  %v11383_v10 = vld [vmem:[#allocation10 + $0x834] sm:$0xf]  ;;  %v10021_v51 = vor.u32 %v11474_v38, %v10020_v15  ;;  %v10085_v5 = vor.u32 %v11490_v52, %v10084_v41 }
 0x8da   :  { %v11451_v52 = vld [vmem:[#allocation10 + $0xa54] sm:$0xf] }
 0x8db   :  { %v5270_v16 = vunpack.c.l.b16 %v5195_v40  ;;  %v5271_v53 = vunpack.c.h.b16 %v5195_v40  ;;  %v11399_v40 = vld [vmem:[#allocation10 + $0x8b4] sm:$0xf] }
 0x8dc   :  { %6187 = vmatpush.bf16.msra.mxu0 %v10053_v57  ;;  %6201 = vmatpush.bf16.msra.mxu1 %v10117_v45  ;;  %v9790_v45 = vld [vmem:[#allocation10 + $0x838] sm:$0xf0]  ;;  %v9857_v22 = vor.u32 %v11399_v40, %v9854_v36  ;;  %v11463_v36 = vld [vmem:[#allocation10 + $0xab4] sm:$0xf] }
 0x8dd   :  { %v13544_v32 = vpack.c.b16 %v5270_v16, %v5268_v62  ;;  %v13546_v24 = vpack.c.b16 %v5271_v53, %v5269_v44  ;;  %v9793_v19 = vor.u32 %v11383_v10, %v9790_v45  ;;  %v11381_v62 = vld [vmem:[#allocation10 + $0x824] sm:$0xf]  ;;  %v9782_v53 = vld [vmem:[#allocation10 + $0x828] sm:$0xf0]  ;;  %v9918_v40 = vld [vmem:[#allocation10 + $0xa38] sm:$0xf0] }
 0x8de   :  { %v9785_v21 = vor.u32 %v11381_v62, %v9782_v53  ;;  %v11461_v62 = vld [vmem:[#allocation10 + $0xaa4] sm:$0xf]  ;;  %v9974_v53 = vld [vmem:[#allocation10 + $0xaa8] sm:$0xf0] }
 0x8df   :  { %5444 = vmatmul.bf16.vlgmr.msrb.gmra.mxu2 %v13544_v32  ;;  %5458 = vmatmul.bf16.vlgmr.msrb.gmra.mxu3 %v13546_v24  ;;  %v5153_v59 = vpop.f32.mrf.mxu0 }
 0x8e0   :  { %5690 = vmatpush.bf16.msrb.mxu2 %v9825_v61  ;;  %5704 = vmatpush.bf16.msrb.mxu3 %v9889_v8  ;;  %v5182_v35 = vpop.f32.mrf.mxu1  ;;  %v11397_v61 = vld [vmem:[#allocation10 + $0x8a4] sm:$0xf]  ;;  %v9846_v8 = vld [vmem:[#allocation10 + $0x8a8] sm:$0xf0] }
 0x8e1   :  { %6188 = vmatpush.bf16.msra.mxu0 %v10045_v0  ;;  %6202 = vmatpush.bf16.msra.mxu1 %v10109_v34  ;;  %v5196_v12 = vpack.c.bf16 %v5182_v35, %v5153_v59  ;;  %v9849_v58 = vor.u32 %v11397_v61, %v9846_v8  ;;  %v11379_v0 = vld [vmem:[#allocation10 + $0x814] sm:$0xf]  ;;  %v9774_v34 = vld [vmem:[#allocation10 + $0x818] sm:$0xf0]  ;;  %v11393_v59 = vld [vmem:[#allocation10 + $0x884] sm:$0xf]  ;;  %v9977_v8 = vor.u32 %v11461_v62, %v9974_v53 }
 0x8e2   :  { %v9777_v42 = vor.u32 %v11379_v0, %v9774_v34 }
 0x8e3   :  { %v5753_v33 = vunpack.c.l.b16 %v5196_v12  ;;  %v5754_v27 = vunpack.c.h.b16 %v5196_v12  ;;  %v9942_v12 = vld [vmem:[#allocation10 + $0xa68] sm:$0xf0] }
 0x8e4   :  { %5691 = vmatpush.bf16.msrb.mxu2 %v9817_v54  ;;  %5705 = vmatpush.bf16.msrb.mxu3 %v9881_v11  ;;  %v9830_v54 = vld [vmem:[#allocation10 + $0x888] sm:$0xf0]  ;;  %v11455_v11 = vld [vmem:[#allocation10 + $0xa74] sm:$0xf]  ;;  %v9945_v38 = vor.u32 %v11453_v30, %v9942_v12 }
 0x8e5   :  { %6189 = vmatpush.bf16.msra.mxu0 %v10037_v23  ;;  %6203 = vmatpush.bf16.msra.mxu1 %v10101_v13  ;;  %v9833_v6 = vor.u32 %v11393_v59, %v9830_v54  ;;  %v9953_v37 = vor.u32 %v11455_v11, %v9950_v9  ;;  %v11503_v59 = vld [vmem:[#allocation10 + $0xbf4] sm:$0xf]  ;;  %v10054_v12 = vld [vmem:[#allocation10 + $0xb48] sm:$0xf0] }
 0x8e7   :  { %v5155_v1 = vpop.f32.mrf.mxu0 }
 0x8e8   :  { %5692 = vmatpush.bf16.msrb.mxu2 %v9809_v28  ;;  %5706 = vmatpush.bf16.msrb.mxu3 %v9873_v39  ;;  %v5184_v20 = vpop.f32.mrf.mxu1  ;;  %v10017_v39 = vor.u32 %v11471_v18, %v10014_v29  ;;  %v11485_v29 = vld [vmem:[#allocation10 + $0xb64] sm:$0xf] }
 0x8e9   :  { %v5197_v57 = vpack.c.bf16 %v5184_v20, %v5155_v1  ;;  %6190 = vmatpush.bf16.msra.mxu0 %v10029_v50  ;;  %6204 = vmatpush.bf16.msra.mxu1 %v10093_v60  ;;  %v10006_v50 = vld [vmem:[#allocation10 + $0xae8] sm:$0xf0]  ;;  %v9934_v1 = vld [vmem:[#allocation10 + $0xa58] sm:$0xf0]  ;;  %v11467_v20 = vld [vmem:[#allocation10 + $0xad4] sm:$0xf] }
 0x8ea   :  { %v10009_v41 = vor.u32 %v11469_v49, %v10006_v50  ;;  %v11497_v49 = vld [vmem:[#allocation10 + $0xbc4] sm:$0xf]  ;;  %v10118_v50 = vld [vmem:[#allocation10 + $0xbc8] sm:$0xf0] }
 0x8eb   :  { %v5755_v2 = vunpack.c.l.b16 %v5197_v57  ;;  %v5756_v63 = vunpack.c.h.b16 %v5197_v57  ;;  %v9990_v57 = vld [vmem:[#allocation10 + $0xac8] sm:$0xf0] }
 0x8ec   :  { %5693 = vmatpush.bf16.msrb.mxu2 %v9801_v3  ;;  %5707 = vmatpush.bf16.msrb.mxu3 %v9865_v25  ;;  %v9998_v3 = vld [vmem:[#allocation10 + $0xad8] sm:$0xf0]  ;;  %v9937_v25 = vor.u32 %v11451_v52, %v9934_v1  ;;  %v11479_v52 = vld [vmem:[#allocation10 + $0xb34] sm:$0xf] }
 0x8ed   :  { %v13550_v44 = vpack.c.b16 %v5755_v2, %v5753_v33  ;;  %v13552_v16 = vpack.c.b16 %v5756_v63, %v5754_v27  ;;  %6191 = vmatpush.bf16.msra.mxu0 %v10021_v51  ;;  %6205 = vmatpush.bf16.msra.mxu1 %v10085_v5  ;;  %v10001_v10 = vor.u32 %v11467_v20, %v9998_v3  ;;  %v11449_v51 = vld [vmem:[#allocation10 + $0xa44] sm:$0xf]  ;;  %v9926_v33 = vld [vmem:[#allocation10 + $0xa48] sm:$0xf0]  ;;  %v9982_v5 = vld [vmem:[#allocation10 + $0xab8] sm:$0xf0] }
 0x8ee   :  { %v11465_v27 = vld [vmem:[#allocation10 + $0xac4] sm:$0xf]  ;;  %v9985_v63 = vor.u32 %v11463_v36, %v9982_v5  ;;  %v10046_v1 = vld [vmem:[#allocation10 + $0xb38] sm:$0xf0]  ;;  %v11495_v20 = vld [vmem:[#allocation10 + $0xbb4] sm:$0xf] }
 0x8ef   :  { %5472 = vmatmul.bf16.vlgmr.msra.gmra.mxu2 %v13544_v32  ;;  %5486 = vmatmul.bf16.vlgmr.msra.gmra.mxu3 %v13546_v24  ;;  %v5158_v26 = vpop.f32.mrf.mxu0  ;;  %v9841_v32 = vor.u32 %v11395_v14, %v9838_v56  ;;  %v9766_v24 = vld [vmem:[#allocation10 + $0x808] sm:$0xf0]  ;;  %v9993_v45 = vor.u32 %v11465_v27, %v9990_v57  ;;  %v11441_v14 = vld [vmem:[#allocation10 + $0xa04] sm:$0xf]  ;;  %v10110_v3 = vld [vmem:[#allocation10 + $0xbb8] sm:$0xf0] }
 0x8f0   :  { %5694 = vmatpush.bf16.msrb.mxu2 %v9793_v19  ;;  %5708 = vmatpush.bf16.msrb.mxu3 %v9857_v22  ;;  %v5187_v47 = vpop.f32.mrf.mxu1  ;;  %v9769_v13 = vor.u32 %v11377_v7, %v9766_v24  ;;  %v11445_v19 = vld [vmem:[#allocation10 + $0xa24] sm:$0xf]  ;;  %v9910_v22 = vld [vmem:[#allocation10 + $0xa28] sm:$0xf0]  ;;  %v11487_v7 = vld [vmem:[#allocation10 + $0xb74] sm:$0xf] }
 0x8f1   :  { %5929 = vmatmul.bf16.vlgmr.msrb.gmra.mxu0 %v13550_v44  ;;  %5943 = vmatmul.bf16.vlgmr.msrb.gmra.mxu1 %v13552_v16  ;;  %v5198_v35 = vpack.c.bf16 %v5187_v47, %v5158_v26  ;;  %v9913_v61 = vor.u32 %v11445_v19, %v9910_v22  ;;  %v11443_v26 = vld [vmem:[#allocation10 + $0xa14] sm:$0xf]  ;;  %v9902_v47 = vld [vmem:[#allocation10 + $0xa18] sm:$0xf0]  ;;  %v9894_v56 = vld [vmem:[#allocation10 + $0xa08] sm:$0xf0] }
 0x8f2   :  { %v9905_v0 = vor.u32 %v11443_v26, %v9902_v47  ;;  %v10078_v24 = vld [vmem:[#allocation10 + $0xb78] sm:$0xf0]  ;;  %v9897_v54 = vor.u32 %v11441_v14, %v9894_v56  ;;  %v11489_v19 = vld [vmem:[#allocation10 + $0xb84] sm:$0xf]  ;;  %v10086_v22 = vld [vmem:[#allocation10 + $0xb88] sm:$0xf0] }
 0x8f3   :  { %v6016_v31 = vunpack.c.l.b16 %v5198_v35  ;;  %v6017_v55 = vunpack.c.h.b16 %v5198_v35  ;;  %v10142_v35 = vld [vmem:[#allocation10 + $0xbf8] sm:$0xf0]  ;;  %v10081_v9 = vor.u32 %v11487_v7, %v10078_v24  ;;  %v10089_v53 = vor.u32 %v11489_v19, %v10086_v22  ;;  %v10160_v47 = vld [vmem:[%s14049_s10 + $0x170] sm:$0xff]  ;;  %v10154_v24 = vld [vmem:[%s14049_s10 + $0x140] sm:$0xff] }
 0x8f4   :  { %5695 = vmatpush.bf16.msrb.mxu2 %v9785_v21  ;;  %5709 = vmatpush.bf16.msrb.mxu3 %v9849_v58  ;;  %v11459_v21 = vld [vmem:[#allocation10 + $0xa94] sm:$0xf]  ;;  %v9966_v58 = vld [vmem:[#allocation10 + $0xa98] sm:$0xf0]  ;;  %v10145_v18 = vor.u32 %v11503_v59, %v10142_v35 }
 0x8f5   :  { %v9969_v34 = vor.u32 %v11459_v21, %v9966_v58  ;;  %v10159_v21 = vld [vmem:[%s14049_s10 + $0x168] sm:$0xff] }
 0x8f6   :  { %v10155_v7 = vld [vmem:[%s14049_s10 + $0x148] sm:$0xff] }
 0x8f7   :  { %v5160_v43 = vpop.f32.mrf.mxu0 }
 0x8f8   :  { %5696 = vmatpush.bf16.msrb.mxu2 %v9777_v42  ;;  %5710 = vmatpush.bf16.msrb.mxu3 %v9841_v32  ;;  %v5189_v23 = vpop.f32.mrf.mxu1  ;;  %v11457_v42 = vld [vmem:[#allocation10 + $0xa84] sm:$0xf]  ;;  %v9958_v32 = vld [vmem:[#allocation10 + $0xa88] sm:$0xf0] }
 0x8f9   :  { %v5199_v28 = vpack.c.bf16 %v5189_v23, %v5160_v43  ;;  %v9961_v11 = vor.u32 %v11457_v42, %v9958_v32  ;;  %v10070_v43 = vld [vmem:[#allocation10 + $0xb68] sm:$0xf0]  ;;  %v11501_v23 = vld [vmem:[#allocation10 + $0xbe4] sm:$0xf] }
 0x8fa   :  { %v10156_v32 = vld [vmem:[%s14049_s10 + $0x150] sm:$0xff] }
 0x8fb   :  { %v6018_v46 = vunpack.c.l.b16 %v5199_v28  ;;  %v6019_v4 = vunpack.c.h.b16 %v5199_v28  ;;  %v11499_v28 = vld [vmem:[#allocation10 + $0xbd4] sm:$0xf] }
 0x8fc   :  { %5697 = vmatpush.bf16.msrb.mxu2 %v9769_v13  ;;  %5711 = vmatpush.bf16.msrb.mxu3 %v9833_v6  ;;  %v10134_v13 = vld [vmem:[#allocation10 + $0xbe8] sm:$0xf0]  ;;  %v10073_v6 = vor.u32 %v11485_v29, %v10070_v43  ;;  %v10151_v43 = vld [vmem:[%s14049_s10 + $0x128] sm:$0xff] }
 0x8fd   :  { %v13558_v60 = vpack.c.b16 %v6018_v46, %v6016_v31  ;;  %v13560_v15 = vpack.c.b16 %v6019_v4, %v6017_v55  ;;  %v11483_v31 = vld [vmem:[#allocation10 + $0xb54] sm:$0xf]  ;;  %v10062_v55 = vld [vmem:[#allocation10 + $0xb58] sm:$0xf0]  ;;  %v11481_v4 = vld [vmem:[#allocation10 + $0xb44] sm:$0xf] }
 0x8fe   :  { %v10065_v30 = vor.u32 %v11483_v31, %v10062_v55  ;;  %v10149_v55 = vld [vmem:[%s14049_s10 + $0x118] sm:$0xff] }
 0x8ff   :  { %5698 = vmatmul.bf16.vlgmr.msrb.gmra.mxu2 %v13538_v17  ;;  %5712 = vmatmul.bf16.vlgmr.msrb.gmra.mxu3 %v13540_v48  ;;  %v9929_v17 = vor.u32 %v11449_v51, %v9926_v33  ;;  %v11447_v48 = vld [vmem:[#allocation10 + $0xa34] sm:$0xf]  ;;  %v11493_v51 = vld [vmem:[#allocation10 + $0xba4] sm:$0xf]  ;;  %v10102_v33 = vld [vmem:[#allocation10 + $0xba8] sm:$0xf0] }
 0x900   :  { %5949 = vmatpush.bf16.msra.mxu2 %v9953_v37  ;;  %5963 = vmatpush.bf16.msra.mxu3 %v10017_v39  ;;  %v9921_v2 = vor.u32 %v11447_v48, %v9918_v40  ;;  %v10137_v37 = vor.u32 %v11501_v23, %v10134_v13  ;;  %v10126_v39 = vld [vmem:[#allocation10 + $0xbd8] sm:$0xf0]  ;;  %v10105_v57 = vor.u32 %v11493_v51, %v10102_v33  ;;  %v11491_v48 = vld [vmem:[#allocation10 + $0xb94] sm:$0xf] }
 0x901   :  { %6192 = vmatmul.bf16.vlgmr.msra.gmra.mxu0 %v13558_v60  ;;  %6206 = vmatmul.bf16.vlgmr.msra.gmra.mxu1 %v13560_v15  ;;  %v10129_v46 = vor.u32 %v11499_v28, %v10126_v39  ;;  %v10094_v40 = vld [vmem:[#allocation10 + $0xb98] sm:$0xf0]  ;;  %v10150_v13 = vld [vmem:[%s14049_s10 + $0x120] sm:$0xff] }
 0x902   :  { %v10097_v5 = vor.u32 %v11491_v48, %v10094_v40 }
 0x904   :  { %5950 = vmatpush.bf16.msra.mxu2 %v9945_v38  ;;  %5964 = vmatpush.bf16.msra.mxu3 %v10009_v41  ;;  %v10057_v38 = vor.u32 %v11481_v4, %v10054_v12  ;;  %v10121_v41 = vor.u32 %v11497_v49, %v10118_v50  ;;  %v10147_v49 = vld [vmem:[%s14049_s10 + $0x108] sm:$0xff] }
 0x908   :  { %5951 = vmatpush.bf16.msra.mxu2 %v9937_v25  ;;  %5965 = vmatpush.bf16.msra.mxu3 %v10001_v10  ;;  %v11477_v25 = vld [vmem:[#allocation10 + $0xb24] sm:$0xf]  ;;  %v10038_v10 = vld [vmem:[#allocation10 + $0xb28] sm:$0xf0] }
 0x909   :  { %v10041_v27 = vor.u32 %v11477_v25, %v10038_v10 }
 0x90c   :  { %5952 = vmatpush.bf16.msra.mxu2 %v9929_v17  ;;  %5966 = vmatpush.bf16.msra.mxu3 %v9993_v45  ;;  %v11475_v17 = vld [vmem:[#allocation10 + $0xb14] sm:$0xf]  ;;  %v10030_v45 = vld [vmem:[#allocation10 + $0xb18] sm:$0xf0] }
 0x90d   :  { %v10033_v36 = vor.u32 %v11475_v17, %v10030_v45 }
 0x910   :  { %5953 = vmatpush.bf16.msra.mxu2 %v9921_v2  ;;  %5967 = vmatpush.bf16.msra.mxu3 %v9985_v63  ;;  %v11473_v2 = vld [vmem:[#allocation10 + $0xb04] sm:$0xf]  ;;  %v10022_v63 = vld [vmem:[#allocation10 + $0xb08] sm:$0xf0] }
 0x911   :  { %v10025_v62 = vor.u32 %v11473_v2, %v10022_v63 }
 0x914   :  { %5954 = vmatpush.bf16.msra.mxu2 %v9913_v61  ;;  %5968 = vmatpush.bf16.msra.mxu3 %v9977_v8  ;;  %v10161_v61 = vld [vmem:[%s14049_s10 + $0x178] sm:$0xff] }
 0x915   :  { %6311 = vmatpush.msrb.mxu0 %v10161_v61 }
 0x917   :  { %6312 = vmatpush.msrb.mxu0 %v10160_v47 }
 0x918   :  { %5955 = vmatpush.bf16.msra.mxu2 %v9905_v0  ;;  %5969 = vmatpush.bf16.msra.mxu3 %v9969_v34  ;;  %v10157_v0 = vld [vmem:[%s14049_s10 + $0x158] sm:$0xff] }
 0x919   :  { %6313 = vmatpush.msrb.mxu0 %v10159_v21 }
 0x91c   :  { %5956 = vmatpush.bf16.msra.mxu2 %v9897_v54  ;;  %5970 = vmatpush.bf16.msra.mxu3 %v9961_v11  ;;  %v10153_v54 = vld [vmem:[%s14049_s10 + $0x138] sm:$0xff]  ;;  %v10152_v11 = vld [vmem:[%s14049_s10 + $0x130] sm:$0xff] }
 0x91f   :  { %5957 = vmatmul.bf16.vlgmr.msra.gmra.mxu2 %v13550_v44  ;;  %5971 = vmatmul.bf16.vlgmr.msra.gmra.mxu3 %v13552_v16  ;;  %v10049_v44 = vor.u32 %v11479_v52, %v10046_v1  ;;  %v10113_v16 = vor.u32 %v11495_v20, %v10110_v3  ;;  %v10146_v1 = vld [vmem:[%s14049_s10 + $0x100] sm:$0xff] }
 0x920   :  { %6212 = vmatpush.bf16.msrb.mxu2 %v10081_v9  ;;  %6226 = vmatpush.bf16.msrb.mxu3 %v10145_v18 }
 0x924   :  { %6213 = vmatpush.bf16.msrb.mxu2 %v10073_v6  ;;  %6227 = vmatpush.bf16.msrb.mxu3 %v10137_v37 }
 0x928   :  { %6214 = vmatpush.bf16.msrb.mxu2 %v10065_v30  ;;  %6228 = vmatpush.bf16.msrb.mxu3 %v10129_v46  ;;  %v10148_v30 = vld [vmem:[%s14049_s10 + $0x110] sm:$0xff] }
 0x92c   :  { %6215 = vmatpush.bf16.msrb.mxu2 %v10057_v38  ;;  %6229 = vmatpush.bf16.msrb.mxu3 %v10121_v41 }
 0x930   :  { %6216 = vmatpush.bf16.msrb.mxu2 %v10049_v44  ;;  %6230 = vmatpush.bf16.msrb.mxu3 %v10113_v16 }
 0x934   :  { %6217 = vmatpush.bf16.msrb.mxu2 %v10041_v27  ;;  %6231 = vmatpush.bf16.msrb.mxu3 %v10105_v57  ;;  %v10177_v57 = vld [vmem:[%s14049_s10 + $0x1f8] sm:$0xff] }
 0x935   :  { %6331 = vmatpush.msrb.mxu1 %v10177_v57 }
 0x938   :  { %6218 = vmatpush.bf16.msrb.mxu2 %v10033_v36  ;;  %6232 = vmatpush.bf16.msrb.mxu3 %v10097_v5 }
 0x93c   :  { %6219 = vmatpush.bf16.msrb.mxu2 %v10025_v62  ;;  %6233 = vmatpush.bf16.msrb.mxu3 %v10089_v53 }
 0x93f   :  { %6220 = vmatmul.bf16.vlgmr.msrb.gmra.mxu2 %v13558_v60  ;;  %6234 = vmatmul.bf16.vlgmr.msrb.gmra.mxu3 %v13560_v15  ;;  %v10158_v60 = vld [vmem:[%s14049_s10 + $0x160] sm:$0xff] }
 0x940   :  { %6314 = vmatpush.msrb.mxu0 %v10158_v60 }
 0x942   :  { %6315 = vmatpush.msrb.mxu0 %v10157_v0 }
 0x944   :  { %6316 = vmatpush.msrb.mxu0 %v10156_v32 }
 0x946   :  { %6317 = vmatpush.msrb.mxu0 %v10155_v7  ;;  %v10172_v7 = vld [vmem:[%s14049_s10 + $0x1d0] sm:$0xff] }
 0x948   :  { %6318 = vmatpush.msrb.mxu0 %v10154_v24  ;;  %v10171_v24 = vld [vmem:[%s14049_s10 + $0x1c8] sm:$0xff] }
 0x94a   :  { %6319 = vmatpush.msrb.mxu0 %v10153_v54 }
 0x94c   :  { %v5671_v8 = vpop.f32.mrf.mxu0  ;;  %v5685_v26 = vpop.f32.mrf.mxu1  ;;  %6320 = vmatpush.msrb.mxu0 %v10152_v11  ;;  %v10169_v11 = vld [vmem:[%s14049_s10 + $0x1b8] sm:$0xff] }
 0x94e   :  { %6321 = vmatpush.msrb.mxu0 %v10151_v43  ;;  %v10166_v43 = vld [vmem:[%s14049_s10 + $0x1a0] sm:$0xff] }
 0x950   :  { %6322 = vmatpush.msrb.mxu0 %v10150_v13 }
 0x952   :  { %6323 = vmatpush.msrb.mxu0 %v10149_v55 }
 0x954   :  { %v5673_v15 = vpop.f32.mrf.mxu0  ;;  %v5687_v58 = vpop.f32.mrf.mxu1  ;;  %6324 = vmatpush.msrb.mxu0 %v10148_v30 }
 0x956   :  { %6325 = vmatpush.msrb.mxu0 %v10147_v49 }
 0x958   :  { %6326 = vmatpush.msrb.mxu0 %v10146_v1 }
 0x962   :  { %v5445_v56 = vpop.f32.mrf.mxu2  ;;  %v5459_v42 = vpop.f32.mrf.mxu3 }
 0x963   :  { %v5460_v29 = vadd.f32 %v5459_v42, %v5445_v56  ;;  %v10173_v56 = vld [vmem:[%s14049_s10 + $0x1d8] sm:$0xff] }
 0x965   :  { %v5672_v31 = vadd.f32 %v5671_v8, %v5460_v29 }
 0x967   :  { %v5686_v46 = vadd.f32 %v5685_v26, %v5672_v31  ;;  %v10165_v31 = vld [vmem:[%s14049_s10 + $0x198] sm:$0xff] }
 0x96a   :  { %v5447_v9 = vpop.f32.mrf.mxu2  ;;  %v5461_v18 = vpop.f32.mrf.mxu3 }
 0x96b   :  { %v5462_v23 = vadd.f32 %v5461_v18, %v5447_v9  ;;  %v10168_v9 = vld [vmem:[%s14049_s10 + $0x1b0] sm:$0xff]  ;;  %v10167_v18 = vld [vmem:[%s14049_s10 + $0x1a8] sm:$0xff] }
 0x96d   :  { %v5674_v28 = vadd.f32 %v5673_v15, %v5462_v23  ;;  %v10176_v15 = vld [vmem:[%s14049_s10 + $0x1f0] sm:$0xff] }
 0x96e   :  { %v5930_v34 = vpop.f32.mrf.mxu0  ;;  %v5944_v14 = vpop.f32.mrf.mxu1  ;;  %6332 = vmatpush.msrb.mxu1 %v10176_v15  ;;  %v6389_v15 = vld [vmem:[#allocation12 + $0xe8] sm:$0xff] }
 0x96f   :  { %v5945_v39 = vadd.f32 %v5944_v14, %v5930_v34  ;;  %v5688_v52 = vadd.f32 %v5687_v58, %v5674_v28  ;;  %v10175_v58 = vld [vmem:[%s14049_s10 + $0x1e8] sm:$0xff]  ;;  %v10174_v14 = vld [vmem:[%s14049_s10 + $0x1e0] sm:$0xff] }
 0x970   :  { %6333 = vmatpush.msrb.mxu1 %v10175_v58 }
 0x971   :  { %v5977_v50 = vadd.f32 %v5945_v39, %v5686_v46  ;;  %v10164_v39 = vld [vmem:[%s14049_s10 + $0x190] sm:$0xff] }
 0x972   :  { %v5473_v38 = vpop.f32.mrf.mxu2  ;;  %v5487_v41 = vpop.f32.mrf.mxu3  ;;  %6334 = vmatpush.msrb.mxu1 %v10174_v14 }
 0x973   :  { %v5488_v29 = vadd.f32 %v5487_v41, %v5473_v38  ;;  %v10162_v38 = vld [vmem:[%s14049_s10 + $0x180] sm:$0xff] }
 0x974   :  { %6335 = vmatpush.msrb.mxu1 %v10173_v56  ;;  %v6384_v56 = vld [vmem:[#allocation12 + $0xc0] sm:$0xff] }
 0x976   :  { %v5932_v59 = vpop.f32.mrf.mxu0  ;;  %v5946_v35 = vpop.f32.mrf.mxu1  ;;  %6336 = vmatpush.msrb.mxu1 %v10172_v7  ;;  %v6382_v7 = vld [vmem:[#allocation12 + $0xb0] sm:$0xff] }
 0x977   :  { %v5947_v4 = vadd.f32 %v5946_v35, %v5932_v59  ;;  %v10170_v59 = vld [vmem:[%s14049_s10 + $0x1c0] sm:$0xff] }
 0x978   :  { %6337 = vmatpush.msrb.mxu1 %v10171_v24  ;;  %v6383_v24 = vld [vmem:[#allocation12 + $0xb8] sm:$0xff] }
 0x979   :  { %v5979_v44 = vadd.f32 %v5947_v4, %v5688_v52 }
 0x97a   :  { %v5475_v48 = vpop.f32.mrf.mxu2  ;;  %v5489_v40 = vpop.f32.mrf.mxu3  ;;  %6338 = vmatpush.msrb.mxu1 %v10170_v59 }
 0x97c   :  { %6339 = vmatpush.msrb.mxu1 %v10169_v11  ;;  %v6378_v11 = vld [vmem:[#allocation12 + $0x90] sm:$0xff] }
 0x97e   :  { %v6193_v6 = vpop.f32.mrf.mxu0  ;;  %v6207_v37 = vpop.f32.mrf.mxu1  ;;  %6340 = vmatpush.msrb.mxu1 %v10168_v9  ;;  %v6379_v9 = vld [vmem:[#allocation12 + $0x98] sm:$0xff] }
 0x97f   :  { %v6208_v12 = vadd.f32 %v6207_v37, %v6193_v6  ;;  %v5490_v6 = vadd.f32 %v5489_v40, %v5475_v48 }
 0x980   :  { %6341 = vmatpush.msrb.mxu1 %v10167_v18  ;;  %v6376_v18 = vld [vmem:[#allocation12 + $0x80] sm:$0xff] }
 0x981   :  { %v13618_v16 = vadd.f32 %v6208_v12, %v5977_v50  ;;  %v10163_v12 = vld [vmem:[%s14049_s10 + $0x188] sm:$0xff] }
 0x982   :  { %v5699_v8 = vpop.f32.mrf.mxu2  ;;  %v5713_v26 = vpop.f32.mrf.mxu3  ;;  %6342 = vmatpush.msrb.mxu1 %v10166_v43 }
 0x983   :  { %v6258_v51 = vmul.f32 %v13618_v16, %v13618_v16  ;;  %v5700_v37 = vadd.f32 %v5699_v8, %v5488_v29  ;;  %v6377_v29 = vld [vmem:[#allocation12 + $0x88] sm:$0xff] }
 0x984   :  { %6343 = vmatpush.msrb.mxu1 %v10165_v31 }
 0x985   :  { %v5714_v30 = vadd.f32 %v5713_v26, %v5700_v37 }
 0x986   :  { %v6195_v20 = vpop.f32.mrf.mxu0  ;;  %v6209_v3 = vpop.f32.mrf.mxu1  ;;  %6344 = vmatpush.msrb.mxu1 %v10164_v39 }
 0x987   :  { %v6210_v25 = vadd.f32 %v6209_v3, %v6195_v20 }
 0x988   :  { %6345 = vmatpush.msrb.mxu1 %v10163_v12 }
 0x989   :  { %v13620_v10 = vadd.f32 %v6210_v25, %v5979_v44 }
 0x98a   :  { %v5701_v0 = vpop.f32.mrf.mxu2  ;;  %v5715_v34 = vpop.f32.mrf.mxu3  ;;  %6346 = vmatpush.msrb.mxu1 %v10162_v38  ;;  %v6442_v38 = vld [vmem:[#allocation13 + $0x2] sm:$0x3] }
 0x98b   :  { %v6244_v33 = vadd.f32 %v13620_v10, %v13618_v16  ;;  %v6260_v27 = vmul.f32 %v13620_v10, %v13620_v10  ;;  %v5702_v55 = vadd.f32 %v5701_v0, %v5490_v6  ;;  %v6386_v0 = vld [vmem:[#allocation12 + $0xd0] sm:$0xff] }
 0x98d   :  { %v6245_v17 = vrot.slane %v6244_v33, 4  ;;  %v6262_v45 = vadd.f32 %v6260_v27, %v6258_v51  ;;  %v5716_v49 = vadd.f32 %v5715_v34, %v5702_v55  ;;  %v6387_v34 = vld [vmem:[#allocation12 + $0xd8] sm:$0xff] }
 0x98f   :  { %v6246_v36 = vadd.f32 %v6245_v17, %v6244_v33  ;;  %v6263_v5 = vrot.slane %v6262_v45, 4 }
 0x991   :  { %v6247_v2 = vrot.slane %v6246_v36, 2  ;;  %v6264_v63 = vadd.f32 %v6263_v5, %v6262_v45 }
 0x993   :  { %v6248_v19 = vadd.f32 %v6247_v2, %v6246_v36  ;;  %v6265_v22 = vrot.slane %v6264_v63, 2 }
 0x995   :  { %v6249_v62 = vrot.slane %v6248_v19, 1  ;;  %v6266_v53 = vadd.f32 %v6265_v22, %v6264_v63 }
 0x997   :  { %v6267_v61 = vrot.slane %v6266_v53, 1  ;;  %v6250_v47 = vadd.f32 %v6249_v62, %v6248_v19 }
 0x999   :  { %v6268_v21 = vadd.f32 %v6267_v61, %v6266_v53 }
 0x99b   :  { %v6276_v60 = vsel %vm4875_vm2, %v6250_v47, %v6268_v21  ;;  %v6390_v47 = vld [vmem:[#allocation12 + $0xf0] sm:$0xff]  ;;  %v6391_v21 = vld [vmem:[#allocation12 + $0xf8] sm:$0xff] }
 0x99c   :  { %6327 = vmatmul.f32.vlgmr.msrb.gmra.mxu0 %v6276_v60  ;;  %v6388_v60 = vld [vmem:[#allocation12 + $0xe0] sm:$0xff]  ;;  %6403 = vmatpush.msra.mxu2 %v6390_v47 }
 0x99d   :  { %6423 = vmatpush.msra.mxu3 %v6391_v21 }
 0x99e   :  { %6404 = vmatpush.msra.mxu2 %v6388_v60 }
 0x99f   :  { %6424 = vmatpush.msra.mxu3 %v6389_v15 }
 0x9a0   :  { %6405 = vmatpush.msra.mxu2 %v6386_v0 }
 0x9a1   :  { %6425 = vmatpush.msra.mxu3 %v6387_v34 }
 0x9a2   :  { %v5958_v42 = vpop.f32.mrf.mxu2  ;;  %v5972_v32 = vpop.f32.mrf.mxu3  ;;  %6406 = vmatpush.msra.mxu2 %v6384_v56  ;;  %v11549_v56 = vld [vmem:[#allocation10 + $0xd54] sm:$0xf] }
 0x9a3   :  { %v5973_v28 = vadd.f32 %v5972_v32, %v5958_v42  ;;  %v6385_v42 = vld [vmem:[#allocation12 + $0xc8] sm:$0xff] }
 0x9a4   :  { %6426 = vmatpush.msra.mxu3 %v6385_v42  ;;  %6407 = vmatpush.msra.mxu2 %v6382_v7  ;;  %v10236_v42 = vld [vmem:[#allocation10 + $0xd58] sm:$0xf0] }
 0x9a5   :  { %v5978_v50 = vadd.f32 %v5973_v28, %v5714_v30 }
 0x9a6   :  { %6427 = vmatpush.msra.mxu3 %v6383_v24 }
 0x9aa   :  { %v5960_v35 = vpop.f32.mrf.mxu2  ;;  %v5974_v54 = vpop.f32.mrf.mxu3 }
 0x9ab   :  { %v5975_v46 = vadd.f32 %v5974_v54, %v5960_v35  ;;  %v6380_v35 = vld [vmem:[#allocation12 + $0xa0] sm:$0xff]  ;;  %v6381_v54 = vld [vmem:[#allocation12 + $0xa8] sm:$0xff] }
 0x9ac   :  { %6408 = vmatpush.msra.mxu2 %v6380_v35  ;;  %6428 = vmatpush.msra.mxu3 %v6381_v54  ;;  %v11568_v35 = vld [vmem:[#allocation10 + $0xde4] sm:$0xf0]  ;;  %v11565_v54 = vld [vmem:[#allocation10 + $0xdd4] sm:$0xf] }
 0x9ad   :  { %v5980_v1 = vadd.f32 %v5975_v46, %v5716_v49 }
 0x9ae   :  { %6409 = vmatpush.msra.mxu2 %v6378_v11  ;;  %6429 = vmatpush.msra.mxu3 %v6379_v9  ;;  %v10300_v11 = vld [vmem:[#allocation10 + $0xdd8] sm:$0xf0] }
 0x9b0   :  { %6410 = vmatpush.msra.mxu2 %v6376_v18  ;;  %6430 = vmatpush.msra.mxu3 %v6377_v29  ;;  %v11505_v18 = vld [vmem:[%s14045_s6] sm:$0xff]  ;;  %v10242_v29 = vld [vmem:[#allocation10 + $0xd60] sm:$0xf] }
 0x9c2   :  { %v6221_v23 = vpop.f32.mrf.mxu2  ;;  %v6235_v13 = vpop.f32.mrf.mxu3 }
 0x9c3   :  { %v6236_v4 = vadd.f32 %v6235_v13, %v6221_v23 }
 0x9c5   :  { %v13677_v20 = vadd.f32 %v6236_v4, %v5978_v50 }
 0x9c7   :  { %v6259_v25 = vmul.f32 %v13677_v20, %v13677_v20 }
 0x9ca   :  { %v6223_v41 = vpop.f32.mrf.mxu2  ;;  %v6237_v52 = vpop.f32.mrf.mxu3 }
 0x9cb   :  { %v6238_v3 = vadd.f32 %v6237_v52, %v6223_v41 }
 0x9cd   :  { %v13679_v44 = vadd.f32 %v6238_v3, %v5980_v1  ;;  %v11553_v1 = vld [vmem:[#allocation10 + $0xd74] sm:$0xf] }
 0x9cf   :  { %v6251_v51 = vadd.f32 %v13679_v44, %v13677_v20  ;;  %v6261_v33 = vmul.f32 %v13679_v44, %v13679_v44 }
 0x9d1   :  { %v6252_v27 = vrot.slane %v6251_v51, 4  ;;  %v6269_v57 = vadd.f32 %v6261_v33, %v6259_v25 }
 0x9d3   :  { %v6253_v17 = vadd.f32 %v6252_v27, %v6251_v51  ;;  %v6270_v45 = vrot.slane %v6269_v57, 4  ;;  %v10252_v27 = vld [vmem:[#allocation10 + $0xd78] sm:$0xf0] }
 0x9d5   :  { %v6254_v48 = vrot.slane %v6253_v17, 2  ;;  %v6271_v40 = vadd.f32 %v6270_v45, %v6269_v57  ;;  %v11569_v57 = vld [vmem:[#allocation10 + $0xdf4] sm:$0xf] }
 0x9d7   :  { %v6255_v36 = vadd.f32 %v6254_v48, %v6253_v17  ;;  %v6272_v5 = vrot.slane %v6271_v40, 2  ;;  %v10316_v17 = vld [vmem:[#allocation10 + $0xdf8] sm:$0xf0] }
 0x9d9   :  { %v6256_v2 = vrot.slane %v6255_v36, 1  ;;  %v6273_v63 = vadd.f32 %v6272_v5, %v6271_v40  ;;  %v10255_v40 = vor.u32 %v11553_v1, %v10252_v27  ;;  %v11551_v5 = vld [vmem:[#allocation10 + $0xd64] sm:$0xf]  ;;  %v10284_v1 = vld [vmem:[#allocation10 + $0xdb8] sm:$0xf0] }
 0x9da   :  { %v11564_v27 = vld [vmem:[#allocation10 + $0xdc4] sm:$0xf0] }
 0x9db   :  { %v6274_v19 = vrot.slane %v6273_v63, 1  ;;  %v6257_v22 = vadd.f32 %v6256_v2, %v6255_v36  ;;  %v10319_v36 = vor.u32 %v11569_v57, %v10316_v17  ;;  %6796 = vmatpush.bf16.msrb.mxu2 %v10255_v40  ;;  %v11548_v17 = vld [vmem:[#allocation10 + $0xd44] sm:$0xf0]  ;;  %v10212_v40 = vld [vmem:[#allocation10 + $0xd28] sm:$0xf0] }
 0x9dd   :  { %v6275_v62 = vadd.f32 %v6274_v19, %v6273_v63  ;;  %6809 = vmatpush.bf16.msrb.mxu3 %v10319_v36  ;;  %v11559_v36 = vld [vmem:[#allocation10 + $0xda4] sm:$0xf] }
 0x9df   :  { %v6277_v53 = vsel %vm4875_vm2, %v6257_v22, %v6275_v62  ;;  %v10250_v62 = vld [vmem:[#allocation10 + $0xd70] sm:$0xf] }
 0x9e0   :  { %6347 = vmatmul.f32.vlgmr.msrb.gmra.mxu1 %v6277_v53  ;;  %v10308_v53 = vld [vmem:[#allocation10 + $0xde8] sm:$0xf0] }
 0xa19   :  { %v6328_v61 = vpop.f32.mrf.mxu0 }
 0xa5d   :  { %v6348_v8 = vpop.f32.mrf.mxu1 }
 0xa5e   :  { %v6349_v26 = vadd.f32 %v6348_v8, %v6328_v61  ;;  %v10314_v61 = vld [vmem:[#allocation10 + $0xdf0] sm:$0xf] }
 0xa60   :  { %v6351_v58 = vmul.f32 %v6349_v26, %v6349_v26 }
 0xa62   :  { %v6353_v14 = vrot.slane %v6351_v58, 7 }
 0xa64   :  { %v6355_v32 = vsub.f32 %v6349_v26, %v6353_v14  ;;  %v10306_v14 = vld [vmem:[#allocation10 + $0xde0] sm:$0xf] }
 0xa66   :  { %v6356_v59 = vadd.f32 1e-05, %v6355_v32 }
 0xa68   :  { %11916 = vrsqrt.f32 %v6356_v59  ;;  %vm6363_vm1 = vweird.f32 %v6356_v59 }
 0xa6e   :  { %v11917_v43 = vpop.eup %11916 }
 0xa6f   :  { %v6358_v23 = vmul.f32 %v11917_v43, %v6356_v59  ;;  %vm6364_vm15 = vweird.f32 %v11917_v43 }
 0xa70   :  { %vm6365_vm3 = vmor %vm6363_vm1, %vm6364_vm15 }
 0xa71   :  { %v6359_v13 = vmul.f32 %v11917_v43, %v6358_v23  ;;  %v10239_v23 = vor.u32 %v11549_v56, %v10236_v42  ;;  %v11539_v56 = vld [vmem:[#allocation10 + $0xd04] sm:$0xf]  ;;  %v10196_v42 = vld [vmem:[#allocation10 + $0xd08] sm:$0xf0] }
 0xa73   :  { %v6360_v6 = vmul.f32 0.5, %v6359_v13  ;;  %v10303_v13 = vor.u32 %v11565_v54, %v10300_v11  ;;  %v11537_v54 = vld [vmem:[#allocation10 + $0xcf4] sm:$0xf]  ;;  %v10444_v11 = vld [vmem:[#allocation10 + $0xcf8] sm:$0xf0] }
 0xa75   :  { %v6361_v37 = vsub.f32 1.5, %v6360_v6  ;;  %v11547_v6 = vld [vmem:[#allocation10 + $0xd44] sm:$0xf] }
 0xa77   :  { %v6362_v31 = vmul.f32 %v11917_v43, %v6361_v37  ;;  %v10228_v37 = vld [vmem:[#allocation10 + $0xd48] sm:$0xf0] }
 0xa79   :  { %v6366_v55 = vsel %vm6365_vm3, %v11917_v43, %v6362_v31  ;;  %v11552_v43 = vld [vmem:[#allocation10 + $0xd64] sm:$0xf0]  ;;  %v11563_v31 = vld [vmem:[#allocation10 + $0xdc4] sm:$0xf]  ;;  %vm8461_vm3 = vcmask 1024  }
 0xa7a   :  { %v6368_v28 = vrot.slane %v6366_v55, 1  ;;  %v10307_v55 = vor.u32 %v11568_v35, %v10306_v14 }
 0xa7c   :  { %v6370_v39 = vmul.f32 %v6368_v28, %v6349_v26 }
 0xa7e   :  { %v6372_v30 = vrot.slane %v6370_v39, 7  ;;  %v10243_v39 = vor.u32 %v11552_v43, %v10242_v29  ;;  %v11558_v29 = vld [vmem:[#allocation10 + $0xd94] sm:$0xf0]  ;;  %v10199_v43 = vor.u32 %v11539_v56, %v10196_v42  ;;  %v10354_v56 = vld [vmem:[#allocation10 + $0xc40] sm:$0xf] }
 0xa7f   :  { %v11516_v42 = vld [vmem:[#allocation10 + $0xc44] sm:$0xf0] }
 0xa80   :  { %v6374_v46 = vsel %vm4875_vm2, %v6368_v28, %v6372_v30  ;;  %v10292_v28 = vld [vmem:[#allocation10 + $0xdc8] sm:$0xf0]  ;;  %v10234_v30 = vld [vmem:[#allocation10 + $0xd50] sm:$0xf] }
 0xa81   :  { %10178 = vmatmul.msk.f32.vlgmr.msra.gmra.mxu2 %vm1496_vm0, %v6374_v46  ;;  %10179 = vmatmul.msk.f32.vlgmr.msra.gmra.mxu3 %vm1496_vm0, %v6374_v46  ;;  %v10298_v46 = vld [vmem:[#allocation10 + $0xdd0] sm:$0xf] }
 0xb04   :  { %v6412_v4 = vpop.f32.mrf.mxu2  ;;  %v6432_v12 = vpop.f32.mrf.mxu3 }
 0xb05   :  { %6445 = vst [vmem:[#allocation1] sm:$0xff] %v6412_v4  ;;  %v6435_v49 = vperm.slane %v6412_v4, 0  ;;  %v6436_v50 = vperm.slane %v6432_v12, 0  ;;  %v11566_v4 = vld [vmem:[#allocation10 + $0xdd4] sm:$0xf0] }
 0xb06   :  { %6446 = vst [vmem:[#allocation1 + $0x9] sm:$0xff] %v6432_v12  ;;  %v10231_v12 = vor.u32 %v11547_v6, %v10228_v37 }
 0xb07   :  { %v6437_v3 = vmul.f32 %v6435_v49, %v13618_v16  ;;  %v6439_v25 = vmul.f32 %v6435_v49, %v13620_v10  ;;  %v6438_v51 = vmul.f32 %v6436_v50, %v13677_v20  ;;  %v6440_v33 = vmul.f32 %v6436_v50, %v13679_v44  ;;  %v10244_v16 = vld [vmem:[#allocation10 + $0xd68] sm:$0xf0]  ;;  %v11567_v10 = vld [vmem:[#allocation10 + $0xde4] sm:$0xf]  ;;  %v11554_v20 = vld [vmem:[#allocation10 + $0xd74] sm:$0xf0] }
 0xb08   :  { %v11570_v44 = vld [vmem:[#allocation10 + $0xdf4] sm:$0xf0]  ;;  %v10247_v8 = vor.u32 %v11551_v5, %v10244_v16  ;;  %v10311_v26 = vor.u32 %v11567_v10, %v10308_v53  ;;  %v10251_v59 = vor.u32 %v11554_v20, %v10250_v62  ;;  %v10295_v50 = vor.u32 %v11563_v31, %v10292_v28  ;;  %v10276_v5 = vld [vmem:[#allocation10 + $0xda8] sm:$0xf0]  ;;  %v11541_v20 = vld [vmem:[#allocation10 + $0xd14] sm:$0xf] }
 0xb09   :  { %v10315_v34 = vor.u32 %v11570_v44, %v10314_v61  ;;  %v11550_v49 = vld [vmem:[#allocation10 + $0xd54] sm:$0xf0]  ;;  %v10279_v53 = vor.u32 %v11559_v36, %v10276_v5  ;;  %v10204_v61 = vld [vmem:[#allocation10 + $0xd18] sm:$0xf0]  ;;  %v11557_v44 = vld [vmem:[#allocation10 + $0xd94] sm:$0xf]  ;;  %v10447_v31 = vor.u32 %v11537_v54, %v10444_v11 }
 0xb0a   :  { %6797 = vmatpush.bf16.msrb.mxu2 %v10247_v8  ;;  %6810 = vmatpush.bf16.msrb.mxu3 %v10311_v26  ;;  %v11562_v62 = vld [vmem:[#allocation10 + $0xdb4] sm:$0xf0]  ;;  %v10268_v8 = vld [vmem:[#allocation10 + $0xd98] sm:$0xf0]  ;;  %v10372_v28 = vld [vmem:[#allocation10 + $0xc68] sm:$0xf0] }
 0xb0b   :  { %v11546_v10 = vld [vmem:[#allocation10 + $0xd34] sm:$0xf0]  ;;  %v10271_v14 = vor.u32 %v11557_v44, %v10268_v8  ;;  %v10370_v5 = vld [vmem:[#allocation10 + $0xc60] sm:$0xf]  ;;  %v10426_v8 = vld [vmem:[#allocation10 + $0xcd0] sm:$0xf] }
 0xb0c   :  { %v11506_v26 = vld [vmem:[%s14045_s6 + $0x8] sm:$0xff] }
 0xb0d   :  { %v6448_v41 = vld [vmem:[#allocation1 + $0x1] ss:$9 sm:$0xff]  ;;  %v11530_v11 = vld [vmem:[#allocation10 + $0xcb4] sm:$0xf0] }
 0xb0e   :  { %v6450_v52 = vsub.f32 %v6442_v38, %v6448_v41  ;;  %6798 = vmatpush.bf16.msrb.mxu2 %v10239_v23  ;;  %6811 = vmatpush.bf16.msrb.mxu3 %v10303_v13  ;;  %v11545_v38 = vld [vmem:[#allocation10 + $0xd34] sm:$0xf]  ;;  %v10220_v41 = vld [vmem:[#allocation10 + $0xd38] sm:$0xf0]  ;;  %v10202_v23 = vld [vmem:[#allocation10 + $0xd10] sm:$0xf] }
 0xb0f   :  { %v10223_v57 = vor.u32 %v11545_v38, %v10220_v41  ;;  %v11542_v13 = vld [vmem:[#allocation10 + $0xd14] sm:$0xf0]  ;;  %v11556_v38 = vld [vmem:[#allocation10 + $0xd84] sm:$0xf0]  ;;  %v10378_v41 = vld [vmem:[#allocation10 + $0xc70] sm:$0xf] }
 0xb10   :  { %v6452_v45 = vperm.slane %v6450_v52, 0  ;;  %v6453_v48 = vperm.slane %v6450_v52, 1  ;;  %v11561_v52 = vld [vmem:[#allocation10 + $0xdb4] sm:$0xf] }
 0xb12   :  { %v6457_v2 = vadd.f32 %v6453_v48, %v6438_v51  ;;  %v6459_v63 = vadd.f32 %v6453_v48, %v6440_v33  ;;  %v6456_v19 = vadd.f32 %v6452_v45, %v6437_v3  ;;  %v6458_v22 = vadd.f32 %v6452_v45, %v6439_v25  ;;  %v10226_v51 = vld [vmem:[#allocation10 + $0xd40] sm:$0xf]  ;;  %6799 = vmatpush.bf16.msrb.mxu2 %v10231_v12  ;;  %v11543_v48 = vld [vmem:[#allocation10 + $0xd24] sm:$0xf] }
 0xb13   :  { %v10299_v3 = vor.u32 %v11566_v4, %v10298_v46  ;;  %v10235_v25 = vor.u32 %v11550_v49, %v10234_v30  ;;  %v10290_v33 = vld [vmem:[#allocation10 + $0xdc0] sm:$0xf]  ;;  %6812 = vmatpush.bf16.msrb.mxu3 %v10295_v50  ;;  %v10287_v45 = vor.u32 %v11561_v52, %v10284_v1  ;;  %v10215_v16 = vor.u32 %v11543_v48, %v10212_v40  ;;  %v11535_v46 = vld [vmem:[#allocation10 + $0xce4] sm:$0xf]  ;;  %v10436_v4 = vld [vmem:[#allocation10 + $0xce8] sm:$0xf0] }
 0xb14   :  { %vm6461_vm4 = vcmp.gt.f32.partialorder %v6457_v2, 0.0  ;;  %vm6463_vm5 = vcmp.gt.f32.partialorder %v6459_v63, 0.0  ;;  %v6465_v47 = vmul.f32 0.2, %v6457_v2  ;;  %v6467_v21 = vmul.f32 0.2, %v6459_v63 }
 0xb15   :  { %vm6460_vm6 = vcmp.gt.f32.partialorder %v6456_v19, 0.0  ;;  %vm6462_vm7 = vcmp.gt.f32.partialorder %v6458_v22, 0.0  ;;  %v6464_v60 = vmul.f32 0.2, %v6456_v19  ;;  %v6466_v15 = vmul.f32 0.2, %v6458_v22 }
 0xb16   :  { %v6469_v58 = vsel %vm6461_vm4, %v6457_v2, %v6465_v47  ;;  %v6471_v0 = vsel %vm6463_vm5, %v6459_v63, %v6467_v21  ;;  %v10291_v2 = vor.u32 %v11564_v27, %v10290_v33  ;;  %v10227_v63 = vor.u32 %v11548_v17, %v10226_v51  ;;  %6800 = vmatpush.bf16.msrb.mxu2 %v10223_v57  ;;  %v10210_v21 = vld [vmem:[#allocation10 + $0xd20] sm:$0xf]  ;;  %v11540_v49 = vld [vmem:[#allocation10 + $0xd04] sm:$0xf0]  ;;  %v10442_v52 = vld [vmem:[#allocation10 + $0xcf0] sm:$0xf] }
 0xb17   :  { %v6468_v32 = vsel %vm6460_vm6, %v6456_v19, %v6464_v60  ;;  %v6470_v7 = vsel %vm6462_vm7, %v6458_v22, %v6466_v15  ;;  %v6473_v24 = vpack.c.bf16 %v6471_v0, %v6469_v58  ;;  %v10218_v19 = vld [vmem:[#allocation10 + $0xd30] sm:$0xf]  ;;  %6813 = vmatpush.bf16.msrb.mxu3 %v10287_v45  ;;  %v11544_v15 = vld [vmem:[#allocation10 + $0xd24] sm:$0xf0]  ;;  %v10274_v58 = vld [vmem:[#allocation10 + $0xda0] sm:$0xf]  ;;  %v10203_v12 = vor.u32 %v11542_v13, %v10202_v23 }
 0xb18   :  { %v6472_v9 = vpack.c.bf16 %v6470_v7, %v6468_v32  ;;  %v10282_v22 = vld [vmem:[#allocation10 + $0xdb0] sm:$0xf]  ;;  %v10219_v60 = vor.u32 %v11546_v10, %v10218_v19  ;;  %v11560_v0 = vld [vmem:[#allocation10 + $0xda4] sm:$0xf0]  ;;  %v11555_v32 = vld [vmem:[#allocation10 + $0xd84] sm:$0xf]  ;;  %v10439_v51 = vor.u32 %v11535_v46, %v10436_v4 }
 0xb19   :  { %6521 = vmatpush.bf16.msra.mxu1 %v6473_v24  ;;  %v10283_v47 = vor.u32 %v11562_v62, %v10282_v22  ;;  %v10260_v7 = vld [vmem:[#allocation10 + $0xd88] sm:$0xf0]  ;;  %v11521_v24 = vld [vmem:[#allocation10 + $0xc74] sm:$0xf]  ;;  %v10275_v35 = vor.u32 %v11560_v0, %v10274_v58  ;;  %v10194_v30 = vld [vmem:[#allocation10 + $0xd00] sm:$0xf] }
 0xb1a   :  { %6502 = vmatpush.bf16.msra.mxu0 %v6472_v9  ;;  %6801 = vmatpush.bf16.msrb.mxu2 %v10215_v16  ;;  %v10211_v9 = vor.u32 %v11544_v15, %v10210_v21  ;;  %v10263_v6 = vor.u32 %v11555_v32, %v10260_v7  ;;  %v10258_v50 = vld [vmem:[#allocation10 + $0xd80] sm:$0xf]  ;;  %v11538_v1 = vld [vmem:[#allocation10 + $0xcf4] sm:$0xf0]  ;;  %v11517_v33 = vld [vmem:[#allocation10 + $0xc54] sm:$0xf]  ;;  %v10195_v48 = vor.u32 %v11540_v49, %v10194_v30 }
 0xb1b   :  { %6814 = vmatpush.bf16.msrb.mxu3 %v10279_v53  ;;  %v10364_v27 = vld [vmem:[#allocation10 + $0xc58] sm:$0xf0]  ;;  %v10259_v57 = vor.u32 %v11556_v38, %v10258_v50  ;;  %v11533_v17 = vld [vmem:[#allocation10 + $0xcd4] sm:$0xf]  ;;  %v10443_v40 = vor.u32 %v11538_v1, %v10442_v52  ;;  %v11520_v22 = vld [vmem:[#allocation10 + $0xc64] sm:$0xf0]  ;;  %v10355_v7 = vor.u32 %v11516_v42, %v10354_v56 }
 0xb1c   :  { %10190 = vmatmul.msk.bf16.vlgmr.msra.gmra.mxu1 %vm6488_vm8, %v11505_v18  ;;  %v10428_v45 = vld [vmem:[#allocation10 + $0xcd8] sm:$0xf0]  ;;  %v10367_v19 = vor.u32 %v11517_v33, %v10364_v27  ;;  %v11515_v16 = vld [vmem:[#allocation10 + $0xc44] sm:$0xf]  ;;  %v10356_v10 = vld [vmem:[#allocation10 + $0xc48] sm:$0xf0]  ;;  %v10371_v44 = vor.u32 %v11520_v22, %v10370_v5 }
 0xb1d   :  { %6783 = vmatpush.bf16.msrb.mxu1 %v10315_v34  ;;  %10188 = vmatmul.msk.bf16.vlgmr.msra.gmra.mxu0 %vm6488_vm8, %v11505_v18  ;;  %v10207_v34 = vor.u32 %v11541_v20, %v10204_v61  ;;  %v10266_v18 = vld [vmem:[#allocation10 + $0xd90] sm:$0xf]  ;;  %v10431_v62 = vor.u32 %v11533_v17, %v10428_v45  ;;  %v11531_v53 = vld [vmem:[#allocation10 + $0xcc4] sm:$0xf]  ;;  %v10420_v20 = vld [vmem:[#allocation10 + $0xcc8] sm:$0xf0] }
 0xb1e   :  { %6770 = vmatpush.bf16.msrb.mxu0 %v10251_v59  ;;  %v10380_v59 = vld [vmem:[#allocation10 + $0xc78] sm:$0xf0]  ;;  %v10362_v21 = vld [vmem:[#allocation10 + $0xc50] sm:$0xf]  ;;  %v10423_v15 = vor.u32 %v11531_v53, %v10420_v20  ;;  %v11529_v23 = vld [vmem:[#allocation10 + $0xcb4] sm:$0xf] }
 0xb1f   :  { %6802 = vmatpush.bf16.msrb.mxu2 %v10207_v34  ;;  %6815 = vmatpush.bf16.msrb.mxu3 %v10271_v14  ;;  %v10383_v37 = vor.u32 %v11521_v24, %v10380_v59  ;;  %v10418_v34 = vld [vmem:[#allocation10 + $0xcc0] sm:$0xf]  ;;  %v11532_v14 = vld [vmem:[#allocation10 + $0xcc4] sm:$0xf0]  ;;  %v10346_v24 = vld [vmem:[#allocation10 + $0xc30] sm:$0xf] }
 0xb20   :  { %v10419_v32 = vor.u32 %v11532_v14, %v10418_v34  ;;  %v11514_v59 = vld [vmem:[#allocation10 + $0xc34] sm:$0xf0]  ;;  %v10412_v13 = vld [vmem:[#allocation10 + $0xcb8] sm:$0xf0]  ;;  %v11511_v46 = vld [vmem:[#allocation10 + $0xc24] sm:$0xf] }
 0xb21   :  { %6784 = vmatpush.bf16.msrb.mxu1 %v10307_v55  ;;  %v11519_v55 = vld [vmem:[#allocation10 + $0xc64] sm:$0xf]  ;;  %v10347_v54 = vor.u32 %v11514_v59, %v10346_v24  ;;  %v10340_v4 = vld [vmem:[#allocation10 + $0xc28] sm:$0xf0]  ;;  %v11510_v52 = vld [vmem:[#allocation10 + $0xc14] sm:$0xf0] }
 0xb22   :  { %6771 = vmatpush.bf16.msrb.mxu0 %v10243_v39  ;;  %v10267_v39 = vor.u32 %v11558_v29, %v10266_v18  ;;  %v10348_v18 = vld [vmem:[#allocation10 + $0xc38] sm:$0xf0]  ;;  %v10343_v49 = vor.u32 %v11511_v46, %v10340_v4  ;;  %v10404_v50 = vld [vmem:[#allocation10 + $0xca8] sm:$0xf0]  ;;  %v10394_v1 = vld [vmem:[#allocation10 + $0xc90] sm:$0xf] }
 0xb23   :  { %6803 = vmatpush.bf16.msrb.mxu2 %v10199_v43  ;;  %6816 = vmatpush.bf16.msrb.mxu3 %v10263_v6  ;;  %v10338_v6 = vld [vmem:[#allocation10 + $0xc20] sm:$0xf]  ;;  %v10332_v33 = vld [vmem:[#allocation10 + $0xc18] sm:$0xf0]  ;;  %v11525_v17 = vld [vmem:[#allocation10 + $0xc94] sm:$0xf] }
 0xb24   :  { %v10396_v45 = vld [vmem:[#allocation10 + $0xc98] sm:$0xf0]  ;;  %v10386_v5 = vld [vmem:[#allocation10 + $0xc80] sm:$0xf]  ;;  %v11507_v22 = vld [vmem:[#allocation10 + $0xc04] sm:$0xf] }
 0xb25   :  { %6785 = vmatpush.bf16.msrb.mxu1 %v10299_v3  ;;  %v10375_v3 = vor.u32 %v11519_v55, %v10372_v28  ;;  %v10402_v55 = vld [vmem:[#allocation10 + $0xca0] sm:$0xf]  ;;  %v11528_v28 = vld [vmem:[#allocation10 + $0xca4] sm:$0xf0]  ;;  %v10388_v53 = vld [vmem:[#allocation10 + $0xc88] sm:$0xf0] }
 0xb26   :  { %6772 = vmatpush.bf16.msrb.mxu0 %v10235_v25  ;;  %v11522_v25 = vld [vmem:[#allocation10 + $0xc74] sm:$0xf0]  ;;  %v10403_v30 = vor.u32 %v11528_v28, %v10402_v55  ;;  %v10508_v56 = vld [vmem:[#allocation10 + $0xe78] sm:$0xf0]  ;;  %v11601_v42 = vld [vmem:[#allocation10 + $0xef4] sm:$0xf] }
 0xb27   :  { %7015 = vmatpush.bf16.msra.mxu2 %v10383_v37  ;;  %7028 = vmatpush.bf16.msra.mxu3 %v10447_v31  ;;  %v10379_v36 = vor.u32 %v11522_v25, %v10378_v41  ;;  %v10415_v37 = vor.u32 %v11529_v23, %v10412_v13  ;;  %v11512_v31 = vld [vmem:[#allocation10 + $0xc24] sm:$0xf0]  ;;  %v10330_v41 = vld [vmem:[#allocation10 + $0xc10] sm:$0xf]  ;;  %v11526_v25 = vld [vmem:[#allocation10 + $0xc94] sm:$0xf0] }
 0xb28   :  { %v10395_v27 = vor.u32 %v11526_v25, %v10394_v1  ;;  %v11583_v23 = vld [vmem:[#allocation10 + $0xe64] sm:$0xf]  ;;  %v10500_v13 = vld [vmem:[#allocation10 + $0xe68] sm:$0xf0]  ;;  %v10490_v28 = vld [vmem:[#allocation10 + $0xe50] sm:$0xf] }
 0xb29   :  { %6786 = vmatpush.bf16.msrb.mxu1 %v10291_v2  ;;  %v10434_v2 = vld [vmem:[#allocation10 + $0xce0] sm:$0xf]  ;;  %v10554_v4 = vld [vmem:[#allocation10 + $0xed0] sm:$0xf] }
 0xb2a   :  { %6773 = vmatpush.bf16.msrb.mxu0 %v10227_v63  ;;  %v11536_v63 = vld [vmem:[#allocation10 + $0xce4] sm:$0xf0]  ;;  %v10482_v25 = vld [vmem:[#allocation10 + $0xe40] sm:$0xf] }
 0xb2b   :  { %7016 = vmatpush.bf16.msra.mxu2 %v10375_v3  ;;  %7029 = vmatpush.bf16.msra.mxu3 %v10439_v51  ;;  %v10435_v61 = vor.u32 %v11536_v63, %v10434_v2  ;;  %v10331_v3 = vor.u32 %v11510_v52, %v10330_v41  ;;  %v11509_v51 = vld [vmem:[#allocation10 + $0xc14] sm:$0xf]  ;;  %v11524_v2 = vld [vmem:[#allocation10 + $0xc84] sm:$0xf0]  ;;  %v10556_v41 = vld [vmem:[#allocation10 + $0xed8] sm:$0xf0] }
 0xb2c   :  { %10191 = vmatmul.msk.bf16.gmra.mxu1 %vm6488_vm8, %v11506_v26 }
 0xb2d   :  { %6787 = vmatpush.bf16.msrb.mxu1 %v10283_v47  ;;  %10189 = vmatmul.msk.bf16.gmra.mxu0 %vm6488_vm8, %v11506_v26  ;;  %v11534_v26 = vld [vmem:[#allocation10 + $0xcd4] sm:$0xf0]  ;;  %v10359_v47 = vor.u32 %v11515_v16, %v10356_v10  ;;  %v11523_v16 = vld [vmem:[#allocation10 + $0xc84] sm:$0xf] }
 0xb2e   :  { %6774 = vmatpush.bf16.msrb.mxu0 %v10219_v60  ;;  %v11518_v60 = vld [vmem:[#allocation10 + $0xc54] sm:$0xf0]  ;;  %v10427_v58 = vor.u32 %v11534_v26, %v10426_v8  ;;  %v10391_v20 = vor.u32 %v11523_v16, %v10388_v53  ;;  %v10538_v53 = vld [vmem:[#allocation10 + $0xeb0] sm:$0xf] }
 0xb2f   :  { %7017 = vmatpush.bf16.msra.mxu2 %v10367_v19  ;;  %7030 = vmatpush.bf16.msra.mxu3 %v10431_v62  ;;  %v10363_v0 = vor.u32 %v11518_v60, %v10362_v21  ;;  %v10387_v19 = vor.u32 %v11524_v2, %v10386_v5  ;;  %v10324_v62 = vld [vmem:[#allocation10 + $0xc08] sm:$0xf0]  ;;  %v10506_v21 = vld [vmem:[#allocation10 + $0xe70] sm:$0xf]  ;;  %v11586_v60 = vld [vmem:[#allocation10 + $0xe74] sm:$0xf0] }
 0xb30   :  { %v10327_v10 = vor.u32 %v11507_v22, %v10324_v62  ;;  %v10507_v59 = vor.u32 %v11586_v60, %v10506_v21  ;;  %v10474_v22 = vld [vmem:[#allocation10 + $0xe30] sm:$0xf]  ;;  %v11578_v62 = vld [vmem:[#allocation10 + $0xe34] sm:$0xf0] }
 0xb31   :  { %6788 = vmatpush.bf16.msrb.mxu1 %v10275_v35  ;;  %v10410_v35 = vld [vmem:[#allocation10 + $0xcb0] sm:$0xf] }
 0xb32   :  { %6775 = vmatpush.bf16.msrb.mxu0 %v10211_v9  ;;  %v11513_v9 = vld [vmem:[#allocation10 + $0xc34] sm:$0xf]  ;;  %v10411_v29 = vor.u32 %v11530_v11, %v10410_v35  ;;  %v11584_v11 = vld [vmem:[#allocation10 + $0xe64] sm:$0xf0] }
 0xb33   :  { %7018 = vmatpush.bf16.msra.mxu2 %v10359_v47  ;;  %7031 = vmatpush.bf16.msra.mxu3 %v10423_v15  ;;  %v10351_v43 = vor.u32 %v11513_v9, %v10348_v18  ;;  %v10570_v15 = vld [vmem:[#allocation10 + $0xef0] sm:$0xf] }
 0xb35   :  { %6789 = vmatpush.bf16.msrb.mxu1 %v10267_v39  ;;  %v10339_v39 = vor.u32 %v11512_v31, %v10338_v6  ;;  %v11599_v6 = vld [vmem:[#allocation10 + $0xee4] sm:$0xf] }
 0xb36   :  { %6776 = vmatpush.bf16.msrb.mxu0 %v10203_v12  ;;  %v11527_v12 = vld [vmem:[#allocation10 + $0xca4] sm:$0xf] }
 0xb37   :  { %7019 = vmatpush.bf16.msra.mxu2 %v10351_v43  ;;  %7032 = vmatpush.bf16.msra.mxu3 %v10415_v37  ;;  %v10407_v38 = vor.u32 %v11527_v12, %v10404_v50  ;;  %v11600_v43 = vld [vmem:[#allocation10 + $0xee4] sm:$0xf0]  ;;  %v10564_v37 = vld [vmem:[#allocation10 + $0xee8] sm:$0xf0]  ;;  %v11598_v12 = vld [vmem:[#allocation10 + $0xed4] sm:$0xf0] }
 0xb38   :  { %v10567_v46 = vor.u32 %v11599_v6, %v10564_v37  ;;  %v10492_v50 = vld [vmem:[#allocation10 + $0xe58] sm:$0xf0] }
 0xb39   :  { %6790 = vmatpush.bf16.msrb.mxu1 %v10259_v57  ;;  %v10335_v57 = vor.u32 %v11509_v51, %v10332_v33  ;;  %v11580_v51 = vld [vmem:[#allocation10 + $0xe44] sm:$0xf0] }
 0xb3a   :  { %6777 = vmatpush.bf16.msrb.mxu0 %v10195_v48  ;;  %v10322_v48 = vld [vmem:[#allocation10 + $0xc00] sm:$0xf] }
 0xb3b   :  { %7020 = vmatpush.bf16.msra.mxu2 %v10343_v49  ;;  %7033 = vmatpush.bf16.msra.mxu3 %v10407_v38  ;;  %v11581_v49 = vld [vmem:[#allocation10 + $0xe54] sm:$0xf] }
 0xb3c   :  { %v11597_v38 = vld [vmem:[#allocation10 + $0xed4] sm:$0xf]  ;;  %v10495_v33 = vor.u32 %v11581_v49, %v10492_v50  ;;  %v10514_v49 = vld [vmem:[#allocation10 + $0xe80] sm:$0xf]  ;;  %v11588_v50 = vld [vmem:[#allocation10 + $0xe84] sm:$0xf0] }
 0xb3d   :  { %7002 = vmatpush.bf16.msra.mxu1 %v10443_v40  ;;  %v10399_v40 = vor.u32 %v11525_v17, %v10396_v45  ;;  %v11596_v17 = vld [vmem:[#allocation10 + $0xec4] sm:$0xf0]  ;;  %v11579_v45 = vld [vmem:[#allocation10 + $0xe44] sm:$0xf] }
 0xb3e   :  { %6989 = vmatpush.bf16.msra.mxu0 %v10379_v36  ;;  %v11508_v36 = vld [vmem:[#allocation10 + $0xc04] sm:$0xf0] }
 0xb3f   :  { %7021 = vmatpush.bf16.msra.mxu2 %v10335_v57  ;;  %v10323_v63 = vor.u32 %v11508_v36, %v10322_v48  ;;  %7034 = vmatpush.bf16.msra.mxu3 %v10399_v40  ;;  %v10546_v57 = vld [vmem:[#allocation10 + $0xec0] sm:$0xf]  ;;  %v10484_v48 = vld [vmem:[#allocation10 + $0xe48] sm:$0xf0]  ;;  %v11595_v40 = vld [vmem:[#allocation10 + $0xec4] sm:$0xf] }
 0xb40   :  { %v10548_v36 = vld [vmem:[#allocation10 + $0xec8] sm:$0xf0]  ;;  %v10487_v16 = vor.u32 %v11579_v45, %v10484_v48 }
 0xb41   :  { %7003 = vmatpush.bf16.msra.mxu1 %v10435_v61 }
 0xb42   :  { %6990 = vmatpush.bf16.msra.mxu0 %v10371_v44 }
 0xb43   :  { %7022 = vmatpush.bf16.msra.mxu2 %v10327_v10  ;;  %7035 = vmatpush.bf16.msra.mxu3 %v10391_v20  ;;  %v10551_v10 = vor.u32 %v11595_v40, %v10548_v36  ;;  %v11594_v20 = vld [vmem:[#allocation10 + $0xeb4] sm:$0xf0]  ;;  %v10515_v36 = vor.u32 %v11588_v50, %v10514_v49 }
 0xb45   :  { %7004 = vmatpush.bf16.msra.mxu1 %v10427_v58  ;;  %v11602_v58 = vld [vmem:[#allocation10 + $0xef4] sm:$0xf0] }
 0xb46   :  { %6991 = vmatpush.bf16.msra.mxu0 %v10363_v0  ;;  %v11585_v0 = vld [vmem:[#allocation10 + $0xe74] sm:$0xf]  ;;  %v10571_v35 = vor.u32 %v11602_v58, %v10570_v15  ;;  %v10539_v15 = vor.u32 %v11594_v20, %v10538_v53  ;;  %v10466_v58 = vld [vmem:[#allocation10 + $0xe20] sm:$0xf]  ;;  %v11616_v53 = vld [vmem:[#allocation10 + $0xf64] sm:$0xf0] }
 0xb47   :  { %v10511_v9 = vor.u32 %v11585_v0, %v10508_v56  ;;  %v11576_v0 = vld [vmem:[#allocation10 + $0xe24] sm:$0xf0]  ;;  %v10530_v56 = vld [vmem:[#allocation10 + $0xea0] sm:$0xf] }
 0xb49   :  { %7005 = vmatpush.bf16.msra.mxu1 %v10419_v32  ;;  %v10572_v32 = vld [vmem:[#allocation10 + $0xef8] sm:$0xf0] }
 0xb4a   :  { %6992 = vmatpush.bf16.msra.mxu0 %v10355_v7  ;;  %v10575_v18 = vor.u32 %v11601_v42, %v10572_v32  ;;  %v11592_v42 = vld [vmem:[#allocation10 + $0xea4] sm:$0xf0]  ;;  %v11575_v32 = vld [vmem:[#allocation10 + $0xe24] sm:$0xf] }
 0xb4d   :  { %7006 = vmatpush.bf16.msra.mxu1 %v10411_v29  ;;  %v10562_v29 = vld [vmem:[#allocation10 + $0xee0] sm:$0xf] }
 0xb4e   :  { %6993 = vmatpush.bf16.msra.mxu0 %v10347_v54  ;;  %v10498_v54 = vld [vmem:[#allocation10 + $0xe60] sm:$0xf]  ;;  %v10563_v55 = vor.u32 %v11600_v43, %v10562_v29  ;;  %v10522_v43 = vld [vmem:[#allocation10 + $0xe90] sm:$0xf] }
 0xb4f   :  { %v10499_v31 = vor.u32 %v11584_v11, %v10498_v54  ;;  %v10531_v54 = vor.u32 %v11592_v42, %v10530_v56  ;;  %v10458_v11 = vld [vmem:[#allocation10 + $0xe10] sm:$0xf]  ;;  %v11614_v56 = vld [vmem:[#allocation10 + $0xf54] sm:$0xf0] }
 0xb51   :  { %7007 = vmatpush.bf16.msra.mxu1 %v10403_v30  ;;  %v10503_v30 = vor.u32 %v11583_v23, %v10500_v13  ;;  %v11590_v23 = vld [vmem:[#allocation10 + $0xe94] sm:$0xf0]  ;;  %v11573_v13 = vld [vmem:[#allocation10 + $0xe14] sm:$0xf] }
 0xb52   :  { %6994 = vmatpush.bf16.msra.mxu0 %v10339_v39  ;;  %v11582_v39 = vld [vmem:[#allocation10 + $0xe54] sm:$0xf0] }
 0xb53   :  { %v10491_v1 = vor.u32 %v11582_v39, %v10490_v28  ;;  %v10524_v28 = vld [vmem:[#allocation10 + $0xe98] sm:$0xf0]  ;;  %v10450_v39 = vld [vmem:[#allocation10 + $0xe00] sm:$0xf] }
 0xb55   :  { %7008 = vmatpush.bf16.msra.mxu1 %v10395_v27  ;;  %v10559_v27 = vor.u32 %v11597_v38, %v10556_v41 }
 0xb56   :  { %6995 = vmatpush.bf16.msra.mxu0 %v10331_v3  ;;  %v10555_v3 = vor.u32 %v11598_v12, %v10554_v4  ;;  %v11572_v12 = vld [vmem:[#allocation10 + $0xe04] sm:$0xf0] }
 0xb57   :  { %v10451_v40 = vor.u32 %v11572_v12, %v10450_v39  ;;  %v10676_v39 = vld [vmem:[#allocation10 + $0xfc8] sm:$0xf0]  ;;  %v11610_v12 = vld [vmem:[#allocation10 + $0xf34] sm:$0xf0] }
 0xb59   :  { %7009 = vmatpush.bf16.msra.mxu1 %v10387_v19  ;;  %v10547_v19 = vor.u32 %v11596_v17, %v10546_v57  ;;  %v11634_v57 = vld [vmem:[#allocation10 + $0xff4] sm:$0xf0]  ;;  %v11617_v17 = vld [vmem:[#allocation10 + $0xf74] sm:$0xf] }
 0xb5a   :  { %6996 = vmatpush.bf16.msra.mxu0 %v10323_v63  ;;  %v10483_v63 = vor.u32 %v11580_v51, %v10482_v25  ;;  %v10516_v25 = vld [vmem:[#allocation10 + $0xe88] sm:$0xf0]  ;;  %v10634_v51 = vld [vmem:[#allocation10 + $0xf70] sm:$0xf] }
 0xb99   :  { %v6523_v61 = vpop.f32.mrf.mxu1 }
 0xb9a   :  { %v6504_v44 = vpop.f32.mrf.mxu0 }
 0xb9b   :  { %v6533_v52 = vpack.c.bf16 %v6523_v61, %v6504_v44  ;;  %v11577_v61 = vld [vmem:[#allocation10 + $0xe34] sm:$0xf]  ;;  %v10476_v44 = vld [vmem:[#allocation10 + $0xe38] sm:$0xf0] }
 0xb9d   :  { %v6823_v5 = vunpack.c.l.b16 %v6533_v52  ;;  %v6824_v2 = vunpack.c.h.b16 %v6533_v52  ;;  %v11571_v52 = vld [vmem:[#allocation10 + $0xe04] sm:$0xf] }
 0xb9f   :  { %v6825_v21 = vpack.c.b16 %v6823_v5, %v6823_v5  ;;  %v6826_v60 = vpack.c.b16 %v6824_v2, %v6824_v2  ;;  %v10636_v5 = vld [vmem:[#allocation10 + $0xf78] sm:$0xf0]  ;;  %v11633_v2 = vld [vmem:[#allocation10 + $0xff4] sm:$0xf] }
 0xba0   :  { %v10639_v20 = vor.u32 %v11617_v17, %v10636_v5  ;;  %v10596_v5 = vld [vmem:[#allocation10 + $0xf28] sm:$0xf0] }
 0xba1   :  { %v6525_v8 = vpop.f32.mrf.mxu1 }
 0xba2   :  { %v6506_v26 = vpop.f32.mrf.mxu0 }
 0xba3   :  { %v6534_v47 = vpack.c.bf16 %v6525_v8, %v6506_v26  ;;  %v11593_v8 = vld [vmem:[#allocation10 + $0xeb4] sm:$0xf]  ;;  %v10540_v26 = vld [vmem:[#allocation10 + $0xeb8] sm:$0xf0] }
 0xba5   :  { %v6604_v34 = vunpack.c.l.b16 %v6534_v47  ;;  %v6605_v14 = vunpack.c.h.b16 %v6534_v47  ;;  %v10475_v47 = vor.u32 %v11578_v62, %v10474_v22 }
 0xba7   :  { %v6606_v7 = vpack.c.b16 %v6604_v34, %v6604_v34  ;;  %v6607_v24 = vpack.c.b16 %v6605_v14, %v6605_v14  ;;  %v10479_v34 = vor.u32 %v11577_v61, %v10476_v44  ;;  %v10543_v14 = vor.u32 %v11593_v8, %v10540_v26  ;;  %v10690_v44 = vld [vmem:[#allocation10 + $0xfe0] sm:$0xf]  ;;  %v11632_v8 = vld [vmem:[#allocation10 + $0xfe4] sm:$0xf0]  ;;  %v11615_v26 = vld [vmem:[#allocation10 + $0xf64] sm:$0xf] }
 0xba9   :  { %6778 = vmatmul.bf16.vlgmr.msrb.gmra.mxu0 %v6606_v7  ;;  %6791 = vmatmul.bf16.vlgmr.msrb.gmra.mxu1 %v6607_v24  ;;  %v6528_v37 = vpop.f32.mrf.mxu1 }
 0xbaa   :  { %6804 = vmatmul.bf16.vlgmr.msrb.gmra.mxu2 %v6606_v7  ;;  %6817 = vmatmul.bf16.vlgmr.msrb.gmra.mxu3 %v6607_v24  ;;  %v10468_v7 = vld [vmem:[#allocation10 + $0xe28] sm:$0xf0]  ;;  %v11591_v24 = vld [vmem:[#allocation10 + $0xea4] sm:$0xf]  ;;  %v6509_v6 = vpop.f32.mrf.mxu0 }
 0xbab   :  { %7241 = vmatpush.bf16.msrb.mxu0 %v10507_v59  ;;  %7254 = vmatpush.bf16.msrb.mxu1 %v10571_v35  ;;  %v10532_v59 = vld [vmem:[#allocation10 + $0xea8] sm:$0xf0]  ;;  %v10467_v35 = vor.u32 %v11576_v0, %v10466_v58  ;;  %v6535_v4 = vpack.c.bf16 %v6528_v37, %v6509_v6  ;;  %v10674_v6 = vld [vmem:[#allocation10 + $0xfc0] sm:$0xf]  ;;  %v11628_v37 = vld [vmem:[#allocation10 + $0xfc4] sm:$0xf0] }
 0xbac   :  { %7267 = vmatpush.bf16.msrb.mxu2 %v10511_v9  ;;  %7280 = vmatpush.bf16.msrb.mxu3 %v10575_v18  ;;  %v11574_v9 = vld [vmem:[#allocation10 + $0xe14] sm:$0xf0]  ;;  %v10471_v18 = vor.u32 %v11575_v32, %v10468_v7  ;;  %v10535_v29 = vor.u32 %v11591_v24, %v10532_v59  ;;  %v10692_v58 = vld [vmem:[#allocation10 + $0xfe8] sm:$0xf0]  ;;  %v10682_v7 = vld [vmem:[#allocation10 + $0xfd0] sm:$0xf] }
 0xbad   :  { %v7075_v45 = vunpack.c.l.b16 %v6535_v4  ;;  %v7076_v48 = vunpack.c.h.b16 %v6535_v4  ;;  %v11630_v24 = vld [vmem:[#allocation10 + $0xfd4] sm:$0xf0]  ;;  %v11613_v59 = vld [vmem:[#allocation10 + $0xf54] sm:$0xf]  ;;  %v10602_v4 = vld [vmem:[#allocation10 + $0xf30] sm:$0xf] }
 0xbaf   :  { %7242 = vmatpush.bf16.msrb.mxu0 %v10499_v31  ;;  %7255 = vmatpush.bf16.msrb.mxu1 %v10563_v55  ;;  %v10460_v31 = vld [vmem:[#allocation10 + $0xe18] sm:$0xf0]  ;;  %v11589_v55 = vld [vmem:[#allocation10 + $0xe94] sm:$0xf] }
 0xbb0   :  { %7268 = vmatpush.bf16.msrb.mxu2 %v10503_v30  ;;  %7281 = vmatpush.bf16.msrb.mxu3 %v10567_v46  ;;  %v10459_v30 = vor.u32 %v11574_v9, %v10458_v11  ;;  %v10523_v46 = vor.u32 %v11590_v23, %v10522_v43  ;;  %v10463_v38 = vor.u32 %v11573_v13, %v10460_v31  ;;  %v10684_v11 = vld [vmem:[#allocation10 + $0xfd8] sm:$0xf0]  ;;  %v11612_v43 = vld [vmem:[#allocation10 + $0xf44] sm:$0xf0]  ;;  %v11611_v31 = vld [vmem:[#allocation10 + $0xf44] sm:$0xf] }
 0xbb1   :  { %v10527_v41 = vor.u32 %v11589_v55, %v10524_v28  ;;  %v10612_v55 = vld [vmem:[#allocation10 + $0xf48] sm:$0xf0]  ;;  %v11627_v28 = vld [vmem:[#allocation10 + $0xfc4] sm:$0xf] }
 0xbb2   :  { %v10615_v49 = vor.u32 %v11611_v31, %v10612_v55  ;;  %v10679_v50 = vor.u32 %v11627_v28, %v10676_v39 }
 0xbb3   :  { %7243 = vmatpush.bf16.msrb.mxu0 %v10491_v1  ;;  %7256 = vmatpush.bf16.msrb.mxu1 %v10555_v3  ;;  %v10452_v1 = vld [vmem:[#allocation10 + $0xe08] sm:$0xf0]  ;;  %v11587_v3 = vld [vmem:[#allocation10 + $0xe84] sm:$0xf] }
 0xbb4   :  { %7269 = vmatpush.bf16.msrb.mxu2 %v10495_v33  ;;  %7282 = vmatpush.bf16.msrb.mxu3 %v10559_v27  ;;  %v11618_v33 = vld [vmem:[#allocation10 + $0xf74] sm:$0xf0]  ;;  %v10698_v27 = vld [vmem:[#allocation10 + $0xff0] sm:$0xf]  ;;  %v10519_v22 = vor.u32 %v11587_v3, %v10516_v25  ;;  %v11625_v3 = vld [vmem:[#allocation10 + $0xfb4] sm:$0xf] }
 0xbb5   :  { %v10635_v62 = vor.u32 %v11618_v33, %v10634_v51  ;;  %v10668_v25 = vld [vmem:[#allocation10 + $0xfb8] sm:$0xf0]  ;;  %v10603_v51 = vor.u32 %v11610_v12, %v10602_v4  ;;  %v10718_v4 = vld [vmem:[%s14049_s10 + $0x270] sm:$0xff]  ;;  %v10735_v12 = vld [vmem:[%s14049_s10 + $0x2f8] sm:$0xff] }
 0xbb7   :  { %7244 = vmatpush.bf16.msrb.mxu0 %v10483_v63  ;;  %7257 = vmatpush.bf16.msrb.mxu1 %v10547_v19  ;;  %v10700_v63 = vld [vmem:[#allocation10 + $0xff8] sm:$0xf0]  ;;  %v10455_v19 = vor.u32 %v11571_v52, %v10452_v1  ;;  %v11609_v52 = vld [vmem:[#allocation10 + $0xf34] sm:$0xf] }
 0xbb8   :  { %7270 = vmatpush.bf16.msrb.mxu2 %v10487_v16  ;;  %7283 = vmatpush.bf16.msrb.mxu3 %v10551_v10  ;;  %v10699_v16 = vor.u32 %v11634_v57, %v10698_v27  ;;  %v10626_v10 = vld [vmem:[#allocation10 + $0xf60] sm:$0xf]  ;;  %v10703_v61 = vor.u32 %v11633_v2, %v10700_v63  ;;  %v10604_v1 = vld [vmem:[#allocation10 + $0xf38] sm:$0xf0]  ;;  %v11608_v57 = vld [vmem:[#allocation10 + $0xf24] sm:$0xf0] }
 0xbb9   :  { %6997 = vmatmul.bf16.vlgmr.msra.gmra.mxu0 %v6825_v21  ;;  %7010 = vmatmul.bf16.vlgmr.msra.gmra.mxu1 %v6826_v60  ;;  %v10627_v0 = vor.u32 %v11616_v53, %v10626_v10  ;;  %v10594_v27 = vld [vmem:[#allocation10 + $0xf20] sm:$0xf]  ;;  %v10607_v17 = vor.u32 %v11609_v52, %v10604_v1  ;;  %v11623_v2 = vld [vmem:[#allocation10 + $0xfa4] sm:$0xf]  ;;  %v10660_v63 = vld [vmem:[#allocation10 + $0xfa8] sm:$0xf0] }
 0xbba   :  { %7023 = vmatmul.bf16.vlgmr.msra.gmra.mxu2 %v6825_v21  ;;  %7036 = vmatmul.bf16.vlgmr.msra.gmra.mxu3 %v6826_v60  ;;  %v7078_v21 = vpack.c.b16 %v7076_v48, %v7076_v48  ;;  %v10628_v60 = vld [vmem:[#allocation10 + $0xf68] sm:$0xf0]  ;;  %v10658_v48 = vld [vmem:[#allocation10 + $0xfa0] sm:$0xf]  ;;  %v10663_v53 = vor.u32 %v11623_v2, %v10660_v63  ;;  %v10716_v1 = vld [vmem:[%s14049_s10 + $0x260] sm:$0xff] }
 0xbbb   :  { %7245 = vmatpush.bf16.msrb.mxu0 %v10475_v47  ;;  %7258 = vmatpush.bf16.msrb.mxu1 %v10539_v15  ;;  %v7077_v47 = vpack.c.b16 %v7075_v45, %v7075_v45  ;;  %v11631_v15 = vld [vmem:[#allocation10 + $0xfe4] sm:$0xf]  ;;  %v10631_v42 = vor.u32 %v11615_v26, %v10628_v60  ;;  %v10671_v45 = vor.u32 %v11625_v3, %v10668_v25  ;;  %v6530_v26 = vpop.f32.mrf.mxu1  ;;  %v10652_v60 = vld [vmem:[#allocation10 + $0xf98] sm:$0xf0]  ;;  %v10715_v25 = vld [vmem:[%s14049_s10 + $0x258] sm:$0xff] }
 0xbbc   :  { %7271 = vmatpush.bf16.msrb.mxu2 %v10479_v34  ;;  %7284 = vmatpush.bf16.msrb.mxu3 %v10543_v14  ;;  %v10691_v34 = vor.u32 %v11632_v8, %v10690_v44  ;;  %v10618_v14 = vld [vmem:[#allocation10 + $0xf50] sm:$0xf]  ;;  %v10695_v32 = vor.u32 %v11631_v15, %v10692_v58  ;;  %v11605_v44 = vld [vmem:[#allocation10 + $0xf14] sm:$0xf]  ;;  %v6511_v8 = vpop.f32.mrf.mxu0  ;;  %v10734_v3 = vld [vmem:[%s14049_s10 + $0x2f0] sm:$0xff] }
 0xbbd   :  { %v10619_v9 = vor.u32 %v11614_v56, %v10618_v14  ;;  %v6536_v14 = vpack.c.bf16 %v6530_v26, %v6511_v8  ;;  %v10713_v2 = vld [vmem:[%s14049_s10 + $0x248] sm:$0xff]  ;;  %v10732_v63 = vld [vmem:[%s14049_s10 + $0x2e0] sm:$0xff] }
 0xbbe   :  { %v10729_v8 = vld [vmem:[%s14049_s10 + $0x2c8] sm:$0xff] }
 0xbbf   :  { %7246 = vmatpush.bf16.msrb.mxu0 %v10467_v35  ;;  %7259 = vmatpush.bf16.msrb.mxu1 %v10531_v54  ;;  %v10620_v35 = vld [vmem:[#allocation10 + $0xf58] sm:$0xf0]  ;;  %v11629_v54 = vld [vmem:[#allocation10 + $0xfd4] sm:$0xf] }
 0xbc0   :  { %7272 = vmatpush.bf16.msrb.mxu2 %v10471_v18  ;;  %7285 = vmatpush.bf16.msrb.mxu3 %v10535_v29  ;;  %v10683_v18 = vor.u32 %v11630_v24, %v10682_v7  ;;  %v10610_v29 = vld [vmem:[#allocation10 + $0xf40] sm:$0xf]  ;;  %v10623_v23 = vor.u32 %v11613_v59, %v10620_v35  ;;  %v10687_v13 = vor.u32 %v11629_v54, %v10684_v11  ;;  %v11620_v7 = vld [vmem:[#allocation10 + $0xf84] sm:$0xf0]  ;;  %v11603_v24 = vld [vmem:[#allocation10 + $0xf04] sm:$0xf] }
 0xbc1   :  { %v10580_v59 = vld [vmem:[#allocation10 + $0xf08] sm:$0xf0]  ;;  %v11619_v35 = vld [vmem:[#allocation10 + $0xf84] sm:$0xf]  ;;  %v10709_v26 = vld [vmem:[%s14049_s10 + $0x228] sm:$0xff] }
 0xbc2   :  { %v10644_v54 = vld [vmem:[#allocation10 + $0xf88] sm:$0xf0] }
 0xbc3   :  { %7247 = vmatpush.bf16.msrb.mxu0 %v10459_v30  ;;  %7260 = vmatpush.bf16.msrb.mxu1 %v10523_v46  ;;  %v10611_v30 = vor.u32 %v11612_v43, %v10610_v29  ;;  %v10675_v46 = vor.u32 %v11628_v37, %v10674_v6  ;;  %v7330_v29 = vunpack.c.h.b16 %v6536_v14  ;;  %v10583_v43 = vor.u32 %v11603_v24, %v10580_v59  ;;  %v10704_v24 = vld [vmem:[%s14049_s10 + $0x200] sm:$0xff]  ;;  %v10723_v59 = vld [vmem:[%s14049_s10 + $0x298] sm:$0xff] }
 0xbc4   :  { %7273 = vmatpush.bf16.msrb.mxu2 %v10463_v38  ;;  %7286 = vmatpush.bf16.msrb.mxu3 %v10527_v41  ;;  %v10666_v38 = vld [vmem:[#allocation10 + $0xfb0] sm:$0xf]  ;;  %v11626_v41 = vld [vmem:[#allocation10 + $0xfb4] sm:$0xf0] }
 0xbc5   :  { %v10667_v33 = vor.u32 %v11626_v41, %v10666_v38  ;;  %v7332_v6 = vpack.c.b16 %v7330_v29, %v7330_v29 }
 0xbc7   :  { %7248 = vmatpush.bf16.msrb.mxu0 %v10451_v40  ;;  %7261 = vmatpush.bf16.msrb.mxu1 %v10515_v36  ;;  %v11624_v40 = vld [vmem:[#allocation10 + $0xfa4] sm:$0xf0]  ;;  %v11607_v36 = vld [vmem:[#allocation10 + $0xf24] sm:$0xf] }
 0xbc8   :  { %7274 = vmatpush.bf16.msrb.mxu2 %v10455_v19  ;;  %7287 = vmatpush.bf16.msrb.mxu3 %v10519_v22  ;;  %v10595_v19 = vor.u32 %v11608_v57, %v10594_v27  ;;  %v10659_v22 = vor.u32 %v11624_v40, %v10658_v48  ;;  %v10599_v10 = vor.u32 %v11607_v36, %v10596_v5 }
 0xbca   :  { %7249 = vmatmul.bf16.vlgmr.msrb.gmra.mxu0 %v7077_v47  ;;  %7262 = vmatmul.bf16.vlgmr.msrb.gmra.mxu1 %v7078_v21 }
 0xbcb   :  { %7495 = vmatpush.bf16.msra.mxu0 %v10635_v62  ;;  %7508 = vmatpush.bf16.msra.mxu1 %v10699_v16  ;;  %v10586_v62 = vld [vmem:[#allocation10 + $0xf10] sm:$0xf]  ;;  %v11606_v16 = vld [vmem:[#allocation10 + $0xf14] sm:$0xf0] }
 0xbcc   :  { %7521 = vmatpush.bf16.msra.mxu2 %v10639_v20  ;;  %7534 = vmatpush.bf16.msra.mxu3 %v10703_v61  ;;  %v10650_v20 = vld [vmem:[#allocation10 + $0xf90] sm:$0xf]  ;;  %v11622_v61 = vld [vmem:[#allocation10 + $0xf94] sm:$0xf0]  ;;  %v10587_v15 = vor.u32 %v11606_v16, %v10586_v62 }
 0xbcd   :  { %7275 = vmatmul.bf16.vlgmr.msrb.gmra.mxu2 %v7077_v47  ;;  %7288 = vmatmul.bf16.vlgmr.msrb.gmra.mxu3 %v7078_v21  ;;  %v10588_v47 = vld [vmem:[#allocation10 + $0xf18] sm:$0xf0]  ;;  %v11621_v21 = vld [vmem:[#allocation10 + $0xf94] sm:$0xf]  ;;  %v10651_v58 = vor.u32 %v11622_v61, %v10650_v20  ;;  %v10731_v16 = vld [vmem:[%s14049_s10 + $0x2d8] sm:$0xff] }
 0xbce   :  { %v10591_v56 = vor.u32 %v11605_v44, %v10588_v47  ;;  %v10711_v20 = vld [vmem:[%s14049_s10 + $0x238] sm:$0xff]  ;;  %v10730_v61 = vld [vmem:[%s14049_s10 + $0x2d0] sm:$0xff]  ;;  %v10728_v47 = vld [vmem:[%s14049_s10 + $0x2c0] sm:$0xff] }
 0xbcf   :  { %7496 = vmatpush.bf16.msra.mxu0 %v10627_v0  ;;  %7509 = vmatpush.bf16.msra.mxu1 %v10691_v34  ;;  %v10578_v0 = vld [vmem:[#allocation10 + $0xf00] sm:$0xf]  ;;  %v11604_v34 = vld [vmem:[#allocation10 + $0xf04] sm:$0xf0] }
 0xbd0   :  { %7522 = vmatpush.bf16.msra.mxu2 %v10631_v42  ;;  %7535 = vmatpush.bf16.msra.mxu3 %v10695_v32  ;;  %v10655_v42 = vor.u32 %v11621_v21, %v10652_v60  ;;  %v10642_v32 = vld [vmem:[#allocation10 + $0xf80] sm:$0xf]  ;;  %v10579_v11 = vor.u32 %v11604_v34, %v10578_v0  ;;  %v10707_v0 = vld [vmem:[%s14049_s10 + $0x218] sm:$0xff] }
 0xbd1   :  { %v10710_v44 = vld [vmem:[%s14049_s10 + $0x230] sm:$0xff] }
 0xbd2   :  { %v10726_v34 = vld [vmem:[%s14049_s10 + $0x2b0] sm:$0xff] }
 0xbd3   :  { %7497 = vmatpush.bf16.msra.mxu0 %v10619_v9  ;;  %7510 = vmatpush.bf16.msra.mxu1 %v10683_v18  ;;  %v10643_v9 = vor.u32 %v11620_v7, %v10642_v32  ;;  %v7329_v18 = vunpack.c.l.b16 %v6536_v14  ;;  %v10706_v14 = vld [vmem:[%s14049_s10 + $0x210] sm:$0xff]  ;;  %v10724_v32 = vld [vmem:[%s14049_s10 + $0x2a0] sm:$0xff] }
 0xbd4   :  { %7523 = vmatpush.bf16.msra.mxu2 %v10623_v23  ;;  %7536 = vmatpush.bf16.msra.mxu3 %v10687_v13  ;;  %v10647_v23 = vor.u32 %v11619_v35, %v10644_v54  ;;  %v10722_v54 = vld [vmem:[%s14049_s10 + $0x290] sm:$0xff] }
 0xbd5   :  { %v7331_v13 = vpack.c.b16 %v7329_v18, %v7329_v18 }
 0xbd7   :  { %7498 = vmatpush.bf16.msra.mxu0 %v10611_v30  ;;  %7511 = vmatpush.bf16.msra.mxu1 %v10675_v46  ;;  %v10719_v46 = vld [vmem:[%s14049_s10 + $0x278] sm:$0xff] }
 0xbd8   :  { %7524 = vmatpush.bf16.msra.mxu2 %v10615_v49  ;;  %7537 = vmatpush.bf16.msra.mxu3 %v10679_v50  ;;  %v10717_v49 = vld [vmem:[%s14049_s10 + $0x268] sm:$0xff] }
 0xbdb   :  { %7499 = vmatpush.bf16.msra.mxu0 %v10603_v51  ;;  %7512 = vmatpush.bf16.msra.mxu1 %v10667_v33  ;;  %v10733_v51 = vld [vmem:[%s14049_s10 + $0x2e8] sm:$0xff]  ;;  %v10714_v33 = vld [vmem:[%s14049_s10 + $0x250] sm:$0xff] }
 0xbdc   :  { %7525 = vmatpush.bf16.msra.mxu2 %v10607_v17  ;;  %7538 = vmatpush.bf16.msra.mxu3 %v10671_v45 }
 0xbdf   :  { %7500 = vmatpush.bf16.msra.mxu0 %v10595_v19  ;;  %7513 = vmatpush.bf16.msra.mxu1 %v10659_v22  ;;  %v10712_v19 = vld [vmem:[%s14049_s10 + $0x240] sm:$0xff] }
 0xbe0   :  { %7526 = vmatpush.bf16.msra.mxu2 %v10599_v10  ;;  %7539 = vmatpush.bf16.msra.mxu3 %v10663_v53 }
 0xbe3   :  { %7501 = vmatpush.bf16.msra.mxu0 %v10587_v15  ;;  %7514 = vmatpush.bf16.msra.mxu1 %v10651_v58  ;;  %v10708_v15 = vld [vmem:[%s14049_s10 + $0x220] sm:$0xff]  ;;  %v10727_v58 = vld [vmem:[%s14049_s10 + $0x2b8] sm:$0xff] }
 0xbe4   :  { %7527 = vmatpush.bf16.msra.mxu2 %v10591_v56  ;;  %7540 = vmatpush.bf16.msra.mxu3 %v10655_v42  ;;  %v10725_v56 = vld [vmem:[%s14049_s10 + $0x2a8] sm:$0xff] }
 0xbe5   :  { %v10705_v42 = vld [vmem:[%s14049_s10 + $0x208] sm:$0xff] }
 0xbe7   :  { %7502 = vmatpush.bf16.msra.mxu0 %v10579_v11  ;;  %7515 = vmatpush.bf16.msra.mxu1 %v10643_v9  ;;  %v10721_v9 = vld [vmem:[%s14049_s10 + $0x288] sm:$0xff] }
 0xbe8   :  { %7528 = vmatpush.bf16.msra.mxu2 %v10583_v43  ;;  %7541 = vmatpush.bf16.msra.mxu3 %v10647_v23 }
 0xbea   :  { %7503 = vmatmul.bf16.vlgmr.msra.gmra.mxu0 %v7331_v13  ;;  %7516 = vmatmul.bf16.vlgmr.msra.gmra.mxu1 %v7332_v6 }
 0xbeb   :  { %7529 = vmatmul.bf16.vlgmr.msra.gmra.mxu2 %v7331_v13  ;;  %7542 = vmatmul.bf16.vlgmr.msra.gmra.mxu3 %v7332_v6  ;;  %v10720_v13 = vld [vmem:[%s14049_s10 + $0x280] sm:$0xff] }
 0xbec   :  { %7610 = vmatpush.msrb.mxu0 %v10719_v46  ;;  %7630 = vmatpush.msrb.mxu1 %v10735_v12 }
 0xbee   :  { %7611 = vmatpush.msrb.mxu0 %v10718_v4  ;;  %7631 = vmatpush.msrb.mxu1 %v10734_v3 }
 0xbf0   :  { %7612 = vmatpush.msrb.mxu0 %v10717_v49  ;;  %7632 = vmatpush.msrb.mxu1 %v10733_v51 }
 0xbf2   :  { %7613 = vmatpush.msrb.mxu0 %v10716_v1  ;;  %7633 = vmatpush.msrb.mxu1 %v10732_v63 }
 0xbf4   :  { %7614 = vmatpush.msrb.mxu0 %v10715_v25  ;;  %7634 = vmatpush.msrb.mxu1 %v10731_v16 }
 0xbf6   :  { %7615 = vmatpush.msrb.mxu0 %v10714_v33  ;;  %7635 = vmatpush.msrb.mxu1 %v10730_v61 }
 0xbf8   :  { %7616 = vmatpush.msrb.mxu0 %v10713_v2  ;;  %7636 = vmatpush.msrb.mxu1 %v10729_v8 }
 0xbfa   :  { %7617 = vmatpush.msrb.mxu0 %v10712_v19  ;;  %7637 = vmatpush.msrb.mxu1 %v10728_v47 }
 0xbfc   :  { %7618 = vmatpush.msrb.mxu0 %v10711_v20  ;;  %7638 = vmatpush.msrb.mxu1 %v10727_v58 }
 0xbfe   :  { %7619 = vmatpush.msrb.mxu0 %v10710_v44  ;;  %7639 = vmatpush.msrb.mxu1 %v10726_v34  ;;  %v7690_v34 = vld [vmem:[#allocation12 + $0x178] sm:$0xff] }
 0xbff   :  { %7722 = vmatpush.msrb.mxu3 %v7690_v34  ;;  %v11666_v34 = vld [vmem:[%s14048_s9 + $0xf8] sm:$0xff] }
 0xc00   :  { %7620 = vmatpush.msrb.mxu0 %v10709_v26  ;;  %7640 = vmatpush.msrb.mxu1 %v10725_v56  ;;  %v7688_v56 = vld [vmem:[#allocation12 + $0x168] sm:$0xff] }
 0xc01   :  { %7723 = vmatpush.msrb.mxu3 %v7688_v56  ;;  %v11643_v56 = vld [vmem:[%s14048_s9 + $0x40] sm:$0xff] }
 0xc02   :  { %7621 = vmatpush.msrb.mxu0 %v10708_v15  ;;  %7641 = vmatpush.msrb.mxu1 %v10724_v32  ;;  %v7685_v32 = vld [vmem:[#allocation12 + $0x150] sm:$0xff] }
 0xc04   :  { %7622 = vmatpush.msrb.mxu0 %v10707_v0  ;;  %7642 = vmatpush.msrb.mxu1 %v10723_v59  ;;  %v7689_v0 = vld [vmem:[#allocation12 + $0x170] sm:$0xff]  ;;  %v7683_v59 = vld [vmem:[#allocation12 + $0x140] sm:$0xff] }
 0xc05   :  { %7702 = vmatpush.msrb.mxu2 %v7689_v0  ;;  %v11658_v0 = vld [vmem:[%s14048_s9 + $0xb8] sm:$0xff] }
 0xc06   :  { %7623 = vmatpush.msrb.mxu0 %v10706_v14  ;;  %7643 = vmatpush.msrb.mxu1 %v10722_v54  ;;  %v7687_v14 = vld [vmem:[#allocation12 + $0x160] sm:$0xff] }
 0xc07   :  { %7703 = vmatpush.msrb.mxu2 %v7687_v14  ;;  %v11635_v14 = vld [vmem:[%s14048_s9] sm:$0xff] }
 0xc08   :  { %7624 = vmatpush.msrb.mxu0 %v10705_v42  ;;  %7644 = vmatpush.msrb.mxu1 %v10721_v9  ;;  %v7682_v9 = vld [vmem:[#allocation12 + $0x138] sm:$0xff] }
 0xc09   :  { %7704 = vmatpush.msrb.mxu2 %v7685_v32 }
 0xc0a   :  { %7625 = vmatpush.msrb.mxu0 %v10704_v24  ;;  %7645 = vmatpush.msrb.mxu1 %v10720_v13  ;;  %v7678_v13 = vld [vmem:[#allocation12 + $0x118] sm:$0xff] }
 0xc0b   :  { %7705 = vmatpush.msrb.mxu2 %v7683_v59  ;;  %v11698_v59 = vld [vmem:[%s14048_s9 + $0x1f8] sm:$0xff] }
 0xc26   :  { %v13705_v37 = vpop.f32.mrf.mxu0  ;;  %v13707_v31 = vpop.f32.mrf.mxu1 }
 0xc27   :  { %v6793_v7 = vadd.f32 %v13707_v31, %v13705_v37 }
 0xc2d   :  { %v13709_v55 = vpop.f32.mrf.mxu2  ;;  %v13711_v28 = vpop.f32.mrf.mxu3 }
 0xc2e   :  { %v6781_v39 = vpop.f32.mrf.mxu0  ;;  %v6794_v30 = vpop.f32.mrf.mxu1  ;;  %v6819_v29 = vadd.f32 %v13711_v28, %v13709_v55 }
 0xc35   :  { %v6807_v50 = vpop.f32.mrf.mxu2  ;;  %v6820_v38 = vpop.f32.mrf.mxu3 }
 0xc36   :  { %v13725_v41 = vpop.f32.mrf.mxu0  ;;  %v13727_v52 = vpop.f32.mrf.mxu1 }
 0xc37   :  { %v6999_v35 = vadd.f32 %v13725_v41, %v6793_v7  ;;  %v7686_v7 = vld [vmem:[#allocation12 + $0x158] sm:$0xff] }
 0xc38   :  { %7724 = vmatpush.msrb.mxu3 %v7686_v7  ;;  %v7763_v7 = vld [vmem:[#allocation9] sm:$0xf] }
 0xc39   :  { %v7012_v18 = vadd.f32 %v13727_v52, %v6999_v35  ;;  %v7684_v35 = vld [vmem:[#allocation12 + $0x148] sm:$0xff] }
 0xc3a   :  { %7725 = vmatpush.msrb.mxu3 %v7684_v35  ;;  %v11657_v35 = vld [vmem:[%s14048_s9 + $0xb0] sm:$0xff] }
 0xc3c   :  { %7726 = vmatpush.msrb.mxu3 %v7682_v9  ;;  %v11697_v9 = vld [vmem:[%s14048_s9 + $0x1f0] sm:$0xff] }
 0xc3d   :  { %v13744_v27 = vpop.f32.mrf.mxu2  ;;  %v13746_v57 = vpop.f32.mrf.mxu3 }
 0xc3e   :  { %v7000_v17 = vpop.f32.mrf.mxu0  ;;  %v7013_v45 = vpop.f32.mrf.mxu1  ;;  %v7025_v31 = vadd.f32 %v13744_v27, %v6819_v29  ;;  %v7679_v29 = vld [vmem:[#allocation12 + $0x120] sm:$0xff] }
 0xc40   :  { %v7038_v28 = vadd.f32 %v13746_v57, %v7025_v31 }
 0xc45   :  { %v7026_v48 = vpop.f32.mrf.mxu2  ;;  %v7039_v40 = vpop.f32.mrf.mxu3 }
 0xc47   :  { %v7250_v36 = vpop.f32.mrf.mxu0  ;;  %v7263_v5 = vpop.f32.mrf.mxu1 }
 0xc48   :  { %v7264_v11 = vadd.f32 %v7263_v5, %v7250_v36 }
 0xc4a   :  { %v7293_v6 = vadd.f32 %v7264_v11, %v7012_v18  ;;  %v7681_v11 = vld [vmem:[#allocation12 + $0x130] sm:$0xff] }
 0xc4b   :  { %7706 = vmatpush.msrb.mxu2 %v7681_v11  ;;  %v11689_v11 = vld [vmem:[%s14048_s9 + $0x1b0] sm:$0xff] }
 0xc4d   :  { %7707 = vmatpush.msrb.mxu2 %v7679_v29  ;;  %v11664_v29 = vld [vmem:[%s14048_s9 + $0xe8] sm:$0xff] }
 0xc4f   :  { %v7252_v10 = vpop.f32.mrf.mxu0  ;;  %v7265_v53 = vpop.f32.mrf.mxu1 }
 0xc50   :  { %v7276_v22 = vpop.f32.mrf.mxu2  ;;  %v7289_v62 = vpop.f32.mrf.mxu3 }
 0xc51   :  { %v7290_v30 = vadd.f32 %v7289_v62, %v7276_v22 }
 0xc53   :  { %v7294_v38 = vadd.f32 %v7290_v30, %v7038_v28 }
 0xc58   :  { %v7278_v21 = vpop.f32.mrf.mxu2  ;;  %v7291_v60 = vpop.f32.mrf.mxu3 }
 0xc67   :  { %v7504_v43 = vpop.f32.mrf.mxu0  ;;  %v7517_v23 = vpop.f32.mrf.mxu1 }
 0xc68   :  { %v7518_v37 = vadd.f32 %v7517_v23, %v7504_v43  ;;  %v7680_v43 = vld [vmem:[#allocation12 + $0x128] sm:$0xff]  ;;  %v7677_v23 = vld [vmem:[#allocation12 + $0x110] sm:$0xff] }
 0xc69   :  { %7727 = vmatpush.msrb.mxu3 %v7680_v43  ;;  %7708 = vmatpush.msrb.mxu2 %v7677_v23  ;;  %v11655_v43 = vld [vmem:[%s14048_s9 + $0xa0] sm:$0xff] }
 0xc6a   :  { %v13824_v39 = vadd.f32 %v7518_v37, %v7293_v6  ;;  %v7675_v6 = vld [vmem:[#allocation12 + $0x100] sm:$0xff]  ;;  %v7676_v37 = vld [vmem:[#allocation12 + $0x108] sm:$0xff]  ;;  %v11663_v23 = vld [vmem:[%s14048_s9 + $0xe0] sm:$0xff] }
 0xc6b   :  { %7728 = vmatpush.msrb.mxu3 %v7678_v13  ;;  %7709 = vmatpush.msrb.mxu2 %v7675_v6  ;;  %v11654_v13 = vld [vmem:[%s14048_s9 + $0x98] sm:$0xff] }
 0xc6c   :  { %v7549_v46 = vrot.slane %v13824_v39, 4  ;;  %v7561_v55 = vmul.f32 %v13824_v39, %v13824_v39  ;;  %v11662_v6 = vld [vmem:[%s14048_s9 + $0xd8] sm:$0xff] }
 0xc6d   :  { %7729 = vmatpush.msrb.mxu3 %v7676_v37  ;;  %v11653_v37 = vld [vmem:[%s14048_s9 + $0x90] sm:$0xff] }
 0xc6e   :  { %v7550_v4 = vadd.f32 %v7549_v46, %v13824_v39  ;;  %v7563_v12 = vrot.slane %v7561_v55, 4  ;;  %v7530_v49 = vpop.f32.mrf.mxu2  ;;  %v7543_v50 = vpop.f32.mrf.mxu3 }
 0xc6f   :  { %v7544_v41 = vadd.f32 %v7543_v50, %v7530_v49  ;;  %v7506_v52 = vpop.f32.mrf.mxu0  ;;  %v7519_v1 = vpop.f32.mrf.mxu1 }
 0xc70   :  { %v7551_v3 = vrot.slane %v7550_v4, 2  ;;  %v7564_v25 = vadd.f32 %v7563_v12, %v7561_v55  ;;  %v11642_v52 = vld [vmem:[%s14048_s9 + $0x38] sm:$0xff] }
 0xc71   :  { %v13831_v51 = vadd.f32 %v7544_v41, %v7294_v38  ;;  %v11650_v1 = vld [vmem:[%s14048_s9 + $0x78] sm:$0xff]  ;;  %8096 = vmatpush.bf16.msra.mxu0 %v11642_v52  ;;  %v11672_v52 = vld [vmem:[%s14048_s9 + $0x128] sm:$0xff] }
 0xc72   :  { %v7552_v33 = vadd.f32 %v7551_v3, %v7550_v4  ;;  %v7565_v27 = vrot.slane %v7564_v25, 2  ;;  %8109 = vmatpush.bf16.msra.mxu1 %v11650_v1  ;;  %v11641_v3 = vld [vmem:[%s14048_s9 + $0x30] sm:$0xff]  ;;  %v11680_v1 = vld [vmem:[%s14048_s9 + $0x168] sm:$0xff] }
 0xc73   :  { %v7555_v17 = vrot.slane %v13831_v51, 4  ;;  %v7562_v57 = vmul.f32 %v13831_v51, %v13831_v51 }
 0xc74   :  { %v7553_v45 = vrot.slane %v7552_v33, 1  ;;  %v7566_v48 = vadd.f32 %v7565_v27, %v7564_v25  ;;  %v11649_v25 = vld [vmem:[%s14048_s9 + $0x70] sm:$0xff]  ;;  %v11648_v27 = vld [vmem:[%s14048_s9 + $0x68] sm:$0xff] }
 0xc75   :  { %v7556_v40 = vadd.f32 %v7555_v17, %v13831_v51  ;;  %v7569_v36 = vrot.slane %v7562_v57, 4  ;;  %8097 = vmatpush.bf16.msra.mxu0 %v11641_v3  ;;  %v11687_v3 = vld [vmem:[%s14048_s9 + $0x1a0] sm:$0xff] }
 0xc76   :  { %v7532_v5 = vpop.f32.mrf.mxu2  ;;  %v7545_v2 = vpop.f32.mrf.mxu3  ;;  %v7567_v63 = vrot.slane %v7566_v48, 1  ;;  %v7554_v62 = vadd.f32 %v7553_v45, %v7552_v33  ;;  %8110 = vmatpush.bf16.msra.mxu1 %v11649_v25  ;;  %v11640_v33 = vld [vmem:[%s14048_s9 + $0x28] sm:$0xff]  ;;  %v11639_v45 = vld [vmem:[%s14048_s9 + $0x20] sm:$0xff] }
 0xc77   :  { %v7557_v19 = vrot.slane %v7556_v40, 2  ;;  %v7570_v22 = vadd.f32 %v7569_v36, %v7562_v57  ;;  %v11638_v36 = vld [vmem:[%s14048_s9 + $0x18] sm:$0xff]  ;;  %v11695_v25 = vld [vmem:[%s14048_s9 + $0x1e0] sm:$0xff] }
 0xc78   :  { %v7568_v16 = vadd.f32 %v7567_v63, %v7566_v48  ;;  %v11647_v48 = vld [vmem:[%s14048_s9 + $0x60] sm:$0xff]  ;;  %v11646_v5 = vld [vmem:[%s14048_s9 + $0x58] sm:$0xff] }
 0xc79   :  { %v7558_v10 = vadd.f32 %v7557_v19, %v7556_v40  ;;  %v7571_v53 = vrot.slane %v7570_v22, 2  ;;  %8098 = vmatpush.bf16.msra.mxu0 %v11640_v33  ;;  %v7739_v40 = vld [vmem:[#allocation13 + $0x4] sm:$0x3]  ;;  %v11671_v33 = vld [vmem:[%s14048_s9 + $0x120] sm:$0xff] }
 0xc7a   :  { %v7575_v20 = vsel %vm4875_vm2, %v7554_v62, %v7568_v16  ;;  %8111 = vmatpush.bf16.msra.mxu1 %v11648_v27  ;;  %v11637_v62 = vld [vmem:[%s14048_s9 + $0x10] sm:$0xff]  ;;  %v11679_v27 = vld [vmem:[%s14048_s9 + $0x160] sm:$0xff] }
 0xc7b   :  { %7626 = vmatmul.f32.vlgmr.msrb.gmra.mxu0 %v7575_v20  ;;  %v7559_v61 = vrot.slane %v7558_v10, 1  ;;  %v7572_v44 = vadd.f32 %v7571_v53, %v7570_v22  ;;  %v11645_v16 = vld [vmem:[%s14048_s9 + $0x50] sm:$0xff] }
 0xc7d   :  { %v7573_v8 = vrot.slane %v7572_v44, 1  ;;  %v7560_v26 = vadd.f32 %v7559_v61, %v7558_v10  ;;  %8099 = vmatpush.bf16.msra.mxu0 %v11639_v45  ;;  %v11670_v45 = vld [vmem:[%s14048_s9 + $0x118] sm:$0xff] }
 0xc7e   :  { %8112 = vmatpush.bf16.msra.mxu1 %v11647_v48  ;;  %v11678_v48 = vld [vmem:[%s14048_s9 + $0x158] sm:$0xff] }
 0xc7f   :  { %v7574_v47 = vadd.f32 %v7573_v8, %v7572_v44 }
 0xc81   :  { %v7576_v21 = vsel %vm4875_vm2, %v7560_v26, %v7574_v47  ;;  %8100 = vmatpush.bf16.msra.mxu0 %v11638_v36  ;;  %v11636_v26 = vld [vmem:[%s14048_s9 + $0x8] sm:$0xff]  ;;  %v11693_v36 = vld [vmem:[%s14048_s9 + $0x1d0] sm:$0xff] }
 0xc82   :  { %7646 = vmatmul.f32.vlgmr.msrb.gmra.mxu1 %v7576_v21  ;;  %v11644_v47 = vld [vmem:[%s14048_s9 + $0x48] sm:$0xff] }
 0xc83   :  { %8113 = vmatpush.bf16.msra.mxu1 %v11646_v5  ;;  %v11669_v5 = vld [vmem:[%s14048_s9 + $0x110] sm:$0xff] }
 0xc85   :  { %8101 = vmatpush.bf16.msra.mxu0 %v11637_v62  ;;  %v11676_v62 = vld [vmem:[%s14048_s9 + $0x148] sm:$0xff] }
 0xc87   :  { %8114 = vmatpush.bf16.msra.mxu1 %v11645_v16  ;;  %v11683_v16 = vld [vmem:[%s14048_s9 + $0x180] sm:$0xff] }
 0xc89   :  { %8102 = vmatpush.bf16.msra.mxu0 %v11636_v26 }
 0xc8b   :  { %8115 = vmatpush.bf16.msra.mxu1 %v11644_v47 }
 0xc8d   :  { %8103 = vmatpush.bf16.msra.mxu0 %v11635_v14 }
 0xc8f   :  { %8116 = vmatpush.bf16.msra.mxu1 %v11643_v56 }
 0xc93   :  { %8428 = vmatpush.bf16.msrb.mxu1 %v11698_v59 }
 0xc97   :  { %8429 = vmatpush.bf16.msrb.mxu1 %v11697_v9 }
 0xcf8   :  { %v7627_v60 = vpop.f32.mrf.mxu0 }
 0xcff   :  { %v7647_v15 = vpop.f32.mrf.mxu1 }
 0xd00   :  { %v7648_v58 = vadd.f32 %v7647_v15, %v7627_v60 }
 0xd02   :  { %v7650_v42 = vmul.f32 %v7648_v58, %v7648_v58 }
 0xd04   :  { %v7652_v24 = vrot.slane %v7650_v42, 7 }
 0xd06   :  { %v7654_v54 = vsub.f32 %v7648_v58, %v7652_v24  ;;  %v11690_v24 = vld [vmem:[%s14048_s9 + $0x1b8] sm:$0xff] }
 0xd07   :  { %8415 = vmatpush.bf16.msrb.mxu0 %v11690_v24 }
 0xd08   :  { %v7655_v18 = vadd.f32 1e-05, %v7654_v54  ;;  %v11665_v54 = vld [vmem:[%s14048_s9 + $0xf0] sm:$0xff] }
 0xd0a   :  { %11918 = vrsqrt.f32 %v7655_v18  ;;  %vm7662_vm10 = vweird.f32 %v7655_v18 }
 0xd0b   :  { %8416 = vmatpush.bf16.msrb.mxu0 %v11689_v11 }
 0xd10   :  { %v11919_v31 = vpop.eup %11918 }
 0xd11   :  { %v7657_v30 = vmul.f32 %v11919_v31, %v7655_v18  ;;  %vm7663_vm9 = vweird.f32 %v11919_v31  ;;  %v11656_v18 = vld [vmem:[%s14048_s9 + $0xa8] sm:$0xff] }
 0xd12   :  { %vm7664_vm11 = vmor %vm7662_vm10, %vm7663_vm9 }
 0xd13   :  { %v7658_v46 = vmul.f32 %v11919_v31, %v7657_v30  ;;  %v11652_v30 = vld [vmem:[%s14048_s9 + $0x88] sm:$0xff] }
 0xd15   :  { %v7659_v55 = vmul.f32 0.5, %v7658_v46  ;;  %v11660_v46 = vld [vmem:[%s14048_s9 + $0xc8] sm:$0xff] }
 0xd17   :  { %v7660_v28 = vsub.f32 1.5, %v7659_v55  ;;  %v11651_v55 = vld [vmem:[%s14048_s9 + $0x80] sm:$0xff] }
 0xd19   :  { %v7661_v4 = vmul.f32 %v11919_v31, %v7660_v28  ;;  %v11659_v28 = vld [vmem:[%s14048_s9 + $0xc0] sm:$0xff] }
 0xd1b   :  { %v7665_v12 = vsel %vm7664_vm11, %v11919_v31, %v7661_v4  ;;  %v11661_v31 = vld [vmem:[%s14048_s9 + $0xd0] sm:$0xff]  ;;  %v11674_v4 = vld [vmem:[%s14048_s9 + $0x138] sm:$0xff] }
 0xd1c   :  { %v7667_v49 = vrot.slane %v7665_v12, 1  ;;  %v11682_v12 = vld [vmem:[%s14048_s9 + $0x178] sm:$0xff] }
 0xd1e   :  { %v7669_v50 = vmul.f32 %v7667_v49, %v7648_v58 }
 0xd20   :  { %v7671_v38 = vrot.slane %v7669_v50, 7  ;;  %v11681_v50 = vld [vmem:[%s14048_s9 + $0x170] sm:$0xff] }
 0xd22   :  { %v7673_v41 = vsel %vm4875_vm2, %v7667_v49, %v7671_v38  ;;  %v11673_v49 = vld [vmem:[%s14048_s9 + $0x130] sm:$0xff]  ;;  %v11688_v38 = vld [vmem:[%s14048_s9 + $0x1a8] sm:$0xff] }
 0xd23   :  { %10736 = vmatmul.msk.f32.vlgmr.msrb.gmra.mxu2 %vm1496_vm0, %v7673_v41  ;;  %10737 = vmatmul.msk.f32.vlgmr.msrb.gmra.mxu3 %vm1496_vm0, %v7673_v41  ;;  %v11696_v41 = vld [vmem:[%s14048_s9 + $0x1e8] sm:$0xff] }
 0xd24   :  { %8417 = vmatpush.bf16.msrb.mxu0 %v11688_v38  ;;  %8430 = vmatpush.bf16.msrb.mxu1 %v11696_v41 }
 0xd28   :  { %8418 = vmatpush.bf16.msrb.mxu0 %v11687_v3  ;;  %8431 = vmatpush.bf16.msrb.mxu1 %v11695_v25 }
 0xda6   :  { %v7711_v17 = vpop.f32.mrf.mxu2  ;;  %v7731_v57 = vpop.f32.mrf.mxu3 }
 0xda7   :  { %7742 = vst [vmem:[#allocation1] sm:$0xff] %v7711_v17  ;;  %v7734_v2 = vperm.slane %v7711_v17, 0  ;;  %v7735_v63 = vperm.slane %v7731_v57, 0  ;;  %v11686_v17 = vld [vmem:[%s14048_s9 + $0x198] sm:$0xff] }
 0xda8   :  { %7743 = vst [vmem:[#allocation1 + $0x9] sm:$0xff] %v7731_v57  ;;  %v11694_v57 = vld [vmem:[%s14048_s9 + $0x1d8] sm:$0xff]  ;;  %8419 = vmatpush.bf16.msrb.mxu0 %v11686_v17 }
 0xda9   :  { %v7736_v10 = vmul.f32 %v7734_v2, %v13824_v39  ;;  %v7737_v53 = vmul.f32 %v7735_v63, %v13831_v51  ;;  %8432 = vmatpush.bf16.msrb.mxu1 %v11694_v57  ;;  %v11677_v2 = vld [vmem:[%s14048_s9 + $0x150] sm:$0xff]  ;;  %v11684_v63 = vld [vmem:[%s14048_s9 + $0x188] sm:$0xff] }
 0xdad   :  { %8433 = vmatpush.bf16.msrb.mxu1 %v11693_v36 }
 0xdaf   :  { %v7745_v19 = vld [vmem:[#allocation1 + $0x1] ss:$9 sm:$0xff] }
 0xdb0   :  { %v7747_v22 = vsub.f32 %v7739_v40, %v7745_v19  ;;  %v11685_v40 = vld [vmem:[%s14048_s9 + $0x190] sm:$0xff]  ;;  %v11692_v19 = vld [vmem:[%s14048_s9 + $0x1c8] sm:$0xff] }
 0xdb1   :  { %8420 = vmatpush.bf16.msrb.mxu0 %v11685_v40  ;;  %8434 = vmatpush.bf16.msrb.mxu1 %v11692_v19 }
 0xdb2   :  { %v7749_v20 = vperm.slane %v7747_v22, 0  ;;  %v7750_v61 = vperm.slane %v7747_v22, 1  ;;  %v11668_v22 = vld [vmem:[%s14048_s9 + $0x108] sm:$0xff] }
 0xdb4   :  { %v7754_v44 = vadd.f32 %v7750_v61, %v7737_v53  ;;  %v7753_v8 = vadd.f32 %v7749_v20, %v7736_v10  ;;  %v11691_v10 = vld [vmem:[%s14048_s9 + $0x1c0] sm:$0xff] }
 0xdb5   :  { %8421 = vmatpush.bf16.msrb.mxu0 %v11684_v63  ;;  %v11667_v53 = vld [vmem:[%s14048_s9 + $0x100] sm:$0xff]  ;;  %8435 = vmatpush.bf16.msrb.mxu1 %v11691_v10 }
 0xdb6   :  { %vm7755_vm0 = vcmp.gt.f32.partialorder %v7753_v8, 0.0  ;;  %v7757_v21 = vmul.f32 0.2, %v7753_v8  ;;  %vm7756_vm2 = vcmp.gt.f32.partialorder %v7754_v44, 0.0  ;;  %v7758_v39 = vmul.f32 0.2, %v7754_v44 }
 0xdb7   :  { %v11675_v20 = vld [vmem:[%s14048_s9 + $0x140] sm:$0xff] }
 0xdb8   :  { %v7759_v60 = vsel %vm7755_vm0, %v7753_v8, %v7757_v21  ;;  %v7760_v51 = vsel %vm7756_vm2, %v7754_v44, %v7758_v39 }
 0xdb9   :  { %v7761_v15 = vpack.c.bf16 %v7759_v60, %v7759_v60  ;;  %v7762_v58 = vpack.c.bf16 %v7760_v51, %v7760_v51  ;;  %8422 = vmatpush.bf16.msrb.mxu0 %v11683_v16 }
 0xdbb   :  { %v7770_v42 = vsel %vm7768_vm12, %v7761_v15, 0  ;;  %v7773_v32 = vsel %vm7768_vm12, %v7762_v58, 0 }
 0xdbc   :  { %7782 = vmatpush.bf16.msra.mxu2 %v7770_v42  ;;  %7795 = vmatpush.bf16.msra.mxu3 %v7773_v32 }
 0xdbf   :  { %10738 = vmatmul.msk.bf16.vlgmr.msra.gmra.mxu2 %vm7764_vm13, %v7763_v7  ;;  %10739 = vmatmul.msk.bf16.vlgmr.msra.gmra.mxu3 %vm7764_vm13, %v7763_v7 }
 0xdc0   :  { %7972 = vmatpush.bf16.msrb.mxu2 %v11658_v0  ;;  %7985 = vmatpush.bf16.msrb.mxu3 %v11666_v34 }
 0xdc4   :  { %7973 = vmatpush.bf16.msrb.mxu2 %v11657_v35  ;;  %7986 = vmatpush.bf16.msrb.mxu3 %v11665_v54 }
 0xdc8   :  { %7974 = vmatpush.bf16.msrb.mxu2 %v11656_v18  ;;  %7987 = vmatpush.bf16.msrb.mxu3 %v11664_v29 }
 0xdcc   :  { %7975 = vmatpush.bf16.msrb.mxu2 %v11655_v43  ;;  %7988 = vmatpush.bf16.msrb.mxu3 %v11663_v23 }
 0xdd0   :  { %7976 = vmatpush.bf16.msrb.mxu2 %v11654_v13  ;;  %7989 = vmatpush.bf16.msrb.mxu3 %v11662_v6 }
 0xdd4   :  { %7977 = vmatpush.bf16.msrb.mxu2 %v11653_v37  ;;  %7990 = vmatpush.bf16.msrb.mxu3 %v11661_v31 }
 0xdd8   :  { %7978 = vmatpush.bf16.msrb.mxu2 %v11652_v30  ;;  %7991 = vmatpush.bf16.msrb.mxu3 %v11660_v46 }
 0xddc   :  { %7979 = vmatpush.bf16.msrb.mxu2 %v11651_v55  ;;  %7992 = vmatpush.bf16.msrb.mxu3 %v11659_v28 }
 0xde0   :  { %8255 = vmatpush.bf16.msra.mxu2 %v11674_v4  ;;  %8268 = vmatpush.bf16.msra.mxu3 %v11682_v12 }
 0xde4   :  { %8256 = vmatpush.bf16.msra.mxu2 %v11673_v49  ;;  %8269 = vmatpush.bf16.msra.mxu3 %v11681_v50 }
 0xde8   :  { %8257 = vmatpush.bf16.msra.mxu2 %v11672_v52  ;;  %8270 = vmatpush.bf16.msra.mxu3 %v11680_v1 }
 0xdec   :  { %8258 = vmatpush.bf16.msra.mxu2 %v11671_v33  ;;  %8271 = vmatpush.bf16.msra.mxu3 %v11679_v27 }
 0xdf0   :  { %8259 = vmatpush.bf16.msra.mxu2 %v11670_v45  ;;  %8272 = vmatpush.bf16.msra.mxu3 %v11678_v48 }
 0xdf4   :  { %8260 = vmatpush.bf16.msra.mxu2 %v11669_v5  ;;  %8273 = vmatpush.bf16.msra.mxu3 %v11677_v2 }
 0xdf8   :  { %8261 = vmatpush.bf16.msra.mxu2 %v11668_v22  ;;  %8274 = vmatpush.bf16.msra.mxu3 %v11676_v62 }
 0xdfc   :  { %8262 = vmatpush.bf16.msra.mxu2 %v11667_v53  ;;  %8275 = vmatpush.bf16.msra.mxu3 %v11675_v20 }
 0xe42   :  { %v7784_v61 = vpop.f32.mrf.mxu2  ;;  %v7797_v44 = vpop.f32.mrf.mxu3 }
 0xe43   :  { %v7801_v8 = vpack.c.bf16 %v7797_v44, %v7784_v61 }
 0xe45   :  { %v7868_v26 = vunpack.c.l.b16 %v7801_v8  ;;  %v7869_v47 = vunpack.c.h.b16 %v7801_v8 }
 0xe47   :  { %v7870_v21 = vpack.c.b16 %v7868_v26, %v7868_v26  ;;  %v7871_v39 = vpack.c.b16 %v7869_v47, %v7869_v47 }
 0xe49   :  { %v7872_v60 = vrot.slane %v7870_v21, 1  ;;  %v7873_v51 = vrot.slane %v7871_v39, 1  ;;  %8104 = vmatmul.bf16.vlgmr.msra.gmra.mxu0 %v7870_v21  ;;  %8117 = vmatmul.bf16.vlgmr.msra.gmra.mxu1 %v7871_v39  ;;  %v8315_v0 = vrot.slane %v7870_v21, 3  ;;  %v8316_v34 = vrot.slane %v7871_v39, 3 }
 0xe4a   :  { %v7786_v15 = vpop.f32.mrf.mxu2  ;;  %v7799_v58 = vpop.f32.mrf.mxu3  ;;  %v8155_v14 = vrot.slane %v7870_v21, 2  ;;  %v8156_v56 = vrot.slane %v7871_v39, 2 }
 0xe4b   :  { %7980 = vmatmul.bf16.vlgmr.msrb.gmra.mxu2 %v7872_v60  ;;  %7993 = vmatmul.bf16.vlgmr.msrb.gmra.mxu3 %v7873_v51 }
 0xe59   :  { %8423 = vmatmul.bf16.vlgmr.msrb.gmra.mxu0 %v8315_v0  ;;  %8436 = vmatmul.bf16.vlgmr.msrb.gmra.mxu1 %v8316_v34 }
 0xe5b   :  { %8263 = vmatmul.bf16.vlgmr.msra.gmra.mxu2 %v8155_v14  ;;  %8276 = vmatmul.bf16.vlgmr.msra.gmra.mxu3 %v8156_v56 }
 0xec6   :  { %v8105_v42 = vpop.f32.mrf.mxu0  ;;  %v8118_v32 = vpop.f32.mrf.mxu1 }
 0xece   :  { %v7981_v7 = vpop.f32.mrf.mxu2  ;;  %v7994_v24 = vpop.f32.mrf.mxu3 }
 0xecf   :  { %v8107_v59 = vpop.f32.mrf.mxu0  ;;  %v8120_v35 = vpop.f32.mrf.mxu1  ;;  %v7995_v9 = vadd.f32 %v7994_v24, %v7981_v7 }
 0xed1   :  { %v8106_v43 = vadd.f32 %v8105_v42, %v7995_v9 }
 0xed3   :  { %v8119_v6 = vadd.f32 %v8118_v32, %v8106_v43 }
 0xed6   :  { %v7983_v54 = vpop.f32.mrf.mxu2  ;;  %v7996_v11 = vpop.f32.mrf.mxu3 }
 0xed7   :  { %v8424_v18 = vpop.f32.mrf.mxu0  ;;  %v8437_v29 = vpop.f32.mrf.mxu1 }
 0xed8   :  { %v8438_v46 = vadd.f32 %v8437_v29, %v8424_v18 }
 0xede   :  { %v8264_v23 = vpop.f32.mrf.mxu2  ;;  %v8277_v13 = vpop.f32.mrf.mxu3 }
 0xedf   :  { %v8278_v37 = vadd.f32 %v8277_v13, %v8264_v23  ;;  %v8426_v31 = vpop.f32.mrf.mxu0  ;;  %v8439_v30 = vpop.f32.mrf.mxu1 }
 0xee1   :  { %v8281_v55 = vadd.f32 %v8278_v37, %v8119_v6 }
 0xee3   :  { %v8441_v28 = vadd.f32 %v8438_v46, %v8281_v55 }
 0xee5   :  { %v11092_v4 = vmul.f32 -1.442695, %v8441_v28 }
 0xee6   :  { %v8266_v12 = vpop.f32.mrf.mxu2  ;;  %v8279_v49 = vpop.f32.mrf.mxu3 }
 0xee7   :  { %11920 = vpow2.f32 %v11092_v4 }
 0xeed   :  { %v11921_v50 = vpop.eup %11920 }
 0xeee   :  { %v8445_v38 = vadd.f32 1.0, %v11921_v50 }
 0xef0   :  { %11922 = vrcp.f32 %v8445_v38  ;;  %v8457_v3 = vand.u32 2147483648, %v8445_v38  ;;  %v8455_v33 = vand.u32 2147483647, %v8445_v38  ;;  %vm8451_vm15 = vweird.f32 %v8445_v38 }
 0xef2   :  { %v8458_v17 = vor.u32 1.1754944e-38, %v8457_v3  ;;  %vm8456_vm4 = vcmp.eq.f32.partialorder %v8455_v33, 8.507059e+37 }
 0xef6   :  { %v11923_v41 = vpop.eup %11922 }
 0xef7   :  { %v8447_v52 = vmul.f32 %v11923_v41, %v8445_v38  ;;  %vm8452_vm14 = vweird.f32 %v11923_v41 }
 0xef8   :  { %vm8453_vm1 = vmor %vm8451_vm15, %vm8452_vm14 }
 0xef9   :  { %v8448_v1 = vsub.f32 1.0, %v8447_v52 }
 0xefb   :  { %v8449_v25 = vmul.f32 %v11923_v41, %v8448_v1 }
 0xefd   :  { %v8450_v27 = vadd.f32 %v11923_v41, %v8449_v25 }
 0xeff   :  { %v8454_v57 = vsel %vm8453_vm1, %v11923_v41, %v8450_v27 }
 0xf00   :  { %v8459_v45 = vsel %vm8456_vm4, %v8458_v17, %v8454_v57 }
 0xf01   :  { %8462 = vst.msk [vmem:[%s14052_s13] sm:$0x3] %vm8461_vm3, %v8459_v45 }
 0xf02   :  { %8467 = vsyncpa [#allocation3], 1 }
 0xf03   :  { %8468 = vsyncpa [#allocation5], 1 }
 0xf04   :  { %8469 = vsyncpa [#allocation8], 1 }
 0xf05   :  { %8470 = vsyncpa [#allocation11], 1 }
 0xf06   :  { %8471 = vsyncpa [#allocation14], 1 }

</bundles_post_ra>
